<compile_context>
chip_gen: v5e
topology: v5e:2x2
jax: 0.10.0
libtpu: 0.0.40
codegen_flags: <defaults>
</compile_context>

<pallas_src>
import functools
import math
from dataclasses import dataclass
from typing import Optional

import jax
import jax.numpy as jnp
from jax import lax
from jax.experimental import pallas as pl
from jax.experimental.pallas import tpu as pltpu


VMEM_LIMIT_BYTES = 32 * 1024 * 1024   # safe on v5e/v6e/v7x; raises v5e's 16 MiB default
MASK_VALUE = -1e30                    # large finite negative (avoids exp(-inf - -inf) NaN)


@dataclass
class ModelArgs:
    dim: int = 256
    n_layers: int = 2
    n_heads: int = 2
    n_kv_heads: Optional[int] = 1     # GQA: n_rep = 2
    vocab_size: int = 512
    hidden_dim: Optional[int] = None
    multiple_of: int = 128
    norm_eps: float = 1e-5
    max_seq_len: int = 128
    dropout: float = 0.0              # eval path -> dropout is identity


def _pick_tile(dim, pref):
    """Preferred tile if it divides the dim evenly, else the full dim (always legal)."""
    return pref if dim % pref == 0 else dim


def _cparams(dimension_semantics):
    return pltpu.CompilerParams(dimension_semantics=dimension_semantics,
                                vmem_limit_bytes=VMEM_LIMIT_BYTES)


# ---------------------------------------------------------------------------
# Kernel 1: fused RMSNorm + matmul  (used for QKV projection and final logits)
# ---------------------------------------------------------------------------

def _rmsnorm_matmul_kernel(x_ref, g_ref, w_ref, o_ref, *, eps):
    x = x_ref[...].astype(jnp.float32)
    ms = jnp.mean(x * x, axis=-1, keepdims=True)
    xn = (x * lax.rsqrt(ms + eps)) * g_ref[...]
    o_ref[...] = jnp.dot(xn.astype(w_ref.dtype), w_ref[...],
                         preferred_element_type=jnp.float32).astype(o_ref.dtype)


def rmsnorm_matmul(x, g, w, eps, *, tm=128, tn=256):
    # x: (M, D) f32, g: (1, D) f32, w: (D, N) bf16  ->  (M, N) f32
    M, D = x.shape
    N = w.shape[1]
    tm = _pick_tile(M, tm)
    tn = _pick_tile(N, tn)
    return pl.pallas_call(
        functools.partial(_rmsnorm_matmul_kernel, eps=eps),
        out_shape=jax.ShapeDtypeStruct((M, N), jnp.float32),
        grid=(M // tm, N // tn),
        in_specs=[pl.BlockSpec((tm, D), lambda i, j: (i, 0)),
                  pl.BlockSpec((1, D), lambda i, j: (0, 0)),
                  pl.BlockSpec((D, tn), lambda i, j: (0, j))],
        out_specs=pl.BlockSpec((tm, tn), lambda i, j: (i, j)),
        compiler_params=_cparams(("parallel", "parallel")),
    )(x, g, w)


# ---------------------------------------------------------------------------
# Kernel 2: tiled matmul with fused residual add  (wo projection epilogue)
# ---------------------------------------------------------------------------

def _matmul_residual_kernel(x_ref, w_ref, r_ref, o_ref, acc_ref):
    k = pl.program_id(2)

    @pl.when(k == 0)
    def _():
        acc_ref[...] = jnp.zeros_like(acc_ref)

    acc_ref[...] += jnp.dot(x_ref[...], w_ref[...],
                            preferred_element_type=jnp.float32)

    @pl.when(k == pl.num_programs(2) - 1)
    def _():
        o_ref[...] = (acc_ref[...] + r_ref[...].astype(jnp.float32)).astype(o_ref.dtype)


def matmul_residual(x, w, res, *, tm=128, tn=256, tk=256):
    # x: (M, K) bf16, w: (K, N) bf16, res: (M, N) f32  ->  (M, N) f32  (= x@w + res)
    M, K = x.shape
    N = w.shape[1]
    tm = _pick_tile(M, tm)
    tn = _pick_tile(N, tn)
    tk = _pick_tile(K, tk)
    return pl.pallas_call(
        _matmul_residual_kernel,
        out_shape=jax.ShapeDtypeStruct((M, N), res.dtype),
        grid=(M // tm, N // tn, K // tk),
        in_specs=[pl.BlockSpec((tm, tk), lambda i, j, k: (i, k)),
                  pl.BlockSpec((tk, tn), lambda i, j, k: (k, j)),
                  pl.BlockSpec((tm, tn), lambda i, j, k: (i, j))],
        out_specs=pl.BlockSpec((tm, tn), lambda i, j, k: (i, j)),
        scratch_shapes=[pltpu.VMEM((tm, tn), jnp.float32)],
        compiler_params=_cparams(("parallel", "parallel", "arbitrary")),
    )(x, w, res)


# ---------------------------------------------------------------------------
# Kernel 3: fused RMSNorm + SwiGLU FFN + residual, tiled over the hidden dim
# ---------------------------------------------------------------------------

def _ffn_kernel(x_ref, g_ref, w1_ref, w3_ref, w2_ref, o_ref, xn_ref, acc_ref, *, eps):
    j = pl.program_id(1)

    @pl.when(j == 0)
    def _():
        x = x_ref[...].astype(jnp.float32)
        ms = jnp.mean(x * x, axis=-1, keepdims=True)
        xn_ref[...] = ((x * lax.rsqrt(ms + eps)) * g_ref[...]).astype(xn_ref.dtype)
        acc_ref[...] = jnp.zeros_like(acc_ref)

    xn = xn_ref[...]                                   # bf16, cached across hidden tiles
    h1 = jnp.dot(xn, w1_ref[...], preferred_element_type=jnp.float32)
    h3 = jnp.dot(xn, w3_ref[...], preferred_element_type=jnp.float32)
    gact = (h1 * jax.nn.sigmoid(h1)) * h3              # SwiGLU in f32
    acc_ref[...] += jnp.dot(gact.astype(w2_ref.dtype), w2_ref[...],
                            preferred_element_type=jnp.float32)

    @pl.when(j == pl.num_programs(1) - 1)
    def _():
        o_ref[...] = (acc_ref[...] + x_ref[...].astype(jnp.float32)).astype(o_ref.dtype)


def ffn_fused(x, g, w1, w3, w2, eps, *, tm=128, th=256):
    # x: (M, D) f32 residual stream; w1/w3: (D, H) bf16; w2: (H, D) bf16 -> (M, D) f32
    M, D = x.shape
    Hd = w1.shape[1]
    tm = _pick_tile(M, tm)
    th = _pick_tile(Hd, th)
    return pl.pallas_call(
        functools.partial(_ffn_kernel, eps=eps),
        out_shape=jax.ShapeDtypeStruct((M, D), x.dtype),
        grid=(M // tm, Hd // th),
        in_specs=[pl.BlockSpec((tm, D), lambda i, j: (i, 0)),
                  pl.BlockSpec((1, D), lambda i, j: (0, 0)),
                  pl.BlockSpec((D, th), lambda i, j: (0, j)),
                  pl.BlockSpec((D, th), lambda i, j: (0, j)),
                  pl.BlockSpec((th, D), lambda i, j: (j, 0))],
        out_specs=pl.BlockSpec((tm, D), lambda i, j: (i, 0)),
        scratch_shapes=[pltpu.VMEM((tm, D), jnp.bfloat16),
                        pltpu.VMEM((tm, D), jnp.float32)],
        compiler_params=_cparams(("parallel", "arbitrary")),
    )(x, g, w1, w3, w2)


# ---------------------------------------------------------------------------
# Kernel 4: flash attention (online softmax), causal, GQA in-kernel, no transposes
# ---------------------------------------------------------------------------

def _flash_attn_kernel(q_ref, k_ref, v_ref, o_ref, m_ref, l_ref, acc_ref,
                       *, n_heads, n_kv_heads, head_dim, tq, tkv):
    qi = pl.program_id(1)
    ki = pl.program_id(2)
    n_rep = n_heads // n_kv_heads
    q_start = qi * tq
    kv_start = ki * tkv

    @pl.when(ki == 0)
    def _():
        m_ref[...] = jnp.full_like(m_ref, MASK_VALUE)
        l_ref[...] = jnp.zeros_like(l_ref)
        acc_ref[...] = jnp.zeros_like(acc_ref)

    # Skip KV tiles entirely above the causal diagonal for this Q tile.
    @pl.when(kv_start <= q_start + (tq - 1))
    def _():
        row = q_start + lax.broadcasted_iota(jnp.int32, (tq, tkv), 0)
        col = kv_start + lax.broadcasted_iota(jnp.int32, (tq, tkv), 1)
        causal = col <= row
        for h in range(n_heads):
            kvh = h // n_rep                                   # GQA: shared KV head
            qh = q_ref[0, :, h * head_dim:(h + 1) * head_dim]          # (tq, hd) bf16
            kh = k_ref[0, :, kvh * head_dim:(kvh + 1) * head_dim]      # (tkv, hd) bf16
            vh = v_ref[0, :, kvh * head_dim:(kvh + 1) * head_dim]      # (tkv, hd) bf16
            s = lax.dot_general(qh, kh, (((1,), (1,)), ((), ())),
                                preferred_element_type=jnp.float32)    # (tq, tkv)
            s = jnp.where(causal, s, MASK_VALUE)
            m_prev = m_ref[h]
            m_new = jnp.maximum(m_prev, jnp.max(s, axis=-1, keepdims=True))
            alpha = jnp.exp(m_prev - m_new)
            p = jnp.exp(s - m_new)
            l_ref[h] = alpha * l_ref[h] + jnp.sum(p, axis=-1, keepdims=True)
            acc_ref[h] = alpha * acc_ref[h] + jnp.dot(
                p.astype(vh.dtype), vh, preferred_element_type=jnp.float32)
            m_ref[h] = m_new

    @pl.when(ki == pl.num_programs(2) - 1)
    def _():
        for h in range(n_heads):
            inv_l = pl.reciprocal(l_ref[h], approx=True)
            o_ref[0, :, h * head_dim:(h + 1) * head_dim] = (
                acc_ref[h] * inv_l).astype(o_ref.dtype)


def flash_attention(q, k, v, *, n_heads, n_kv_heads, head_dim, tq=128, tkv=128):
    # q: (B, S, H*hd) bf16 (scale pre-folded); k, v: (B, S, Hkv*hd) bf16 -> (B, S, H*hd) bf16
    B, S, Dq = q.shape
    Dkv = k.shape[-1]
    tq = _pick_tile(S, tq)
    tkv = _pick_tile(S, tkv)
    kern = functools.partial(_flash_attn_kernel, n_heads=n_heads,
                             n_kv_heads=n_kv_heads, head_dim=head_dim,
                             tq=tq, tkv=tkv)
    return pl.pallas_call(
        kern,
        out_shape=jax.ShapeDtypeStruct((B, S, Dq), q.dtype),
        grid=(B, S // tq, S // tkv),
        in_specs=[pl.BlockSpec((1, tq, Dq), lambda b, qi, ki: (b, qi, 0)),
                  pl.BlockSpec((1, tkv, Dkv), lambda b, qi, ki: (b, ki, 0)),
                  pl.BlockSpec((1, tkv, Dkv), lambda b, qi, ki: (b, ki, 0))],
        out_specs=pl.BlockSpec((1, tq, Dq), lambda b, qi, ki: (b, qi, 0)),
        scratch_shapes=[pltpu.VMEM((n_heads, tq, 1), jnp.float32),       # m
                        pltpu.VMEM((n_heads, tq, 1), jnp.float32),       # l
                        pltpu.VMEM((n_heads, tq, head_dim), jnp.float32)],  # acc
        compiler_params=_cparams(("parallel", "parallel", "arbitrary")),
    )(q, k, v)


# ---------------------------------------------------------------------------
# Plain-JAX glue: RoPE tables, rotary application, embedding gather
# ---------------------------------------------------------------------------

def precompute_freqs_cis(dim, end, theta=10000.0):
    freqs = 1.0 / theta ** (jnp.arange(0, dim, 2)[: dim // 2].astype(jnp.float32) / dim)
    t = jnp.arange(end, dtype=jnp.float32)
    freqs = jnp.outer(t, freqs)
    return jnp.cos(freqs), jnp.sin(freqs)


def apply_rotary_emb(x, cos, sin):
    # x: (B, S, H, hd) f32; cos/sin: (S, hd//2)
    B, S, H, hd = x.shape
    xr = x.reshape(B, S, H, hd // 2, 2)
    x_r, x_i = xr[..., 0], xr[..., 1]
    fc = cos[None, :, None, :]
    fs = sin[None, :, None, :]
    o_r = x_r * fc - x_i * fs
    o_i = x_r * fs + x_i * fc
    return jnp.stack([o_r, o_i], axis=-1).reshape(B, S, H, hd)


# ---------------------------------------------------------------------------
# Parameter init (deterministic, mirrors Transformer._init_weights shapes/std)
# ---------------------------------------------------------------------------

def _ffn_hidden_dim(args: ModelArgs):
    hidden = args.hidden_dim
    if hidden is None:
        hidden = 4 * args.dim
        hidden = int(2 * hidden / 3)
        hidden = args.multiple_of * ((hidden + args.multiple_of - 1) // args.multiple_of)
    return hidden


def init_params(args: ModelArgs, key):
    D = args.dim
    H = args.n_heads
    Hkv = args.n_kv_heads if args.n_kv_heads is not None else H
    hd = D // H
    hidden = _ffn_hidden_dim(args)
    std = 0.02
    std_small = 0.02 / math.sqrt(2 * args.n_layers)    # for w3 / wo

    keys = jax.random.split(key, 1 + 7 * args.n_layers)
    ki = iter(range(len(keys)))

    emb = std * jax.random.normal(keys[next(ki)], (args.vocab_size, D), jnp.float32)
    params = {
        'emb': emb,                                    # f32 table for the gather
        'emb_out': emb.T.astype(jnp.bfloat16),         # tied output weight, pre-transposed once
        'norm': jnp.ones((1, D), jnp.float32),
    }

    layers = []
    for _ in range(args.n_layers):
        wq = std * jax.random.normal(keys[next(ki)], (D, H * hd), jnp.float32)
        wk = std * jax.random.normal(keys[next(ki)], (D, Hkv * hd), jnp.float32)
        wv = std * jax.random.normal(keys[next(ki)], (D, Hkv * hd), jnp.float32)
        lp = {
            'attn_norm': jnp.ones((1, D), jnp.float32),
            'ffn_norm': jnp.ones((1, D), jnp.float32),
            # Linear weights stored pre-transposed (in, out); wq/wk/wv fused into one matrix.
            'wqkv': jnp.concatenate([wq, wk, wv], axis=1).astype(jnp.bfloat16),
            'wo': (std_small * jax.random.normal(keys[next(ki)], (H * hd, D), jnp.float32)
                   ).astype(jnp.bfloat16),
            'w1': (std * jax.random.normal(keys[next(ki)], (D, hidden), jnp.float32)
                   ).astype(jnp.bfloat16),
            'w2': (std * jax.random.normal(keys[next(ki)], (hidden, D), jnp.float32)
                   ).astype(jnp.bfloat16),
            'w3': (std_small * jax.random.normal(keys[next(ki)], (D, hidden), jnp.float32)
                   ).astype(jnp.bfloat16),
        }
        layers.append(lp)
    params['layers'] = layers
    return params


# ---------------------------------------------------------------------------
# Forward pass (targets=None path: returns logits for the last position only)
# ---------------------------------------------------------------------------

def transformer_forward(params, tokens, *, args: ModelArgs):
    B, S = tokens.shape
    D = args.dim
    H = args.n_heads
    Hkv = args.n_kv_heads if args.n_kv_heads is not None else H
    hd = D // H
    Dq, Dkv = H * hd, Hkv * hd
    eps = args.norm_eps
    scale = 1.0 / math.sqrt(hd)

    # token embedding (gather stays in JAX)
    h = jnp.take(params['emb'], tokens, axis=0)                      # (B, S, D) f32

    fc, fs = precompute_freqs_cis(hd, args.max_seq_len)
    fc, fs = fc[:S], fs[:S]

    for lp in params['layers']:
        x2d = h.reshape(B * S, D)

        # fused RMSNorm + (wq|wk|wv) projection — one GEMM, norm input read once
        qkv = rmsnorm_matmul(x2d, lp['attn_norm'], lp['wqkv'], eps)  # (B*S, Dq+2*Dkv) f32
        xq = qkv[:, :Dq].reshape(B, S, H, hd)
        xk = qkv[:, Dq:Dq + Dkv].reshape(B, S, Hkv, hd)
        xv = qkv[:, Dq + Dkv:].reshape(B, S, Dkv)

        # RoPE in f32 glue; softmax scale folded into q (never scales the SxS scores)
        xq = apply_rotary_emb(xq, fc, fs) * scale
        xk = apply_rotary_emb(xk, fc, fs)

        q = xq.reshape(B, S, Dq).astype(jnp.bfloat16)
        k = xk.reshape(B, S, Dkv).astype(jnp.bfloat16)
        v = xv.astype(jnp.bfloat16)

        # flash attention; GQA resolved in-kernel; layout stays (B, S, H*hd) — no transposes
        attn = flash_attention(q, k, v, n_heads=H, n_kv_heads=Hkv, head_dim=hd)

        # wo projection with fused residual add
        h2d = matmul_residual(attn.reshape(B * S, Dq), lp['wo'], x2d)   # (B*S, D) f32

        # fused RMSNorm + SwiGLU FFN + residual add
        h2d = ffn_fused(h2d, lp['ffn_norm'], lp['w1'], lp['w3'], lp['w2'], eps)
        h = h2d.reshape(B, S, D)

    # final RMSNorm + tied output projection on the LAST position only.
    # RMSNorm is per-row, so select-then-norm == norm-then-select (matches output(norm(h)[:, [-1], :])).
    last = h[:, -1, :]                                                # (B, D)
    logits = rmsnorm_matmul(last, params['norm'], params['emb_out'], eps)   # (B, vocab) f32
    return logits.reshape(B, 1, args.vocab_size)


# ---------------------------------------------------------------------------

if __name__ == "__main__":
    args = ModelArgs()
    key = jax.random.PRNGKey(0)
    pkey, tkey = jax.random.split(key)

    params = init_params(args, pkey)
    tokens = jax.random.randint(tkey, (2, args.max_seq_len), 0, args.vocab_size,
                                dtype=jnp.int32)

    fwd = jax.jit(functools.partial(transformer_forward, args=args))
    logits = fwd(params, tokens)
    jax.block_until_ready(logits)

    assert logits.shape == (2, 1, args.vocab_size)
    assert logits.dtype == jnp.float32
    assert bool(jnp.all(jnp.isfinite(logits)))
    print("KERNEL_OK")
</pallas_src>

<mosaic_0001>
module attributes {stable_mosaic.version = 11 : i64} {
  func.func @_rmsnorm_matmul_kernel(%arg0: i32, %arg1: i32, %arg2: memref<128x256xf32, #tpu.memory_space<vmem>>, %arg3: memref<1x256xf32, #tpu.memory_space<vmem>>, %arg4: memref<256x256xbf16, #tpu.memory_space<vmem>>, %arg5: memref<128x256xf32, #tpu.memory_space<vmem>>) attributes {dimension_semantics = [#tpu.dimension_semantics<parallel>, #tpu.dimension_semantics<parallel>], iteration_bounds = array<i64: 2, 2>, scalar_prefetch = 0 : i64, scratch_operands = 0 : i64, tpu.core_type = #tpu.core_type<tc>, window_params = [{transform_indices = @transform_0, window_bounds = array<i64: 128, 256>}, {pipeline_mode = #tpu.pipeline_mode<synchronous>, transform_indices = @transform_1, window_bounds = array<i64: 1, 256>}, {transform_indices = @transform_2, window_bounds = array<i64: 256, 256>}, {transform_indices = @transform_3, window_bounds = array<i64: 128, 256>}]} {
    %c0 = arith.constant 0 : index
    %c0_0 = arith.constant 0 : index
    %0 = vector.load %arg2[%c0, %c0_0] : memref<128x256xf32, #tpu.memory_space<vmem>>, vector<128x256xf32>
    %1 = arith.mulf %0, %0 : vector<128x256xf32>
    %cst = arith.constant dense<0.000000e+00> : vector<128xf32>
    %2 = vector.multi_reduction <add>, %1, %cst [1] : vector<128x256xf32> to vector<128xf32>
    %3 = vector.shape_cast %2 : vector<128xf32> to vector<128x1xf32>
    %cst_1 = arith.constant 2.560000e+02 : f32
    %4 = vector.broadcast %cst_1 : f32 to vector<128x1xf32>
    %5 = arith.divf %3, %4 : vector<128x1xf32>
    %cst_2 = arith.constant 9.99999974E-6 : f32
    %6 = vector.broadcast %cst_2 : f32 to vector<128x1xf32>
    %7 = arith.addf %5, %6 : vector<128x1xf32>
    %8 = math.rsqrt %7 : vector<128x1xf32>
    %9 = vector.broadcast %8 : vector<128x1xf32> to vector<128x256xf32>
    %10 = arith.mulf %0, %9 : vector<128x256xf32>
    %c0_3 = arith.constant 0 : index
    %c0_4 = arith.constant 0 : index
    %11 = vector.load %arg3[%c0_3, %c0_4] : memref<1x256xf32, #tpu.memory_space<vmem>>, vector<1x256xf32>
    %12 = vector.broadcast %11 : vector<1x256xf32> to vector<128x256xf32>
    %13 = arith.mulf %10, %12 : vector<128x256xf32>
    %14 = arith.truncf %13 : vector<128x256xf32> to vector<128x256xbf16>
    %c0_5 = arith.constant 0 : index
    %c0_6 = arith.constant 0 : index
    %15 = vector.load %arg4[%c0_5, %c0_6] : memref<256x256xbf16, #tpu.memory_space<vmem>>, vector<256x256xbf16>
    %cst_7 = arith.constant dense<0.000000e+00> : vector<128x256xf32>
    %16 = tpu.matmul %14, %15, %cst_7 {dimension_numbers = #tpu.dot_dimension_numbers<[1], [0], [0], [1], [0, 0, 1, 1], [], []>} : vector<128x256xbf16>, vector<256x256xbf16>, vector<128x256xf32> -> vector<128x256xf32>
    %c0_8 = arith.constant 0 : index
    %c0_9 = arith.constant 0 : index
    %17 = vector.load %arg5[%c0_8, %c0_9] : memref<128x256xf32, #tpu.memory_space<vmem>>, vector<128x256xf32>
    tpu.vector_store %arg5[%c0_8, %c0_9], %16 {strides = array<i32>} : memref<128x256xf32, #tpu.memory_space<vmem>>, vector<128x256xf32>,
    return
  }
  func.func @transform_0(%arg0: i32, %arg1: i32) -> (i32, i32) {
    %c0_i32 = arith.constant 0 : i32
    %c0_i32_0 = arith.constant 0 : i32
    return %arg0, %c0_i32 : i32, i32
  }
  func.func @transform_1(%arg0: i32, %arg1: i32) -> (i32, i32) {
    %c0_i32 = arith.constant 0 : i32
    %c0_i32_0 = arith.constant 0 : i32
    %c0_i32_1 = arith.constant 0 : i32
    return %c0_i32, %c0_i32_0 : i32, i32
  }
  func.func @transform_2(%arg0: i32, %arg1: i32) -> (i32, i32) {
    %c0_i32 = arith.constant 0 : i32
    %c0_i32_0 = arith.constant 0 : i32
    return %c0_i32, %arg1 : i32, i32
  }
  func.func @transform_3(%arg0: i32, %arg1: i32) -> (i32, i32) {
    %c0_i32 = arith.constant 0 : i32
    return %arg0, %arg1 : i32, i32
  }
}

module attributes {stable_mosaic.version = 11 : i64} {
  func.func @_matmul_residual_kernel(%arg0: i32, %arg1: i32, %arg2: i32, %arg3: memref<128x256xbf16, #tpu.memory_space<vmem>>, %arg4: memref<256x256xbf16, #tpu.memory_space<vmem>>, %arg5: memref<128x256xf32, #tpu.memory_space<vmem>>, %arg6: memref<128x256xf32, #tpu.memory_space<vmem>>, %arg7: memref<128x256xf32, #tpu.memory_space<vmem>>) attributes {dimension_semantics = [#tpu.dimension_semantics<parallel>, #tpu.dimension_semantics<parallel>, #tpu.dimension_semantics<arbitrary>], iteration_bounds = array<i64: 2, 1, 1>, scalar_prefetch = 0 : i64, scratch_operands = 1 : i64, tpu.core_type = #tpu.core_type<tc>, window_params = [{transform_indices = @transform_0, window_bounds = array<i64: 128, 256>}, {transform_indices = @transform_1, window_bounds = array<i64: 256, 256>}, {transform_indices = @transform_2, window_bounds = array<i64: 128, 256>}, {transform_indices = @transform_3, window_bounds = array<i64: 128, 256>}]} {
    %c0_i32 = arith.constant 0 : i32
    %0 = arith.cmpi eq, %arg2, %c0_i32 : i32
    %1 = arith.extui %0 : i1 to i32
    %c0_i32_0 = arith.constant 0 : i32
    %2 = arith.cmpi ne, %1, %c0_i32_0 : i32
    scf.if %2 {
      %cst_10 = arith.constant 0.000000e+00 : f32
      %12 = vector.broadcast %cst_10 : f32 to vector<128x256xf32>
      %c0_11 = arith.constant 0 : index
      %c0_12 = arith.constant 0 : index
      %13 = vector.load %arg7[%c0_11, %c0_12] : memref<128x256xf32, #tpu.memory_space<vmem>>, vector<128x256xf32>
      tpu.vector_store %arg7[%c0_11, %c0_12], %12 {strides = array<i32>} : memref<128x256xf32, #tpu.memory_space<vmem>>, vector<128x256xf32>,
    } else {
    }
    %c0 = arith.constant 0 : index
    %c0_1 = arith.constant 0 : index
    %3 = vector.load %arg7[%c0, %c0_1] : memref<128x256xf32, #tpu.memory_space<vmem>>, vector<128x256xf32>
    %c0_2 = arith.constant 0 : index
    %c0_3 = arith.constant 0 : index
    %4 = vector.load %arg3[%c0_2, %c0_3] : memref<128x256xbf16, #tpu.memory_space<vmem>>, vector<128x256xbf16>
    %c0_4 = arith.constant 0 : index
    %c0_5 = arith.constant 0 : index
    %5 = vector.load %arg4[%c0_4, %c0_5] : memref<256x256xbf16, #tpu.memory_space<vmem>>, vector<256x256xbf16>
    %cst = arith.constant dense<0.000000e+00> : vector<128x256xf32>
    %6 = tpu.matmul %4, %5, %cst {dimension_numbers = #tpu.dot_dimension_numbers<[1], [0], [0], [1], [0, 0, 1, 1], [], []>} : vector<128x256xbf16>, vector<256x256xbf16>, vector<128x256xf32> -> vector<128x256xf32>
    %7 = arith.addf %3, %6 : vector<128x256xf32>
    %c0_6 = arith.constant 0 : index
    %c0_7 = arith.constant 0 : index
    %8 = vector.load %arg7[%c0_6, %c0_7] : memref<128x256xf32, #tpu.memory_space<vmem>>, vector<128x256xf32>
    tpu.vector_store %arg7[%c0_6, %c0_7], %7 {strides = array<i32>} : memref<128x256xf32, #tpu.memory_space<vmem>>, vector<128x256xf32>,
    %c0_i32_8 = arith.constant 0 : i32
    %9 = arith.cmpi eq, %arg2, %c0_i32_8 : i32
    %10 = arith.extui %9 : i1 to i32
    %c0_i32_9 = arith.constant 0 : i32
    %11 = arith.cmpi ne, %10, %c0_i32_9 : i32
    scf.if %11 {
      %c0_10 = arith.constant 0 : index
      %c0_11 = arith.constant 0 : index
      %12 = vector.load %arg7[%c0_10, %c0_11] : memref<128x256xf32, #tpu.memory_space<vmem>>, vector<128x256xf32>
      %c0_12 = arith.constant 0 : index
      %c0_13 = arith.constant 0 : index
      %13 = vector.load %arg5[%c0_12, %c0_13] : memref<128x256xf32, #tpu.memory_space<vmem>>, vector<128x256xf32>
      %14 = arith.addf %12, %13 : vector<128x256xf32>
      %c0_14 = arith.constant 0 : index
      %c0_15 = arith.constant 0 : index
      %15 = vector.load %arg6[%c0_14, %c0_15] : memref<128x256xf32, #tpu.memory_space<vmem>>, vector<128x256xf32>
      tpu.vector_store %arg6[%c0_14, %c0_15], %14 {strides = array<i32>} : memref<128x256xf32, #tpu.memory_space<vmem>>, vector<128x256xf32>,
    } else {
    }
    return
  }
  func.func @transform_0(%arg0: i32, %arg1: i32, %arg2: i32) -> (i32, i32) {
    %c0_i32 = arith.constant 0 : i32
    return %arg0, %arg2 : i32, i32
  }
  func.func @transform_1(%arg0: i32, %arg1: i32, %arg2: i32) -> (i32, i32) {
    %c0_i32 = arith.constant 0 : i32
    return %arg2, %arg1 : i32, i32
  }
  func.func @transform_2(%arg0: i32, %arg1: i32, %arg2: i32) -> (i32, i32) {
    %c0_i32 = arith.constant 0 : i32
    return %arg0, %arg1 : i32, i32
  }
  func.func @transform_3(%arg0: i32, %arg1: i32, %arg2: i32) -> (i32, i32) {
    %c0_i32 = arith.constant 0 : i32
    return %arg0, %arg1 : i32, i32
  }
}

module attributes {stable_mosaic.version = 11 : i64} {
  func.func @_flash_attn_kernel(%arg0: i32, %arg1: i32, %arg2: i32, %arg3: memref<1x128x256xbf16, #tpu.memory_space<vmem>>, %arg4: memref<1x128x128xbf16, #tpu.memory_space<vmem>>, %arg5: memref<1x128x128xbf16, #tpu.memory_space<vmem>>, %arg6: memref<1x128x256xbf16, #tpu.memory_space<vmem>>, %arg7: memref<2x128x1xf32, #tpu.memory_space<vmem>>, %arg8: memref<2x128x1xf32, #tpu.memory_space<vmem>>, %arg9: memref<2x128x128xf32, #tpu.memory_space<vmem>>) attributes {dimension_semantics = [#tpu.dimension_semantics<parallel>, #tpu.dimension_semantics<parallel>, #tpu.dimension_semantics<arbitrary>], iteration_bounds = array<i64: 2, 1, 1>, scalar_prefetch = 0 : i64, scratch_operands = 3 : i64, tpu.core_type = #tpu.core_type<tc>, window_params = [{transform_indices = @transform_0, window_bounds = array<i64: 1, 128, 256>}, {transform_indices = @transform_1, window_bounds = array<i64: 1, 128, 128>}, {transform_indices = @transform_2, window_bounds = array<i64: 1, 128, 128>}, {transform_indices = @transform_3, window_bounds = array<i64: 1, 128, 256>}]} {
    %c128_i32 = arith.constant 128 : i32
    %0 = arith.muli %arg1, %c128_i32 : i32
    %c128_i32_0 = arith.constant 128 : i32
    %1 = arith.muli %arg2, %c128_i32_0 : i32
    %c0_i32 = arith.constant 0 : i32
    %2 = arith.cmpi eq, %arg2, %c0_i32 : i32
    %3 = arith.extui %2 : i1 to i32
    %c0_i32_1 = arith.constant 0 : i32
    %4 = arith.cmpi ne, %3, %c0_i32_1 : i32
    scf.if %4 {
      %cst = arith.constant -1.000000e+30 : f32
      %12 = vector.broadcast %cst : f32 to vector<2x128x1xf32>
      %c0 = arith.constant 0 : index
      %c0_5 = arith.constant 0 : index
      %c0_6 = arith.constant 0 : index
      %13 = vector.load %arg7[%c0, %c0_5, %c0_6] : memref<2x128x1xf32, #tpu.memory_space<vmem>>, vector<2x128x1xf32>
      tpu.vector_store %arg7[%c0, %c0_5, %c0_6], %12 {strides = array<i32>} : memref<2x128x1xf32, #tpu.memory_space<vmem>>, vector<2x128x1xf32>,
      %cst_7 = arith.constant 0.000000e+00 : f32
      %14 = vector.broadcast %cst_7 : f32 to vector<2x128x1xf32>
      %c0_8 = arith.constant 0 : index
      %c0_9 = arith.constant 0 : index
      %c0_10 = arith.constant 0 : index
      %15 = vector.load %arg8[%c0_8, %c0_9, %c0_10] : memref<2x128x1xf32, #tpu.memory_space<vmem>>, vector<2x128x1xf32>
      tpu.vector_store %arg8[%c0_8, %c0_9, %c0_10], %14 {strides = array<i32>} : memref<2x128x1xf32, #tpu.memory_space<vmem>>, vector<2x128x1xf32>,
      %cst_11 = arith.constant 0.000000e+00 : f32
      %16 = vector.broadcast %cst_11 : f32 to vector<2x128x128xf32>
      %c0_12 = arith.constant 0 : index
      %c0_13 = arith.constant 0 : index
      %c0_14 = arith.constant 0 : index
      %17 = vector.load %arg9[%c0_12, %c0_13, %c0_14] : memref<2x128x128xf32, #tpu.memory_space<vmem>>, vector<2x128x128xf32>
      tpu.vector_store %arg9[%c0_12, %c0_13, %c0_14], %16 {strides = array<i32>} : memref<2x128x128xf32, #tpu.memory_space<vmem>>, vector<2x128x128xf32>,
    } else {
    }
    %c127_i32 = arith.constant 127 : i32
    %5 = arith.addi %0, %c127_i32 : i32
    %6 = arith.cmpi sle, %1, %5 : i32
    %7 = arith.extui %6 : i1 to i32
    %c0_i32_2 = arith.constant 0 : i32
    %8 = arith.cmpi ne, %7, %c0_i32_2 : i32
    scf.if %8 {
      %12 = tpu.iota {dimensions = array<i32: 0>} : vector<128x128xi32>
      %13 = vector.broadcast %0 : i32 to vector<128x128xi32>
      %14 = arith.addi %13, %12 : vector<128x128xi32>
      %15 = tpu.iota {dimensions = array<i32: 1>} : vector<128x128xi32>
      %16 = vector.broadcast %1 : i32 to vector<128x128xi32>
      %17 = arith.addi %16, %15 : vector<128x128xi32>
      %18 = arith.cmpi sle, %17, %14 : vector<128x128xi32>
      %c0 = arith.constant 0 : index
      %c0_5 = arith.constant 0 : index
      %c0_6 = arith.constant 0 : index
      %19 = vector.load %arg3[%c0, %c0_5, %c0_6] : memref<1x128x256xbf16, #tpu.memory_space<vmem>>, vector<1x128x128xbf16>
      %20 = vector.shape_cast %19 : vector<1x128x128xbf16> to vector<128x128xbf16>
      %c0_7 = arith.constant 0 : index
      %c0_8 = arith.constant 0 : index
      %c0_9 = arith.constant 0 : index
      %21 = vector.load %arg4[%c0_7, %c0_8, %c0_9] : memref<1x128x128xbf16, #tpu.memory_space<vmem>>, vector<1x128x128xbf16>
      %22 = vector.shape_cast %21 : vector<1x128x128xbf16> to vector<128x128xbf16>
      %c0_10 = arith.constant 0 : index
      %c0_11 = arith.constant 0 : index
      %c0_12 = arith.constant 0 : index
      %23 = vector.load %arg5[%c0_10, %c0_11, %c0_12] : memref<1x128x128xbf16, #tpu.memory_space<vmem>>, vector<1x128x128xbf16>
      %24 = vector.shape_cast %23 : vector<1x128x128xbf16> to vector<128x128xbf16>
      %cst = arith.constant dense<0.000000e+00> : vector<128x128xf32>
      %25 = tpu.matmul %20, %22, %cst {dimension_numbers = #tpu.dot_dimension_numbers<[1], [1], [0], [0], [0, 0, 1, 0], [], []>} : vector<128x128xbf16>, vector<128x128xbf16>, vector<128x128xf32> -> vector<128x128xf32>
      %cst_13 = arith.constant -1.000000e+30 : f32
      %26 = vector.broadcast %cst_13 : f32 to vector<128x128xf32>
      %27 = arith.select %18, %25, %26 : vector<128x128xi1>, vector<128x128xf32>
      %c0_14 = arith.constant 0 : index
      %c0_15 = arith.constant 0 : index
      %c0_16 = arith.constant 0 : index
      %28 = vector.load %arg7[%c0_14, %c0_15, %c0_16] : memref<2x128x1xf32, #tpu.memory_space<vmem>>, vector<1x128x1xf32>
      %29 = vector.shape_cast %28 : vector<1x128x1xf32> to vector<128x1xf32>
      %cst_17 = arith.constant dense<0xFF800000> : vector<128xf32>
      %30 = vector.multi_reduction <maximumf>, %27, %cst_17 [1] : vector<128x128xf32> to vector<128xf32>
      %31 = vector.shape_cast %30 : vector<128xf32> to vector<128x1xf32>
      %32 = arith.maximumf %29, %31 : vector<128x1xf32>
      %33 = arith.subf %29, %32 : vector<128x1xf32>
      %34 = math.exp %33 : vector<128x1xf32>
      %35 = vector.broadcast %32 : vector<128x1xf32> to vector<128x128xf32>
      %36 = arith.subf %27, %35 : vector<128x128xf32>
      %37 = math.exp %36 : vector<128x128xf32>
      %c0_18 = arith.constant 0 : index
      %c0_19 = arith.constant 0 : index
      %c0_20 = arith.constant 0 : index
      %38 = vector.load %arg8[%c0_18, %c0_19, %c0_20] : memref<2x128x1xf32, #tpu.memory_space<vmem>>, vector<1x128x1xf32>
      %39 = vector.shape_cast %38 : vector<1x128x1xf32> to vector<128x1xf32>
      %40 = arith.mulf %34, %39 : vector<128x1xf32>
      %cst_21 = arith.constant dense<0.000000e+00> : vector<128xf32>
      %41 = vector.multi_reduction <add>, %37, %cst_21 [1] : vector<128x128xf32> to vector<128xf32>
      %42 = vector.shape_cast %41 : vector<128xf32> to vector<128x1xf32>
      %43 = arith.addf %40, %42 : vector<128x1xf32>
      %c0_22 = arith.constant 0 : index
      %c0_23 = arith.constant 0 : index
      %c0_24 = arith.constant 0 : index
      %44 = vector.load %arg8[%c0_22, %c0_23, %c0_24] : memref<2x128x1xf32, #tpu.memory_space<vmem>>, vector<1x128x1xf32>
      %45 = vector.shape_cast %44 : vector<1x128x1xf32> to vector<128x1xf32>
      %46 = vector.shape_cast %43 : vector<128x1xf32> to vector<1x128x1xf32>
      tpu.vector_store %arg8[%c0_22, %c0_23, %c0_24], %46 {strides = array<i32>} : memref<2x128x1xf32, #tpu.memory_space<vmem>>, vector<1x128x1xf32>,
      %c0_25 = arith.constant 0 : index
      %c0_26 = arith.constant 0 : index
      %c0_27 = arith.constant 0 : index
      %47 = vector.load %arg9[%c0_25, %c0_26, %c0_27] : memref<2x128x128xf32, #tpu.memory_space<vmem>>, vector<1x128x128xf32>
      %48 = vector.shape_cast %47 : vector<1x128x128xf32> to vector<128x128xf32>
      %49 = vector.broadcast %34 : vector<128x1xf32> to vector<128x128xf32>
      %50 = arith.mulf %49, %48 : vector<128x128xf32>
      %51 = arith.truncf %37 : vector<128x128xf32> to vector<128x128xbf16>
      %cst_28 = arith.constant dense<0.000000e+00> : vector<128x128xf32>
      %52 = tpu.matmul %51, %24, %cst_28 {dimension_numbers = #tpu.dot_dimension_numbers<[1], [0], [0], [1], [0, 0, 1, 1], [], []>} : vector<128x128xbf16>, vector<128x128xbf16>, vector<128x128xf32> -> vector<128x128xf32>
      %53 = arith.addf %50, %52 : vector<128x128xf32>
      %c0_29 = arith.constant 0 : index
      %c0_30 = arith.constant 0 : index
      %c0_31 = arith.constant 0 : index
      %54 = vector.load %arg9[%c0_29, %c0_30, %c0_31] : memref<2x128x128xf32, #tpu.memory_space<vmem>>, vector<1x128x128xf32>
      %55 = vector.shape_cast %54 : vector<1x128x128xf32> to vector<128x128xf32>
      %56 = vector.shape_cast %53 : vector<128x128xf32> to vector<1x128x128xf32>
      tpu.vector_store %arg9[%c0_29, %c0_30, %c0_31], %56 {strides = array<i32>} : memref<2x128x128xf32, #tpu.memory_space<vmem>>, vector<1x128x128xf32>,
      %c0_32 = arith.constant 0 : index
      %c0_33 = arith.constant 0 : index
      %c0_34 = arith.constant 0 : index
      %57 = vector.load %arg7[%c0_32, %c0_33, %c0_34] : memref<2x128x1xf32, #tpu.memory_space<vmem>>, vector<1x128x1xf32>
      %58 = vector.shape_cast %57 : vector<1x128x1xf32> to vector<128x1xf32>
      %59 = vector.shape_cast %32 : vector<128x1xf32> to vector<1x128x1xf32>
      tpu.vector_store %arg7[%c0_32, %c0_33, %c0_34], %59 {strides = array<i32>} : memref<2x128x1xf32, #tpu.memory_space<vmem>>, vector<1x128x1xf32>,
      %c0_35 = arith.constant 0 : index
      %c0_36 = arith.constant 0 : index
      %c128 = arith.constant 128 : index
      %60 = vector.load %arg3[%c0_35, %c0_36, %c128] : memref<1x128x256xbf16, #tpu.memory_space<vmem>>, vector<1x128x128xbf16>
      %61 = vector.shape_cast %60 : vector<1x128x128xbf16> to vector<128x128xbf16>
      %c0_37 = arith.constant 0 : index
      %c0_38 = arith.constant 0 : index
      %c0_39 = arith.constant 0 : index
      %62 = vector.load %arg4[%c0_37, %c0_38, %c0_39] : memref<1x128x128xbf16, #tpu.memory_space<vmem>>, vector<1x128x128xbf16>
      %63 = vector.shape_cast %62 : vector<1x128x128xbf16> to vector<128x128xbf16>
      %c0_40 = arith.constant 0 : index
      %c0_41 = arith.constant 0 : index
      %c0_42 = arith.constant 0 : index
      %64 = vector.load %arg5[%c0_40, %c0_41, %c0_42] : memref<1x128x128xbf16, #tpu.memory_space<vmem>>, vector<1x128x128xbf16>
      %65 = vector.shape_cast %64 : vector<1x128x128xbf16> to vector<128x128xbf16>
      %cst_43 = arith.constant dense<0.000000e+00> : vector<128x128xf32>
      %66 = tpu.matmul %61, %63, %cst_43 {dimension_numbers = #tpu.dot_dimension_numbers<[1], [1], [0], [0], [0, 0, 1, 0], [], []>} : vector<128x128xbf16>, vector<128x128xbf16>, vector<128x128xf32> -> vector<128x128xf32>
      %cst_44 = arith.constant -1.000000e+30 : f32
      %67 = vector.broadcast %cst_44 : f32 to vector<128x128xf32>
      %68 = arith.select %18, %66, %67 : vector<128x128xi1>, vector<128x128xf32>
      %c1 = arith.constant 1 : index
      %c0_45 = arith.constant 0 : index
      %c0_46 = arith.constant 0 : index
      %69 = vector.load %arg7[%c1, %c0_45, %c0_46] : memref<2x128x1xf32, #tpu.memory_space<vmem>>, vector<1x128x1xf32>
      %70 = vector.shape_cast %69 : vector<1x128x1xf32> to vector<128x1xf32>
      %cst_47 = arith.constant dense<0xFF800000> : vector<128xf32>
      %71 = vector.multi_reduction <maximumf>, %68, %cst_47 [1] : vector<128x128xf32> to vector<128xf32>
      %72 = vector.shape_cast %71 : vector<128xf32> to vector<128x1xf32>
      %73 = arith.maximumf %70, %72 : vector<128x1xf32>
      %74 = arith.subf %70, %73 : vector<128x1xf32>
      %75 = math.exp %74 : vector<128x1xf32>
      %76 = vector.broadcast %73 : vector<128x1xf32> to vector<128x128xf32>
      %77 = arith.subf %68, %76 : vector<128x128xf32>
      %78 = math.exp %77 : vector<128x128xf32>
      %c1_48 = arith.constant 1 : index
      %c0_49 = arith.constant 0 : index
      %c0_50 = arith.constant 0 : index
      %79 = vector.load %arg8[%c1_48, %c0_49, %c0_50] : memref<2x128x1xf32, #tpu.memory_space<vmem>>, vector<1x128x1xf32>
      %80 = vector.shape_cast %79 : vector<1x128x1xf32> to vector<128x1xf32>
      %81 = arith.mulf %75, %80 : vector<128x1xf32>
      %cst_51 = arith.constant dense<0.000000e+00> : vector<128xf32>
      %82 = vector.multi_reduction <add>, %78, %cst_51 [1] : vector<128x128xf32> to vector<128xf32>
      %83 = vector.shape_cast %82 : vector<128xf32> to vector<128x1xf32>
      %84 = arith.addf %81, %83 : vector<128x1xf32>
      %c1_52 = arith.constant 1 : index
      %c0_53 = arith.constant 0 : index
      %c0_54 = arith.constant 0 : index
      %85 = vector.load %arg8[%c1_52, %c0_53, %c0_54] : memref<2x128x1xf32, #tpu.memory_space<vmem>>, vector<1x128x1xf32>
      %86 = vector.shape_cast %85 : vector<1x128x1xf32> to vector<128x1xf32>
      %87 = vector.shape_cast %84 : vector<128x1xf32> to vector<1x128x1xf32>
      tpu.vector_store %arg8[%c1_52, %c0_53, %c0_54], %87 {strides = array<i32>} : memref<2x128x1xf32, #tpu.memory_space<vmem>>, vector<1x128x1xf32>,
      %c1_55 = arith.constant 1 : index
      %c0_56 = arith.constant 0 : index
      %c0_57 = arith.constant 0 : index
      %88 = vector.load %arg9[%c1_55, %c0_56, %c0_57] : memref<2x128x128xf32, #tpu.memory_space<vmem>>, vector<1x128x128xf32>
      %89 = vector.shape_cast %88 : vector<1x128x128xf32> to vector<128x128xf32>
      %90 = vector.broadcast %75 : vector<128x1xf32> to vector<128x128xf32>
      %91 = arith.mulf %90, %89 : vector<128x128xf32>
      %92 = arith.truncf %78 : vector<128x128xf32> to vector<128x128xbf16>
      %cst_58 = arith.constant dense<0.000000e+00> : vector<128x128xf32>
      %93 = tpu.matmul %92, %65, %cst_58 {dimension_numbers = #tpu.dot_dimension_numbers<[1], [0], [0], [1], [0, 0, 1, 1], [], []>} : vector<128x128xbf16>, vector<128x128xbf16>, vector<128x128xf32> -> vector<128x128xf32>
      %94 = arith.addf %91, %93 : vector<128x128xf32>
      %c1_59 = arith.constant 1 : index
      %c0_60 = arith.constant 0 : index
      %c0_61 = arith.constant 0 : index
      %95 = vector.load %arg9[%c1_59, %c0_60, %c0_61] : memref<2x128x128xf32, #tpu.memory_space<vmem>>, vector<1x128x128xf32>
      %96 = vector.shape_cast %95 : vector<1x128x128xf32> to vector<128x128xf32>
      %97 = vector.shape_cast %94 : vector<128x128xf32> to vector<1x128x128xf32>
      tpu.vector_store %arg9[%c1_59, %c0_60, %c0_61], %97 {strides = array<i32>} : memref<2x128x128xf32, #tpu.memory_space<vmem>>, vector<1x128x128xf32>,
      %c1_62 = arith.constant 1 : index
      %c0_63 = arith.constant 0 : index
      %c0_64 = arith.constant 0 : index
      %98 = vector.load %arg7[%c1_62, %c0_63, %c0_64] : memref<2x128x1xf32, #tpu.memory_space<vmem>>, vector<1x128x1xf32>
      %99 = vector.shape_cast %98 : vector<1x128x1xf32> to vector<128x1xf32>
      %100 = vector.shape_cast %73 : vector<128x1xf32> to vector<1x128x1xf32>
      tpu.vector_store %arg7[%c1_62, %c0_63, %c0_64], %100 {strides = array<i32>} : memref<2x128x1xf32, #tpu.memory_space<vmem>>, vector<1x128x1xf32>,
    } else {
    }
    %c0_i32_3 = arith.constant 0 : i32
    %9 = arith.cmpi eq, %arg2, %c0_i32_3 : i32
    %10 = arith.extui %9 : i1 to i32
    %c0_i32_4 = arith.constant 0 : i32
    %11 = arith.cmpi ne, %10, %c0_i32_4 : i32
    scf.if %11 {
      %c0 = arith.constant 0 : index
      %c0_5 = arith.constant 0 : index
      %c0_6 = arith.constant 0 : index
      %12 = vector.load %arg8[%c0, %c0_5, %c0_6] : memref<2x128x1xf32, #tpu.memory_space<vmem>>, vector<1x128x1xf32>
      %13 = vector.shape_cast %12 : vector<1x128x1xf32> to vector<128x1xf32>
      %14 = tpu.reciprocal %13 {approx = true} : vector<128x1xf32> -> vector<128x1xf32>
      %c0_7 = arith.constant 0 : index
      %c0_8 = arith.constant 0 : index
      %c0_9 = arith.constant 0 : index
      %15 = vector.load %arg9[%c0_7, %c0_8, %c0_9] : memref<2x128x128xf32, #tpu.memory_space<vmem>>, vector<1x128x128xf32>
      %16 = vector.shape_cast %15 : vector<1x128x128xf32> to vector<128x128xf32>
      %17 = vector.broadcast %14 : vector<128x1xf32> to vector<128x128xf32>
      %18 = arith.mulf %16, %17 : vector<128x128xf32>
      %19 = arith.truncf %18 : vector<128x128xf32> to vector<128x128xbf16>
      %c0_10 = arith.constant 0 : index
      %c0_11 = arith.constant 0 : index
      %c0_12 = arith.constant 0 : index
      %20 = vector.load %arg6[%c0_10, %c0_11, %c0_12] : memref<1x128x256xbf16, #tpu.memory_space<vmem>>, vector<1x128x128xbf16>
      %21 = vector.shape_cast %20 : vector<1x128x128xbf16> to vector<128x128xbf16>
      %22 = vector.shape_cast %19 : vector<128x128xbf16> to vector<1x128x128xbf16>
      tpu.vector_store %arg6[%c0_10, %c0_11, %c0_12], %22 {strides = array<i32>} : memref<1x128x256xbf16, #tpu.memory_space<vmem>>, vector<1x128x128xbf16>,
      %c1 = arith.constant 1 : index
      %c0_13 = arith.constant 0 : index
      %c0_14 = arith.constant 0 : index
      %23 = vector.load %arg8[%c1, %c0_13, %c0_14] : memref<2x128x1xf32, #tpu.memory_space<vmem>>, vector<1x128x1xf32>
      %24 = vector.shape_cast %23 : vector<1x128x1xf32> to vector<128x1xf32>
      %25 = tpu.reciprocal %24 {approx = true} : vector<128x1xf32> -> vector<128x1xf32>
      %c1_15 = arith.constant 1 : index
      %c0_16 = arith.constant 0 : index
      %c0_17 = arith.constant 0 : index
      %26 = vector.load %arg9[%c1_15, %c0_16, %c0_17] : memref<2x128x128xf32, #tpu.memory_space<vmem>>, vector<1x128x128xf32>
      %27 = vector.shape_cast %26 : vector<1x128x128xf32> to vector<128x128xf32>
      %28 = vector.broadcast %25 : vector<128x1xf32> to vector<128x128xf32>
      %29 = arith.mulf %27, %28 : vector<128x128xf32>
      %30 = arith.truncf %29 : vector<128x128xf32> to vector<128x128xbf16>
      %c0_18 = arith.constant 0 : index
      %c0_19 = arith.constant 0 : index
      %c128 = arith.constant 128 : index
      %31 = vector.load %arg6[%c0_18, %c0_19, %c128] : memref<1x128x256xbf16, #tpu.memory_space<vmem>>, vector<1x128x128xbf16>
      %32 = vector.shape_cast %31 : vector<1x128x128xbf16> to vector<128x128xbf16>
      %33 = vector.shape_cast %30 : vector<128x128xbf16> to vector<1x128x128xbf16>
      tpu.vector_store %arg6[%c0_18, %c0_19, %c128], %33 {strides = array<i32>} : memref<1x128x256xbf16, #tpu.memory_space<vmem>>, vector<1x128x128xbf16>,
    } else {
    }
    return
  }
  func.func @transform_0(%arg0: i32, %arg1: i32, %arg2: i32) -> (i32, i32, i32) {
    %c0_i32 = arith.constant 0 : i32
    %c0_i32_0 = arith.constant 0 : i32
    return %arg0, %arg1, %c0_i32 : i32, i32, i32
  }
  func.func @transform_1(%arg0: i32, %arg1: i32, %arg2: i32) -> (i32, i32, i32) {
    %c0_i32 = arith.constant 0 : i32
    %c0_i32_0 = arith.constant 0 : i32
    return %arg0, %arg2, %c0_i32 : i32, i32, i32
  }
  func.func @transform_2(%arg0: i32, %arg1: i32, %arg2: i32) -> (i32, i32, i32) {
    %c0_i32 = arith.constant 0 : i32
    %c0_i32_0 = arith.constant 0 : i32
    return %arg0, %arg2, %c0_i32 : i32, i32, i32
  }
  func.func @transform_3(%arg0: i32, %arg1: i32, %arg2: i32) -> (i32, i32, i32) {
    %c0_i32 = arith.constant 0 : i32
    %c0_i32_0 = arith.constant 0 : i32
    return %arg0, %arg1, %c0_i32 : i32, i32, i32
  }
}

module attributes {stable_mosaic.version = 11 : i64} {
  func.func @_ffn_kernel(%arg0: i32, %arg1: i32, %arg2: memref<128x256xf32, #tpu.memory_space<vmem>>, %arg3: memref<1x256xf32, #tpu.memory_space<vmem>>, %arg4: memref<256x256xbf16, #tpu.memory_space<vmem>>, %arg5: memref<256x256xbf16, #tpu.memory_space<vmem>>, %arg6: memref<256x256xbf16, #tpu.memory_space<vmem>>, %arg7: memref<128x256xf32, #tpu.memory_space<vmem>>, %arg8: memref<128x256xbf16, #tpu.memory_space<vmem>>, %arg9: memref<128x256xf32, #tpu.memory_space<vmem>>) attributes {dimension_semantics = [#tpu.dimension_semantics<parallel>, #tpu.dimension_semantics<arbitrary>], iteration_bounds = array<i64: 2, 3>, scalar_prefetch = 0 : i64, scratch_operands = 2 : i64, tpu.core_type = #tpu.core_type<tc>, window_params = [{transform_indices = @transform_0, window_bounds = array<i64: 128, 256>}, {pipeline_mode = #tpu.pipeline_mode<synchronous>, transform_indices = @transform_1, window_bounds = array<i64: 1, 256>}, {transform_indices = @transform_2, window_bounds = array<i64: 256, 256>}, {transform_indices = @transform_3, window_bounds = array<i64: 256, 256>}, {transform_indices = @transform_4, window_bounds = array<i64: 256, 256>}, {transform_indices = @transform_5, window_bounds = array<i64: 128, 256>}]} {
    %c0_i32 = arith.constant 0 : i32
    %0 = arith.cmpi eq, %arg1, %c0_i32 : i32
    %1 = arith.extui %0 : i1 to i32
    %c0_i32_0 = arith.constant 0 : i32
    %2 = arith.cmpi ne, %1, %c0_i32_0 : i32
    scf.if %2 {
      %c0_16 = arith.constant 0 : index
      %c0_17 = arith.constant 0 : index
      %24 = vector.load %arg2[%c0_16, %c0_17] : memref<128x256xf32, #tpu.memory_space<vmem>>, vector<128x256xf32>
      %25 = arith.mulf %24, %24 : vector<128x256xf32>
      %cst_18 = arith.constant dense<0.000000e+00> : vector<128xf32>
      %26 = vector.multi_reduction <add>, %25, %cst_18 [1] : vector<128x256xf32> to vector<128xf32>
      %27 = vector.shape_cast %26 : vector<128xf32> to vector<128x1xf32>
      %cst_19 = arith.constant 2.560000e+02 : f32
      %28 = vector.broadcast %cst_19 : f32 to vector<128x1xf32>
      %29 = arith.divf %27, %28 : vector<128x1xf32>
      %cst_20 = arith.constant 9.99999974E-6 : f32
      %30 = vector.broadcast %cst_20 : f32 to vector<128x1xf32>
      %31 = arith.addf %29, %30 : vector<128x1xf32>
      %32 = math.rsqrt %31 : vector<128x1xf32>
      %33 = vector.broadcast %32 : vector<128x1xf32> to vector<128x256xf32>
      %34 = arith.mulf %24, %33 : vector<128x256xf32>
      %c0_21 = arith.constant 0 : index
      %c0_22 = arith.constant 0 : index
      %35 = vector.load %arg3[%c0_21, %c0_22] : memref<1x256xf32, #tpu.memory_space<vmem>>, vector<1x256xf32>
      %36 = vector.broadcast %35 : vector<1x256xf32> to vector<128x256xf32>
      %37 = arith.mulf %34, %36 : vector<128x256xf32>
      %38 = arith.truncf %37 : vector<128x256xf32> to vector<128x256xbf16>
      %c0_23 = arith.constant 0 : index
      %c0_24 = arith.constant 0 : index
      %39 = vector.load %arg8[%c0_23, %c0_24] : memref<128x256xbf16, #tpu.memory_space<vmem>>, vector<128x256xbf16>
      tpu.vector_store %arg8[%c0_23, %c0_24], %38 {strides = array<i32>} : memref<128x256xbf16, #tpu.memory_space<vmem>>, vector<128x256xbf16>,
      %cst_25 = arith.constant 0.000000e+00 : f32
      %40 = vector.broadcast %cst_25 : f32 to vector<128x256xf32>
      %c0_26 = arith.constant 0 : index
      %c0_27 = arith.constant 0 : index
      %41 = vector.load %arg9[%c0_26, %c0_27] : memref<128x256xf32, #tpu.memory_space<vmem>>, vector<128x256xf32>
      tpu.vector_store %arg9[%c0_26, %c0_27], %40 {strides = array<i32>} : memref<128x256xf32, #tpu.memory_space<vmem>>, vector<128x256xf32>,
    } else {
    }
    %c0 = arith.constant 0 : index
    %c0_1 = arith.constant 0 : index
    %3 = vector.load %arg8[%c0, %c0_1] : memref<128x256xbf16, #tpu.memory_space<vmem>>, vector<128x256xbf16>
    %c0_2 = arith.constant 0 : index
    %c0_3 = arith.constant 0 : index
    %4 = vector.load %arg4[%c0_2, %c0_3] : memref<256x256xbf16, #tpu.memory_space<vmem>>, vector<256x256xbf16>
    %cst = arith.constant dense<0.000000e+00> : vector<128x256xf32>
    %5 = tpu.matmul %3, %4, %cst {dimension_numbers = #tpu.dot_dimension_numbers<[1], [0], [0], [1], [0, 0, 1, 1], [], []>} : vector<128x256xbf16>, vector<256x256xbf16>, vector<128x256xf32> -> vector<128x256xf32>
    %c0_4 = arith.constant 0 : index
    %c0_5 = arith.constant 0 : index
    %6 = vector.load %arg5[%c0_4, %c0_5] : memref<256x256xbf16, #tpu.memory_space<vmem>>, vector<256x256xbf16>
    %cst_6 = arith.constant dense<0.000000e+00> : vector<128x256xf32>
    %7 = tpu.matmul %3, %6, %cst_6 {dimension_numbers = #tpu.dot_dimension_numbers<[1], [0], [0], [1], [0, 0, 1, 1], [], []>} : vector<128x256xbf16>, vector<256x256xbf16>, vector<128x256xf32> -> vector<128x256xf32>
    %8 = arith.negf %5 : vector<128x256xf32>
    %9 = math.exp %8 : vector<128x256xf32>
    %cst_7 = arith.constant 1.000000e+00 : f32
    %10 = vector.broadcast %cst_7 : f32 to vector<128x256xf32>
    %11 = arith.addf %10, %9 : vector<128x256xf32>
    %12 = arith.divf %10, %11 : vector<128x256xf32>
    %13 = arith.mulf %5, %12 : vector<128x256xf32>
    %14 = arith.mulf %13, %7 : vector<128x256xf32>
    %c0_8 = arith.constant 0 : index
    %c0_9 = arith.constant 0 : index
    %15 = vector.load %arg9[%c0_8, %c0_9] : memref<128x256xf32, #tpu.memory_space<vmem>>, vector<128x256xf32>
    %16 = arith.truncf %14 : vector<128x256xf32> to vector<128x256xbf16>
    %c0_10 = arith.constant 0 : index
    %c0_11 = arith.constant 0 : index
    %17 = vector.load %arg6[%c0_10, %c0_11] : memref<256x256xbf16, #tpu.memory_space<vmem>>, vector<256x256xbf16>
    %cst_12 = arith.constant dense<0.000000e+00> : vector<128x256xf32>
    %18 = tpu.matmul %16, %17, %cst_12 {dimension_numbers = #tpu.dot_dimension_numbers<[1], [0], [0], [1], [0, 0, 1, 1], [], []>} : vector<128x256xbf16>, vector<256x256xbf16>, vector<128x256xf32> -> vector<128x256xf32>
    %19 = arith.addf %15, %18 : vector<128x256xf32>
    %c0_13 = arith.constant 0 : index
    %c0_14 = arith.constant 0 : index
    %20 = vector.load %arg9[%c0_13, %c0_14] : memref<128x256xf32, #tpu.memory_space<vmem>>, vector<128x256xf32>
    tpu.vector_store %arg9[%c0_13, %c0_14], %19 {strides = array<i32>} : memref<128x256xf32, #tpu.memory_space<vmem>>, vector<128x256xf32>,
    %c2_i32 = arith.constant 2 : i32
    %21 = arith.cmpi eq, %arg1, %c2_i32 : i32
    %22 = arith.extui %21 : i1 to i32
    %c0_i32_15 = arith.constant 0 : i32
    %23 = arith.cmpi ne, %22, %c0_i32_15 : i32
    scf.if %23 {
      %c0_16 = arith.constant 0 : index
      %c0_17 = arith.constant 0 : index
      %24 = vector.load %arg9[%c0_16, %c0_17] : memref<128x256xf32, #tpu.memory_space<vmem>>, vector<128x256xf32>
      %c0_18 = arith.constant 0 : index
      %c0_19 = arith.constant 0 : index
      %25 = vector.load %arg2[%c0_18, %c0_19] : memref<128x256xf32, #tpu.memory_space<vmem>>, vector<128x256xf32>
      %26 = arith.addf %24, %25 : vector<128x256xf32>
      %c0_20 = arith.constant 0 : index
      %c0_21 = arith.constant 0 : index
      %27 = vector.load %arg7[%c0_20, %c0_21] : memref<128x256xf32, #tpu.memory_space<vmem>>, vector<128x256xf32>
      tpu.vector_store %arg7[%c0_20, %c0_21], %26 {strides = array<i32>} : memref<128x256xf32, #tpu.memory_space<vmem>>, vector<128x256xf32>,
    } else {
    }
    return
  }
  func.func @transform_0(%arg0: i32, %arg1: i32) -> (i32, i32) {
    %c0_i32 = arith.constant 0 : i32
    %c0_i32_0 = arith.constant 0 : i32
    return %arg0, %c0_i32 : i32, i32
  }
  func.func @transform_1(%arg0: i32, %arg1: i32) -> (i32, i32) {
    %c0_i32 = arith.constant 0 : i32
    %c0_i32_0 = arith.constant 0 : i32
    %c0_i32_1 = arith.constant 0 : i32
    return %c0_i32, %c0_i32_0 : i32, i32
  }
  func.func @transform_2(%arg0: i32, %arg1: i32) -> (i32, i32) {
    %c0_i32 = arith.constant 0 : i32
    %c0_i32_0 = arith.constant 0 : i32
    return %c0_i32, %arg1 : i32, i32
  }
  func.func @transform_3(%arg0: i32, %arg1: i32) -> (i32, i32) {
    %c0_i32 = arith.constant 0 : i32
    %c0_i32_0 = arith.constant 0 : i32
    return %c0_i32, %arg1 : i32, i32
  }
  func.func @transform_4(%arg0: i32, %arg1: i32) -> (i32, i32) {
    %c0_i32 = arith.constant 0 : i32
    %c0_i32_0 = arith.constant 0 : i32
    return %arg1, %c0_i32 : i32, i32
  }
  func.func @transform_5(%arg0: i32, %arg1: i32) -> (i32, i32) {
    %c0_i32 = arith.constant 0 : i32
    %c0_i32_0 = arith.constant 0 : i32
    return %arg0, %c0_i32 : i32, i32
  }
}

module attributes {stable_mosaic.version = 11 : i64} {
  func.func @_rmsnorm_matmul_kernel(%arg0: i32, %arg1: i32, %arg2: memref<2x256xf32, #tpu.memory_space<vmem>>, %arg3: memref<1x256xf32, #tpu.memory_space<vmem>>, %arg4: memref<256x256xbf16, #tpu.memory_space<vmem>>, %arg5: memref<2x256xf32, #tpu.memory_space<vmem>>) attributes {dimension_semantics = [#tpu.dimension_semantics<parallel>, #tpu.dimension_semantics<parallel>], iteration_bounds = array<i64: 1, 2>, scalar_prefetch = 0 : i64, scratch_operands = 0 : i64, tpu.core_type = #tpu.core_type<tc>, window_params = [{transform_indices = @transform_0, window_bounds = array<i64: 2, 256>}, {pipeline_mode = #tpu.pipeline_mode<synchronous>, transform_indices = @transform_1, window_bounds = array<i64: 1, 256>}, {transform_indices = @transform_2, window_bounds = array<i64: 256, 256>}, {transform_indices = @transform_3, window_bounds = array<i64: 2, 256>}]} {
    %c0 = arith.constant 0 : index
    %c0_0 = arith.constant 0 : index
    %0 = vector.load %arg2[%c0, %c0_0] : memref<2x256xf32, #tpu.memory_space<vmem>>, vector<2x256xf32>
    %1 = arith.mulf %0, %0 : vector<2x256xf32>
    %cst = arith.constant dense<0.000000e+00> : vector<2xf32>
    %2 = vector.multi_reduction <add>, %1, %cst [1] : vector<2x256xf32> to vector<2xf32>
    %3 = vector.shape_cast %2 : vector<2xf32> to vector<2x1xf32>
    %cst_1 = arith.constant 2.560000e+02 : f32
    %4 = vector.broadcast %cst_1 : f32 to vector<2x1xf32>
    %5 = arith.divf %3, %4 : vector<2x1xf32>
    %cst_2 = arith.constant 9.99999974E-6 : f32
    %6 = vector.broadcast %cst_2 : f32 to vector<2x1xf32>
    %7 = arith.addf %5, %6 : vector<2x1xf32>
    %8 = math.rsqrt %7 : vector<2x1xf32>
    %9 = vector.broadcast %8 : vector<2x1xf32> to vector<2x256xf32>
    %10 = arith.mulf %0, %9 : vector<2x256xf32>
    %c0_3 = arith.constant 0 : index
    %c0_4 = arith.constant 0 : index
    %11 = vector.load %arg3[%c0_3, %c0_4] : memref<1x256xf32, #tpu.memory_space<vmem>>, vector<1x256xf32>
    %12 = vector.broadcast %11 : vector<1x256xf32> to vector<2x256xf32>
    %13 = arith.mulf %10, %12 : vector<2x256xf32>
    %14 = arith.truncf %13 : vector<2x256xf32> to vector<2x256xbf16>
    %c0_5 = arith.constant 0 : index
    %c0_6 = arith.constant 0 : index
    %15 = vector.load %arg4[%c0_5, %c0_6] : memref<256x256xbf16, #tpu.memory_space<vmem>>, vector<256x256xbf16>
    %cst_7 = arith.constant dense<0.000000e+00> : vector<2x256xf32>
    %16 = tpu.matmul %14, %15, %cst_7 {dimension_numbers = #tpu.dot_dimension_numbers<[1], [0], [0], [1], [0, 0, 1, 1], [], []>} : vector<2x256xbf16>, vector<256x256xbf16>, vector<2x256xf32> -> vector<2x256xf32>
    %c0_8 = arith.constant 0 : index
    %c0_9 = arith.constant 0 : index
    %17 = vector.load %arg5[%c0_8, %c0_9] : memref<2x256xf32, #tpu.memory_space<vmem>>, vector<2x256xf32>
    tpu.vector_store %arg5[%c0_8, %c0_9], %16 {strides = array<i32>} : memref<2x256xf32, #tpu.memory_space<vmem>>, vector<2x256xf32>,
    return
  }
  func.func @transform_0(%arg0: i32, %arg1: i32) -> (i32, i32) {
    %c0_i32 = arith.constant 0 : i32
    %c0_i32_0 = arith.constant 0 : i32
    return %arg0, %c0_i32 : i32, i32
  }
  func.func @transform_1(%arg0: i32, %arg1: i32) -> (i32, i32) {
    %c0_i32 = arith.constant 0 : i32
    %c0_i32_0 = arith.constant 0 : i32
    %c0_i32_1 = arith.constant 0 : i32
    return %c0_i32, %c0_i32_0 : i32, i32
  }
  func.func @transform_2(%arg0: i32, %arg1: i32) -> (i32, i32) {
    %c0_i32 = arith.constant 0 : i32
    %c0_i32_0 = arith.constant 0 : i32
    return %c0_i32, %arg1 : i32, i32
  }
  func.func @transform_3(%arg0: i32, %arg1: i32) -> (i32, i32) {
    %c0_i32 = arith.constant 0 : i32
    return %arg0, %arg1 : i32, i32
  }
}

</mosaic_0001>

<bundles_post_ra>
// kernel: transformer_forward.9
= control target key start
LH: loop header
LB: loop body
LE: loop exit
PB: predicated region body
PF: predicated region fallthrough
CT: control target
= control target key end

     0   :  { %s1742_s12 = smov 0   ;;  %s1744_s13 = smov 0   ;;  %s2495_s0 = inlined_call_operand.vmem [shape: f32[256,256], index: 0, kind: input, shape index: {}]   ;;  %s2496_s1 = inlined_call_operand.vmem [shape: f32[1,256], index: 1, kind: input, shape index: {}]   ;;  %s2497_s2 = inlined_call_operand.vmem [shape: bf16[256,512], index: 2, kind: input, shape index: {}]   ;;  %s2498_s3 = inlined_call_operand.vmem [shape: f32[256,512], index: 3, kind: output, shape index: {}]  }
   0x1   :  { %s1746_s14 = smov 0   ;;  %s1748_s15 = smov 0  }
   0x2   :  { %s1750_s16 = smov 0   ;;  %s1752_s17 = smov 0  }
   0x3   :  { %s1754_s18 = smov 0   ;;  %s1756_s19 = smov 0  }
   0x4   :  { %s1758_s20 = smov 0  }
   0x5 LB: > { %s1359_s21 = sadd.s32 4294967295, %s1719_s20   ;;  %s22_s22 = sadd.s32 1, %s1711_s18  ;;  %s1719_s20 = sphi %s1758_s20, %s13_s20   ;;  %s1715_s19 = sphi %s1756_s19, %s2507_s19   ;;  %s1711_s18 = sphi %s1754_s18, %s2506_s18   ;;  %s1707_s17 = sphi %s1752_s17, %s2505_s17   ;;  %s1703_s16 = sphi %s1750_s16, %s2504_s16   ;;  %s1699_s15 = sphi %s1748_s15, %s2503_s15   ;;  %s1695_s14 = sphi %s1746_s14, %s2502_s14   ;;  %s1691_s13 = sphi %s1744_s13, %s2501_s13   ;;  %s1687_s12 = sphi %s1742_s12, %s2500_s12  }
   0x6   : > { %p23_p0 = scmp.ge.s32.totalorder %s22_s22, 2  ;;  %s25_s23 = sadd.s32 1, %s1715_s19 }
   0x7   : > { %s79_s24 = sadd.s32 1, %s1699_s15  ;;  %p86_p1 = scmp.ne.s32.totalorder %s1699_s15, %s1695_s14 }
   0x8   : > { %s2509_s22 = smov (%p23_p0, %s22_s22), 0  ;;  %s2511_s23 = smov (!%p23_p0, %s25_s23), %s1715_s19 }
   0x9   : > { %s76_s25 = ssub.s32 %s1711_s18, %s2509_s22  ;;  %p87_p2 = scmp.eq.s32.totalorder %s1719_s20, 0 }
   0xa   : > { %p27_p3 = scmp.ge.s32.totalorder %s2511_s23, 2  ;;  %p77_p4 = scmp.eq.s32.totalorder %s76_s25, 0 }
   0xb   : > { %p88_p5 = por %p87_p2, %p86_p1  ;;  %s107_s26 = sadd.s32 1, %s1691_s13 }
   0xc   : > { %s2513_s23 = smov (%p27_p3, %s2511_s23), 0  ;;  %p117_p6 = scmp.ne.s32.totalorder %s1691_s13, %s1687_s12 }
   0xd   : > { %s1803_s27 = scalar_select %p77_p4, %s1699_s15, %s79_s24  }
   0xe   : > { %s102_s28 = ssub.s32 %s1715_s19, %s2513_s23  ;;  %p118_p7 = scmp.eq.s32.totalorder %s1359_s21, 3 }
   0xf   : > { %s104_s29 = sor.u32 %s102_s28, %s76_s25  ;;  %p1362_p10 = scmp.ge.s32.totalorder %s1719_s20, 4 }
  0x10   : > { %p105_p8 = scmp.eq.s32.totalorder %s104_s29, 0  ;;  %p1809_p9 = por %p118_p7, %p117_p6 }
  0x11   : > { %143 = sbr.rel (%p1362_p10) target bundleno = 58 (0x3a), region = 20 }
  0x12   : > { %s1814_s4 = scalar_select %p105_p8, %s1691_s13, %s107_s26  }
  0x16   : > { %156 = sbr.rel (!%p88_p5) target bundleno = 58 (0x3a), region = 28  ;;  %s158_s5 = sand.u32 (%p88_p5), 1, %s1699_s15  }
  0x17   : > { %s1507_s6 = sshll.u32 (%p88_p5), %s1711_s18, 3  ;;  %s1363_s7 = sshll.u32 (%p88_p5), %s158_s5, 8 }
  0x18   : > { %s1822_s10 = scalar_lea.vmem (%p88_p5), %s2497_s2, %s1507_s6  ;;  %s1827_s11 = scalar_lea.vmem (%p88_p5), [#allocation2], %s1363_s7 }
  0x19   : > { %v254_v0 = vld [vmem:[%s1822_s10] sm:$0xff] (%p88_p5)  ;;  %v256_v1 = vld [vmem:[%s1822_s10 + $0x10] sm:$0xff] (%p88_p5) }
  0x1a   : > { %v258_v2 = vld [vmem:[%s1822_s10 + $0x20] sm:$0xff] (%p88_p5)  ;;  %255 = vst [vmem:[%s1827_s11] sm:$0xff] (%p88_p5), %v254_v0  ;;  %v260_v3 = vld [vmem:[%s1822_s10 + $0x30] sm:$0xff] (%p88_p5) }
  0x1b   : > { %257 = vst [vmem:[%s1827_s11 + $0x8] sm:$0xff] %v256_v1  ;;  %v262_v4 = vld [vmem:[%s1822_s10 + $0x40] sm:$0xff]  ;;  %v264_v5 = vld [vmem:[%s1822_s10 + $0x50] sm:$0xff] }
  0x1c   : > { %259 = vst [vmem:[%s1827_s11 + $0x10] sm:$0xff] %v258_v2  ;;  %v266_v6 = vld [vmem:[%s1822_s10 + $0x60] sm:$0xff]  ;;  %v268_v7 = vld [vmem:[%s1822_s10 + $0x70] sm:$0xff] }
  0x1d   : > { %261 = vst [vmem:[%s1827_s11 + $0x18] sm:$0xff] %v260_v3  ;;  %v270_v8 = vld [vmem:[%s1822_s10 + $0x80] sm:$0xff]  ;;  %v272_v9 = vld [vmem:[%s1822_s10 + $0x90] sm:$0xff] }
  0x1e   : > { %263 = vst [vmem:[%s1827_s11 + $0x20] sm:$0xff] %v262_v4  ;;  %v274_v10 = vld [vmem:[%s1822_s10 + $0xa0] sm:$0xff]  ;;  %v276_v11 = vld [vmem:[%s1822_s10 + $0xb0] sm:$0xff] }
  0x1f   : > { %265 = vst [vmem:[%s1827_s11 + $0x28] sm:$0xff] %v264_v5  ;;  %v278_v12 = vld [vmem:[%s1822_s10 + $0xc0] sm:$0xff]  ;;  %v280_v13 = vld [vmem:[%s1822_s10 + $0xd0] sm:$0xff] }
  0x20   : > { %267 = vst [vmem:[%s1827_s11 + $0x30] sm:$0xff] %v266_v6  ;;  %v282_v14 = vld [vmem:[%s1822_s10 + $0xe0] sm:$0xff]  ;;  %v284_v15 = vld [vmem:[%s1822_s10 + $0xf0] sm:$0xff] }
  0x21   : > { %269 = vst [vmem:[%s1827_s11 + $0x38] sm:$0xff] %v268_v7  ;;  %v286_v16 = vld [vmem:[%s1822_s10 + $0x100] sm:$0xff]  ;;  %v288_v17 = vld [vmem:[%s1822_s10 + $0x110] sm:$0xff] }
  0x22   : > { %271 = vst [vmem:[%s1827_s11 + $0x40] sm:$0xff] %v270_v8  ;;  %v290_v18 = vld [vmem:[%s1822_s10 + $0x120] sm:$0xff]  ;;  %v292_v19 = vld [vmem:[%s1822_s10 + $0x130] sm:$0xff] }
  0x23   : > { %273 = vst [vmem:[%s1827_s11 + $0x48] sm:$0xff] %v272_v9  ;;  %v294_v20 = vld [vmem:[%s1822_s10 + $0x140] sm:$0xff]  ;;  %v296_v21 = vld [vmem:[%s1822_s10 + $0x150] sm:$0xff] }
  0x24   : > { %275 = vst [vmem:[%s1827_s11 + $0x50] sm:$0xff] %v274_v10  ;;  %v298_v22 = vld [vmem:[%s1822_s10 + $0x160] sm:$0xff]  ;;  %v300_v23 = vld [vmem:[%s1822_s10 + $0x170] sm:$0xff] }
  0x25   : > { %277 = vst [vmem:[%s1827_s11 + $0x58] sm:$0xff] %v276_v11  ;;  %v302_v24 = vld [vmem:[%s1822_s10 + $0x180] sm:$0xff]  ;;  %v304_v25 = vld [vmem:[%s1822_s10 + $0x190] sm:$0xff] }
  0x26   : > { %279 = vst [vmem:[%s1827_s11 + $0x60] sm:$0xff] %v278_v12  ;;  %v306_v26 = vld [vmem:[%s1822_s10 + $0x1a0] sm:$0xff]  ;;  %v308_v27 = vld [vmem:[%s1822_s10 + $0x1b0] sm:$0xff] }
  0x27   : > { %281 = vst [vmem:[%s1827_s11 + $0x68] sm:$0xff] %v280_v13  ;;  %v310_v28 = vld [vmem:[%s1822_s10 + $0x1c0] sm:$0xff]  ;;  %v312_v29 = vld [vmem:[%s1822_s10 + $0x1d0] sm:$0xff] }
  0x28   : > { %283 = vst [vmem:[%s1827_s11 + $0x70] sm:$0xff] %v282_v14  ;;  %v314_v30 = vld [vmem:[%s1822_s10 + $0x1e0] sm:$0xff]  ;;  %v316_v31 = vld [vmem:[%s1822_s10 + $0x1f0] sm:$0xff] }
  0x29   : > { %285 = vst [vmem:[%s1827_s11 + $0x78] sm:$0xff] %v284_v15 }
  0x2a   : > { %287 = vst [vmem:[%s1827_s11 + $0x80] sm:$0xff] %v286_v16 }
  0x2b   : > { %289 = vst [vmem:[%s1827_s11 + $0x88] sm:$0xff] %v288_v17 }
  0x2c   : > { %291 = vst [vmem:[%s1827_s11 + $0x90] sm:$0xff] %v290_v18 }
  0x2d   : > { %293 = vst [vmem:[%s1827_s11 + $0x98] sm:$0xff] %v292_v19 }
  0x2e   : > { %295 = vst [vmem:[%s1827_s11 + $0xa0] sm:$0xff] %v294_v20 }
  0x2f   : > { %297 = vst [vmem:[%s1827_s11 + $0xa8] sm:$0xff] %v296_v21 }
  0x30   : > { %299 = vst [vmem:[%s1827_s11 + $0xb0] sm:$0xff] %v298_v22 }
  0x31   : > { %301 = vst [vmem:[%s1827_s11 + $0xb8] sm:$0xff] %v300_v23 }
  0x32   : > { %303 = vst [vmem:[%s1827_s11 + $0xc0] sm:$0xff] %v302_v24 }
  0x33   : > { %305 = vst [vmem:[%s1827_s11 + $0xc8] sm:$0xff] %v304_v25 }
  0x34   : > { %307 = vst [vmem:[%s1827_s11 + $0xd0] sm:$0xff] %v306_v26 }
  0x35   : > { %309 = vst [vmem:[%s1827_s11 + $0xd8] sm:$0xff] %v308_v27 }
  0x36   : > { %311 = vst [vmem:[%s1827_s11 + $0xe0] sm:$0xff] %v310_v28 }
  0x37   : > { %313 = vst [vmem:[%s1827_s11 + $0xe8] sm:$0xff] %v312_v29 }
  0x38   : > { %315 = vst [vmem:[%s1827_s11 + $0xf0] sm:$0xff] %v314_v30 }
  0x39   : > { %317 = vst [vmem:[%s1827_s11 + $0xf8] sm:$0xff] %v316_v31 }
  0x3a PF: > { %p1366_p11 = scmp.ge.s32.totalorder %s1719_s20, 1  ;;  %p322_p12 = scmp.lt.s32.totalorder %s1719_s20, 5 }
  0x3c   : > { %p323_p13 = pnand %p1366_p11, %p322_p12 }
  0x3d   : > { %s1369_s21 = sshll.u32 (!%p323_p13), %s1707_s17, 4  ;;  %s329_s29 = sand.u32 (!%p323_p13), 1, %s1695_s14  }
  0x3e   : > { %326 = sbr.rel (%p323_p13) target bundleno = 492 (0x1ec), region = 66  ;;  %p358_p0 = scmp.lt.s32.totalorder (!%p323_p13), %s1369_s21, 31 }
  0x3f   : > { %s1367_s5 = sshll.u32 (!%p323_p13), %s329_s29, 8  ;;  %s354_s8 = sand.u32 (!%p323_p13), 1, %s1687_s12  }
  0x40   : > { %s2059_s6 = scalar_lea.vmem (!%p323_p13), [#allocation2], %s1367_s5  ;;  %s1368_s9 = sshll.u32 (!%p323_p13), %s354_s8, 8 }
  0x41   : > { %s2361_s10 = scalar_lea.vmem (!%p323_p13), [#allocation3], %s1368_s9 }
  0x43   : > { %s2515_s21 = smov (!%p358_p0, %s1369_s21), 31  ;;  %s1502_s12 = sshll.u32 (%p1809_p9), %s1703_s16, 1 }
  0x44   : > { %s1508_s24 = sshll.u32 %s2515_s21, 4  ;;  %s1541_s11 = sshll.u32 (%p1809_p9), %s1707_s17, 6 }
  0x45   : > { %s1896_s28 = scalar_lea.vmem %s2495_s0, %s1508_s24  ;;  %s1194_s21 = sadd.s32 (%p1809_p9), %s1541_s11, %s1502_s12 }
  0x46   : > { %v1899_v32 = vld [vmem:[%s1896_s28 + $0x20] sm:$0xff]  ;;  %v1902_v33 = vld [vmem:[%s1896_s28 + $0x28] sm:$0xff]  ;;  %v1919_v40 = vld [vmem:[%s1896_s28 + $0x30] sm:$0xff]  ;;  %s1504_s24 = sshll.u32 (%p1809_p9), %s1194_s21, 3 }
  0x47   : > { %v1905_v34 = vld [vmem:[%s1896_s28] sm:$0xff]  ;;  %v403_v35 = vmul.f32 %v1899_v32, %v1899_v32  ;;  %v404_v36 = vmul.f32 %v1902_v33, %v1902_v33  ;;  %v1912_v37 = vld [vmem:[%s1896_s28 + $0x8] sm:$0xff]  ;;  %v1922_v41 = vld [vmem:[%s1896_s28 + $0x38] sm:$0xff]  ;;  %v405_v50 = vmul.f32 %v1919_v40, %v1919_v40  ;;  %s2404_s26 = scalar_lea.vmem (%p1809_p9), %s2498_s3, %s1504_s24 }
  0x48   : > { %v399_v38 = vmul.f32 %v1905_v34, %v1905_v34  ;;  %v400_v39 = vmul.f32 %v1912_v37, %v1912_v37  ;;  %v1925_v42 = vld [vmem:[%s1896_s28 + $0x40] sm:$0xff]  ;;  %v1928_v44 = vld [vmem:[%s1896_s28 + $0x10] sm:$0xff]  ;;  %v1931_v45 = vld [vmem:[%s1896_s28 + $0x18] sm:$0xff]  ;;  %v406_v51 = vmul.f32 %v1922_v41, %v1922_v41 }
  0x49   : > { %v437_v43 = vadd.f32 %v404_v36, %v403_v35  ;;  %v1934_v46 = vld [vmem:[%s1896_s28 + $0x48] sm:$0xff]  ;;  %v407_v47 = vmul.f32 %v1925_v42, %v1925_v42  ;;  %v1945_v52 = vld [vmem:[%s1896_s28 + $0x50] sm:$0xff]  ;;  %v1948_v53 = vld [vmem:[%s1896_s28 + $0x58] sm:$0xff]  ;;  %v401_v54 = vmul.f32 %v1928_v44, %v1928_v44  ;;  %v402_v55 = vmul.f32 %v1931_v45, %v1931_v45 }
  0x4a   : > { %v431_v48 = vadd.f32 %v400_v39, %v399_v38  ;;  %v408_v49 = vmul.f32 %v1934_v46, %v1934_v46  ;;  %v409_v57 = vmul.f32 %v1945_v52, %v1945_v52  ;;  %v410_v58 = vmul.f32 %v1948_v53, %v1948_v53  ;;  %v1959_v61 = vld [vmem:[%s1896_s28 + $0x70] sm:$0xff]  ;;  %v1962_v62 = vld [vmem:[%s1896_s28 + $0x78] sm:$0xff]  ;;  %v1965_v63 = vld [vmem:[%s1896_s28 + $0x60] sm:$0xff] }
  0x4b   : > { %438 = vadd.xlane.f32.xlu1 %v437_v43  ;;  %v440_v59 = vadd.f32 %v406_v51, %v405_v50  ;;  %v434_v60 = vadd.f32 %v402_v55, %v401_v54  ;;  %v1968_v0 = vld [vmem:[%s1896_s28 + $0x68] sm:$0xff]  ;;  %v413_v2 = vmul.f32 %v1959_v61, %v1959_v61  ;;  %v414_v3 = vmul.f32 %v1962_v62, %v1962_v62  ;;  %v1975_v4 = vld [vmem:[%s1896_s28 + $0x80] sm:$0xff]  ;;  %v1995_v14 = vld [vmem:[%s1896_s28 + $0x90] sm:$0xff] }
  0x4c   : > { %432 = vadd.xlane.f32.xlu0 %v431_v48  ;;  %v443_v56 = vadd.f32 %v408_v49, %v407_v47  ;;  %v446_v1 = vadd.f32 %v410_v58, %v409_v57  ;;  %v1978_v5 = vld [vmem:[%s1896_s28 + $0x88] sm:$0xff]  ;;  %v411_v6 = vmul.f32 %v1965_v63, %v1965_v63  ;;  %v412_v7 = vmul.f32 %v1968_v0, %v1968_v0  ;;  %v1989_v12 = vld [vmem:[%s1896_s28 + $0xa0] sm:$0xff]  ;;  %v1998_v15 = vld [vmem:[%s1896_s28 + $0x98] sm:$0xff] }
  0x4d   : > { %v415_v8 = vmul.f32 %v1975_v4, %v1975_v4  ;;  %v416_v9 = vmul.f32 %v1978_v5, %v1978_v5  ;;  %v452_v10 = vadd.f32 %v414_v3, %v413_v2  ;;  %v1992_v13 = vld [vmem:[%s1896_s28 + $0xa8] sm:$0xff]  ;;  %v2001_v17 = vld [vmem:[%s1896_s28 + $0xb0] sm:$0xff]  ;;  %v2004_v18 = vld [vmem:[%s1896_s28 + $0xb8] sm:$0xff]  ;;  %v419_v19 = vmul.f32 %v1989_v12, %v1989_v12 }
  0x4e   : > { %444 = vadd.xlane.f32.xlu2 %v443_v56  ;;  %v449_v11 = vadd.f32 %v412_v7, %v411_v6  ;;  %v420_v20 = vmul.f32 %v1992_v13, %v1992_v13  ;;  %v417_v21 = vmul.f32 %v1995_v14, %v1995_v14  ;;  %v418_v22 = vmul.f32 %v1998_v15, %v1998_v15  ;;  %v2019_v27 = vld [vmem:[%s1896_s28 + $0xd0] sm:$0xff]  ;;  %v2022_v28 = vld [vmem:[%s1896_s28 + $0xd8] sm:$0xff]  ;;  %v2025_v29 = vld [vmem:[%s1896_s28 + $0xc0] sm:$0xff] }
  0x4f   : > { %v455_v16 = vadd.f32 %v416_v9, %v415_v8  ;;  %v421_v23 = vmul.f32 %v2001_v17, %v2001_v17  ;;  %v422_v24 = vmul.f32 %v2004_v18, %v2004_v18  ;;  %v2028_v30 = vld [vmem:[%s1896_s28 + $0xc8] sm:$0xff]  ;;  %v425_v35 = vmul.f32 %v2019_v27, %v2019_v27  ;;  %v2035_v38 = vld [vmem:[%s1896_s28 + $0xe0] sm:$0xff]  ;;  %v2049_v54 = vld [vmem:[%s1896_s28 + $0xf0] sm:$0xff] }
  0x50   : > { %v461_v25 = vadd.f32 %v420_v20, %v419_v19  ;;  %v458_v26 = vadd.f32 %v418_v22, %v417_v21  ;;  %v426_v36 = vmul.f32 %v2022_v28, %v2022_v28  ;;  %v2038_v39 = vld [vmem:[%s1896_s28 + $0xe8] sm:$0xff]  ;;  %v423_v43 = vmul.f32 %v2025_v29, %v2025_v29  ;;  %v2052_v55 = vld [vmem:[%s1896_s28 + $0xf8] sm:$0xff]  ;;  %v1494_v2 = vld [vmem:[%s2059_s6 + $0xf0] sm:$0xf] }
  0x51   : > { %v464_v31 = vadd.f32 %v422_v24, %v421_v23  ;;  %v424_v47 = vmul.f32 %v2028_v30, %v2028_v30  ;;  %v427_v48 = vmul.f32 %v2035_v38, %v2035_v38  ;;  %v428_v49 = vmul.f32 %v2038_v39, %v2038_v39  ;;  %v1540_v6 = vld [vmem:[%s2059_s6 + $0xf4] sm:$0xf0]  ;;  %v1523_v7 = vld [vmem:[%s2059_s6 + $0x74] sm:$0xf]  ;;  %v1432_v8 = vld [vmem:[%s2059_s6 + $0x78] sm:$0xf0] }
  0x52   : > { %v470_v50 = vadd.f32 %v426_v36, %v425_v35  ;;  %v429_v57 = vmul.f32 %v2049_v54, %v2049_v54  ;;  %v430_v58 = vmul.f32 %v2052_v55, %v2052_v55  ;;  %v1721_v9 = vmov 256.0   ;;  %v1496_v19 = vld [vmem:[%s2059_s6 + $0xf8] sm:$0xf0]  ;;  %v1422_v21 = vld [vmem:[%s2059_s6 + $0x60] sm:$0xf] }
  0x53   : > { %441 = vadd.xlane.f32.xlu1 %v440_v59  ;;  %v467_v51 = vadd.f32 %v424_v47, %v423_v43  ;;  %v473_v56 = vadd.f32 %v428_v49, %v427_v48  ;;  %1615 = vrcp.f32 %v1721_v9  ;;  %v1522_v22 = vld [vmem:[%s2059_s6 + $0x64] sm:$0xf0]  ;;  %v1486_v23 = vld [vmem:[%s2059_s6 + $0xe0] sm:$0xf]  ;;  %v1537_v43 = vld [vmem:[%s2059_s6 + $0xe4] sm:$0xf] }
  0x54   : > { %435 = vadd.xlane.f32.xlu0 %v434_v60  ;;  %v476_v59 = vadd.f32 %v430_v58, %v429_v57  ;;  %v1430_v60 = vld [vmem:[%s2059_s6 + $0x70] sm:$0xf]  ;;  %v1423_v24 = vor.u32 %v1522_v22, %v1422_v21  ;;  %v1488_v47 = vld [vmem:[%s2059_s6 + $0xe8] sm:$0xf0]  ;;  %v1536_v58 = vld [vmem:[%s2059_s6 + $0xd4] sm:$0xf0] }
  0x55   : > { %v1491_v48 = vor.u32 %v1537_v43, %v1488_v47  ;;  %v1406_v9 = vld [vmem:[%s2059_s6 + $0x40] sm:$0xf]  ;;  %v1408_v21 = vld [vmem:[%s2059_s6 + $0x48] sm:$0xf0]  ;;  %v1462_v43 = vld [vmem:[%s2059_s6 + $0xb0] sm:$0xf] }
  0x56   : > { %447 = vadd.xlane.f32.xlu2 %v446_v1  ;;  %v1524_v1 = vld [vmem:[%s2059_s6 + $0x74] sm:$0xf0] }
  0x57   : > { %v1431_v3 = vor.u32 %v1524_v1, %v1430_v60  ;;  %v1416_v60 = vld [vmem:[%s2059_s6 + $0x58] sm:$0xf0] }
  0x59   : > { %956 = vmatpush.bf16.msra.mxu0 %v1431_v3  ;;  %v2077_v49 = vpop.eup %1615  ;;  %v1535_v3 = vld [vmem:[%s2059_s6 + $0xd4] sm:$0xf] }
  0x5a   : > { %vm484_vm0 = vweird.f32 %v2077_v49 }
  0x5b   : > { %453 = vadd.xlane.f32.xlu1 %v452_v10  ;;  %v1495_v10 = vor.u32 %v1540_v6, %v1494_v2  ;;  %v1480_v6 = vld [vmem:[%s2059_s6 + $0xd8] sm:$0xf0] }
  0x5c   : > { %450 = vadd.xlane.f32.xlu0 %v449_v11  ;;  %v1435_v11 = vor.u32 %v1523_v7, %v1432_v8  ;;  %v480_v7 = vmul.f32 256.0, %v2077_v49  ;;  %v1483_v8 = vor.u32 %v1535_v3, %v1480_v6  ;;  %v1514_v3 = vld [vmem:[%s2059_s6 + $0x24] sm:$0xf0]  ;;  %v1454_v6 = vld [vmem:[%s2059_s6 + $0xa0] sm:$0xf] }
  0x5d   : > { %1005 = vmatpush.bf16.msra.mxu1 %v1495_v10  ;;  %957 = vmatpush.bf16.msra.mxu0 %v1423_v24  ;;  %v1518_v10 = vld [vmem:[%s2059_s6 + $0x44] sm:$0xf0]  ;;  %v1533_v24 = vld [vmem:[%s2059_s6 + $0xc4] sm:$0xf] }
  0x5e   : > { %456 = vadd.xlane.f32.xlu2 %v455_v16  ;;  %v1539_v16 = vld [vmem:[%s2059_s6 + $0xf4] sm:$0xf]  ;;  %1054 = vmatpush.bf16.msra.mxu2 %v1435_v11  ;;  %v1470_v11 = vld [vmem:[%s2059_s6 + $0xc0] sm:$0xf] }
  0x5f   : > { %v1499_v20 = vor.u32 %v1539_v16, %v1496_v19  ;;  %v1407_v16 = vor.u32 %v1518_v10, %v1406_v9  ;;  %v1534_v19 = vld [vmem:[%s2059_s6 + $0xc4] sm:$0xf0]  ;;  %v1513_v9 = vld [vmem:[%s2059_s6 + $0x24] sm:$0xf]  ;;  %v1392_v10 = vld [vmem:[%s2059_s6 + $0x28] sm:$0xf0] }
  0x60   : > { %v1471_v22 = vor.u32 %v1534_v19, %v1470_v11  ;;  %v1529_v19 = vld [vmem:[%s2059_s6 + $0xa4] sm:$0xf] }
  0x61   : > { %1103 = vmatpush.bf16.msra.mxu3 %v1499_v20  ;;  %v1517_v20 = vld [vmem:[%s2059_s6 + $0x44] sm:$0xf] }
  0x63   : > { %462 = vadd.xlane.f32.xlu1 %v461_v25  ;;  %v1538_v25 = vld [vmem:[%s2059_s6 + $0xe4] sm:$0xf0] }
  0x64   : > { %459 = vadd.xlane.f32.xlu0 %v458_v26  ;;  %v1521_v26 = vld [vmem:[%s2059_s6 + $0x64] sm:$0xf]  ;;  %v1487_v35 = vor.u32 %v1538_v25, %v1486_v23  ;;  %v1411_v23 = vor.u32 %v1517_v20, %v1408_v21  ;;  %v1472_v25 = vld [vmem:[%s2059_s6 + $0xc8] sm:$0xf0] }
  0x65   : > { %1104 = vmatpush.bf16.msra.mxu3 %v1491_v48  ;;  %v1532_v48 = vld [vmem:[%s2059_s6 + $0xb4] sm:$0xf0]  ;;  %v1456_v20 = vld [vmem:[%s2059_s6 + $0xa8] sm:$0xf0] }
  0x66   : > { %465 = vadd.xlane.f32.xlu2 %v464_v31  ;;  %v1424_v31 = vld [vmem:[%s2059_s6 + $0x68] sm:$0xf0]  ;;  %1006 = vmatpush.bf16.msra.mxu1 %v1487_v35  ;;  %v1398_v35 = vld [vmem:[%s2059_s6 + $0x30] sm:$0xf] }
  0x67   : > { %v1427_v36 = vor.u32 %v1521_v26, %v1424_v31  ;;  %v481_v26 = vsub.f32 1.0, %v480_v7  ;;  %v1475_v31 = vor.u32 %v1533_v24, %v1472_v25  ;;  %v1512_v24 = vld [vmem:[%s2059_s6 + $0x14] sm:$0xf0]  ;;  %v1446_v25 = vld [vmem:[%s2059_s6 + $0x90] sm:$0xf] }
  0x69   : > { %1055 = vmatpush.bf16.msra.mxu2 %v1427_v36  ;;  %1105 = vmatpush.bf16.msra.mxu3 %v1483_v8  ;;  %v1516_v36 = vld [vmem:[%s2059_s6 + $0x34] sm:$0xf0]  ;;  %v1530_v8 = vld [vmem:[%s2059_s6 + $0xa4] sm:$0xf0] }
  0x6a   : > { %v1399_v47 = vor.u32 %v1516_v36, %v1398_v35  ;;  %v1455_v11 = vor.u32 %v1530_v8, %v1454_v6  ;;  %v1511_v35 = vld [vmem:[%s2059_s6 + $0x14] sm:$0xf]  ;;  %v1384_v36 = vld [vmem:[%s2059_s6 + $0x18] sm:$0xf0]  ;;  %v1376_v6 = vld [vmem:[%s2059_s6 + $0x8] sm:$0xf0] }
  0x6b   : > { %471 = vadd.xlane.f32.xlu1 %v470_v50  ;;  %v1414_v50 = vld [vmem:[%s2059_s6 + $0x50] sm:$0xf] }
  0x6c   : > { %468 = vadd.xlane.f32.xlu0 %v467_v51  ;;  %v1520_v51 = vld [vmem:[%s2059_s6 + $0x54] sm:$0xf0] }
  0x6d   : > { %v1415_v57 = vor.u32 %v1520_v51, %v1414_v50  ;;  %1106 = vmatpush.bf16.msra.mxu3 %v1475_v31  ;;  %v1515_v50 = vld [vmem:[%s2059_s6 + $0x34] sm:$0xf]  ;;  %v1400_v51 = vld [vmem:[%s2059_s6 + $0x38] sm:$0xf0]  ;;  %v1528_v31 = vld [vmem:[%s2059_s6 + $0x94] sm:$0xf0] }
  0x6e   : > { %474 = vadd.xlane.f32.xlu2 %v473_v56  ;;  %v1478_v56 = vld [vmem:[%s2059_s6 + $0xd0] sm:$0xf] }
  0x6f   : > { %v1479_v1 = vor.u32 %v1536_v58, %v1478_v56  ;;  %958 = vmatpush.bf16.msra.mxu0 %v1415_v57  ;;  %v1463_v56 = vor.u32 %v1532_v48, %v1462_v43  ;;  %v1403_v57 = vor.u32 %v1515_v50, %v1400_v51  ;;  %v1531_v58 = vld [vmem:[%s2059_s6 + $0xb4] sm:$0xf]  ;;  %v1447_v43 = vor.u32 %v1528_v31, %v1446_v25  ;;  %v1448_v50 = vld [vmem:[%s2059_s6 + $0x98] sm:$0xf0] }
  0x70   : > { %v1527_v48 = vld [vmem:[%s2059_s6 + $0x94] sm:$0xf] }
  0x71   : > { %1007 = vmatpush.bf16.msra.mxu1 %v1479_v1 }
  0x73   : > { %959 = vmatpush.bf16.msra.mxu0 %v1407_v16  ;;  %v1395_v16 = vor.u32 %v1513_v9, %v1392_v10  ;;  %v1440_v10 = vld [vmem:[%s2059_s6 + $0x88] sm:$0xf0] }
  0x74   : > { %477 = vadd.xlane.f32.xlu0 %v476_v59  ;;  %v1519_v59 = vld [vmem:[%s2059_s6 + $0x54] sm:$0xf] }
  0x75   : > { %v1419_v2 = vor.u32 %v1519_v59, %v1416_v60  ;;  %1008 = vmatpush.bf16.msra.mxu1 %v1471_v22  ;;  %v1464_v59 = vld [vmem:[%s2059_s6 + $0xb8] sm:$0xf0]  ;;  %v482_v60 = vmul.f32 %v2077_v49, %v481_v26  ;;  %v1459_v22 = vor.u32 %v1529_v19, %v1456_v20 }
  0x76   : > { %v1467_v1 = vor.u32 %v1531_v58, %v1464_v59  ;;  %v1510_v58 = vld [vmem:[%s2059_s6 + $0x4] sm:$0xf0]  ;;  %v1438_v59 = vld [vmem:[%s2059_s6 + $0x80] sm:$0xf] }
  0x77   : > { %1056 = vmatpush.bf16.msra.mxu2 %v1419_v2  ;;  %960 = vmatpush.bf16.msra.mxu0 %v1399_v47  ;;  %v1390_v2 = vld [vmem:[%s2059_s6 + $0x20] sm:$0xf]  ;;  %v483_v21 = vadd.f32 %v2077_v49, %v482_v60  ;;  %v1387_v47 = vor.u32 %v1511_v35, %v1384_v36 }
  0x78   : > { %1107 = vmatpush.bf16.msra.mxu3 %v1467_v1  ;;  %v1391_v7 = vor.u32 %v1514_v3, %v1390_v2  ;;  %v1526_v2 = vld [vmem:[%s2059_s6 + $0x84] sm:$0xf0]  ;;  %v1509_v3 = vld [vmem:[%s2059_s6 + $0x4] sm:$0xf] }
  0x79   : > { %1009 = vmatpush.bf16.msra.mxu1 %v1463_v56  ;;  %v2124_v51 = vsel %vm484_vm0, %v2077_v49, %v483_v21  ;;  %v1451_v56 = vor.u32 %v1527_v48, %v1448_v50  ;;  %v1439_v8 = vor.u32 %v1526_v2, %v1438_v59  ;;  %v1379_v9 = vor.u32 %v1509_v3, %v1376_v6  ;;  %v1525_v49 = vld [vmem:[%s2059_s6 + $0x84] sm:$0xf] }
  0x7b   : > { %1057 = vmatpush.bf16.msra.mxu2 %v1411_v23  ;;  %961 = vmatpush.bf16.msra.mxu0 %v1391_v7  ;;  %v1382_v23 = vld [vmem:[%s2059_s6 + $0x10] sm:$0xf] }
  0x7c   : > { %1108 = vmatpush.bf16.msra.mxu3 %v1459_v22  ;;  %v1383_v26 = vor.u32 %v1512_v24, %v1382_v23 }
  0x7d   : > { %1010 = vmatpush.bf16.msra.mxu1 %v1455_v11 }
  0x7f   : > { %1058 = vmatpush.bf16.msra.mxu2 %v1403_v57  ;;  %962 = vmatpush.bf16.msra.mxu0 %v1383_v26  ;;  %v1374_v57 = vld [vmem:[%s2059_s6] sm:$0xf] }
  0x80   : > { %v1375_v1 = vor.u32 %v1510_v58, %v1374_v57  ;;  %1109 = vmatpush.bf16.msra.mxu3 %v1451_v56 }
  0x81   : > { %1011 = vmatpush.bf16.msra.mxu1 %v1447_v43 }
  0x83   : > { %1059 = vmatpush.bf16.msra.mxu2 %v1395_v16  ;;  %v1443_v16 = vor.u32 %v1525_v49, %v1440_v10  ;;  %963 = vmatpush.bf16.msra.mxu0 %v1375_v1 }
  0x85   : > { %1012 = vmatpush.bf16.msra.mxu1 %v1439_v8  ;;  %1110 = vmatpush.bf16.msra.mxu3 %v1443_v16 }
  0x87   : > { %1060 = vmatpush.bf16.msra.mxu2 %v1387_v47 }
  0x8b   : > { %1061 = vmatpush.bf16.msra.mxu2 %v1379_v9 }
  0xbe   : > { %v439_v60 = vpop.xlane.xlu1 %438 }
  0xbf   : > { %v433_v7 = vpop.xlane.xlu0 %432  ;;  %v488_v19 = vmul.f32 %v2124_v51, %v439_v60 }
  0xc0   : > { %v486_v11 = vmul.f32 %v2124_v51, %v433_v7 }
  0xc1   : > { %v445_v21 = vpop.xlane.xlu2 %444  ;;  %v2136_v22 = vadd.f32 1e-05, %v488_v19 }
  0xc2   : > { %v502_v20 = vadd.f32 1e-05, %v486_v11  ;;  %v490_v57 = vmul.f32 %v2124_v51, %v445_v21 }
  0xc3   : > { %vm544_vm9 = vweird.f32 %v2136_v22 }
  0xc4   : > { %1617 = vrsqrt.f32 %v502_v20  ;;  %v2152_v6 = vadd.f32 1e-05, %v490_v57  ;;  %vm524_vm2 = vweird.f32 %v502_v20 }
  0xc5   : > { %1619 = vrsqrt.f32 %v2136_v22 }
  0xc6   : > { %v442_v23 = vpop.xlane.xlu1 %441  ;;  %vm564_vm13 = vweird.f32 %v2152_v6 }
  0xc7   : > { %v489_v24 = vmul.f32 %v2124_v51, %v442_v23  ;;  %v436_v25 = vpop.xlane.xlu0 %435  ;;  %v710_v23 = vld [vmem:[%s2496_s1] sm:$0x3] }
  0xc8   : > { %v487_v26 = vmul.f32 %v2124_v51, %v436_v25 }
  0xc9   : > { %v2140_v31 = vadd.f32 1e-05, %v489_v24  ;;  %v448_v50 = vpop.xlane.xlu2 %447 }
  0xca   : > { %v1618_v35 = vpop.eup %1617  ;;  %v503_v36 = vadd.f32 1e-05, %v487_v26  ;;  %v491_v1 = vmul.f32 %v2124_v51, %v448_v50  ;;  %v2166_v26 = vperm.slane %v710_v23, 0 }
  0xcb   : > { %v519_v43 = vmul.f32 %v1618_v35, %v502_v20  ;;  %1621 = vrsqrt.f32 %v2140_v31  ;;  %v2144_v56 = vpop.eup %1619  ;;  %vm525_vm1 = vweird.f32 %v1618_v35  ;;  %vm554_vm7 = vweird.f32 %v2140_v31 }
  0xcc   : > { %1623 = vrsqrt.f32 %v503_v36  ;;  %v539_v7 = vmul.f32 %v2144_v56, %v2136_v22  ;;  %v2156_v49 = vadd.f32 1e-05, %v491_v1  ;;  %vm526_vm3 = vmor %vm524_vm2, %vm525_vm1  ;;  %vm534_vm5 = vweird.f32 %v503_v36 }
  0xcd   : > { %v520_v47 = vmul.f32 %v1618_v35, %v519_v43  ;;  %1625 = vrsqrt.f32 %v2152_v6  ;;  %vm545_vm10 = vweird.f32 %v2144_v56 }
  0xce   : > { %v540_v16 = vmul.f32 %v2144_v56, %v539_v7  ;;  %1627 = vrsqrt.f32 %v2156_v49  ;;  %v454_v1 = vpop.xlane.xlu1 %453  ;;  %vm546_vm12 = vmor %vm544_vm9, %vm545_vm10  ;;  %vm574_vm15 = vweird.f32 %v2156_v49 }
  0xcf   : > { %v521_v48 = vmul.f32 0.5, %v520_v47  ;;  %v2169_v47 = vperm.slane %v710_v23, 1 }
  0xd1   : > { %v2147_v58 = vpop.eup %1621  ;;  %v522_v59 = vsub.f32 1.5, %v521_v48  ;;  %v541_v48 = vmul.f32 0.5, %v540_v16 }
  0xd2   : > { %v1624_v60 = vpop.eup %1623  ;;  %v549_v2 = vmul.f32 %v2147_v58, %v2140_v31  ;;  %vm555_vm8 = vweird.f32 %v2147_v58 }
  0xd3   : > { %v529_v3 = vmul.f32 %v1624_v60, %v503_v36  ;;  %v523_v8 = vmul.f32 %v1618_v35, %v522_v59  ;;  %vm535_vm4 = vweird.f32 %v1624_v60  ;;  %v2171_v50 = vpop.eup %1625  ;;  %v451_v36 = vpop.xlane.xlu0 %450  ;;  %vm556_vm11 = vmor %vm554_vm7, %vm555_vm8 }
  0xd4   : > { %v550_v10 = vmul.f32 %v2147_v58, %v549_v2  ;;  %vm536_vm6 = vmor %vm534_vm5, %vm535_vm4  ;;  %v559_v16 = vmul.f32 %v2171_v50, %v2152_v6  ;;  %vm565_vm14 = vweird.f32 %v2171_v50 }
  0xd5   : > { %v530_v9 = vmul.f32 %v1624_v60, %v529_v3  ;;  %v527_v21 = vsel %vm526_vm3, %v1618_v35, %v523_v8  ;;  %v2175_v3 = vpop.eup %1627  ;;  %vm566_vm1 = vmor %vm564_vm13, %vm565_vm14 }
  0xd6   : > { %v551_v24 = vmul.f32 0.5, %v550_v10  ;;  %v678_v20 = vmul.f32 %v527_v21, %v1905_v34  ;;  %v679_v43 = vmul.f32 %v527_v21, %v1912_v37  ;;  %v492_v10 = vmul.f32 %v2124_v51, %v451_v36 }
  0xd7   : > { %v531_v11 = vmul.f32 0.5, %v530_v9  ;;  %v569_v31 = vmul.f32 %v2175_v3, %v2156_v49  ;;  %vm575_vm0 = vweird.f32 %v2175_v3 }
  0xd8   : > { %v552_v2 = vsub.f32 1.5, %v551_v24  ;;  %v716_v34 = vmul.f32 %v2166_v26, %v678_v20  ;;  %v717_v37 = vmul.f32 %v2169_v47, %v679_v43  ;;  %v2197_v23 = vadd.f32 1e-05, %v492_v10  ;;  %vm576_vm2 = vmor %vm574_vm15, %vm575_vm0 }
  0xd9   : > { %v532_v19 = vsub.f32 1.5, %v531_v11  ;;  %v560_v24 = vmul.f32 %v2171_v50, %v559_v16 }
  0xda   : > { %v553_v11 = vmul.f32 %v2147_v58, %v552_v2  ;;  %v457_v2 = vpop.xlane.xlu2 %456  ;;  %vm584_vm5 = vweird.f32 %v2197_v23 }
  0xdb   : > { %v533_v25 = vmul.f32 %v1624_v60, %v532_v19  ;;  %v561_v22 = vmul.f32 0.5, %v560_v24 }
  0xdc   : > { %v557_v20 = vsel %vm556_vm11, %v2147_v58, %v553_v11 }
  0xdd   : > { %v537_v35 = vsel %vm536_vm6, %v1624_v60, %v533_v25  ;;  %v542_v60 = vsub.f32 1.5, %v541_v48  ;;  %v570_v25 = vmul.f32 %v2175_v3, %v569_v31  ;;  %v684_v48 = vmul.f32 %v557_v20, %v1919_v40 }
  0xde   : > { %v680_v57 = vmul.f32 %v537_v35, %v1928_v44  ;;  %v681_v59 = vmul.f32 %v537_v35, %v1931_v45  ;;  %v493_v44 = vmul.f32 %v2124_v51, %v454_v1  ;;  %v685_v35 = vmul.f32 %v557_v20, %v1922_v41 }
  0xdf   : > { %v543_v19 = vmul.f32 %v2144_v56, %v542_v60  ;;  %v722_v36 = vmul.f32 %v2166_v26, %v684_v48  ;;  %v494_v41 = vmul.f32 %v2124_v51, %v457_v2 }
  0xe0   : > { %v718_v7 = vmul.f32 %v2166_v26, %v680_v57  ;;  %v719_v8 = vmul.f32 %v2169_v47, %v681_v59  ;;  %v2193_v21 = vadd.f32 1e-05, %v493_v44  ;;  %v571_v57 = vmul.f32 0.5, %v570_v25 }
  0xe1   : > { %v547_v43 = vsel %vm546_vm12, %v2144_v56, %v543_v19  ;;  %v723_v58 = vmul.f32 %v2169_v47, %v685_v35  ;;  %v562_v56 = vsub.f32 1.5, %v561_v22  ;;  %v2229_v49 = vadd.f32 1e-05, %v494_v41 }
  0xe2   : > { %v748_v45 = vpack.c.bf16 %v718_v7, %v716_v34  ;;  %v749_v9 = vpack.c.bf16 %v719_v8, %v717_v37  ;;  %1629 = vrsqrt.f32 %v2193_v21  ;;  %v682_v59 = vmul.f32 %v547_v43, %v1899_v32  ;;  %v460_v34 = vpop.xlane.xlu0 %459 }
  0xe3   : > { %1631 = vrsqrt.f32 %v2197_v23  ;;  %v683_v1 = vmul.f32 %v547_v43, %v1902_v33  ;;  %v572_v40 = vsub.f32 1.5, %v571_v57  ;;  %v495_v8 = vmul.f32 %v2124_v51, %v460_v34  ;;  %v466_v57 = vpop.xlane.xlu2 %465 }
  0xe4   : > { %964 = vmatmul.bf16.vlgmr.msra.gmra.mxu0 %v748_v45  ;;  %1013 = vmatmul.bf16.vlgmr.msra.gmra.mxu1 %v749_v9  ;;  %v720_v32 = vmul.f32 %v2166_v26, %v682_v59  ;;  %v563_v6 = vmul.f32 %v2171_v50, %v562_v56  ;;  %1633 = vrsqrt.f32 %v2229_v49  ;;  %vm594_vm3 = vweird.f32 %v2193_v21 }
  0xe5   : > { %1062 = vmatmul.bf16.vlgmr.msra.gmra.mxu2 %v748_v45  ;;  %1111 = vmatmul.bf16.vlgmr.msra.gmra.mxu3 %v749_v9  ;;  %v721_v33 = vmul.f32 %v2169_v47, %v683_v1  ;;  %v573_v45 = vmul.f32 %v2175_v3, %v572_v40  ;;  %v2231_v11 = vadd.f32 1e-05, %v495_v8  ;;  %vm604_vm9 = vweird.f32 %v2229_v49 }
  0xe6   : > { %v750_v60 = vpack.c.bf16 %v722_v36, %v720_v32  ;;  %v567_v19 = vsel %vm566_vm1, %v2171_v50, %v563_v6 }
  0xe7   : > { %v751_v44 = vpack.c.bf16 %v723_v58, %v721_v33  ;;  %v577_v24 = vsel %vm576_vm2, %v2175_v3, %v573_v45  ;;  %1635 = vrsqrt.f32 %v2231_v11  ;;  %v686_v25 = vmul.f32 %v567_v19, %v1925_v42  ;;  %v463_v42 = vpop.xlane.xlu1 %462 }
  0xe8   : > { %v2211_v7 = vpop.eup %1629  ;;  %v688_v20 = vmul.f32 %v577_v24, %v1945_v52  ;;  %v687_v43 = vmul.f32 %v567_v19, %v1934_v46  ;;  %v689_v48 = vmul.f32 %v577_v24, %v1948_v53  ;;  %v497_v53 = vmul.f32 %v2124_v51, %v466_v57 }
  0xe9   : > { %v2214_v37 = vpop.eup %1631  ;;  %v589_v9 = vmul.f32 %v2211_v7, %v2193_v21  ;;  %v724_v50 = vmul.f32 %v2166_v26, %v686_v25  ;;  %vm595_vm4 = vweird.f32 %v2211_v7  ;;  %v496_v34 = vmul.f32 %v2124_v51, %v463_v42 }
  0xea   : > { %v579_v10 = vmul.f32 %v2214_v37, %v2197_v23  ;;  %v2243_v59 = vpop.eup %1633  ;;  %v726_v3 = vmul.f32 %v2166_v26, %v688_v20  ;;  %v725_v1 = vmul.f32 %v2169_v47, %v687_v43  ;;  %v727_v2 = vmul.f32 %v2169_v47, %v689_v48  ;;  %vm596_vm7 = vmor %vm594_vm3, %vm595_vm4 }
  0xeb   : > { %v590_v16 = vmul.f32 %v2211_v7, %v589_v9  ;;  %vm585_vm6 = vweird.f32 %v2214_v37  ;;  %v599_v58 = vmul.f32 %v2243_v59, %v2229_v49  ;;  %v2263_v23 = vadd.f32 1e-05, %v497_v53 }
  0xec   : > { %v580_v31 = vmul.f32 %v2214_v37, %v579_v10  ;;  %v752_v56 = vpack.c.bf16 %v726_v3, %v724_v50  ;;  %v753_v40 = vpack.c.bf16 %v727_v2, %v725_v1  ;;  %vm586_vm8 = vmor %vm584_vm5, %vm585_vm6  ;;  %v2266_v8 = vadd.f32 1e-05, %v496_v34 }
  0xed   : > { %v591_v35 = vmul.f32 0.5, %v590_v16  ;;  %v2249_v36 = vpop.eup %1635  ;;  %v600_v41 = vmul.f32 %v2243_v59, %v599_v58  ;;  %1637 = vrsqrt.f32 %v2263_v23  ;;  %vm605_vm10 = vweird.f32 %v2243_v59 }
  0xee   : > { %v581_v22 = vmul.f32 0.5, %v580_v31  ;;  %v609_v33 = vmul.f32 %v2249_v36, %v2231_v11  ;;  %1639 = vrsqrt.f32 %v2266_v8  ;;  %vm614_vm11 = vweird.f32 %v2231_v11  ;;  %vm606_vm13 = vmor %vm604_vm9, %vm605_vm10 }
  0xef   : > { %v592_v52 = vsub.f32 1.5, %v591_v35  ;;  %v601_v45 = vmul.f32 0.5, %v600_v41  ;;  %v472_v48 = vpop.xlane.xlu1 %471  ;;  %v469_v35 = vpop.xlane.xlu0 %468  ;;  %vm615_vm12 = vweird.f32 %v2249_v36  ;;  %vm624_vm15 = vweird.f32 %v2266_v8 }
  0xf0   : > { %v582_v46 = vsub.f32 1.5, %v581_v22  ;;  %v498_v3 = vmul.f32 %v2124_v51, %v469_v35  ;;  %vm616_vm14 = vmor %vm614_vm11, %vm615_vm12  ;;  %vm634_vm1 = vweird.f32 %v2263_v23 }
  0xf1   : > { %v593_v32 = vmul.f32 %v2211_v7, %v592_v52  ;;  %v602_v24 = vsub.f32 1.5, %v601_v45 }
  0xf2   : > { %v583_v21 = vmul.f32 %v2214_v37, %v582_v46  ;;  %v2300_v42 = vadd.f32 1e-05, %v498_v3 }
  0xf3   : > { %v597_v6 = vsel %vm596_vm7, %v2211_v7, %v593_v32  ;;  %v2277_v25 = vpop.eup %1637 }
  0xf4   : > { %969 = vmatmul.bf16.gmra.mxu0 %v750_v60  ;;  %1018 = vmatmul.bf16.gmra.mxu1 %v751_v44  ;;  %v692_v10 = vmul.f32 %v597_v6, %v1959_v61  ;;  %v693_v31 = vmul.f32 %v597_v6, %v1962_v62  ;;  %v603_v62 = vmul.f32 %v2243_v59, %v602_v24  ;;  %vm635_vm2 = vweird.f32 %v2277_v25 }
  0xf5   : > { %1067 = vmatmul.bf16.gmra.mxu2 %v750_v60  ;;  %1116 = vmatmul.bf16.gmra.mxu3 %v751_v44  ;;  %v610_v60 = vmul.f32 %v2249_v36, %v609_v33  ;;  %v587_v44 = vsel %vm586_vm8, %v2214_v37, %v583_v21  ;;  %v629_v1 = vmul.f32 %v2277_v25, %v2263_v23  ;;  %vm636_vm4 = vmor %vm634_vm1, %vm635_vm2  ;;  %vm644_vm7 = vweird.f32 %v2300_v42 }
  0xf6   : > { %v690_v9 = vmul.f32 %v587_v44, %v1965_v63  ;;  %v691_v16 = vmul.f32 %v587_v44, %v1968_v0  ;;  %v730_v7 = vmul.f32 %v2166_v26, %v692_v10  ;;  %v731_v43 = vmul.f32 %v2169_v47, %v693_v31  ;;  %v2283_v63 = vpop.eup %1639 }
  0xf7   : > { %v611_v19 = vmul.f32 0.5, %v610_v60  ;;  %v499_v0 = vmul.f32 %v2124_v51, %v472_v48  ;;  %v619_v22 = vmul.f32 %v2283_v63, %v2266_v8  ;;  %v607_v52 = vsel %vm606_vm13, %v2243_v59, %v603_v62  ;;  %v478_v6 = vpop.xlane.xlu0 %477 }
  0xf8   : > { %v728_v37 = vmul.f32 %v2166_v26, %v690_v9  ;;  %v729_v20 = vmul.f32 %v2169_v47, %v691_v16  ;;  %v630_v46 = vmul.f32 %v2277_v25, %v629_v1  ;;  %v694_v58 = vmul.f32 %v607_v52, %v1975_v4  ;;  %v475_v4 = vpop.xlane.xlu2 %474 }
  0xf9   : > { %v612_v61 = vsub.f32 1.5, %v611_v19  ;;  %v2297_v11 = vadd.f32 1e-05, %v499_v0  ;;  %v620_v2 = vmul.f32 %v2283_v63, %v619_v22  ;;  %v695_v34 = vmul.f32 %v607_v52, %v1978_v5 }
  0xfa   : > { %v754_v57 = vpack.c.bf16 %v730_v7, %v728_v37  ;;  %v755_v50 = vpack.c.bf16 %v731_v43, %v729_v20  ;;  %v631_v21 = vmul.f32 0.5, %v630_v46  ;;  %v732_v59 = vmul.f32 %v2166_v26, %v694_v58 }
  0xfb   : > { %v613_v49 = vmul.f32 %v2249_v36, %v612_v61  ;;  %1641 = vrsqrt.f32 %v2297_v11  ;;  %vm625_vm0 = vweird.f32 %v2283_v63  ;;  %v501_v16 = vmul.f32 %v2124_v51, %v478_v6 }
  0xfc   : > { %1643 = vrsqrt.f32 %v2300_v42  ;;  %v632_v5 = vsub.f32 1.5, %v631_v21  ;;  %vm626_vm3 = vmor %vm624_vm15, %vm625_vm0  ;;  %vm654_vm5 = vweird.f32 %v2297_v11 }
  0xfd   : > { %v617_v53 = vsel %vm616_vm14, %v2249_v36, %v613_v49  ;;  %v733_v36 = vmul.f32 %v2169_v47, %v695_v34  ;;  %v517_v24 = vadd.f32 1e-05, %v501_v16 }
  0xfe   : > { %v697_v32 = vmul.f32 %v617_v53, %v1998_v15  ;;  %v633_v31 = vmul.f32 %v2277_v25, %v632_v5 }
  0xff   : > { %vm674_vm13 = vweird.f32 %v517_v24 }
 0x100   : > { %v735_v60 = vmul.f32 %v2169_v47, %v697_v32  ;;  %v637_v20 = vsel %vm636_vm4, %v2277_v25, %v633_v31 }
 0x101   : > { %v2315_v44 = vpop.eup %1641  ;;  %v700_v48 = vmul.f32 %v637_v20, %v2001_v17  ;;  %v701_v35 = vmul.f32 %v637_v20, %v2004_v18 }
 0x102   : > { %v1644_v45 = vpop.eup %1643  ;;  %v757_v10 = vpack.c.bf16 %v735_v60, %v733_v36  ;;  %v649_v8 = vmul.f32 %v2315_v44, %v2297_v11  ;;  %vm655_vm6 = vweird.f32 %v2315_v44 }
 0x103   : > { %v639_v19 = vmul.f32 %v1644_v45, %v2300_v42  ;;  %v739_v25 = vmul.f32 %v2169_v47, %v701_v35  ;;  %vm645_vm8 = vweird.f32 %v1644_v45  ;;  %vm656_vm9 = vmor %vm654_vm5, %vm655_vm6 }
 0x104   : > { %974 = vmatmul.bf16.gmra.mxu0 %v752_v56  ;;  %1023 = vmatmul.bf16.gmra.mxu1 %v753_v40  ;;  %v650_v7 = vmul.f32 %v2315_v44, %v649_v8  ;;  %vm646_vm10 = vmor %vm644_vm7, %vm645_vm8 }
 0x105   : > { %1072 = vmatmul.bf16.gmra.mxu2 %v752_v56  ;;  %1121 = vmatmul.bf16.gmra.mxu3 %v753_v40  ;;  %v621_v56 = vmul.f32 0.5, %v620_v2  ;;  %v696_v40 = vmul.f32 %v617_v53, %v1995_v14  ;;  %v500_v14 = vmul.f32 %v2124_v51, %v475_v4  ;;  %v640_v51 = vmul.f32 %v1644_v45, %v639_v19 }
 0x106   : > { %v651_v62 = vmul.f32 0.5, %v650_v7 }
 0x107   : > { %v622_v33 = vsub.f32 1.5, %v621_v56  ;;  %v734_v41 = vmul.f32 %v2166_v26, %v696_v40  ;;  %v516_v23 = vadd.f32 1e-05, %v500_v14  ;;  %v641_v0 = vmul.f32 0.5, %v640_v51 }
 0x108   : > { %v652_v3 = vsub.f32 1.5, %v651_v62 }
 0x109   : > { %v623_v15 = vmul.f32 %v2283_v63, %v622_v33  ;;  %v756_v9 = vpack.c.bf16 %v734_v41, %v732_v59  ;;  %1645 = vrsqrt.f32 %v516_v23  ;;  %vm664_vm11 = vweird.f32 %v516_v23 }
 0x10a   : > { %1647 = vrsqrt.f32 %v517_v24  ;;  %v653_v18 = vmul.f32 %v2315_v44, %v652_v3 }
 0x10b   : > { %v627_v37 = vsel %vm626_vm3, %v2283_v63, %v623_v15  ;;  %v738_v63 = vmul.f32 %v2166_v26, %v700_v48 }
 0x10c   : > { %v698_v43 = vmul.f32 %v627_v37, %v1989_v12  ;;  %v699_v61 = vmul.f32 %v627_v37, %v1992_v13  ;;  %v642_v12 = vsub.f32 1.5, %v641_v0  ;;  %v657_v58 = vsel %vm656_vm9, %v2315_v44, %v653_v18 }
 0x10d   : > { %v704_v34 = vmul.f32 %v657_v58, %v2019_v27  ;;  %v705_v40 = vmul.f32 %v657_v58, %v2022_v28 }
 0x10e   : > { %v736_v22 = vmul.f32 %v2166_v26, %v698_v43  ;;  %v643_v1 = vmul.f32 %v1644_v45, %v642_v12 }
 0x10f   : > { %v742_v33 = vmul.f32 %v2166_v26, %v704_v34  ;;  %v743_v36 = vmul.f32 %v2169_v47, %v705_v40 }
 0x110   : > { %v758_v13 = vpack.c.bf16 %v738_v63, %v736_v22  ;;  %v647_v53 = vsel %vm646_vm10, %v1644_v45, %v643_v1 }
 0x111   : > { %v702_v42 = vmul.f32 %v647_v53, %v2025_v29  ;;  %v703_v56 = vmul.f32 %v647_v53, %v2028_v30 }
 0x113   : > { %v740_v59 = vmul.f32 %v2166_v26, %v702_v42  ;;  %v741_v41 = vmul.f32 %v2169_v47, %v703_v56 }
 0x114   : > { %979 = vmatmul.bf16.gmra.mxu0 %v754_v57  ;;  %1028 = vmatmul.bf16.gmra.mxu1 %v755_v50 }
 0x115   : > { %1077 = vmatmul.bf16.gmra.mxu2 %v754_v57  ;;  %1126 = vmatmul.bf16.gmra.mxu3 %v755_v50  ;;  %v737_v57 = vmul.f32 %v2169_v47, %v699_v61  ;;  %v1646_v50 = vpop.eup %1645  ;;  %v760_v27 = vpack.c.bf16 %v742_v33, %v740_v59  ;;  %v761_v29 = vpack.c.bf16 %v743_v36, %v741_v41 }
 0x116   : > { %v1648_v49 = vpop.eup %1647  ;;  %v659_v2 = vmul.f32 %v1646_v50, %v516_v23  ;;  %vm665_vm12 = vweird.f32 %v1646_v50 }
 0x117   : > { %v759_v17 = vpack.c.bf16 %v739_v25, %v737_v57  ;;  %v669_v52 = vmul.f32 %v1648_v49, %v517_v24  ;;  %vm675_vm14 = vweird.f32 %v1648_v49  ;;  %vm666_vm15 = vmor %vm664_vm11, %vm665_vm12 }
 0x118   : > { %v660_v46 = vmul.f32 %v1646_v50, %v659_v2  ;;  %vm676_vm0 = vmor %vm674_vm13, %vm675_vm14 }
 0x119   : > { %v670_v11 = vmul.f32 %v1648_v49, %v669_v52 }
 0x11a   : > { %v661_v32 = vmul.f32 0.5, %v660_v46 }
 0x11b   : > { %v671_v21 = vmul.f32 0.5, %v670_v11 }
 0x11c   : > { %v662_v60 = vsub.f32 1.5, %v661_v32 }
 0x11d   : > { %v672_v4 = vsub.f32 1.5, %v671_v21 }
 0x11e   : > { %v663_v30 = vmul.f32 %v1646_v50, %v662_v60 }
 0x11f   : > { %v673_v28 = vmul.f32 %v1648_v49, %v672_v4 }
 0x120   : > { %v667_v44 = vsel %vm666_vm15, %v1646_v50, %v663_v30 }
 0x121   : > { %v677_v5 = vsel %vm676_vm0, %v1648_v49, %v673_v28  ;;  %v706_v6 = vmul.f32 %v667_v44, %v2035_v38  ;;  %v707_v14 = vmul.f32 %v667_v44, %v2038_v39 }
 0x122   : > { %v708_v45 = vmul.f32 %v677_v5, %v2049_v54  ;;  %v709_v15 = vmul.f32 %v677_v5, %v2052_v55 }
 0x123   : > { %v745_v16 = vmul.f32 %v2169_v47, %v707_v14 }
 0x124   : > { %984 = vmatmul.bf16.gmra.mxu0 %v756_v9  ;;  %1033 = vmatmul.bf16.gmra.mxu1 %v757_v10  ;;  %v747_v31 = vmul.f32 %v2169_v47, %v709_v15 }
 0x125   : > { %1082 = vmatmul.bf16.gmra.mxu2 %v756_v9  ;;  %1131 = vmatmul.bf16.gmra.mxu3 %v757_v10  ;;  %v744_v9 = vmul.f32 %v2166_v26, %v706_v6  ;;  %v746_v10 = vmul.f32 %v2166_v26, %v708_v45 }
 0x126   : > { %v763_v19 = vpack.c.bf16 %v747_v31, %v745_v16 }
 0x127   : > { %v762_v8 = vpack.c.bf16 %v746_v10, %v744_v9 }
 0x134   : > { %989 = vmatmul.bf16.gmra.mxu0 %v758_v13  ;;  %1038 = vmatmul.bf16.gmra.mxu1 %v759_v17 }
 0x135   : > { %1087 = vmatmul.bf16.gmra.mxu2 %v758_v13  ;;  %1136 = vmatmul.bf16.gmra.mxu3 %v759_v17 }
 0x144   : > { %994 = vmatmul.bf16.gmra.mxu0 %v760_v27  ;;  %1043 = vmatmul.bf16.gmra.mxu1 %v761_v29 }
 0x145   : > { %1092 = vmatmul.bf16.gmra.mxu2 %v760_v27  ;;  %1141 = vmatmul.bf16.gmra.mxu3 %v761_v29 }
 0x154   : > { %999 = vmatmul.bf16.gmra.mxu0 %v762_v8  ;;  %1048 = vmatmul.bf16.gmra.mxu1 %v763_v19 }
 0x155   : > { %1097 = vmatmul.bf16.gmra.mxu2 %v762_v8  ;;  %1146 = vmatmul.bf16.gmra.mxu3 %v763_v19 }
 0x161   : > { %v965_v38 = vpop.f32.mrf.mxu0  ;;  %v1014_v39 = vpop.f32.mrf.mxu1 }
 0x162   : > { %v1015_v54 = vadd.f32 %v1014_v39, %v965_v38 }
 0x164   : > { %1152 = vst [vmem:[%s2361_s10] sm:$0xff] %v1015_v54 }
 0x168   : > { %v1063_v55 = vpop.f32.mrf.mxu2  ;;  %v1112_v26 = vpop.f32.mrf.mxu3 }
 0x169   : > { %v1113_v47 = vadd.f32 %v1112_v26, %v1063_v55  ;;  %v967_v23 = vpop.f32.mrf.mxu0  ;;  %v1016_v24 = vpop.f32.mrf.mxu1 }
 0x16a   : > { %v1017_v37 = vadd.f32 %v1016_v24, %v967_v23 }
 0x16b   : > { %1153 = vst [vmem:[%s2361_s10 + $0x8] sm:$0xff] %v1113_v47 }
 0x16c   : > { %1154 = vst [vmem:[%s2361_s10 + $0x10] sm:$0xff] %v1017_v37 }
 0x170   : > { %v1065_v7 = vpop.f32.mrf.mxu2  ;;  %v1114_v51 = vpop.f32.mrf.mxu3 }
 0x171   : > { %v1115_v20 = vadd.f32 %v1114_v51, %v1065_v7  ;;  %v970_v43 = vpop.f32.mrf.mxu0  ;;  %v1019_v48 = vpop.f32.mrf.mxu1 }
 0x172   : > { %v1020_v61 = vadd.f32 %v1019_v48, %v970_v43 }
 0x173   : > { %1155 = vst [vmem:[%s2361_s10 + $0x18] sm:$0xff] %v1115_v20 }
 0x174   : > { %1156 = vst [vmem:[%s2361_s10 + $0x20] sm:$0xff] %v1020_v61 }
 0x178   : > { %v1068_v35 = vpop.f32.mrf.mxu2  ;;  %v1117_v62 = vpop.f32.mrf.mxu3 }
 0x179   : > { %v1118_v0 = vadd.f32 %v1117_v62, %v1068_v35  ;;  %v972_v22 = vpop.f32.mrf.mxu0  ;;  %v1021_v63 = vpop.f32.mrf.mxu1 }
 0x17a   : > { %v1022_v57 = vadd.f32 %v1021_v63, %v972_v22 }
 0x17b   : > { %1157 = vst [vmem:[%s2361_s10 + $0x28] sm:$0xff] %v1118_v0 }
 0x17c   : > { %1158 = vst [vmem:[%s2361_s10 + $0x30] sm:$0xff] %v1022_v57 }
 0x180   : > { %v1070_v25 = vpop.f32.mrf.mxu2  ;;  %v1119_v50 = vpop.f32.mrf.mxu3 }
 0x181   : > { %v1120_v3 = vadd.f32 %v1119_v50, %v1070_v25  ;;  %v975_v12 = vpop.f32.mrf.mxu0  ;;  %v1024_v49 = vpop.f32.mrf.mxu1 }
 0x182   : > { %v1025_v13 = vadd.f32 %v1024_v49, %v975_v12 }
 0x183   : > { %1159 = vst [vmem:[%s2361_s10 + $0x38] sm:$0xff] %v1120_v3 }
 0x184   : > { %1160 = vst [vmem:[%s2361_s10 + $0x40] sm:$0xff] %v1025_v13 }
 0x188   : > { %v1073_v17 = vpop.f32.mrf.mxu2  ;;  %v1122_v18 = vpop.f32.mrf.mxu3 }
 0x189   : > { %v1123_v1 = vadd.f32 %v1122_v18, %v1073_v17  ;;  %v977_v2 = vpop.f32.mrf.mxu0  ;;  %v1026_v52 = vpop.f32.mrf.mxu1 }
 0x18a   : > { %v1027_v46 = vadd.f32 %v1026_v52, %v977_v2 }
 0x18b   : > { %1161 = vst [vmem:[%s2361_s10 + $0x48] sm:$0xff] %v1123_v1 }
 0x18c   : > { %1162 = vst [vmem:[%s2361_s10 + $0x50] sm:$0xff] %v1027_v46  ;;  %v1209_v46 = vld [vmem:[%s2361_s10] sm:$0xff] (%p1809_p9) }
 0x18d   : > { %1210 = vst [vmem:[%s2404_s26] sm:$0xff] (%p1809_p9), %v1209_v46 }
 0x190   : > { %v1075_v11 = vpop.f32.mrf.mxu2  ;;  %v1124_v53 = vpop.f32.mrf.mxu3 }
 0x191   : > { %v1125_v58 = vadd.f32 %v1124_v53, %v1075_v11  ;;  %v980_v42 = vpop.f32.mrf.mxu0  ;;  %v1029_v34 = vpop.f32.mrf.mxu1  ;;  %v1211_v11 = vld [vmem:[%s2361_s10 + $0x8] sm:$0xff] (%p1809_p9)  ;;  %v1213_v53 = vld [vmem:[%s2361_s10 + $0x10] sm:$0xff] (%p1809_p9) }
 0x192   : > { %v1030_v56 = vadd.f32 %v1029_v34, %v980_v42  ;;  %1212 = vst [vmem:[%s2404_s26 + $0x8] sm:$0xff] (%p1809_p9), %v1211_v11  ;;  %v1217_v42 = vld [vmem:[%s2361_s10 + $0x20] sm:$0xff] (%p1809_p9)  ;;  %v1219_v34 = vld [vmem:[%s2361_s10 + $0x28] sm:$0xff] (%p1809_p9) }
 0x193   : > { %1163 = vst [vmem:[%s2361_s10 + $0x58] sm:$0xff] %v1125_v58  ;;  %v1215_v58 = vld [vmem:[%s2361_s10 + $0x18] sm:$0xff] (%p1809_p9) }
 0x194   : > { %1164 = vst [vmem:[%s2361_s10 + $0x60] sm:$0xff] %v1030_v56  ;;  %v1221_v56 = vld [vmem:[%s2361_s10 + $0x30] sm:$0xff] (%p1809_p9) }
 0x195   : > { %1214 = vst [vmem:[%s2404_s26 + $0x20] sm:$0xff] (%p1809_p9), %v1213_v53 }
 0x196   : > { %1216 = vst [vmem:[%s2404_s26 + $0x28] sm:$0xff] (%p1809_p9), %v1215_v58 }
 0x197   : > { %1218 = vst [vmem:[%s2404_s26 + $0x40] sm:$0xff] (%p1809_p9), %v1217_v42 }
 0x198   : > { %v1078_v40 = vpop.f32.mrf.mxu2  ;;  %v1127_v32 = vpop.f32.mrf.mxu3  ;;  %1220 = vst [vmem:[%s2404_s26 + $0x48] sm:$0xff] (%p1809_p9), %v1219_v34 }
 0x199   : > { %v1128_v21 = vadd.f32 %v1127_v32, %v1078_v40  ;;  %v982_v59 = vpop.f32.mrf.mxu0  ;;  %v1031_v33 = vpop.f32.mrf.mxu1  ;;  %v1223_v40 = vld [vmem:[%s2361_s10 + $0x38] sm:$0xff] (%p1809_p9)  ;;  %v1225_v32 = vld [vmem:[%s2361_s10 + $0x40] sm:$0xff] (%p1809_p9)  ;;  %1222 = vst [vmem:[%s2404_s26 + $0x60] sm:$0xff] (%p1809_p9), %v1221_v56 }
 0x19a   : > { %v1032_v41 = vadd.f32 %v1031_v33, %v982_v59  ;;  %1224 = vst [vmem:[%s2404_s26 + $0x68] sm:$0xff] (%p1809_p9), %v1223_v40  ;;  %v1229_v59 = vld [vmem:[%s2361_s10 + $0x50] sm:$0xff] (%p1809_p9)  ;;  %v1231_v33 = vld [vmem:[%s2361_s10 + $0x58] sm:$0xff] (%p1809_p9) }
 0x19b   : > { %1165 = vst [vmem:[%s2361_s10 + $0x68] sm:$0xff] %v1128_v21  ;;  %v1227_v21 = vld [vmem:[%s2361_s10 + $0x48] sm:$0xff] (%p1809_p9) }
 0x19c   : > { %1166 = vst [vmem:[%s2361_s10 + $0x70] sm:$0xff] %v1032_v41  ;;  %v1233_v41 = vld [vmem:[%s2361_s10 + $0x60] sm:$0xff] (%p1809_p9) }
 0x19d   : > { %1226 = vst [vmem:[%s2404_s26 + $0x80] sm:$0xff] (%p1809_p9), %v1225_v32 }
 0x19e   : > { %1228 = vst [vmem:[%s2404_s26 + $0x88] sm:$0xff] (%p1809_p9), %v1227_v21 }
 0x19f   : > { %1230 = vst [vmem:[%s2404_s26 + $0xa0] sm:$0xff] (%p1809_p9), %v1229_v59 }
 0x1a0   : > { %v1080_v36 = vpop.f32.mrf.mxu2  ;;  %v1129_v60 = vpop.f32.mrf.mxu3  ;;  %1232 = vst [vmem:[%s2404_s26 + $0xa8] sm:$0xff] (%p1809_p9), %v1231_v33 }
 0x1a1   : > { %v1130_v4 = vadd.f32 %v1129_v60, %v1080_v36  ;;  %v985_v27 = vpop.f32.mrf.mxu0  ;;  %v1034_v29 = vpop.f32.mrf.mxu1  ;;  %1234 = vst [vmem:[%s2404_s26 + $0xc0] sm:$0xff] (%p1809_p9), %v1233_v41 }
 0x1a2   : > { %v1035_v30 = vadd.f32 %v1034_v29, %v985_v27  ;;  %v1235_v36 = vld [vmem:[%s2361_s10 + $0x68] sm:$0xff] (%p1809_p9) }
 0x1a3   : > { %1167 = vst [vmem:[%s2361_s10 + $0x78] sm:$0xff] %v1130_v4  ;;  %v1237_v60 = vld [vmem:[%s2361_s10 + $0x70] sm:$0xff] (%p1809_p9) }
 0x1a4   : > { %1168 = vst [vmem:[%s2361_s10 + $0x80] sm:$0xff] %v1035_v30 }
 0x1a5   : > { %1236 = vst [vmem:[%s2404_s26 + $0xc8] sm:$0xff] (%p1809_p9), %v1235_v36 }
 0x1a6   : > { %1238 = vst [vmem:[%s2404_s26 + $0xe0] sm:$0xff] (%p1809_p9), %v1237_v60 }
 0x1a8   : > { %v1083_v28 = vpop.f32.mrf.mxu2  ;;  %v1132_v44 = vpop.f32.mrf.mxu3 }
 0x1a9   : > { %v1133_v5 = vadd.f32 %v1132_v44, %v1083_v28  ;;  %v987_v6 = vpop.f32.mrf.mxu0  ;;  %v1036_v45 = vpop.f32.mrf.mxu1 }
 0x1aa   : > { %v1037_v14 = vadd.f32 %v1036_v45, %v987_v6  ;;  %v1239_v4 = vld [vmem:[%s2361_s10 + $0x78] sm:$0xff] (%p1809_p9) }
 0x1ab   : > { %1169 = vst [vmem:[%s2361_s10 + $0x88] sm:$0xff] %v1133_v5  ;;  %v1241_v27 = vld [vmem:[%s2361_s10 + $0x80] sm:$0xff] (%p1809_p9) }
 0x1ac   : > { %1170 = vst [vmem:[%s2361_s10 + $0x90] sm:$0xff] %v1037_v14 }
 0x1ad   : > { %1240 = vst [vmem:[%s2404_s26 + $0xe8] sm:$0xff] (%p1809_p9), %v1239_v4 }
 0x1ae   : > { %1242 = vst [vmem:[%s2404_s26 + $0x100] sm:$0xff] (%p1809_p9), %v1241_v27 }
 0x1b0   : > { %v1085_v15 = vpop.f32.mrf.mxu2  ;;  %v1134_v9 = vpop.f32.mrf.mxu3 }
 0x1b1   : > { %v1135_v10 = vadd.f32 %v1134_v9, %v1085_v15  ;;  %v990_v16 = vpop.f32.mrf.mxu0  ;;  %v1039_v31 = vpop.f32.mrf.mxu1 }
 0x1b2   : > { %v1040_v8 = vadd.f32 %v1039_v31, %v990_v16  ;;  %v1243_v29 = vld [vmem:[%s2361_s10 + $0x88] sm:$0xff] (%p1809_p9) }
 0x1b3   : > { %1171 = vst [vmem:[%s2361_s10 + $0x98] sm:$0xff] %v1135_v10  ;;  %v1245_v30 = vld [vmem:[%s2361_s10 + $0x90] sm:$0xff] (%p1809_p9) }
 0x1b4   : > { %1172 = vst [vmem:[%s2361_s10 + $0xa0] sm:$0xff] %v1040_v8 }
 0x1b5   : > { %1244 = vst [vmem:[%s2404_s26 + $0x108] sm:$0xff] (%p1809_p9), %v1243_v29 }
 0x1b6   : > { %1246 = vst [vmem:[%s2404_s26 + $0x120] sm:$0xff] (%p1809_p9), %v1245_v30 }
 0x1b8   : > { %v1088_v19 = vpop.f32.mrf.mxu2  ;;  %v1137_v38 = vpop.f32.mrf.mxu3 }
 0x1b9   : > { %v1138_v39 = vadd.f32 %v1137_v38, %v1088_v19  ;;  %v992_v54 = vpop.f32.mrf.mxu0  ;;  %v1041_v55 = vpop.f32.mrf.mxu1 }
 0x1ba   : > { %v1042_v26 = vadd.f32 %v1041_v55, %v992_v54  ;;  %v1247_v28 = vld [vmem:[%s2361_s10 + $0x98] sm:$0xff] (%p1809_p9) }
 0x1bb   : > { %1173 = vst [vmem:[%s2361_s10 + $0xa8] sm:$0xff] %v1138_v39  ;;  %v1249_v44 = vld [vmem:[%s2361_s10 + $0xa0] sm:$0xff] (%p1809_p9) }
 0x1bc   : > { %1174 = vst [vmem:[%s2361_s10 + $0xb0] sm:$0xff] %v1042_v26 }
 0x1bd   : > { %1248 = vst [vmem:[%s2404_s26 + $0x128] sm:$0xff] (%p1809_p9), %v1247_v28 }
 0x1be   : > { %1250 = vst [vmem:[%s2404_s26 + $0x140] sm:$0xff] (%p1809_p9), %v1249_v44 }
 0x1c0   : > { %v1090_v47 = vpop.f32.mrf.mxu2  ;;  %v1139_v23 = vpop.f32.mrf.mxu3 }
 0x1c1   : > { %v1140_v24 = vadd.f32 %v1139_v23, %v1090_v47  ;;  %v995_v37 = vpop.f32.mrf.mxu0  ;;  %v1044_v7 = vpop.f32.mrf.mxu1 }
 0x1c2   : > { %v1045_v51 = vadd.f32 %v1044_v7, %v995_v37  ;;  %v1251_v5 = vld [vmem:[%s2361_s10 + $0xa8] sm:$0xff] (%p1809_p9) }
 0x1c3   : > { %1175 = vst [vmem:[%s2361_s10 + $0xb8] sm:$0xff] %v1140_v24  ;;  %v1253_v6 = vld [vmem:[%s2361_s10 + $0xb0] sm:$0xff] (%p1809_p9) }
 0x1c4   : > { %1176 = vst [vmem:[%s2361_s10 + $0xc0] sm:$0xff] %v1045_v51 }
 0x1c5   : > { %1252 = vst [vmem:[%s2404_s26 + $0x148] sm:$0xff] (%p1809_p9), %v1251_v5 }
 0x1c6   : > { %1254 = vst [vmem:[%s2404_s26 + $0x160] sm:$0xff] (%p1809_p9), %v1253_v6 }
 0x1c8   : > { %v1093_v20 = vpop.f32.mrf.mxu2  ;;  %v1142_v43 = vpop.f32.mrf.mxu3 }
 0x1c9   : > { %v1143_v48 = vadd.f32 %v1142_v43, %v1093_v20  ;;  %v997_v61 = vpop.f32.mrf.mxu0  ;;  %v1046_v35 = vpop.f32.mrf.mxu1 }
 0x1ca   : > { %v1047_v62 = vadd.f32 %v1046_v35, %v997_v61  ;;  %v1255_v45 = vld [vmem:[%s2361_s10 + $0xb8] sm:$0xff] (%p1809_p9) }
 0x1cb   : > { %1177 = vst [vmem:[%s2361_s10 + $0xc8] sm:$0xff] %v1143_v48  ;;  %v1257_v14 = vld [vmem:[%s2361_s10 + $0xc0] sm:$0xff] (%p1809_p9) }
 0x1cc   : > { %1178 = vst [vmem:[%s2361_s10 + $0xd0] sm:$0xff] %v1047_v62 }
 0x1cd   : > { %1256 = vst [vmem:[%s2404_s26 + $0x168] sm:$0xff] (%p1809_p9), %v1255_v45 }
 0x1ce   : > { %1258 = vst [vmem:[%s2404_s26 + $0x180] sm:$0xff] (%p1809_p9), %v1257_v14 }
 0x1d0   : > { %v1095_v0 = vpop.f32.mrf.mxu2  ;;  %v1144_v22 = vpop.f32.mrf.mxu3 }
 0x1d1   : > { %v1145_v63 = vadd.f32 %v1144_v22, %v1095_v0  ;;  %v1000_v57 = vpop.f32.mrf.mxu0  ;;  %v1049_v25 = vpop.f32.mrf.mxu1 }
 0x1d2   : > { %v1050_v50 = vadd.f32 %v1049_v25, %v1000_v57  ;;  %v1259_v15 = vld [vmem:[%s2361_s10 + $0xc8] sm:$0xff] (%p1809_p9) }
 0x1d3   : > { %1179 = vst [vmem:[%s2361_s10 + $0xd8] sm:$0xff] %v1145_v63  ;;  %v1261_v9 = vld [vmem:[%s2361_s10 + $0xd0] sm:$0xff] (%p1809_p9) }
 0x1d4   : > { %1180 = vst [vmem:[%s2361_s10 + $0xe0] sm:$0xff] %v1050_v50 }
 0x1d5   : > { %1260 = vst [vmem:[%s2404_s26 + $0x188] sm:$0xff] (%p1809_p9), %v1259_v15 }
 0x1d6   : > { %1262 = vst [vmem:[%s2404_s26 + $0x1a0] sm:$0xff] (%p1809_p9), %v1261_v9 }
 0x1d8   : > { %v1098_v3 = vpop.f32.mrf.mxu2  ;;  %v1147_v12 = vpop.f32.mrf.mxu3 }
 0x1d9   : > { %v1148_v49 = vadd.f32 %v1147_v12, %v1098_v3  ;;  %v1002_v13 = vpop.f32.mrf.mxu0  ;;  %v1051_v17 = vpop.f32.mrf.mxu1 }
 0x1da   : > { %v1052_v18 = vadd.f32 %v1051_v17, %v1002_v13  ;;  %v1263_v10 = vld [vmem:[%s2361_s10 + $0xd8] sm:$0xff] (%p1809_p9) }
 0x1db   : > { %1181 = vst [vmem:[%s2361_s10 + $0xe8] sm:$0xff] %v1148_v49  ;;  %v1265_v16 = vld [vmem:[%s2361_s10 + $0xe0] sm:$0xff] (%p1809_p9) }
 0x1dc   : > { %1182 = vst [vmem:[%s2361_s10 + $0xf0] sm:$0xff] %v1052_v18 }
 0x1dd   : > { %1264 = vst [vmem:[%s2404_s26 + $0x1a8] sm:$0xff] (%p1809_p9), %v1263_v10 }
 0x1de   : > { %1266 = vst [vmem:[%s2404_s26 + $0x1c0] sm:$0xff] (%p1809_p9), %v1265_v16 }
 0x1df   : > { %1190 = sbr.rel (!%p1809_p9) target bundleno = 492 (0x1ec), region = 74 }
 0x1e0   : > { %v1100_v1 = vpop.f32.mrf.mxu2  ;;  %v1149_v2 = vpop.f32.mrf.mxu3 }
 0x1e1   : > { %v1150_v52 = vadd.f32 %v1149_v2, %v1100_v1 }
 0x1e2   : > { %v1267_v31 = vld [vmem:[%s2361_s10 + $0xe8] sm:$0xff] (%p1809_p9) }
 0x1e3   : > { %1183 = vst [vmem:[%s2361_s10 + $0xf8] sm:$0xff] %v1150_v52  ;;  %v1269_v8 = vld [vmem:[%s2361_s10 + $0xf0] sm:$0xff] (%p1809_p9) }
 0x1e4   : > { %1268 = vst [vmem:[%s2404_s26 + $0x1c8] sm:$0xff] %v1267_v31 }
 0x1e5   : > { %1270 = vst [vmem:[%s2404_s26 + $0x1e0] sm:$0xff] %v1269_v8 }
 0x1ea   : > { %v1271_v19 = vld [vmem:[%s2361_s10 + $0xf8] sm:$0xff] }
 0x1eb   : > { %1272 = vst [vmem:[%s2404_s26 + $0x1e8] sm:$0xff] %v1271_v19 }
 0x1ec PF: > { %s13_s20 = sadd.s32 1, %s1719_s20   ;;  %s2500_s12 = smov %s1691_s13 }
 0x1ed   : > { %p10_p1 = scmp.ge.s32.totalorder %s13_s20, 6   ;;  %s2501_s13 = smov %s1814_s4 }
 0x1ee   : > { %s2502_s14 = smov %s1699_s15  ;;  %s2503_s15 = smov %s1803_s27 }
 0x1ef   : > { %s2504_s16 = smov %s1711_s18  ;;  %s2505_s17 = smov %s1715_s19 }
 0x1f0   : > { %s2506_s18 = smov %s2509_s22  ;;  %s2507_s19 = smov %s2513_s23 }
 0x1f1   :  { %12 = sbr.rel (!%p10_p1) target bundleno = 5 (0x5), region = 131 }

// kernel: transformer_forward.11
= control target key start
LH: loop header
LB: loop body
LE: loop exit
PB: predicated region body
PF: predicated region fallthrough
CT: control target
= control target key end

     0   :  { %s1514_s12 = smov 0   ;;  %s1516_s13 = smov 0   ;;  %s1851_s0 = inlined_call_operand.vmem [shape: bf16[256,256], index: 0, kind: input, shape index: {}]   ;;  %s1852_s1 = inlined_call_operand.vmem [shape: bf16[256,256], index: 1, kind: input, shape index: {}]   ;;  %s1853_s2 = inlined_call_operand.vmem [shape: f32[256,256], index: 2, kind: input, shape index: {}]   ;;  %s1854_s3 = inlined_call_operand.vmem [shape: f32[256,256], index: 3, kind: output, shape index: {}]  }
   0x1   :  { %s1518_s14 = smov 0  }
   0x2 LB: > { %s32_s15 = sadd.s32 1, %s1488_s13  ;;  %p1191_p0 = scmp.ge.s32.totalorder %s1492_s14, 1  ;;  %s1492_s14 = sphi %s1518_s14, %s13_s14   ;;  %s1488_s13 = sphi %s1516_s13, %s1856_s13   ;;  %s1484_s12 = sphi %s1514_s12, %s1855_s12  }
   0x3   : > { %p34_p1 = scmp.ge.s32.totalorder %s32_s15, 2  ;;  %p205_p2 = scmp.lt.s32.totalorder %s1492_s14, 3 }
   0x5   : > { %s1858_s15 = smov (%p34_p1, %s32_s15), 0  ;;  %p206_p3 = pnand %p1191_p0, %p205_p2 }
   0x6   : > { %s1192_s5 = sshll.u32 (!%p206_p3), %s1484_s12, 4 }
   0x7   : > { %209 = sbr.rel (%p206_p3) target bundleno = 305 (0x131), region = 32  ;;  %p261_p4 = scmp.lt.s32.totalorder (!%p206_p3), %s1192_s5, 31 }
   0xc   : > { %v1323_v0 = vld [vmem:[%s1852_s1 + $0x70] sm:$0xf]  ;;  %v1429_v1 = vld [vmem:[%s1852_s1 + $0x74] sm:$0xf0]  ;;  %v1428_v5 = vld [vmem:[%s1852_s1 + $0x74] sm:$0xf] }
   0xd   : > { %v1387_v2 = vld [vmem:[%s1852_s1 + $0xf0] sm:$0xf]  ;;  %v1324_v3 = vor.u32 %v1429_v1, %v1323_v0  ;;  %v1445_v4 = vld [vmem:[%s1852_s1 + $0xf4] sm:$0xf0]  ;;  %v1325_v6 = vld [vmem:[%s1852_s1 + $0x78] sm:$0xf0] }
   0xe   : > { %v1388_v7 = vor.u32 %v1445_v4, %v1387_v2  ;;  %v1328_v8 = vor.u32 %v1428_v5, %v1325_v6  ;;  %v1444_v9 = vld [vmem:[%s1852_s1 + $0xf4] sm:$0xf]  ;;  %v1389_v10 = vld [vmem:[%s1852_s1 + $0xf8] sm:$0xf0]  ;;  %v1315_v11 = vld [vmem:[%s1852_s1 + $0x60] sm:$0xf] }
   0xf   : > { %663 = vmatpush.bf16.msra.mxu0 %v1324_v3  ;;  %v1392_v12 = vor.u32 %v1444_v9, %v1389_v10  ;;  %v1427_v13 = vld [vmem:[%s1852_s1 + $0x64] sm:$0xf0]  ;;  %v1379_v14 = vld [vmem:[%s1852_s1 + $0xe0] sm:$0xf]  ;;  %v1426_v18 = vld [vmem:[%s1852_s1 + $0x64] sm:$0xf] }
  0x10   : > { %v1443_v15 = vld [vmem:[%s1852_s1 + $0xe4] sm:$0xf0]  ;;  %712 = vmatpush.bf16.msra.mxu1 %v1388_v7  ;;  %761 = vmatpush.bf16.msra.mxu2 %v1328_v8  ;;  %v1316_v16 = vor.u32 %v1427_v13, %v1315_v11  ;;  %v1317_v19 = vld [vmem:[%s1852_s1 + $0x68] sm:$0xf0]  ;;  %v1442_v20 = vld [vmem:[%s1852_s1 + $0xe4] sm:$0xf] }
  0x11   : > { %v1380_v17 = vor.u32 %v1443_v15, %v1379_v14  ;;  %810 = vmatpush.bf16.msra.mxu3 %v1392_v12  ;;  %v1320_v21 = vor.u32 %v1426_v18, %v1317_v19  ;;  %v1381_v22 = vld [vmem:[%s1852_s1 + $0xe8] sm:$0xf0]  ;;  %v1307_v23 = vld [vmem:[%s1852_s1 + $0x50] sm:$0xf]  ;;  %v1425_v24 = vld [vmem:[%s1852_s1 + $0x54] sm:$0xf0] }
  0x12   : > { %v1384_v25 = vor.u32 %v1442_v20, %v1381_v22  ;;  %v1371_v26 = vld [vmem:[%s1852_s1 + $0xd0] sm:$0xf]  ;;  %v1441_v27 = vld [vmem:[%s1852_s1 + $0xd4] sm:$0xf0]  ;;  %v1424_v28 = vld [vmem:[%s1852_s1 + $0x54] sm:$0xf]  ;;  %v1308_v29 = vor.u32 %v1425_v24, %v1307_v23 }
  0x13   : > { %664 = vmatpush.bf16.msra.mxu0 %v1316_v16  ;;  %v1309_v30 = vld [vmem:[%s1852_s1 + $0x58] sm:$0xf0]  ;;  %v1440_v31 = vld [vmem:[%s1852_s1 + $0xd4] sm:$0xf]  ;;  %v1372_v33 = vor.u32 %v1441_v27, %v1371_v26  ;;  %v1299_v35 = vld [vmem:[%s1852_s1 + $0x40] sm:$0xf] }
  0x14   : > { %v1373_v32 = vld [vmem:[%s1852_s1 + $0xd8] sm:$0xf0]  ;;  %713 = vmatpush.bf16.msra.mxu1 %v1380_v17  ;;  %762 = vmatpush.bf16.msra.mxu2 %v1320_v21  ;;  %v1312_v34 = vor.u32 %v1424_v28, %v1309_v30  ;;  %v1423_v36 = vld [vmem:[%s1852_s1 + $0x44] sm:$0xf0]  ;;  %v1363_v37 = vld [vmem:[%s1852_s1 + $0xc0] sm:$0xf] }
  0x15   : > { %811 = vmatpush.bf16.msra.mxu3 %v1384_v25  ;;  %v1376_v38 = vor.u32 %v1440_v31, %v1373_v32  ;;  %v1439_v39 = vld [vmem:[%s1852_s1 + $0xc4] sm:$0xf0]  ;;  %v1422_v40 = vld [vmem:[%s1852_s1 + $0x44] sm:$0xf]  ;;  %v1301_v41 = vld [vmem:[%s1852_s1 + $0x48] sm:$0xf0]  ;;  %v1300_v44 = vor.u32 %v1423_v36, %v1299_v35 }
  0x16   : > { %v1438_v42 = vld [vmem:[%s1852_s1 + $0xc4] sm:$0xf]  ;;  %v1365_v43 = vld [vmem:[%s1852_s1 + $0xc8] sm:$0xf0]  ;;  %v1364_v45 = vor.u32 %v1439_v39, %v1363_v37  ;;  %v1304_v46 = vor.u32 %v1422_v40, %v1301_v41  ;;  %v1291_v47 = vld [vmem:[%s1852_s1 + $0x30] sm:$0xf] }
  0x17   : > { %665 = vmatpush.bf16.msra.mxu0 %v1308_v29  ;;  %v1421_v48 = vld [vmem:[%s1852_s1 + $0x34] sm:$0xf0]  ;;  %v1355_v49 = vld [vmem:[%s1852_s1 + $0xb0] sm:$0xf]  ;;  %v1368_v50 = vor.u32 %v1438_v42, %v1365_v43  ;;  %v1420_v52 = vld [vmem:[%s1852_s1 + $0x34] sm:$0xf] }
  0x18   : > { %714 = vmatpush.bf16.msra.mxu1 %v1372_v33  ;;  %763 = vmatpush.bf16.msra.mxu2 %v1312_v34  ;;  %v1437_v51 = vld [vmem:[%s1852_s1 + $0xb4] sm:$0xf0]  ;;  %v1293_v53 = vld [vmem:[%s1852_s1 + $0x38] sm:$0xf0]  ;;  %v1436_v54 = vld [vmem:[%s1852_s1 + $0xb4] sm:$0xf]  ;;  %v1292_v56 = vor.u32 %v1421_v48, %v1291_v47 }
  0x19   : > { %812 = vmatpush.bf16.msra.mxu3 %v1376_v38  ;;  %v1357_v55 = vld [vmem:[%s1852_s1 + $0xb8] sm:$0xf0]  ;;  %v1356_v57 = vor.u32 %v1437_v51, %v1355_v49  ;;  %v1296_v58 = vor.u32 %v1420_v52, %v1293_v53  ;;  %v1283_v59 = vld [vmem:[%s1852_s1 + $0x20] sm:$0xf]  ;;  %v1419_v60 = vld [vmem:[%s1852_s1 + $0x24] sm:$0xf0] }
  0x1a   : > { %v1347_v61 = vld [vmem:[%s1852_s1 + $0xa0] sm:$0xf]  ;;  %v1360_v62 = vor.u32 %v1436_v54, %v1357_v55  ;;  %v1435_v63 = vld [vmem:[%s1852_s1 + $0xa4] sm:$0xf0]  ;;  %v1418_v0 = vld [vmem:[%s1852_s1 + $0x24] sm:$0xf]  ;;  %v1284_v4 = vor.u32 %v1419_v60, %v1283_v59 }
  0x1b   : > { %666 = vmatpush.bf16.msra.mxu0 %v1300_v44  ;;  %v1285_v1 = vld [vmem:[%s1852_s1 + $0x28] sm:$0xf0]  ;;  %v1434_v2 = vld [vmem:[%s1852_s1 + $0xa4] sm:$0xf]  ;;  %v1275_v5 = vld [vmem:[%s1852_s1 + $0x10] sm:$0xf]  ;;  %v1348_v6 = vor.u32 %v1435_v63, %v1347_v61 }
  0x1c   : > { %715 = vmatpush.bf16.msra.mxu1 %v1364_v45  ;;  %764 = vmatpush.bf16.msra.mxu2 %v1304_v46  ;;  %v1349_v3 = vld [vmem:[%s1852_s1 + $0xa8] sm:$0xf0]  ;;  %v1288_v7 = vor.u32 %v1418_v0, %v1285_v1  ;;  %v1417_v8 = vld [vmem:[%s1852_s1 + $0x14] sm:$0xf0]  ;;  %v1339_v9 = vld [vmem:[%s1852_s1 + $0x90] sm:$0xf] }
  0x1d   : > { %813 = vmatpush.bf16.msra.mxu3 %v1368_v50  ;;  %v1433_v10 = vld [vmem:[%s1852_s1 + $0x94] sm:$0xf0]  ;;  %v1352_v11 = vor.u32 %v1434_v2, %v1349_v3  ;;  %v1416_v12 = vld [vmem:[%s1852_s1 + $0x14] sm:$0xf]  ;;  %v1277_v13 = vld [vmem:[%s1852_s1 + $0x18] sm:$0xf0]  ;;  %v1276_v16 = vor.u32 %v1417_v8, %v1275_v5 }
  0x1e   : > { %v1432_v14 = vld [vmem:[%s1852_s1 + $0x94] sm:$0xf]  ;;  %v1341_v15 = vld [vmem:[%s1852_s1 + $0x98] sm:$0xf0]  ;;  %v1267_v17 = vld [vmem:[%s1852_s1] sm:$0xf]  ;;  %v1340_v18 = vor.u32 %v1433_v10, %v1339_v9  ;;  %v1280_v19 = vor.u32 %v1416_v12, %v1277_v13 }
  0x1f   : > { %667 = vmatpush.bf16.msra.mxu0 %v1292_v56  ;;  %v1415_v20 = vld [vmem:[%s1852_s1 + $0x4] sm:$0xf0]  ;;  %v1331_v21 = vld [vmem:[%s1852_s1 + $0x80] sm:$0xf]  ;;  %s1860_s5 = smov (!%p261_p4, %s1192_s5), 31  ;;  %v1344_v22 = vor.u32 %v1432_v14, %v1341_v15 }
  0x20   : > { %716 = vmatpush.bf16.msra.mxu1 %v1356_v57  ;;  %765 = vmatpush.bf16.msra.mxu2 %v1296_v58  ;;  %v1431_v23 = vld [vmem:[%s1852_s1 + $0x84] sm:$0xf0]  ;;  %v1414_v24 = vld [vmem:[%s1852_s1 + $0x4] sm:$0xf]  ;;  %v1269_v25 = vld [vmem:[%s1852_s1 + $0x8] sm:$0xf0]  ;;  %v1268_v28 = vor.u32 %v1415_v20, %v1267_v17 }
  0x21   : > { %814 = vmatpush.bf16.msra.mxu3 %v1360_v62  ;;  %v1430_v26 = vld [vmem:[%s1852_s1 + $0x84] sm:$0xf]  ;;  %v1333_v27 = vld [vmem:[%s1852_s1 + $0x88] sm:$0xf0]  ;;  %s1395_s29 = sshll.u32 %s1860_s5, 3  ;;  %v1332_v29 = vor.u32 %v1431_v23, %v1331_v21  ;;  %v1272_v30 = vor.u32 %v1414_v24, %v1269_v25  ;;  %s1396_s7 = sshll.u32 %s1860_s5, 4 }
  0x22   : > { %s1733_s6 = scalar_lea.vmem %s1851_s0, %s1395_s29  ;;  %v1336_v34 = vor.u32 %v1430_v26, %v1333_v27  ;;  %s1771_s10 = scalar_lea.vmem %s1853_s2, %s1396_s7 }
  0x23   : > { %668 = vmatpush.bf16.msra.mxu0 %v1284_v4  ;;  %v1203_v31 = vld [vmem:[%s1733_s6] sm:$0xf]  ;;  %v1399_v32 = vld [vmem:[%s1733_s6 + $0x4] sm:$0xf0]  ;;  %v1398_v33 = vld [vmem:[%s1733_s6 + $0x4] sm:$0xf]  ;;  %s1777_s16 = scalar_lea.vmem %s1854_s3, %s1396_s7 }
  0x24   : > { %717 = vmatpush.bf16.msra.mxu1 %v1348_v6  ;;  %766 = vmatpush.bf16.msra.mxu2 %v1288_v7  ;;  %v1205_v35 = vld [vmem:[%s1733_s6 + $0x8] sm:$0xf0]  ;;  %v1204_v36 = vor.u32 %v1399_v32, %v1203_v31  ;;  %v1211_v38 = vld [vmem:[%s1733_s6 + $0x10] sm:$0xf]  ;;  %v1401_v39 = vld [vmem:[%s1733_s6 + $0x14] sm:$0xf0] }
  0x25   : > { %815 = vmatpush.bf16.msra.mxu3 %v1352_v11  ;;  %v1208_v37 = vor.u32 %v1398_v33, %v1205_v35  ;;  %v1400_v40 = vld [vmem:[%s1733_s6 + $0x14] sm:$0xf]  ;;  %v1213_v41 = vld [vmem:[%s1733_s6 + $0x18] sm:$0xf0]  ;;  %v1212_v42 = vor.u32 %v1401_v39, %v1211_v38  ;;  %v1219_v44 = vld [vmem:[%s1733_s6 + $0x20] sm:$0xf] }
  0x26   : > { %v1216_v43 = vor.u32 %v1400_v40, %v1213_v41  ;;  %v1403_v45 = vld [vmem:[%s1733_s6 + $0x24] sm:$0xf0]  ;;  %v1402_v46 = vld [vmem:[%s1733_s6 + $0x24] sm:$0xf]  ;;  %v1221_v47 = vld [vmem:[%s1733_s6 + $0x28] sm:$0xf0] }
  0x27   : > { %669 = vmatpush.bf16.msra.mxu0 %v1276_v16  ;;  %v1220_v48 = vor.u32 %v1403_v45, %v1219_v44  ;;  %v1224_v49 = vor.u32 %v1402_v46, %v1221_v47  ;;  %v1227_v50 = vld [vmem:[%s1733_s6 + $0x30] sm:$0xf]  ;;  %v1405_v51 = vld [vmem:[%s1733_s6 + $0x34] sm:$0xf0]  ;;  %v1404_v52 = vld [vmem:[%s1733_s6 + $0x34] sm:$0xf] }
  0x28   : > { %718 = vmatpush.bf16.msra.mxu1 %v1340_v18  ;;  %767 = vmatpush.bf16.msra.mxu2 %v1280_v19  ;;  %v1229_v53 = vld [vmem:[%s1733_s6 + $0x38] sm:$0xf0]  ;;  %v1228_v54 = vor.u32 %v1405_v51, %v1227_v50  ;;  %v1235_v56 = vld [vmem:[%s1733_s6 + $0x40] sm:$0xf]  ;;  %v1407_v57 = vld [vmem:[%s1733_s6 + $0x44] sm:$0xf0] }
  0x29   : > { %816 = vmatpush.bf16.msra.mxu3 %v1344_v22  ;;  %v1232_v55 = vor.u32 %v1404_v52, %v1229_v53  ;;  %v1406_v58 = vld [vmem:[%s1733_s6 + $0x44] sm:$0xf]  ;;  %v1237_v59 = vld [vmem:[%s1733_s6 + $0x48] sm:$0xf0]  ;;  %v1236_v60 = vor.u32 %v1407_v57, %v1235_v56  ;;  %v1243_v62 = vld [vmem:[%s1733_s6 + $0x50] sm:$0xf] }
  0x2a   : > { %v1240_v61 = vor.u32 %v1406_v58, %v1237_v59  ;;  %v1409_v63 = vld [vmem:[%s1733_s6 + $0x54] sm:$0xf0]  ;;  %v1408_v0 = vld [vmem:[%s1733_s6 + $0x54] sm:$0xf]  ;;  %v1245_v1 = vld [vmem:[%s1733_s6 + $0x58] sm:$0xf0] }
  0x2b   : > { %670 = vmatpush.bf16.msra.mxu0 %v1268_v28  ;;  %v1244_v2 = vor.u32 %v1409_v63, %v1243_v62  ;;  %v1248_v3 = vor.u32 %v1408_v0, %v1245_v1  ;;  %v1251_v4 = vld [vmem:[%s1733_s6 + $0x60] sm:$0xf]  ;;  %v1411_v5 = vld [vmem:[%s1733_s6 + $0x64] sm:$0xf0]  ;;  %v1410_v6 = vld [vmem:[%s1733_s6 + $0x64] sm:$0xf] }
  0x2c   : > { %719 = vmatpush.bf16.msra.mxu1 %v1332_v29  ;;  %768 = vmatpush.bf16.msra.mxu2 %v1272_v30  ;;  %v1253_v7 = vld [vmem:[%s1733_s6 + $0x68] sm:$0xf0]  ;;  %v1252_v8 = vor.u32 %v1411_v5, %v1251_v4  ;;  %v1259_v10 = vld [vmem:[%s1733_s6 + $0x70] sm:$0xf]  ;;  %v1413_v11 = vld [vmem:[%s1733_s6 + $0x74] sm:$0xf0] }
  0x2d   : > { %817 = vmatpush.bf16.msra.mxu3 %v1336_v34  ;;  %v1256_v9 = vor.u32 %v1410_v6, %v1253_v7  ;;  %v1412_v12 = vld [vmem:[%s1733_s6 + $0x74] sm:$0xf]  ;;  %v1261_v13 = vld [vmem:[%s1733_s6 + $0x78] sm:$0xf0]  ;;  %v1260_v14 = vor.u32 %v1413_v11, %v1259_v10  ;;  %v958_v18 = vld [vmem:[%s1771_s10] sm:$0xff] }
  0x2e   : > { %671 = vmatmul.bf16.vlgmr.msra.gmra.mxu0 %v1204_v36  ;;  %v1264_v15 = vor.u32 %v1412_v12, %v1261_v13  ;;  %v959_v23 = vld [vmem:[%s1771_s10 + $0x8] sm:$0xff]  ;;  %v960_v27 = vld [vmem:[%s1771_s10 + $0x10] sm:$0xff]  ;;  %v961_v33 = vld [vmem:[%s1771_s10 + $0x18] sm:$0xff] }
  0x2f   : > { %720 = vmatmul.bf16.vlgmr.msra.gmra.mxu1 %v1208_v37  ;;  %769 = vmatmul.bf16.vlgmr.msra.gmra.mxu2 %v1204_v36  ;;  %v964_v47 = vld [vmem:[%s1771_s10 + $0x30] sm:$0xff]  ;;  %v965_v53 = vld [vmem:[%s1771_s10 + $0x38] sm:$0xff]  ;;  %v966_v57 = vld [vmem:[%s1771_s10 + $0x40] sm:$0xff] }
  0x30   : > { %818 = vmatmul.bf16.vlgmr.msra.gmra.mxu3 %v1208_v37  ;;  %v962_v37 = vld [vmem:[%s1771_s10 + $0x20] sm:$0xff]  ;;  %v967_v63 = vld [vmem:[%s1771_s10 + $0x48] sm:$0xff] }
  0x31   : > { %v970_v13 = vld [vmem:[%s1771_s10 + $0x60] sm:$0xff] }
  0x3e   : > { %676 = vmatmul.bf16.gmra.mxu0 %v1212_v42 }
  0x3f   : > { %725 = vmatmul.bf16.gmra.mxu1 %v1216_v43  ;;  %774 = vmatmul.bf16.gmra.mxu2 %v1212_v42 }
  0x40   : > { %823 = vmatmul.bf16.gmra.mxu3 %v1216_v43  ;;  %v963_v43 = vld [vmem:[%s1771_s10 + $0x28] sm:$0xff] }
  0x4e   : > { %681 = vmatmul.bf16.gmra.mxu0 %v1220_v48 }
  0x4f   : > { %730 = vmatmul.bf16.gmra.mxu1 %v1224_v49  ;;  %779 = vmatmul.bf16.gmra.mxu2 %v1220_v48 }
  0x50   : > { %828 = vmatmul.bf16.gmra.mxu3 %v1224_v49 }
  0x5e   : > { %686 = vmatmul.bf16.gmra.mxu0 %v1228_v54 }
  0x5f   : > { %735 = vmatmul.bf16.gmra.mxu1 %v1232_v55  ;;  %784 = vmatmul.bf16.gmra.mxu2 %v1228_v54 }
  0x60   : > { %833 = vmatmul.bf16.gmra.mxu3 %v1232_v55 }
  0x6e   : > { %691 = vmatmul.bf16.gmra.mxu0 %v1236_v60 }
  0x6f   : > { %740 = vmatmul.bf16.gmra.mxu1 %v1240_v61  ;;  %789 = vmatmul.bf16.gmra.mxu2 %v1236_v60 }
  0x70   : > { %838 = vmatmul.bf16.gmra.mxu3 %v1240_v61 }
  0x7e   : > { %696 = vmatmul.bf16.gmra.mxu0 %v1244_v2 }
  0x7f   : > { %745 = vmatmul.bf16.gmra.mxu1 %v1248_v3  ;;  %794 = vmatmul.bf16.gmra.mxu2 %v1244_v2 }
  0x80   : > { %843 = vmatmul.bf16.gmra.mxu3 %v1248_v3  ;;  %v968_v3 = vld [vmem:[%s1771_s10 + $0x50] sm:$0xff] }
  0x8e   : > { %701 = vmatmul.bf16.gmra.mxu0 %v1252_v8 }
  0x8f   : > { %750 = vmatmul.bf16.gmra.mxu1 %v1256_v9  ;;  %799 = vmatmul.bf16.gmra.mxu2 %v1252_v8 }
  0x90   : > { %848 = vmatmul.bf16.gmra.mxu3 %v1256_v9  ;;  %v969_v9 = vld [vmem:[%s1771_s10 + $0x58] sm:$0xff] }
  0x9e   : > { %706 = vmatmul.bf16.gmra.mxu0 %v1260_v14 }
  0x9f   : > { %755 = vmatmul.bf16.gmra.mxu1 %v1264_v15  ;;  %804 = vmatmul.bf16.gmra.mxu2 %v1260_v14 }
  0xa0   : > { %853 = vmatmul.bf16.gmra.mxu3 %v1264_v15 }
  0xab   : > { %v672_v16 = vpop.f32.mrf.mxu0 }
  0xac   : > { %v721_v17 = vpop.f32.mrf.mxu1 }
  0xad   : > { %v722_v19 = vadd.f32 %v721_v17, %v672_v16 }
  0xaf   : > { %v990_v20 = vadd.f32 %v958_v18, %v722_v19  ;;  %v971_v19 = vld [vmem:[%s1771_s10 + $0x68] sm:$0xff] }
  0xb1   : > { %1022 = vst [vmem:[%s1777_s16] sm:$0xff] %v990_v20 }
  0xb2   : > { %v770_v21 = vpop.f32.mrf.mxu2 }
  0xb3   : > { %v819_v22 = vpop.f32.mrf.mxu3  ;;  %v674_v24 = vpop.f32.mrf.mxu0 }
  0xb4   : > { %v820_v25 = vadd.f32 %v819_v22, %v770_v21  ;;  %v723_v26 = vpop.f32.mrf.mxu1 }
  0xb5   : > { %v724_v28 = vadd.f32 %v723_v26, %v674_v24 }
  0xb6   : > { %v991_v29 = vadd.f32 %v959_v23, %v820_v25  ;;  %v972_v23 = vld [vmem:[%s1771_s10 + $0x70] sm:$0xff] }
  0xb7   : > { %v992_v30 = vadd.f32 %v960_v27, %v724_v28 }
  0xb8   : > { %1023 = vst [vmem:[%s1777_s16 + $0x8] sm:$0xff] %v991_v29  ;;  %v973_v29 = vld [vmem:[%s1771_s10 + $0x78] sm:$0xff] }
  0xb9   : > { %1024 = vst [vmem:[%s1777_s16 + $0x10] sm:$0xff] %v992_v30 }
  0xba   : > { %v772_v31 = vpop.f32.mrf.mxu2 }
  0xbb   : > { %v821_v32 = vpop.f32.mrf.mxu3  ;;  %v677_v34 = vpop.f32.mrf.mxu0 }
  0xbc   : > { %v822_v35 = vadd.f32 %v821_v32, %v772_v31  ;;  %v726_v36 = vpop.f32.mrf.mxu1 }
  0xbd   : > { %v727_v38 = vadd.f32 %v726_v36, %v677_v34 }
  0xbe   : > { %v993_v39 = vadd.f32 %v961_v33, %v822_v35  ;;  %v974_v33 = vld [vmem:[%s1771_s10 + $0x80] sm:$0xff] }
  0xbf   : > { %v994_v40 = vadd.f32 %v962_v37, %v727_v38 }
  0xc0   : > { %1025 = vst [vmem:[%s1777_s16 + $0x18] sm:$0xff] %v993_v39  ;;  %v975_v39 = vld [vmem:[%s1771_s10 + $0x88] sm:$0xff] }
  0xc1   : > { %1026 = vst [vmem:[%s1777_s16 + $0x20] sm:$0xff] %v994_v40 }
  0xc2   : > { %v775_v41 = vpop.f32.mrf.mxu2 }
  0xc3   : > { %v824_v42 = vpop.f32.mrf.mxu3  ;;  %v679_v44 = vpop.f32.mrf.mxu0 }
  0xc4   : > { %v825_v45 = vadd.f32 %v824_v42, %v775_v41  ;;  %v728_v46 = vpop.f32.mrf.mxu1 }
  0xc5   : > { %v729_v48 = vadd.f32 %v728_v46, %v679_v44 }
  0xc6   : > { %v995_v49 = vadd.f32 %v963_v43, %v825_v45  ;;  %v976_v43 = vld [vmem:[%s1771_s10 + $0x90] sm:$0xff] }
  0xc7   : > { %v996_v50 = vadd.f32 %v964_v47, %v729_v48 }
  0xc8   : > { %1027 = vst [vmem:[%s1777_s16 + $0x28] sm:$0xff] %v995_v49  ;;  %v977_v49 = vld [vmem:[%s1771_s10 + $0x98] sm:$0xff] }
  0xc9   : > { %1028 = vst [vmem:[%s1777_s16 + $0x30] sm:$0xff] %v996_v50 }
  0xca   : > { %v777_v51 = vpop.f32.mrf.mxu2 }
  0xcb   : > { %v826_v52 = vpop.f32.mrf.mxu3  ;;  %v682_v54 = vpop.f32.mrf.mxu0 }
  0xcc   : > { %v827_v55 = vadd.f32 %v826_v52, %v777_v51  ;;  %v731_v56 = vpop.f32.mrf.mxu1 }
  0xcd   : > { %v732_v58 = vadd.f32 %v731_v56, %v682_v54 }
  0xce   : > { %v997_v59 = vadd.f32 %v965_v53, %v827_v55  ;;  %v978_v53 = vld [vmem:[%s1771_s10 + $0xa0] sm:$0xff] }
  0xcf   : > { %v998_v60 = vadd.f32 %v966_v57, %v732_v58 }
  0xd0   : > { %1029 = vst [vmem:[%s1777_s16 + $0x38] sm:$0xff] %v997_v59  ;;  %v979_v59 = vld [vmem:[%s1771_s10 + $0xa8] sm:$0xff] }
  0xd1   : > { %1030 = vst [vmem:[%s1777_s16 + $0x40] sm:$0xff] %v998_v60 }
  0xd2   : > { %v780_v61 = vpop.f32.mrf.mxu2 }
  0xd3   : > { %v829_v62 = vpop.f32.mrf.mxu3  ;;  %v684_v0 = vpop.f32.mrf.mxu0 }
  0xd4   : > { %v830_v1 = vadd.f32 %v829_v62, %v780_v61  ;;  %v733_v2 = vpop.f32.mrf.mxu1 }
  0xd5   : > { %v734_v4 = vadd.f32 %v733_v2, %v684_v0 }
  0xd6   : > { %v999_v5 = vadd.f32 %v967_v63, %v830_v1  ;;  %v980_v63 = vld [vmem:[%s1771_s10 + $0xb0] sm:$0xff] }
  0xd7   : > { %v1000_v6 = vadd.f32 %v968_v3, %v734_v4 }
  0xd8   : > { %1031 = vst [vmem:[%s1777_s16 + $0x48] sm:$0xff] %v999_v5  ;;  %v981_v5 = vld [vmem:[%s1771_s10 + $0xb8] sm:$0xff] }
  0xd9   : > { %1032 = vst [vmem:[%s1777_s16 + $0x50] sm:$0xff] %v1000_v6 }
  0xda   : > { %v782_v7 = vpop.f32.mrf.mxu2 }
  0xdb   : > { %v831_v8 = vpop.f32.mrf.mxu3  ;;  %v687_v10 = vpop.f32.mrf.mxu0 }
  0xdc   : > { %v832_v11 = vadd.f32 %v831_v8, %v782_v7  ;;  %v736_v12 = vpop.f32.mrf.mxu1 }
  0xdd   : > { %v737_v14 = vadd.f32 %v736_v12, %v687_v10 }
  0xde   : > { %v1001_v15 = vadd.f32 %v969_v9, %v832_v11  ;;  %v982_v9 = vld [vmem:[%s1771_s10 + $0xc0] sm:$0xff] }
  0xdf   : > { %v1002_v16 = vadd.f32 %v970_v13, %v737_v14 }
  0xe0   : > { %1033 = vst [vmem:[%s1777_s16 + $0x58] sm:$0xff] %v1001_v15  ;;  %v983_v15 = vld [vmem:[%s1771_s10 + $0xc8] sm:$0xff] }
  0xe1   : > { %1034 = vst [vmem:[%s1777_s16 + $0x60] sm:$0xff] %v1002_v16 }
  0xe2   : > { %v785_v17 = vpop.f32.mrf.mxu2 }
  0xe3   : > { %v834_v18 = vpop.f32.mrf.mxu3  ;;  %v689_v20 = vpop.f32.mrf.mxu0 }
  0xe4   : > { %v835_v21 = vadd.f32 %v834_v18, %v785_v17  ;;  %v738_v22 = vpop.f32.mrf.mxu1 }
  0xe5   : > { %v739_v24 = vadd.f32 %v738_v22, %v689_v20 }
  0xe6   : > { %v1003_v25 = vadd.f32 %v971_v19, %v835_v21  ;;  %v984_v19 = vld [vmem:[%s1771_s10 + $0xd0] sm:$0xff] }
  0xe7   : > { %v1004_v26 = vadd.f32 %v972_v23, %v739_v24 }
  0xe8   : > { %1035 = vst [vmem:[%s1777_s16 + $0x68] sm:$0xff] %v1003_v25  ;;  %v985_v25 = vld [vmem:[%s1771_s10 + $0xd8] sm:$0xff] }
  0xe9   : > { %1036 = vst [vmem:[%s1777_s16 + $0x70] sm:$0xff] %v1004_v26 }
  0xea   : > { %v787_v27 = vpop.f32.mrf.mxu2 }
  0xeb   : > { %v836_v28 = vpop.f32.mrf.mxu3  ;;  %v692_v30 = vpop.f32.mrf.mxu0 }
  0xec   : > { %v837_v31 = vadd.f32 %v836_v28, %v787_v27  ;;  %v741_v32 = vpop.f32.mrf.mxu1 }
  0xed   : > { %v742_v34 = vadd.f32 %v741_v32, %v692_v30 }
  0xee   : > { %v1005_v35 = vadd.f32 %v973_v29, %v837_v31  ;;  %v986_v29 = vld [vmem:[%s1771_s10 + $0xe0] sm:$0xff] }
  0xef   : > { %v1006_v36 = vadd.f32 %v974_v33, %v742_v34 }
  0xf0   : > { %1037 = vst [vmem:[%s1777_s16 + $0x78] sm:$0xff] %v1005_v35  ;;  %v987_v35 = vld [vmem:[%s1771_s10 + $0xe8] sm:$0xff] }
  0xf1   : > { %1038 = vst [vmem:[%s1777_s16 + $0x80] sm:$0xff] %v1006_v36 }
  0xf2   : > { %v790_v37 = vpop.f32.mrf.mxu2 }
  0xf3   : > { %v839_v38 = vpop.f32.mrf.mxu3  ;;  %v694_v40 = vpop.f32.mrf.mxu0 }
  0xf4   : > { %v840_v41 = vadd.f32 %v839_v38, %v790_v37  ;;  %v743_v42 = vpop.f32.mrf.mxu1 }
  0xf5   : > { %v744_v44 = vadd.f32 %v743_v42, %v694_v40 }
  0xf6   : > { %v1007_v45 = vadd.f32 %v975_v39, %v840_v41  ;;  %v988_v39 = vld [vmem:[%s1771_s10 + $0xf0] sm:$0xff] }
  0xf7   : > { %v1008_v46 = vadd.f32 %v976_v43, %v744_v44 }
  0xf8   : > { %1039 = vst [vmem:[%s1777_s16 + $0x88] sm:$0xff] %v1007_v45  ;;  %v989_v45 = vld [vmem:[%s1771_s10 + $0xf8] sm:$0xff] }
  0xf9   : > { %1040 = vst [vmem:[%s1777_s16 + $0x90] sm:$0xff] %v1008_v46 }
  0xfa   : > { %v792_v47 = vpop.f32.mrf.mxu2 }
  0xfb   : > { %v841_v48 = vpop.f32.mrf.mxu3  ;;  %v697_v50 = vpop.f32.mrf.mxu0 }
  0xfc   : > { %v842_v51 = vadd.f32 %v841_v48, %v792_v47  ;;  %v746_v52 = vpop.f32.mrf.mxu1 }
  0xfd   : > { %v747_v54 = vadd.f32 %v746_v52, %v697_v50 }
  0xfe   : > { %v1009_v55 = vadd.f32 %v977_v49, %v842_v51 }
  0xff   : > { %v1010_v56 = vadd.f32 %v978_v53, %v747_v54 }
 0x100   : > { %1041 = vst [vmem:[%s1777_s16 + $0x98] sm:$0xff] %v1009_v55 }
 0x101   : > { %1042 = vst [vmem:[%s1777_s16 + $0xa0] sm:$0xff] %v1010_v56 }
 0x102   : > { %v795_v57 = vpop.f32.mrf.mxu2 }
 0x103   : > { %v844_v58 = vpop.f32.mrf.mxu3  ;;  %v699_v60 = vpop.f32.mrf.mxu0 }
 0x104   : > { %v845_v61 = vadd.f32 %v844_v58, %v795_v57  ;;  %v748_v62 = vpop.f32.mrf.mxu1 }
 0x105   : > { %v749_v0 = vadd.f32 %v748_v62, %v699_v60 }
 0x106   : > { %v1011_v1 = vadd.f32 %v979_v59, %v845_v61 }
 0x107   : > { %v1012_v2 = vadd.f32 %v980_v63, %v749_v0 }
 0x108   : > { %1043 = vst [vmem:[%s1777_s16 + $0xa8] sm:$0xff] %v1011_v1 }
 0x109   : > { %1044 = vst [vmem:[%s1777_s16 + $0xb0] sm:$0xff] %v1012_v2 }
 0x10a   : > { %v797_v3 = vpop.f32.mrf.mxu2 }
 0x10b   : > { %v846_v4 = vpop.f32.mrf.mxu3  ;;  %v702_v6 = vpop.f32.mrf.mxu0 }
 0x10c   : > { %v847_v7 = vadd.f32 %v846_v4, %v797_v3  ;;  %v751_v8 = vpop.f32.mrf.mxu1 }
 0x10d   : > { %v752_v10 = vadd.f32 %v751_v8, %v702_v6 }
 0x10e   : > { %v1013_v11 = vadd.f32 %v981_v5, %v847_v7 }
 0x10f   : > { %v1014_v12 = vadd.f32 %v982_v9, %v752_v10 }
 0x110   : > { %1045 = vst [vmem:[%s1777_s16 + $0xb8] sm:$0xff] %v1013_v11 }
 0x111   : > { %1046 = vst [vmem:[%s1777_s16 + $0xc0] sm:$0xff] %v1014_v12 }
 0x112   : > { %v800_v13 = vpop.f32.mrf.mxu2 }
 0x113   : > { %v849_v14 = vpop.f32.mrf.mxu3  ;;  %v704_v16 = vpop.f32.mrf.mxu0 }
 0x114   : > { %v850_v17 = vadd.f32 %v849_v14, %v800_v13  ;;  %v753_v18 = vpop.f32.mrf.mxu1 }
 0x115   : > { %v754_v20 = vadd.f32 %v753_v18, %v704_v16 }
 0x116   : > { %v1015_v21 = vadd.f32 %v983_v15, %v850_v17 }
 0x117   : > { %v1016_v22 = vadd.f32 %v984_v19, %v754_v20 }
 0x118   : > { %1047 = vst [vmem:[%s1777_s16 + $0xc8] sm:$0xff] %v1015_v21 }
 0x119   : > { %1048 = vst [vmem:[%s1777_s16 + $0xd0] sm:$0xff] %v1016_v22 }
 0x11a   : > { %v802_v23 = vpop.f32.mrf.mxu2 }
 0x11b   : > { %v851_v24 = vpop.f32.mrf.mxu3  ;;  %v707_v26 = vpop.f32.mrf.mxu0 }
 0x11c   : > { %v852_v27 = vadd.f32 %v851_v24, %v802_v23  ;;  %v756_v28 = vpop.f32.mrf.mxu1 }
 0x11d   : > { %v757_v30 = vadd.f32 %v756_v28, %v707_v26 }
 0x11e   : > { %v1017_v31 = vadd.f32 %v985_v25, %v852_v27 }
 0x11f   : > { %v1018_v32 = vadd.f32 %v986_v29, %v757_v30 }
 0x120   : > { %1049 = vst [vmem:[%s1777_s16 + $0xd8] sm:$0xff] %v1017_v31 }
 0x121   : > { %1050 = vst [vmem:[%s1777_s16 + $0xe0] sm:$0xff] %v1018_v32 }
 0x122   : > { %v805_v33 = vpop.f32.mrf.mxu2 }
 0x123   : > { %v854_v34 = vpop.f32.mrf.mxu3  ;;  %v709_v36 = vpop.f32.mrf.mxu0 }
 0x124   : > { %v855_v37 = vadd.f32 %v854_v34, %v805_v33  ;;  %v758_v38 = vpop.f32.mrf.mxu1 }
 0x125   : > { %v759_v40 = vadd.f32 %v758_v38, %v709_v36 }
 0x126   : > { %v1019_v41 = vadd.f32 %v987_v35, %v855_v37 }
 0x127   : > { %v1020_v42 = vadd.f32 %v988_v39, %v759_v40 }
 0x128   : > { %1051 = vst [vmem:[%s1777_s16 + $0xe8] sm:$0xff] %v1019_v41 }
 0x129   : > { %1052 = vst [vmem:[%s1777_s16 + $0xf0] sm:$0xff] %v1020_v42 }
 0x12a   : > { %v807_v43 = vpop.f32.mrf.mxu2 }
 0x12b   : > { %v856_v44 = vpop.f32.mrf.mxu3 }
 0x12c   : > { %v857_v46 = vadd.f32 %v856_v44, %v807_v43 }
 0x12e   : > { %v1021_v47 = vadd.f32 %v989_v45, %v857_v46 }
 0x130   : > { %1053 = vst [vmem:[%s1777_s16 + $0xf8] sm:$0xff] %v1021_v47 }
 0x131 PF: > { %s13_s14 = sadd.s32 1, %s1492_s14   ;;  %s1855_s12 = smov %s1488_s13 }
 0x132   : > { %p10_p5 = scmp.ge.s32.totalorder %s13_s14, 4   ;;  %s1856_s13 = smov %s1858_s15 }
 0x134   :  { %12 = sbr.rel (!%p10_p5) target bundleno = 2 (0x2), region = 76 }

// kernel: transformer_forward.17
= control target key start
LH: loop header
LB: loop body
LE: loop exit
PB: predicated region body
PF: predicated region fallthrough
CT: control target
= control target key end

     0   :  { %s1066_s12 = smov 0   ;;  %s1068_s13 = smov 0   ;;  %s1287_s0 = inlined_call_operand.vmem [shape: f32[2,256], index: 0, kind: input, shape index: {}]   ;;  %s1288_s1 = inlined_call_operand.vmem [shape: f32[1,256], index: 1, kind: input, shape index: {}]   ;;  %s1289_s2 = inlined_call_operand.vmem [shape: bf16[256,512], index: 2, kind: input, shape index: {}]   ;;  %s1290_s3 = inlined_call_operand.vmem [shape: f32[2,512], index: 3, kind: output, shape index: {}]  }
   0x1   :  { %s1070_s14 = smov 0   ;;  %s1072_s15 = smov 0  }
   0x2   :  { %s1074_s16 = smov 0  }
   0x3 LB: > { %s22_s17 = sadd.s32 1, %s1038_s15  ;;  %p86_p1 = scmp.ne.s32.totalorder %s1030_s13, %s1026_s12  ;;  %s1042_s16 = sphi %s1074_s16, %s13_s16   ;;  %s1038_s15 = sphi %s1072_s15, %s1294_s15   ;;  %s1034_s14 = sphi %s1070_s14, %s1293_s14   ;;  %s1030_s13 = sphi %s1068_s13, %s1292_s13   ;;  %s1026_s12 = sphi %s1066_s12, %s1291_s12  }
   0x4   : > { %p23_p0 = scmp.ge.s32.totalorder %s22_s17, 2  ;;  %p87_p2 = scmp.eq.s32.totalorder %s1042_s16, 0 }
   0x5   : > { %s79_s19 = sadd.s32 1, %s1030_s13  ;;  %p787_p5 = scmp.ge.s32.totalorder %s1042_s16, 2 }
   0x6   : > { %s1296_s17 = smov (%p23_p0, %s22_s17), 0  ;;  %p88_p3 = por %p87_p2, %p86_p1 }
   0x7   : > { %s76_s18 = ssub.s32 %s1038_s15, %s1296_s17  ;;  %151 = sbr.rel (%p787_p5) target bundleno = 48 (0x30), region = 24 }
   0x8   : > { %p77_p4 = scmp.eq.s32.totalorder %s76_s18, 0 }
   0xa   : > { %s1101_s20 = scalar_select %p77_p4, %s1030_s13, %s79_s19  }
   0xc   : > { %154 = sbr.rel (!%p88_p3) target bundleno = 48 (0x30), region = 28  ;;  %s156_s21 = sand.u32 (%p88_p3), 1, %s1030_s13  }
   0xd   : > { %s925_s22 = sshll.u32 (%p88_p3), %s1038_s15, 3  ;;  %s788_s23 = sshll.u32 (%p88_p3), %s156_s21, 8 }
   0xe   : > { %s1109_s26 = scalar_lea.vmem (%p88_p3), %s1289_s2, %s925_s22  ;;  %s1114_s27 = scalar_lea.vmem (%p88_p3), [#allocation2], %s788_s23 }
   0xf   : > { %v252_v0 = vld [vmem:[%s1109_s26] sm:$0xff] (%p88_p3)  ;;  %v254_v1 = vld [vmem:[%s1109_s26 + $0x10] sm:$0xff] (%p88_p3) }
  0x10   : > { %v256_v2 = vld [vmem:[%s1109_s26 + $0x20] sm:$0xff] (%p88_p3)  ;;  %253 = vst [vmem:[%s1114_s27] sm:$0xff] (%p88_p3), %v252_v0  ;;  %v258_v3 = vld [vmem:[%s1109_s26 + $0x30] sm:$0xff] (%p88_p3) }
  0x11   : > { %255 = vst [vmem:[%s1114_s27 + $0x8] sm:$0xff] %v254_v1  ;;  %v260_v4 = vld [vmem:[%s1109_s26 + $0x40] sm:$0xff]  ;;  %v262_v5 = vld [vmem:[%s1109_s26 + $0x50] sm:$0xff] }
  0x12   : > { %257 = vst [vmem:[%s1114_s27 + $0x10] sm:$0xff] %v256_v2  ;;  %v264_v6 = vld [vmem:[%s1109_s26 + $0x60] sm:$0xff]  ;;  %v266_v7 = vld [vmem:[%s1109_s26 + $0x70] sm:$0xff] }
  0x13   : > { %259 = vst [vmem:[%s1114_s27 + $0x18] sm:$0xff] %v258_v3  ;;  %v268_v8 = vld [vmem:[%s1109_s26 + $0x80] sm:$0xff]  ;;  %v270_v9 = vld [vmem:[%s1109_s26 + $0x90] sm:$0xff] }
  0x14   : > { %261 = vst [vmem:[%s1114_s27 + $0x20] sm:$0xff] %v260_v4  ;;  %v272_v10 = vld [vmem:[%s1109_s26 + $0xa0] sm:$0xff]  ;;  %v274_v11 = vld [vmem:[%s1109_s26 + $0xb0] sm:$0xff] }
  0x15   : > { %263 = vst [vmem:[%s1114_s27 + $0x28] sm:$0xff] %v262_v5  ;;  %v276_v12 = vld [vmem:[%s1109_s26 + $0xc0] sm:$0xff]  ;;  %v278_v13 = vld [vmem:[%s1109_s26 + $0xd0] sm:$0xff] }
  0x16   : > { %265 = vst [vmem:[%s1114_s27 + $0x30] sm:$0xff] %v264_v6  ;;  %v280_v14 = vld [vmem:[%s1109_s26 + $0xe0] sm:$0xff]  ;;  %v282_v15 = vld [vmem:[%s1109_s26 + $0xf0] sm:$0xff] }
  0x17   : > { %267 = vst [vmem:[%s1114_s27 + $0x38] sm:$0xff] %v266_v7  ;;  %v284_v16 = vld [vmem:[%s1109_s26 + $0x100] sm:$0xff]  ;;  %v286_v17 = vld [vmem:[%s1109_s26 + $0x110] sm:$0xff] }
  0x18   : > { %269 = vst [vmem:[%s1114_s27 + $0x40] sm:$0xff] %v268_v8  ;;  %v288_v18 = vld [vmem:[%s1109_s26 + $0x120] sm:$0xff]  ;;  %v290_v19 = vld [vmem:[%s1109_s26 + $0x130] sm:$0xff] }
  0x19   : > { %271 = vst [vmem:[%s1114_s27 + $0x48] sm:$0xff] %v270_v9  ;;  %v292_v20 = vld [vmem:[%s1109_s26 + $0x140] sm:$0xff]  ;;  %v294_v21 = vld [vmem:[%s1109_s26 + $0x150] sm:$0xff] }
  0x1a   : > { %273 = vst [vmem:[%s1114_s27 + $0x50] sm:$0xff] %v272_v10  ;;  %v296_v22 = vld [vmem:[%s1109_s26 + $0x160] sm:$0xff]  ;;  %v298_v23 = vld [vmem:[%s1109_s26 + $0x170] sm:$0xff] }
  0x1b   : > { %275 = vst [vmem:[%s1114_s27 + $0x58] sm:$0xff] %v274_v11  ;;  %v300_v24 = vld [vmem:[%s1109_s26 + $0x180] sm:$0xff]  ;;  %v302_v25 = vld [vmem:[%s1109_s26 + $0x190] sm:$0xff] }
  0x1c   : > { %277 = vst [vmem:[%s1114_s27 + $0x60] sm:$0xff] %v276_v12  ;;  %v304_v26 = vld [vmem:[%s1109_s26 + $0x1a0] sm:$0xff]  ;;  %v306_v27 = vld [vmem:[%s1109_s26 + $0x1b0] sm:$0xff] }
  0x1d   : > { %279 = vst [vmem:[%s1114_s27 + $0x68] sm:$0xff] %v278_v13  ;;  %v308_v28 = vld [vmem:[%s1109_s26 + $0x1c0] sm:$0xff]  ;;  %v310_v29 = vld [vmem:[%s1109_s26 + $0x1d0] sm:$0xff] }
  0x1e   : > { %281 = vst [vmem:[%s1114_s27 + $0x70] sm:$0xff] %v280_v14  ;;  %v312_v30 = vld [vmem:[%s1109_s26 + $0x1e0] sm:$0xff]  ;;  %v314_v31 = vld [vmem:[%s1109_s26 + $0x1f0] sm:$0xff] }
  0x1f   : > { %283 = vst [vmem:[%s1114_s27 + $0x78] sm:$0xff] %v282_v15 }
  0x20   : > { %285 = vst [vmem:[%s1114_s27 + $0x80] sm:$0xff] %v284_v16 }
  0x21   : > { %287 = vst [vmem:[%s1114_s27 + $0x88] sm:$0xff] %v286_v17 }
  0x22   : > { %289 = vst [vmem:[%s1114_s27 + $0x90] sm:$0xff] %v288_v18 }
  0x23   : > { %291 = vst [vmem:[%s1114_s27 + $0x98] sm:$0xff] %v290_v19 }
  0x24   : > { %293 = vst [vmem:[%s1114_s27 + $0xa0] sm:$0xff] %v292_v20 }
  0x25   : > { %295 = vst [vmem:[%s1114_s27 + $0xa8] sm:$0xff] %v294_v21 }
  0x26   : > { %297 = vst [vmem:[%s1114_s27 + $0xb0] sm:$0xff] %v296_v22 }
  0x27   : > { %299 = vst [vmem:[%s1114_s27 + $0xb8] sm:$0xff] %v298_v23 }
  0x28   : > { %301 = vst [vmem:[%s1114_s27 + $0xc0] sm:$0xff] %v300_v24 }
  0x29   : > { %303 = vst [vmem:[%s1114_s27 + $0xc8] sm:$0xff] %v302_v25 }
  0x2a   : > { %305 = vst [vmem:[%s1114_s27 + $0xd0] sm:$0xff] %v304_v26 }
  0x2b   : > { %307 = vst [vmem:[%s1114_s27 + $0xd8] sm:$0xff] %v306_v27 }
  0x2c   : > { %309 = vst [vmem:[%s1114_s27 + $0xe0] sm:$0xff] %v308_v28 }
  0x2d   : > { %311 = vst [vmem:[%s1114_s27 + $0xe8] sm:$0xff] %v310_v29 }
  0x2e   : > { %313 = vst [vmem:[%s1114_s27 + $0xf0] sm:$0xff] %v312_v30 }
  0x2f   : > { %315 = vst [vmem:[%s1114_s27 + $0xf8] sm:$0xff] %v314_v31 }
  0x30 PF: > { %p791_p6 = scmp.ge.s32.totalorder %s1042_s16, 1  ;;  %p320_p7 = scmp.lt.s32.totalorder %s1042_s16, 3 }
  0x32   : > { %p321_p8 = pnand %p791_p6, %p320_p7 }
  0x33   : > { %s327_s30 = sand.u32 (!%p321_p8), 1, %s1026_s12   ;;  %s793_s8 = sshll.u32 (!%p321_p8), %s1034_s14, 1 }
  0x34   : > { %324 = sbr.rel (%p321_p8) target bundleno = 366 (0x16e), region = 66  ;;  %s792_s4 = sshll.u32 (!%p321_p8), %s327_s30, 8 }
  0x35   : > { %s1189_s5 = scalar_lea.vmem (!%p321_p8), [#allocation2], %s792_s4  ;;  %p368_p9 = scmp.lt.s32.totalorder (!%p321_p8), %s793_s8, 3 }
  0x39   : > { %v1182_v32 = vld [vmem:[%s1287_s0] sm:$0xf]  ;;  %vm383_vm0 = vcmask 1041408   ;;  %v1044_v39 = vmov 256.0   ;;  %v853_v40 = vld [vmem:[%s1189_s5 + $0x70] sm:$0xf] }
  0x3a   : > { %v376_v33 = vmul.f32 %v1182_v32, %v1182_v32  ;;  %1000 = vrcp.f32 %v1044_v39  ;;  %v941_v41 = vld [vmem:[%s1189_s5 + $0x74] sm:$0xf0]  ;;  %v917_v42 = vld [vmem:[%s1189_s5 + $0xf0] sm:$0xf]  ;;  %v940_v45 = vld [vmem:[%s1189_s5 + $0x74] sm:$0xf] }
  0x3b   : > { %v854_v43 = vor.u32 %v941_v41, %v853_v40  ;;  %v957_v44 = vld [vmem:[%s1189_s5 + $0xf4] sm:$0xf0]  ;;  %v855_v46 = vld [vmem:[%s1189_s5 + $0x78] sm:$0xf0]  ;;  %v956_v49 = vld [vmem:[%s1189_s5 + $0xf4] sm:$0xf] }
  0x3c   : > { %378 = vst [vmem:[#allocation1] ss:$4 sm:$0xff] %v376_v33  ;;  %v918_v47 = vor.u32 %v957_v44, %v917_v42  ;;  %v858_v48 = vor.u32 %v940_v45, %v855_v46  ;;  %v919_v50 = vld [vmem:[%s1189_s5 + $0xf8] sm:$0xf0]  ;;  %v845_v53 = vld [vmem:[%s1189_s5 + $0x60] sm:$0xf] }
  0x3d   : > { %623 = vmatpush.bf16.msra.mxu0 %v854_v43  ;;  %v922_v51 = vor.u32 %v956_v49, %v919_v50  ;;  %v939_v54 = vld [vmem:[%s1189_s5 + $0x64] sm:$0xf0]  ;;  %v909_v55 = vld [vmem:[%s1189_s5 + $0xe0] sm:$0xf]  ;;  %v938_v58 = vld [vmem:[%s1189_s5 + $0x64] sm:$0xf] }
  0x3e   : > { %636 = vmatpush.bf16.msra.mxu1 %v918_v47  ;;  %649 = vmatpush.bf16.msra.mxu2 %v858_v48  ;;  %v846_v56 = vor.u32 %v939_v54, %v845_v53  ;;  %v955_v57 = vld [vmem:[%s1189_s5 + $0xe4] sm:$0xf0]  ;;  %v847_v59 = vld [vmem:[%s1189_s5 + $0x68] sm:$0xf0]  ;;  %v954_v62 = vld [vmem:[%s1189_s5 + $0xe4] sm:$0xf] }
  0x3f   : > { %662 = vmatpush.bf16.msra.mxu3 %v922_v51  ;;  %v910_v60 = vor.u32 %v955_v57, %v909_v55  ;;  %v850_v61 = vor.u32 %v938_v58, %v847_v59  ;;  %v911_v63 = vld [vmem:[%s1189_s5 + $0xe8] sm:$0xf0]  ;;  %v837_v2 = vld [vmem:[%s1189_s5 + $0x50] sm:$0xf]  ;;  %v937_v3 = vld [vmem:[%s1189_s5 + $0x54] sm:$0xf0] }
  0x40   : > { %v1199_v52 = vpop.eup %1000  ;;  %v914_v1 = vor.u32 %v954_v62, %v911_v63  ;;  %v901_v4 = vld [vmem:[%s1189_s5 + $0xd0] sm:$0xf]  ;;  %v838_v5 = vor.u32 %v937_v3, %v837_v2  ;;  %v953_v6 = vld [vmem:[%s1189_s5 + $0xd4] sm:$0xf0]  ;;  %v936_v7 = vld [vmem:[%s1189_s5 + $0x54] sm:$0xf] }
  0x41   : > { %v390_v0 = vmul.f32 256.0, %v1199_v52  ;;  %624 = vmatpush.bf16.msra.mxu0 %v846_v56  ;;  %v839_v8 = vld [vmem:[%s1189_s5 + $0x58] sm:$0xf0]  ;;  %v902_v9 = vor.u32 %v953_v6, %v901_v4  ;;  %v952_v11 = vld [vmem:[%s1189_s5 + $0xd4] sm:$0xf]  ;;  %vm394_vm1 = vweird.f32 %v1199_v52  ;;  %s1298_s8 = smov (!%p368_p9, %s793_s8), 3 }
  0x42   : > { %637 = vmatpush.bf16.msra.mxu1 %v910_v60  ;;  %650 = vmatpush.bf16.msra.mxu2 %v850_v61  ;;  %v842_v10 = vor.u32 %v936_v7, %v839_v8  ;;  %v903_v12 = vld [vmem:[%s1189_s5 + $0xd8] sm:$0xf0]  ;;  %v829_v14 = vld [vmem:[%s1189_s5 + $0x40] sm:$0xf]  ;;  %v935_v15 = vld [vmem:[%s1189_s5 + $0x44] sm:$0xf0] }
  0x43   : > { %v379_v34 = vld.sshfl [vmem:[#allocation1] sm:$0xff pattern:$0x73625140]  ;;  %v380_v35 = vld.sshfl [vmem:[#allocation1 + $0x8] sm:$0xff pattern:$0x73625140]  ;;  %663 = vmatpush.bf16.msra.mxu3 %v914_v1  ;;  %v906_v13 = vor.u32 %v952_v11, %v903_v12  ;;  %v830_v18 = vor.u32 %v935_v15, %v829_v14 }
  0x44   : > { %v384_v36 = vsel %vm383_vm0, %v379_v34, 0.0  ;;  %v385_v37 = vsel %vm383_vm0, %v380_v35, 0.0  ;;  %v893_v16 = vld [vmem:[%s1189_s5 + $0xc0] sm:$0xf]  ;;  %v391_v17 = vsub.f32 1.0, %v390_v0  ;;  %s794_s9 = sshll.u32 %s1298_s8, 1 }
  0x45   : > { %v386_v38 = vadd.f32 %v385_v37, %v384_v36  ;;  %625 = vmatpush.bf16.msra.mxu0 %v838_v5  ;;  %v951_v19 = vld [vmem:[%s1189_s5 + $0xc4] sm:$0xf0]  ;;  %v934_v20 = vld [vmem:[%s1189_s5 + $0x44] sm:$0xf]  ;;  %v831_v22 = vld [vmem:[%s1189_s5 + $0x48] sm:$0xf0]  ;;  %s373_s12 = scalar_lea.vmem %s1290_s3, %s794_s9 }
  0x46   : > { %638 = vmatpush.bf16.msra.mxu1 %v902_v9  ;;  %651 = vmatpush.bf16.msra.mxu2 %v842_v10  ;;  %v894_v21 = vor.u32 %v951_v19, %v893_v16  ;;  %v950_v23 = vld [vmem:[%s1189_s5 + $0xc4] sm:$0xf]  ;;  %v895_v24 = vld [vmem:[%s1189_s5 + $0xc8] sm:$0xf0]  ;;  %v834_v25 = vor.u32 %v934_v20, %v831_v22  ;;  %v821_v27 = vld [vmem:[%s1189_s5 + $0x30] sm:$0xf]  ;;  %v392_v30 = vmul.f32 %v1199_v52, %v391_v17 }
  0x47   : > { %387 = vadd.xlane.f32.xlu0 %v386_v38  ;;  %664 = vmatpush.bf16.msra.mxu3 %v906_v13  ;;  %v898_v26 = vor.u32 %v950_v23, %v895_v24  ;;  %v933_v28 = vld [vmem:[%s1189_s5 + $0x34] sm:$0xf0]  ;;  %v885_v29 = vld [vmem:[%s1189_s5 + $0xb0] sm:$0xf]  ;;  %v932_v34 = vld [vmem:[%s1189_s5 + $0x34] sm:$0xf] }
  0x48   : > { %v822_v31 = vor.u32 %v933_v28, %v821_v27  ;;  %v949_v33 = vld [vmem:[%s1189_s5 + $0xb4] sm:$0xf0]  ;;  %v823_v35 = vld [vmem:[%s1189_s5 + $0x38] sm:$0xf0]  ;;  %v948_v38 = vld [vmem:[%s1189_s5 + $0xb4] sm:$0xf]  ;;  %v393_v44 = vadd.f32 %v1199_v52, %v392_v30 }
  0x49   : > { %626 = vmatpush.bf16.msra.mxu0 %v830_v18  ;;  %v886_v36 = vor.u32 %v949_v33, %v885_v29  ;;  %v826_v37 = vor.u32 %v932_v34, %v823_v35  ;;  %v887_v39 = vld [vmem:[%s1189_s5 + $0xb8] sm:$0xf0]  ;;  %v813_v41 = vld [vmem:[%s1189_s5 + $0x20] sm:$0xf]  ;;  %v931_v42 = vld [vmem:[%s1189_s5 + $0x24] sm:$0xf0] }
  0x4a   : > { %639 = vmatpush.bf16.msra.mxu1 %v894_v21  ;;  %652 = vmatpush.bf16.msra.mxu2 %v834_v25  ;;  %v890_v40 = vor.u32 %v948_v38, %v887_v39  ;;  %v877_v43 = vld [vmem:[%s1189_s5 + $0xa0] sm:$0xf]  ;;  %v814_v45 = vor.u32 %v931_v42, %v813_v41  ;;  %v947_v46 = vld [vmem:[%s1189_s5 + $0xa4] sm:$0xf0]  ;;  %v930_v47 = vld [vmem:[%s1189_s5 + $0x24] sm:$0xf]  ;;  %v395_v58 = vsel %vm394_vm1, %v1199_v52, %v393_v44 }
  0x4b   : > { %665 = vmatpush.bf16.msra.mxu3 %v898_v26  ;;  %v815_v48 = vld [vmem:[%s1189_s5 + $0x28] sm:$0xf0]  ;;  %v878_v49 = vor.u32 %v947_v46, %v877_v43  ;;  %v946_v51 = vld [vmem:[%s1189_s5 + $0xa4] sm:$0xf]  ;;  %v805_v55 = vld [vmem:[%s1189_s5 + $0x10] sm:$0xf] }
  0x4c   : > { %v818_v50 = vor.u32 %v930_v47, %v815_v48  ;;  %v879_v53 = vld [vmem:[%s1189_s5 + $0xa8] sm:$0xf0]  ;;  %v929_v56 = vld [vmem:[%s1189_s5 + $0x14] sm:$0xf0]  ;;  %v869_v57 = vld [vmem:[%s1189_s5 + $0x90] sm:$0xf] }
  0x4d   : > { %627 = vmatpush.bf16.msra.mxu0 %v822_v31  ;;  %v882_v54 = vor.u32 %v946_v51, %v879_v53  ;;  %v806_v59 = vor.u32 %v929_v56, %v805_v55  ;;  %v945_v60 = vld [vmem:[%s1189_s5 + $0x94] sm:$0xf0]  ;;  %v928_v61 = vld [vmem:[%s1189_s5 + $0x14] sm:$0xf]  ;;  %v807_v62 = vld [vmem:[%s1189_s5 + $0x18] sm:$0xf0] }
  0x4e   : > { %640 = vmatpush.bf16.msra.mxu1 %v886_v36  ;;  %653 = vmatpush.bf16.msra.mxu2 %v826_v37  ;;  %v870_v63 = vor.u32 %v945_v60, %v869_v57  ;;  %v810_v0 = vor.u32 %v928_v61, %v807_v62  ;;  %v944_v1 = vld [vmem:[%s1189_s5 + $0x94] sm:$0xf]  ;;  %v871_v2 = vld [vmem:[%s1189_s5 + $0x98] sm:$0xf0]  ;;  %v797_v3 = vld [vmem:[%s1189_s5] sm:$0xf] }
  0x4f   : > { %666 = vmatpush.bf16.msra.mxu3 %v890_v40  ;;  %v874_v52 = vor.u32 %v944_v1, %v871_v2  ;;  %v927_v5 = vld [vmem:[%s1189_s5 + $0x4] sm:$0xf0]  ;;  %v861_v6 = vld [vmem:[%s1189_s5 + $0x80] sm:$0xf]  ;;  %v926_v11 = vld [vmem:[%s1189_s5 + $0x4] sm:$0xf] }
  0x50   : > { %v943_v7 = vld [vmem:[%s1189_s5 + $0x84] sm:$0xf0]  ;;  %v798_v9 = vor.u32 %v927_v5, %v797_v3  ;;  %v799_v12 = vld [vmem:[%s1189_s5 + $0x8] sm:$0xf0]  ;;  %v942_v13 = vld [vmem:[%s1189_s5 + $0x84] sm:$0xf] }
  0x51   : > { %628 = vmatpush.bf16.msra.mxu0 %v814_v45  ;;  %v862_v10 = vor.u32 %v943_v7, %v861_v6  ;;  %v802_v14 = vor.u32 %v926_v11, %v799_v12  ;;  %v863_v15 = vld [vmem:[%s1189_s5 + $0x88] sm:$0xf0]  ;;  %v415_v20 = vld [vmem:[%s1288_s1] sm:$0x3]  ;;  %v1045_v22 = vmov 269488144  }
  0x52   : > { %641 = vmatpush.bf16.msra.mxu1 %v878_v49  ;;  %654 = vmatpush.bf16.msra.mxu2 %v818_v50  ;;  %v866_v17 = vor.u32 %v942_v13, %v863_v15  ;;  %v410_v23 = vunpack.c.l.s4 %v1045_v22  ;;  %v418_v24 = vperm.slane %v415_v20, 1  ;;  %v417_v28 = vperm.slane %v415_v20, 0 }
  0x53   : > { %667 = vmatpush.bf16.msra.mxu3 %v882_v54 }
  0x54   : > { %v411_v27 = vunpack.c.0.s8 %v410_v23  ;;  %v419_v29 = vrot.slane %v418_v24, 6 }
  0x55   : > { %629 = vmatpush.bf16.msra.mxu0 %v806_v59 }
  0x56   : > { %642 = vmatpush.bf16.msra.mxu1 %v870_v63  ;;  %655 = vmatpush.bf16.msra.mxu2 %v810_v0  ;;  %v420_v34 = vsel %vm383_vm0, %v417_v28, %v419_v29 }
  0x57   : > { %668 = vmatpush.bf16.msra.mxu3 %v874_v52 }
  0x59   : > { %630 = vmatpush.bf16.msra.mxu0 %v798_v9 }
  0x5a   : > { %643 = vmatpush.bf16.msra.mxu1 %v862_v10  ;;  %656 = vmatpush.bf16.msra.mxu2 %v802_v14 }
  0x5b   : > { %669 = vmatpush.bf16.msra.mxu3 %v866_v17 }
  0xba   : > { %v388_v4 = vpop.xlane.xlu0 %387 }
  0xbb   : > { %v396_v8 = vmul.f32 %v395_v58, %v388_v4 }
  0xbd   : > { %v397_v16 = vadd.f32 1e-05, %v396_v8 }
  0xbf   : > { %1002 = vrsqrt.f32 %v397_v16  ;;  %vm404_vm3 = vweird.f32 %v397_v16 }
  0xc5   : > { %v1003_v18 = vpop.eup %1002 }
  0xc6   : > { %v399_v19 = vmul.f32 %v1003_v18, %v397_v16  ;;  %vm405_vm2 = vweird.f32 %v1003_v18 }
  0xc7   : > { %vm406_vm4 = vmor %vm404_vm3, %vm405_vm2 }
  0xc8   : > { %v400_v21 = vmul.f32 %v1003_v18, %v399_v19 }
  0xca   : > { %v401_v25 = vmul.f32 0.5, %v400_v21 }
  0xcc   : > { %v402_v26 = vsub.f32 1.5, %v401_v25 }
  0xce   : > { %v403_v30 = vmul.f32 %v1003_v18, %v402_v26 }
  0xd0   : > { %v407_v31 = vsel %vm406_vm4, %v1003_v18, %v403_v30 }
  0xd1   : > { %v412_v33 = vperm.slane %v407_v31, %v411_v27 }
  0xd3   : > { %v414_v35 = vmul.f32 %v412_v33, %v1182_v32 }
  0xd5   : > { %v422_v36 = vmul.f32 %v420_v34, %v414_v35 }
  0xd7   : > { %424 = vst [vmem:[#allocation1] ss:$4 sm:$0xff] %v422_v36 }
  0xde   : > { %v425_v37 = vld.sshfl [vmem:[#allocation1] sm:$0xff pattern:$0x73625140]  ;;  %v426_v38 = vld.sshfl [vmem:[#allocation1 + $0x8] sm:$0xff pattern:$0x73625140] }
  0xdf   : > { %v429_v39 = vpack.c.bf16 %v425_v37, %v425_v37  ;;  %v430_v40 = vpack.c.bf16 %v426_v38, %v426_v38 }
  0xe1   : > { %631 = vmatmul.bf16.vlgmr.msra.gmra.mxu0 %v429_v39  ;;  %644 = vmatmul.bf16.vlgmr.msra.gmra.mxu1 %v430_v40 }
  0xe2   : > { %657 = vmatmul.bf16.vlgmr.msra.gmra.mxu2 %v429_v39  ;;  %670 = vmatmul.bf16.vlgmr.msra.gmra.mxu3 %v430_v40 }
 0x15e   : > { %v632_v41 = vpop.f32.mrf.mxu0  ;;  %v645_v42 = vpop.f32.mrf.mxu1 }
 0x15f   : > { %v646_v47 = vadd.f32 %v645_v42, %v632_v41 }
 0x165   : > { %v658_v43 = vpop.f32.mrf.mxu2  ;;  %v671_v44 = vpop.f32.mrf.mxu3 }
 0x166   : > { %v672_v45 = vadd.f32 %v671_v44, %v658_v43  ;;  %v634_v32 = vpop.f32.mrf.mxu0  ;;  %v647_v46 = vpop.f32.mrf.mxu1 }
 0x168   : > { %v677_v48 = vrot.slane %v672_v45, 6 }
 0x16a   : > { %v678_v49 = vsel %vm383_vm0, %v646_v47, %v677_v48 }
 0x16b   : > { %680 = vst [vmem:[%s373_s12] sm:$0xf] %v678_v49 }
 0x16d   : > { %v660_v50 = vpop.f32.mrf.mxu2  ;;  %v673_v51 = vpop.f32.mrf.mxu3 }
 0x16e PF: > { %s13_s16 = sadd.s32 1, %s1042_s16   ;;  %s1291_s12 = smov %s1030_s13 }
 0x16f   : > { %p10_p10 = scmp.ge.s32.totalorder %s13_s16, 4   ;;  %s1292_s13 = smov %s1101_s20 }
 0x170   : > { %s1293_s14 = smov %s1038_s15  ;;  %s1294_s15 = smov %s1296_s17 }
 0x171   :  { %12 = sbr.rel (!%p10_p10) target bundleno = 3 (0x3), region = 108 }

// kernel: transformer_forward.12
= control target key start
LH: loop header
LB: loop body
LE: loop exit
PB: predicated region body
PF: predicated region fallthrough
CT: control target
= control target key end

     0   :  { %s4306_s18 = smov 0   ;;  %s4308_s19 = smov 0   ;;  %s6541_s0 = inlined_call_operand.vmem [shape: f32[256,256], index: 0, kind: input, shape index: {}]   ;;  %s6542_s1 = inlined_call_operand.vmem [shape: f32[1,256], index: 1, kind: input, shape index: {}]   ;;  %s6543_s2 = inlined_call_operand.vmem [shape: bf16[256,768], index: 2, kind: input, shape index: {}]   ;;  %s6544_s3 = inlined_call_operand.vmem [shape: bf16[256,768], index: 3, kind: input, shape index: {}]   ;;  %s6545_s4 = inlined_call_operand.vmem [shape: bf16[768,256], index: 4, kind: input, shape index: {}]   ;;  %s6546_s5 = inlined_call_operand.vmem [shape: f32[256,256], index: 5, kind: output, shape index: {}]  }
   0x1   :  { %s4310_s20 = smov 0   ;;  %s4312_s21 = smov 0  }
   0x2   :  { %s4314_s22 = smov 0   ;;  %s4316_s23 = smov 0  }
   0x3   :  { %s4318_s24 = smov 0  }
   0x4 LB: > { %s24_s25 = sadd.s32 1, %s4264_s22  ;;  %s27_s26 = sadd.s32 1, %s4268_s23  ;;  %s4272_s24 = sphi %s4318_s24, %s15_s24   ;;  %s4268_s23 = sphi %s4316_s23, %s6717_s23   ;;  %s4264_s22 = sphi %s4314_s22, %s6716_s22   ;;  %s4260_s21 = sphi %s4312_s21, %s6715_s21   ;;  %s4256_s20 = sphi %s4310_s20, %s6714_s20   ;;  %s4252_s19 = sphi %s4308_s19, %s6713_s19   ;;  %s4248_s18 = sphi %s4306_s18, %s6712_s18  }
   0x5   : > { %p25_p0 = scmp.ge.s32.totalorder %s24_s25, 3  ;;  %s81_s27 = sadd.s32 1, %s4252_s19 }
   0x6   : > { %p88_p1 = scmp.ne.s32.totalorder %s4252_s19, %s4248_s18  ;;  %p89_p2 = scmp.eq.s32.totalorder %s4272_s24, 0 }
   0x7   : > { %s6719_s25 = smov (%p25_p0, %s24_s25), 0  ;;  %s6721_s26 = smov (!%p25_p0, %s27_s26), %s4268_s23 }
   0x8   : > { %s78_s28 = ssub.s32 %s4264_s22, %s6719_s25  ;;  %p4352_p3 = por %p89_p2, %p88_p1 }
   0x9   : > { %p29_p4 = scmp.ge.s32.totalorder %s6721_s26, 2  ;;  %p79_p5 = scmp.eq.s32.totalorder %s78_s28, 0 }
   0xa   : > { %p3378_p6 = scmp.ge.s32.totalorder %s4272_s24, 6 }
   0xb   : > { %s6723_s26 = smov (%p29_p4, %s6721_s26), 0 }
   0xc   : > { %s4359_s30 = scalar_select %p79_p5, %s4252_s19, %s81_s27  }
   0xd   : > { %195 = sbr.rel (%p3378_p6) target bundleno = 90 (0x5a), region = 20 }
  0x12   : > { %208 = sbr.rel (!%p4352_p3) target bundleno = 54 (0x36), region = 28  ;;  %s210_s6 = sand.u32 (%p4352_p3), 1, %s4252_s19  }
  0x13   : > { %s3881_s7 = sshll.u32 (%p4352_p3), %s4264_s22, 3  ;;  %s3379_s8 = sshll.u32 (%p4352_p3), %s210_s6, 8 }
  0x14   : > { %s4369_s11 = scalar_lea.vmem (%p4352_p3), %s6543_s2, %s3881_s7  ;;  %s4374_s12 = scalar_lea.vmem (%p4352_p3), [#allocation4], %s3379_s8 }
  0x15   : > { %v306_v0 = vld [vmem:[%s4369_s11] sm:$0xff] (%p4352_p3)  ;;  %v308_v1 = vld [vmem:[%s4369_s11 + $0x18] sm:$0xff] (%p4352_p3)  ;;  %v310_v2 = vld [vmem:[%s4369_s11 + $0x30] sm:$0xff] (%p4352_p3) }
  0x16   : > { %307 = vst [vmem:[%s4374_s12] sm:$0xff] (%p4352_p3), %v306_v0  ;;  %v312_v3 = vld [vmem:[%s4369_s11 + $0x48] sm:$0xff] (%p4352_p3)  ;;  %v314_v4 = vld [vmem:[%s4369_s11 + $0x60] sm:$0xff] (%p4352_p3)  ;;  %v316_v5 = vld [vmem:[%s4369_s11 + $0x78] sm:$0xff] (%p4352_p3) }
  0x17   : > { %309 = vst [vmem:[%s4374_s12 + $0x8] sm:$0xff] %v308_v1  ;;  %v318_v6 = vld [vmem:[%s4369_s11 + $0x90] sm:$0xff]  ;;  %v320_v7 = vld [vmem:[%s4369_s11 + $0xa8] sm:$0xff]  ;;  %v322_v8 = vld [vmem:[%s4369_s11 + $0xc0] sm:$0xff] }
  0x18   : > { %311 = vst [vmem:[%s4374_s12 + $0x10] sm:$0xff] %v310_v2  ;;  %v324_v9 = vld [vmem:[%s4369_s11 + $0xd8] sm:$0xff]  ;;  %v326_v10 = vld [vmem:[%s4369_s11 + $0xf0] sm:$0xff]  ;;  %v328_v11 = vld [vmem:[%s4369_s11 + $0x108] sm:$0xff] }
  0x19   : > { %313 = vst [vmem:[%s4374_s12 + $0x18] sm:$0xff] %v312_v3  ;;  %v330_v12 = vld [vmem:[%s4369_s11 + $0x120] sm:$0xff]  ;;  %v332_v13 = vld [vmem:[%s4369_s11 + $0x138] sm:$0xff]  ;;  %v334_v14 = vld [vmem:[%s4369_s11 + $0x150] sm:$0xff] }
  0x1a   : > { %315 = vst [vmem:[%s4374_s12 + $0x20] sm:$0xff] %v314_v4  ;;  %v336_v15 = vld [vmem:[%s4369_s11 + $0x168] sm:$0xff]  ;;  %v338_v16 = vld [vmem:[%s4369_s11 + $0x180] sm:$0xff]  ;;  %v340_v17 = vld [vmem:[%s4369_s11 + $0x198] sm:$0xff] }
  0x1b   : > { %317 = vst [vmem:[%s4374_s12 + $0x28] sm:$0xff] %v316_v5  ;;  %v342_v18 = vld [vmem:[%s4369_s11 + $0x1b0] sm:$0xff]  ;;  %v344_v19 = vld [vmem:[%s4369_s11 + $0x1c8] sm:$0xff]  ;;  %v346_v20 = vld [vmem:[%s4369_s11 + $0x1e0] sm:$0xff] }
  0x1c   : > { %319 = vst [vmem:[%s4374_s12 + $0x30] sm:$0xff] %v318_v6  ;;  %v348_v21 = vld [vmem:[%s4369_s11 + $0x1f8] sm:$0xff]  ;;  %v350_v22 = vld [vmem:[%s4369_s11 + $0x210] sm:$0xff]  ;;  %v352_v23 = vld [vmem:[%s4369_s11 + $0x228] sm:$0xff] }
  0x1d   : > { %321 = vst [vmem:[%s4374_s12 + $0x38] sm:$0xff] %v320_v7  ;;  %v354_v24 = vld [vmem:[%s4369_s11 + $0x240] sm:$0xff]  ;;  %v356_v25 = vld [vmem:[%s4369_s11 + $0x258] sm:$0xff]  ;;  %v358_v26 = vld [vmem:[%s4369_s11 + $0x270] sm:$0xff] }
  0x1e   : > { %323 = vst [vmem:[%s4374_s12 + $0x40] sm:$0xff] %v322_v8  ;;  %v360_v27 = vld [vmem:[%s4369_s11 + $0x288] sm:$0xff]  ;;  %v362_v28 = vld [vmem:[%s4369_s11 + $0x2a0] sm:$0xff]  ;;  %v364_v29 = vld [vmem:[%s4369_s11 + $0x2b8] sm:$0xff] }
  0x1f   : > { %325 = vst [vmem:[%s4374_s12 + $0x48] sm:$0xff] %v324_v9  ;;  %v366_v30 = vld [vmem:[%s4369_s11 + $0x2d0] sm:$0xff]  ;;  %v368_v31 = vld [vmem:[%s4369_s11 + $0x2e8] sm:$0xff] }
  0x20   : > { %327 = vst [vmem:[%s4374_s12 + $0x50] sm:$0xff] %v326_v10 }
  0x21   : > { %329 = vst [vmem:[%s4374_s12 + $0x58] sm:$0xff] %v328_v11 }
  0x22   : > { %331 = vst [vmem:[%s4374_s12 + $0x60] sm:$0xff] %v330_v12 }
  0x23   : > { %333 = vst [vmem:[%s4374_s12 + $0x68] sm:$0xff] %v332_v13 }
  0x24   : > { %335 = vst [vmem:[%s4374_s12 + $0x70] sm:$0xff] %v334_v14 }
  0x25   : > { %337 = vst [vmem:[%s4374_s12 + $0x78] sm:$0xff] %v336_v15 }
  0x26   : > { %339 = vst [vmem:[%s4374_s12 + $0x80] sm:$0xff] %v338_v16 }
  0x27   : > { %341 = vst [vmem:[%s4374_s12 + $0x88] sm:$0xff] %v340_v17 }
  0x28   : > { %343 = vst [vmem:[%s4374_s12 + $0x90] sm:$0xff] %v342_v18 }
  0x29   : > { %345 = vst [vmem:[%s4374_s12 + $0x98] sm:$0xff] %v344_v19 }
  0x2a   : > { %347 = vst [vmem:[%s4374_s12 + $0xa0] sm:$0xff] %v346_v20 }
  0x2b   : > { %349 = vst [vmem:[%s4374_s12 + $0xa8] sm:$0xff] %v348_v21 }
  0x2c   : > { %351 = vst [vmem:[%s4374_s12 + $0xb0] sm:$0xff] %v350_v22 }
  0x2d   : > { %353 = vst [vmem:[%s4374_s12 + $0xb8] sm:$0xff] %v352_v23 }
  0x2e   : > { %355 = vst [vmem:[%s4374_s12 + $0xc0] sm:$0xff] %v354_v24 }
  0x2f   : > { %357 = vst [vmem:[%s4374_s12 + $0xc8] sm:$0xff] %v356_v25 }
  0x30   : > { %359 = vst [vmem:[%s4374_s12 + $0xd0] sm:$0xff] %v358_v26 }
  0x31   : > { %361 = vst [vmem:[%s4374_s12 + $0xd8] sm:$0xff] %v360_v27 }
  0x32   : > { %363 = vst [vmem:[%s4374_s12 + $0xe0] sm:$0xff] %v362_v28 }
  0x33   : > { %365 = vst [vmem:[%s4374_s12 + $0xe8] sm:$0xff] %v364_v29 }
  0x34   : > { %367 = vst [vmem:[%s4374_s12 + $0xf0] sm:$0xff] %v366_v30 }
  0x35   : > { %369 = vst [vmem:[%s4374_s12 + $0xf8] sm:$0xff] %v368_v31 }
  0x36 PF: > { %375 = sbr.rel (!%p4352_p3) target bundleno = 90 (0x5a), region = 66  ;;  %s377_s13 = sand.u32 (%p4352_p3), 1, %s4252_s19  }
  0x37   : > { %s3882_s14 = sshll.u32 (%p4352_p3), %s4264_s22, 3  ;;  %s3382_s15 = sshll.u32 (%p4352_p3), %s377_s13, 8 }
  0x38   : > { %s4444_s27 = scalar_lea.vmem (%p4352_p3), %s6544_s3, %s3882_s14  ;;  %s4449_s28 = scalar_lea.vmem (%p4352_p3), [#allocation5], %s3382_s15 }
  0x39   : > { %v473_v32 = vld [vmem:[%s4444_s27] sm:$0xff] (%p4352_p3)  ;;  %v475_v33 = vld [vmem:[%s4444_s27 + $0x18] sm:$0xff] (%p4352_p3)  ;;  %v477_v34 = vld [vmem:[%s4444_s27 + $0x30] sm:$0xff] (%p4352_p3) }
  0x3a   : > { %474 = vst [vmem:[%s4449_s28] sm:$0xff] (%p4352_p3), %v473_v32  ;;  %v479_v35 = vld [vmem:[%s4444_s27 + $0x48] sm:$0xff] (%p4352_p3)  ;;  %v481_v36 = vld [vmem:[%s4444_s27 + $0x60] sm:$0xff] (%p4352_p3)  ;;  %v483_v37 = vld [vmem:[%s4444_s27 + $0x78] sm:$0xff] (%p4352_p3) }
  0x3b   : > { %476 = vst [vmem:[%s4449_s28 + $0x8] sm:$0xff] %v475_v33  ;;  %v485_v38 = vld [vmem:[%s4444_s27 + $0x90] sm:$0xff]  ;;  %v487_v39 = vld [vmem:[%s4444_s27 + $0xa8] sm:$0xff]  ;;  %v489_v40 = vld [vmem:[%s4444_s27 + $0xc0] sm:$0xff] }
  0x3c   : > { %478 = vst [vmem:[%s4449_s28 + $0x10] sm:$0xff] %v477_v34  ;;  %v491_v41 = vld [vmem:[%s4444_s27 + $0xd8] sm:$0xff]  ;;  %v493_v42 = vld [vmem:[%s4444_s27 + $0xf0] sm:$0xff]  ;;  %v495_v43 = vld [vmem:[%s4444_s27 + $0x108] sm:$0xff] }
  0x3d   : > { %480 = vst [vmem:[%s4449_s28 + $0x18] sm:$0xff] %v479_v35  ;;  %v497_v44 = vld [vmem:[%s4444_s27 + $0x120] sm:$0xff]  ;;  %v499_v45 = vld [vmem:[%s4444_s27 + $0x138] sm:$0xff]  ;;  %v501_v46 = vld [vmem:[%s4444_s27 + $0x150] sm:$0xff] }
  0x3e   : > { %482 = vst [vmem:[%s4449_s28 + $0x20] sm:$0xff] %v481_v36  ;;  %v503_v47 = vld [vmem:[%s4444_s27 + $0x168] sm:$0xff]  ;;  %v505_v48 = vld [vmem:[%s4444_s27 + $0x180] sm:$0xff]  ;;  %v507_v49 = vld [vmem:[%s4444_s27 + $0x198] sm:$0xff] }
  0x3f   : > { %484 = vst [vmem:[%s4449_s28 + $0x28] sm:$0xff] %v483_v37  ;;  %v509_v50 = vld [vmem:[%s4444_s27 + $0x1b0] sm:$0xff]  ;;  %v511_v51 = vld [vmem:[%s4444_s27 + $0x1c8] sm:$0xff]  ;;  %v513_v52 = vld [vmem:[%s4444_s27 + $0x1e0] sm:$0xff] }
  0x40   : > { %486 = vst [vmem:[%s4449_s28 + $0x30] sm:$0xff] %v485_v38  ;;  %v515_v53 = vld [vmem:[%s4444_s27 + $0x1f8] sm:$0xff]  ;;  %v517_v54 = vld [vmem:[%s4444_s27 + $0x210] sm:$0xff]  ;;  %v519_v55 = vld [vmem:[%s4444_s27 + $0x228] sm:$0xff] }
  0x41   : > { %488 = vst [vmem:[%s4449_s28 + $0x38] sm:$0xff] %v487_v39  ;;  %v521_v56 = vld [vmem:[%s4444_s27 + $0x240] sm:$0xff]  ;;  %v523_v57 = vld [vmem:[%s4444_s27 + $0x258] sm:$0xff]  ;;  %v525_v58 = vld [vmem:[%s4444_s27 + $0x270] sm:$0xff] }
  0x42   : > { %490 = vst [vmem:[%s4449_s28 + $0x40] sm:$0xff] %v489_v40  ;;  %v527_v59 = vld [vmem:[%s4444_s27 + $0x288] sm:$0xff]  ;;  %v529_v60 = vld [vmem:[%s4444_s27 + $0x2a0] sm:$0xff]  ;;  %v531_v61 = vld [vmem:[%s4444_s27 + $0x2b8] sm:$0xff] }
  0x43   : > { %492 = vst [vmem:[%s4449_s28 + $0x48] sm:$0xff] %v491_v41  ;;  %v533_v62 = vld [vmem:[%s4444_s27 + $0x2d0] sm:$0xff]  ;;  %v535_v63 = vld [vmem:[%s4444_s27 + $0x2e8] sm:$0xff] }
  0x44   : > { %494 = vst [vmem:[%s4449_s28 + $0x50] sm:$0xff] %v493_v42 }
  0x45   : > { %496 = vst [vmem:[%s4449_s28 + $0x58] sm:$0xff] %v495_v43 }
  0x46   : > { %498 = vst [vmem:[%s4449_s28 + $0x60] sm:$0xff] %v497_v44 }
  0x47   : > { %500 = vst [vmem:[%s4449_s28 + $0x68] sm:$0xff] %v499_v45 }
  0x48   : > { %502 = vst [vmem:[%s4449_s28 + $0x70] sm:$0xff] %v501_v46 }
  0x49   : > { %504 = vst [vmem:[%s4449_s28 + $0x78] sm:$0xff] %v503_v47 }
  0x4a   : > { %506 = vst [vmem:[%s4449_s28 + $0x80] sm:$0xff] %v505_v48 }
  0x4b   : > { %508 = vst [vmem:[%s4449_s28 + $0x88] sm:$0xff] %v507_v49 }
  0x4c   : > { %510 = vst [vmem:[%s4449_s28 + $0x90] sm:$0xff] %v509_v50 }
  0x4d   : > { %512 = vst [vmem:[%s4449_s28 + $0x98] sm:$0xff] %v511_v51 }
  0x4e   : > { %514 = vst [vmem:[%s4449_s28 + $0xa0] sm:$0xff] %v513_v52 }
  0x4f   : > { %516 = vst [vmem:[%s4449_s28 + $0xa8] sm:$0xff] %v515_v53 }
  0x50   : > { %518 = vst [vmem:[%s4449_s28 + $0xb0] sm:$0xff] %v517_v54 }
  0x51   : > { %520 = vst [vmem:[%s4449_s28 + $0xb8] sm:$0xff] %v519_v55 }
  0x52   : > { %522 = vst [vmem:[%s4449_s28 + $0xc0] sm:$0xff] %v521_v56 }
  0x53   : > { %524 = vst [vmem:[%s4449_s28 + $0xc8] sm:$0xff] %v523_v57 }
  0x54   : > { %526 = vst [vmem:[%s4449_s28 + $0xd0] sm:$0xff] %v525_v58 }
  0x55   : > { %528 = vst [vmem:[%s4449_s28 + $0xd8] sm:$0xff] %v527_v59 }
  0x56   : > { %530 = vst [vmem:[%s4449_s28 + $0xe0] sm:$0xff] %v529_v60 }
  0x57   : > { %532 = vst [vmem:[%s4449_s28 + $0xe8] sm:$0xff] %v531_v61 }
  0x58   : > { %534 = vst [vmem:[%s4449_s28 + $0xf0] sm:$0xff] %v533_v62 }
  0x59   : > { %536 = vst [vmem:[%s4449_s28 + $0xf8] sm:$0xff] %v535_v63 }
  0x5a PF: > { %p3385_p7 = scmp.ge.s32.totalorder %s4272_s24, 1  ;;  %p551_p8 = scmp.lt.s32.totalorder %s4272_s24, 7 }
  0x5c   : > { %p552_p9 = pnand %p3385_p7, %p551_p8 }
  0x5e   : > { %555 = sbr.rel (%p552_p9) target bundleno = 951 (0x3b7), region = 108 }
  0x63   : > { %s558_s29 = sand.u32 1, %s4248_s18   ;;  %s3388_s6 = sshll.u32 %s4260_s21, 4 }
  0x64   : > { %s3386_s7 = sshll.u32 %s558_s29, 8  ;;  %p610_p10 = scmp.lt.s32.totalorder %s3388_s6, 31 }
  0x65   : > { %s3391_s8 = sshll.u32 %s4256_s20, 5  ;;  %s4532_s27 = scalar_lea.vmem [#allocation4], %s3386_s7 }
  0x66   : > { %s6725_s6 = smov (!%p610_p10, %s3388_s6), 31  ;;  %p619_p11 = scmp.lt.s32.totalorder %s3391_s8, 95 }
  0x67   : > { %s3883_s9 = sshll.u32 %s6725_s6, 4  ;;  %s4534_s28 = scalar_lea.vmem [#allocation5], %s3386_s7 }
  0x68   : > { %s4520_s12 = scalar_lea.vmem %s6541_s0, %s3883_s9  ;;  %s4525_s15 = scalar_lea.vmem %s6546_s5, %s3883_s9 }
  0x69   : > { %s6727_s8 = smov (!%p619_p11, %s3391_s8), 95  ;;  %p3397_p12 = scmp.ne.s32.totalorder %s4256_s20, 0 }
  0x6a   : > { %s3884_s16 = sshll.u32 %s6727_s8, 3 }
  0x6b   : > { %s4530_s17 = scalar_lea.vmem %s6545_s4, %s3884_s16  ;;  %635 = sbr.rel (%p3397_p12) target bundleno = 336 (0x150), region = 120 }
  0x70   : > { %v4538_v0 = vld [vmem:[%s4520_s12 + $0x40] sm:$0xff]  ;;  %v4541_v1 = vld [vmem:[%s4520_s12 + $0x48] sm:$0xff]  ;;  %v4568_v12 = vld [vmem:[%s4520_s12 + $0x50] sm:$0xff] }
  0x71   : > { %v4544_v2 = vld [vmem:[%s4520_s12 + $0x20] sm:$0xff]  ;;  %v676_v3 = vmul.f32 %v4538_v0, %v4538_v0  ;;  %v677_v4 = vmul.f32 %v4541_v1, %v4541_v1  ;;  %v4551_v5 = vld [vmem:[%s4520_s12 + $0x28] sm:$0xff]  ;;  %v4571_v13 = vld [vmem:[%s4520_s12 + $0x58] sm:$0xff]  ;;  %v678_v21 = vmul.f32 %v4568_v12, %v4568_v12 }
  0x72   : > { %v672_v6 = vmul.f32 %v4544_v2, %v4544_v2  ;;  %v4556_v7 = vld [vmem:[%s4520_s12] sm:$0xff]  ;;  %v4559_v8 = vld [vmem:[%s4520_s12 + $0x8] sm:$0xff]  ;;  %v673_v9 = vmul.f32 %v4551_v5, %v4551_v5  ;;  %v4574_v14 = vld [vmem:[%s4520_s12 + $0x30] sm:$0xff]  ;;  %v679_v22 = vmul.f32 %v4571_v13, %v4571_v13 }
  0x73   : > { %v668_v10 = vmul.f32 %v4556_v7, %v4556_v7  ;;  %v669_v11 = vmul.f32 %v4559_v8, %v4559_v8  ;;  %v712_v15 = vadd.f32 %v677_v4, %v676_v3  ;;  %v4577_v16 = vld [vmem:[%s4520_s12 + $0x38] sm:$0xff]  ;;  %v4580_v17 = vld [vmem:[%s4520_s12 + $0x10] sm:$0xff]  ;;  %v674_v23 = vmul.f32 %v4574_v14, %v4574_v14  ;;  %v4598_v30 = vld [vmem:[%s4520_s12 + $0x80] sm:$0xff] }
  0x74   : > { %v4583_v18 = vld [vmem:[%s4520_s12 + $0x18] sm:$0xff]  ;;  %v706_v19 = vadd.f32 %v673_v9, %v672_v6  ;;  %v675_v24 = vmul.f32 %v4577_v16, %v4577_v16  ;;  %v670_v25 = vmul.f32 %v4580_v17, %v4580_v17  ;;  %v715_v27 = vadd.f32 %v679_v22, %v678_v21  ;;  %v4601_v31 = vld [vmem:[%s4520_s12 + $0x88] sm:$0xff]  ;;  %v4604_v32 = vld [vmem:[%s4520_s12 + $0x70] sm:$0xff] }
  0x75   : > { %v700_v20 = vadd.f32 %v669_v11, %v668_v10  ;;  %713 = vadd.xlane.f32.xlu2 %v712_v15  ;;  %v671_v26 = vmul.f32 %v4583_v18, %v4583_v18  ;;  %v4607_v33 = vld [vmem:[%s4520_s12 + $0x78] sm:$0xff]  ;;  %v4610_v34 = vld [vmem:[%s4520_s12 + $0x60] sm:$0xff]  ;;  %v4613_v35 = vld [vmem:[%s4520_s12 + $0x68] sm:$0xff]  ;;  %v684_v36 = vmul.f32 %v4598_v30, %v4598_v30  ;;  %v685_v37 = vmul.f32 %v4601_v31, %v4601_v31 }
  0x76   : > { %707 = vadd.xlane.f32.xlu1 %v706_v19  ;;  %v709_v28 = vadd.f32 %v675_v24, %v674_v23  ;;  %v682_v38 = vmul.f32 %v4604_v32, %v4604_v32  ;;  %v683_v39 = vmul.f32 %v4607_v33, %v4607_v33  ;;  %v680_v40 = vmul.f32 %v4610_v34, %v4610_v34  ;;  %v4628_v45 = vld [vmem:[%s4520_s12 + $0xb0] sm:$0xff]  ;;  %v4631_v46 = vld [vmem:[%s4520_s12 + $0xb8] sm:$0xff]  ;;  %v4634_v47 = vld [vmem:[%s4520_s12 + $0xa0] sm:$0xff] }
  0x77   : > { %701 = vadd.xlane.f32.xlu0 %v700_v20  ;;  %v703_v29 = vadd.f32 %v671_v26, %v670_v25  ;;  %v681_v41 = vmul.f32 %v4613_v35, %v4613_v35  ;;  %v724_v42 = vadd.f32 %v685_v37, %v684_v36  ;;  %v4637_v48 = vld [vmem:[%s4520_s12 + $0xa8] sm:$0xff]  ;;  %v4640_v49 = vld [vmem:[%s4520_s12 + $0x90] sm:$0xff]  ;;  %v4643_v50 = vld [vmem:[%s4520_s12 + $0x98] sm:$0xff]  ;;  %v690_v51 = vmul.f32 %v4628_v45, %v4628_v45 }
  0x78   : > { %v721_v43 = vadd.f32 %v683_v39, %v682_v38  ;;  %v691_v52 = vmul.f32 %v4631_v46, %v4631_v46  ;;  %v688_v53 = vmul.f32 %v4634_v47, %v4634_v47  ;;  %v689_v54 = vmul.f32 %v4637_v48, %v4637_v48  ;;  %v4658_v60 = vld [vmem:[%s4520_s12 + $0xe0] sm:$0xff]  ;;  %v4661_v61 = vld [vmem:[%s4520_s12 + $0xe8] sm:$0xff]  ;;  %v4664_v62 = vld [vmem:[%s4520_s12 + $0xd0] sm:$0xff] }
  0x79   : > { %v718_v44 = vadd.f32 %v681_v41, %v680_v40  ;;  %v686_v55 = vmul.f32 %v4640_v49, %v4640_v49  ;;  %v687_v56 = vmul.f32 %v4643_v50, %v4643_v50  ;;  %v4667_v63 = vld [vmem:[%s4520_s12 + $0xd8] sm:$0xff]  ;;  %v4670_v3 = vld [vmem:[%s4520_s12 + $0xc0] sm:$0xff]  ;;  %v4673_v4 = vld [vmem:[%s4520_s12 + $0xc8] sm:$0xff]  ;;  %v696_v6 = vmul.f32 %v4658_v60, %v4658_v60 }
  0x7a   : > { %v733_v57 = vadd.f32 %v691_v52, %v690_v51  ;;  %v730_v58 = vadd.f32 %v689_v54, %v688_v53  ;;  %v697_v9 = vmul.f32 %v4661_v61, %v4661_v61  ;;  %v694_v10 = vmul.f32 %v4664_v62, %v4664_v62  ;;  %v4688_v23 = vld [vmem:[%s4520_s12 + $0xf0] sm:$0xff]  ;;  %v4691_v24 = vld [vmem:[%s4520_s12 + $0xf8] sm:$0xff] }
  0x7b   : > { %v727_v59 = vadd.f32 %v687_v56, %v686_v55  ;;  %v695_v11 = vmul.f32 %v4667_v63, %v4667_v63  ;;  %v692_v15 = vmul.f32 %v4670_v3, %v4670_v3  ;;  %v693_v19 = vmul.f32 %v4673_v4, %v4673_v4 }
  0x7c   : > { %v742_v20 = vadd.f32 %v697_v9, %v696_v6  ;;  %v698_v25 = vmul.f32 %v4688_v23, %v4688_v23  ;;  %v699_v26 = vmul.f32 %v4691_v24, %v4691_v24 }
  0x7d   : > { %716 = vadd.xlane.f32.xlu2 %v715_v27  ;;  %v739_v21 = vadd.f32 %v695_v11, %v694_v10  ;;  %v736_v22 = vadd.f32 %v693_v19, %v692_v15  ;;  %v979_v19 = vld [vmem:[%s6542_s1] sm:$0x3] }
  0x7e   : > { %710 = vadd.xlane.f32.xlu1 %v709_v28  ;;  %v745_v27 = vadd.f32 %v699_v26, %v698_v25  ;;  %v4274_v28 = vmov 256.0  }
  0x7f   : > { %704 = vadd.xlane.f32.xlu0 %v703_v29  ;;  %4056 = vrcp.f32 %v4274_v28 }
  0x85   : > { %725 = vadd.xlane.f32.xlu2 %v724_v42  ;;  %v4057_v29 = vpop.eup %4056 }
  0x86   : > { %722 = vadd.xlane.f32.xlu1 %v721_v43  ;;  %v749_v36 = vmul.f32 256.0, %v4057_v29  ;;  %vm753_vm0 = vweird.f32 %v4057_v29 }
  0x87   : > { %719 = vadd.xlane.f32.xlu0 %v718_v44 }
  0x88   : > { %v750_v37 = vsub.f32 1.0, %v749_v36  ;;  %v4722_v36 = vperm.slane %v979_v19, 1 }
  0x8a   : > { %v751_v38 = vmul.f32 %v4057_v29, %v750_v37 }
  0x8c   : > { %v752_v39 = vadd.f32 %v4057_v29, %v751_v38 }
  0x8d   : > { %734 = vadd.xlane.f32.xlu2 %v733_v57 }
  0x8e   : > { %731 = vadd.xlane.f32.xlu1 %v730_v58  ;;  %v4697_v40 = vsel %vm753_vm0, %v4057_v29, %v752_v39  ;;  %v4720_v29 = vperm.slane %v979_v19, 0 }
  0x8f   : > { %728 = vadd.xlane.f32.xlu0 %v727_v59 }
  0x95   : > { %743 = vadd.xlane.f32.xlu2 %v742_v20 }
  0x96   : > { %740 = vadd.xlane.f32.xlu1 %v739_v21 }
  0x97   : > { %737 = vadd.xlane.f32.xlu0 %v736_v22 }
  0x9f   : > { %746 = vadd.xlane.f32.xlu0 %v745_v27 }
  0xe8   : > { %v714_v41 = vpop.xlane.xlu2 %713 }
  0xe9   : > { %v759_v42 = vmul.f32 %v4697_v40, %v714_v41  ;;  %v708_v43 = vpop.xlane.xlu1 %707 }
  0xea   : > { %v702_v44 = vpop.xlane.xlu0 %701  ;;  %v757_v51 = vmul.f32 %v4697_v40, %v708_v43 }
  0xeb   : > { %v755_v52 = vmul.f32 %v4697_v40, %v702_v44  ;;  %v775_v53 = vadd.f32 1e-05, %v759_v42 }
  0xec   : > { %v773_v54 = vadd.f32 1e-05, %v757_v51 }
  0xed   : > { %v4702_v55 = vadd.f32 1e-05, %v755_v52  ;;  %4058 = vrsqrt.f32 %v775_v53  ;;  %vm833_vm1 = vweird.f32 %v775_v53 }
  0xee   : > { %4060 = vrsqrt.f32 %v773_v54  ;;  %vm813_vm2 = vweird.f32 %v773_v54 }
  0xef   : > { %4062 = vrsqrt.f32 %v4702_v55  ;;  %vm793_vm4 = vweird.f32 %v4702_v55 }
  0xf0   : > { %v717_v56 = vpop.xlane.xlu2 %716 }
  0xf1   : > { %v760_v57 = vmul.f32 %v4697_v40, %v717_v56  ;;  %v711_v58 = vpop.xlane.xlu1 %710 }
  0xf2   : > { %v705_v59 = vpop.xlane.xlu0 %704  ;;  %v758_v6 = vmul.f32 %v4697_v40, %v711_v58 }
  0xf3   : > { %v756_v9 = vmul.f32 %v4697_v40, %v705_v59  ;;  %v4059_v10 = vpop.eup %4058  ;;  %v4708_v11 = vadd.f32 1e-05, %v760_v57 }
  0xf4   : > { %v4061_v15 = vpop.eup %4060  ;;  %v828_v20 = vmul.f32 %v4059_v10, %v775_v53  ;;  %v4713_v21 = vadd.f32 1e-05, %v758_v6  ;;  %vm834_vm3 = vweird.f32 %v4059_v10 }
  0xf5   : > { %v4715_v22 = vadd.f32 1e-05, %v756_v9  ;;  %v4063_v25 = vpop.eup %4062  ;;  %v808_v26 = vmul.f32 %v4061_v15, %v773_v54  ;;  %4064 = vrsqrt.f32 %v4708_v11  ;;  %vm814_vm5 = vweird.f32 %v4061_v15  ;;  %vm835_vm9 = vmor %vm833_vm1, %vm834_vm3 }
  0xf6   : > { %v829_v27 = vmul.f32 %v4059_v10, %v828_v20  ;;  %v788_v28 = vmul.f32 %v4063_v25, %v4702_v55  ;;  %4066 = vrsqrt.f32 %v4713_v21  ;;  %vm843_vm6 = vweird.f32 %v4708_v11  ;;  %vm815_vm11 = vmor %vm813_vm2, %vm814_vm5 }
  0xf7   : > { %v809_v37 = vmul.f32 %v4061_v15, %v808_v26  ;;  %4068 = vrsqrt.f32 %v4715_v22  ;;  %vm794_vm7 = vweird.f32 %v4063_v25  ;;  %vm823_vm8 = vweird.f32 %v4713_v21 }
  0xf8   : > { %v830_v38 = vmul.f32 0.5, %v829_v27  ;;  %v789_v39 = vmul.f32 %v4063_v25, %v788_v28  ;;  %v726_v41 = vpop.xlane.xlu2 %725  ;;  %vm795_vm12 = vmor %vm793_vm4, %vm794_vm7  ;;  %vm803_vm15 = vweird.f32 %v4715_v22 }
  0xf9   : > { %v810_v42 = vmul.f32 0.5, %v809_v37  ;;  %v763_v43 = vmul.f32 %v4697_v40, %v726_v41  ;;  %v723_v44 = vpop.xlane.xlu1 %722 }
  0xfa   : > { %v720_v51 = vpop.xlane.xlu0 %719  ;;  %v831_v52 = vsub.f32 1.5, %v830_v38  ;;  %v790_v56 = vmul.f32 0.5, %v789_v39  ;;  %v762_v6 = vmul.f32 %v4697_v40, %v723_v44 }
  0xfb   : > { %v4065_v57 = vpop.eup %4064  ;;  %v811_v58 = vsub.f32 1.5, %v810_v42  ;;  %v4728_v59 = vadd.f32 1e-05, %v763_v43  ;;  %v761_v27 = vmul.f32 %v4697_v40, %v720_v51 }
  0xfc   : > { %v4731_v9 = vpop.eup %4066  ;;  %v832_v19 = vmul.f32 %v4059_v10, %v831_v52  ;;  %v791_v20 = vsub.f32 1.5, %v790_v56  ;;  %v838_v26 = vmul.f32 %v4065_v57, %v4708_v11  ;;  %vm844_vm10 = vweird.f32 %v4065_v57 }
  0xfd   : > { %v4736_v28 = vpop.eup %4068  ;;  %v812_v37 = vmul.f32 %v4061_v15, %v811_v58  ;;  %v818_v38 = vmul.f32 %v4731_v9, %v4713_v21  ;;  %4070 = vrsqrt.f32 %v4728_v59  ;;  %vm824_vm13 = vweird.f32 %v4731_v9  ;;  %vm845_vm14 = vmor %vm843_vm6, %vm844_vm10 }
  0xfe   : > { %v836_v39 = vsel %vm835_vm9, %v4059_v10, %v832_v19  ;;  %v792_v41 = vmul.f32 %v4063_v25, %v791_v20  ;;  %v839_v42 = vmul.f32 %v4065_v57, %v838_v26  ;;  %v798_v43 = vmul.f32 %v4736_v28, %v4715_v22  ;;  %vm825_vm1 = vmor %vm823_vm8, %vm824_vm13 }
  0xff   : > { %v955_v44 = vmul.f32 %v836_v39, %v4538_v0  ;;  %v956_v53 = vmul.f32 %v836_v39, %v4541_v1  ;;  %v816_v51 = vsel %vm815_vm11, %v4061_v15, %v812_v37  ;;  %v819_v52 = vmul.f32 %v4731_v9, %v818_v38 }
 0x100   : > { %v951_v10 = vmul.f32 %v816_v51, %v4544_v2  ;;  %v952_v54 = vmul.f32 %v816_v51, %v4551_v5  ;;  %v796_v56 = vsel %vm795_vm12, %v4063_v25, %v792_v41  ;;  %v840_v58 = vmul.f32 0.5, %v839_v42  ;;  %v735_v42 = vpop.xlane.xlu2 %734 }
 0x101   : > { %v993_v19 = vmul.f32 %v4720_v29, %v955_v44  ;;  %v994_v20 = vmul.f32 %v4722_v36, %v956_v53  ;;  %v947_v0 = vmul.f32 %v796_v56, %v4556_v7  ;;  %v948_v1 = vmul.f32 %v796_v56, %v4559_v8 }
 0x102   : > { %v729_v15 = vpop.xlane.xlu0 %728  ;;  %v989_v55 = vmul.f32 %v4720_v29, %v951_v10  ;;  %v990_v26 = vmul.f32 %v4722_v36, %v952_v54  ;;  %v841_v37 = vsub.f32 1.5, %v840_v58  ;;  %v820_v38 = vmul.f32 0.5, %v819_v52 }
 0x103   : > { %v4761_v2 = vpop.eup %4070  ;;  %v1021_v5 = vpack.c.bf16 %v994_v20, %v993_v19  ;;  %v985_v25 = vmul.f32 %v4720_v29, %v947_v0  ;;  %v986_v39 = vmul.f32 %v4722_v36, %v948_v1  ;;  %v799_v41 = vmul.f32 %v4736_v28, %v798_v43 }
 0x104   : > { %v1019_v7 = vpack.c.bf16 %v990_v26, %v989_v55  ;;  %v842_v44 = vmul.f32 %v4065_v57, %v841_v37  ;;  %v821_v8 = vsub.f32 1.5, %v820_v38  ;;  %v868_v52 = vmul.f32 %v4761_v2, %v4728_v59 }
 0x105   : > { %1037 = vst [vmem:[#allocation2 + $0x20] sm:$0xff] %v1021_v5  ;;  %v1017_v53 = vpack.c.bf16 %v986_v39, %v985_v25  ;;  %v800_v51 = vmul.f32 0.5, %v799_v41  ;;  %vm804_vm0 = vweird.f32 %v4736_v28  ;;  %v4775_v54 = vadd.f32 1e-05, %v762_v6 }
 0x106   : > { %1035 = vst [vmem:[#allocation2 + $0x10] sm:$0xff] %v1019_v7  ;;  %v846_v43 = vsel %vm845_vm14, %v4065_v57, %v842_v44  ;;  %v822_v10 = vmul.f32 %v4731_v9, %v821_v8  ;;  %v869_v19 = vmul.f32 %v4761_v2, %v868_v52  ;;  %v732_v57 = vpop.xlane.xlu1 %731  ;;  %vm873_vm2 = vweird.f32 %v4728_v59  ;;  %vm805_vm4 = vmor %vm803_vm15, %vm804_vm0 }
 0x107   : > { %1033 = vst [vmem:[#allocation2] sm:$0xff] %v1017_v53  ;;  %v957_v56 = vmul.f32 %v846_v43, %v4568_v12  ;;  %v958_v11 = vmul.f32 %v846_v43, %v4571_v13  ;;  %v801_v58 = vsub.f32 1.5, %v800_v51  ;;  %4072 = vrsqrt.f32 %v4775_v54 }
 0x108   : > { %v826_v20 = vsel %vm825_vm1, %v4731_v9, %v822_v10  ;;  %v4787_v6 = vadd.f32 1e-05, %v761_v27  ;;  %v870_v55 = vmul.f32 0.5, %v869_v19  ;;  %vm874_vm3 = vweird.f32 %v4761_v2  ;;  %v744_v8 = vpop.xlane.xlu2 %743 }
 0x109   : > { %v995_v12 = vmul.f32 %v4720_v29, %v957_v56  ;;  %v996_v13 = vmul.f32 %v4722_v36, %v958_v11  ;;  %v953_v0 = vmul.f32 %v826_v20, %v4574_v14  ;;  %v954_v21 = vmul.f32 %v826_v20, %v4577_v16  ;;  %vm875_vm5 = vmor %vm873_vm2, %vm874_vm3 }
 0x10a   : > { %v802_v1 = vmul.f32 %v4736_v28, %v801_v58  ;;  %4074 = vrsqrt.f32 %v4787_v6  ;;  %v738_v9 = vpop.xlane.xlu0 %737  ;;  %v766_v14 = vmul.f32 %v4697_v40, %v735_v42  ;;  %v871_v38 = vsub.f32 1.5, %v870_v55 }
 0x10b   : > { %v1022_v26 = vpack.c.bf16 %v996_v13, %v995_v12  ;;  %v991_v27 = vmul.f32 %v4720_v29, %v953_v0  ;;  %v992_v37 = vmul.f32 %v4722_v36, %v954_v21  ;;  %v765_v5 = vmul.f32 %v4697_v40, %v732_v57 }
 0x10c   : > { %v806_v16 = vsel %vm805_vm4, %v4736_v28, %v802_v1  ;;  %v764_v25 = vmul.f32 %v4697_v40, %v729_v15  ;;  %v4808_v44 = vadd.f32 1e-05, %v766_v14  ;;  %v872_v53 = vmul.f32 %v4761_v2, %v871_v38 }
 0x10d   : > { %1038 = vst [vmem:[#allocation2 + $0x28] sm:$0xff] %v1022_v26  ;;  %v1020_v39 = vpack.c.bf16 %v992_v37, %v991_v27  ;;  %v949_v41 = vmul.f32 %v806_v16, %v4580_v17  ;;  %v950_v7 = vmul.f32 %v806_v16, %v4583_v18  ;;  %v4073_v22 = vpop.eup %4072  ;;  %v4811_v42 = vadd.f32 1e-05, %v765_v5 }
 0x10e   : > { %v858_v17 = vmul.f32 %v4073_v22, %v4775_v54  ;;  %v4820_v18 = vadd.f32 1e-05, %v764_v25  ;;  %v876_v52 = vsel %vm875_vm5, %v4761_v2, %v872_v53  ;;  %4076 = vrsqrt.f32 %v4808_v44  ;;  %v741_v19 = vpop.xlane.xlu1 %740 }
 0x10f   : > { %1036 = vst [vmem:[#allocation2 + $0x18] sm:$0xff] %v1020_v39  ;;  %v987_v28 = vmul.f32 %v4720_v29, %v949_v41  ;;  %v988_v51 = vmul.f32 %v4722_v36, %v950_v7  ;;  %v769_v43 = vmul.f32 %v4697_v40, %v744_v8  ;;  %v963_v56 = vmul.f32 %v876_v52, %v4598_v30 }
 0x110   : > { %v4075_v15 = vpop.eup %4074  ;;  %v964_v11 = vmul.f32 %v876_v52, %v4601_v31  ;;  %v859_v58 = vmul.f32 %v4073_v22, %v858_v17  ;;  %vm863_vm6 = vweird.f32 %v4775_v54  ;;  %4078 = vrsqrt.f32 %v4811_v42 }
 0x111   : > { %v1018_v10 = vpack.c.bf16 %v988_v51, %v987_v28  ;;  %v848_v59 = vmul.f32 %v4075_v15, %v4787_v6  ;;  %v1001_v2 = vmul.f32 %v4720_v29, %v963_v56  ;;  %4080 = vrsqrt.f32 %v4820_v18 }
 0x112   : > { %v1002_v57 = vmul.f32 %v4722_v36, %v964_v11  ;;  %v860_v20 = vmul.f32 0.5, %v859_v58  ;;  %v4833_v30 = vadd.f32 1e-05, %v769_v43  ;;  %v768_v31 = vmul.f32 %v4697_v40, %v741_v19  ;;  %v747_v0 = vpop.xlane.xlu0 %746 }
 0x113   : > { %1034 = vst [vmem:[#allocation2 + $0x8] sm:$0xff] %v1018_v10  ;;  %v849_v12 = vmul.f32 %v4075_v15, %v848_v59  ;;  %v767_v13 = vmul.f32 %v4697_v40, %v738_v9  ;;  %vm864_vm7 = vweird.f32 %v4073_v22  ;;  %vm853_vm8 = vweird.f32 %v4787_v6 }
 0x114   : > { %v1025_v21 = vpack.c.bf16 %v1002_v57, %v1001_v2  ;;  %v861_v1 = vsub.f32 1.5, %v860_v20  ;;  %v4077_v55 = vpop.eup %4076  ;;  %vm903_vm9 = vweird.f32 %v4808_v44  ;;  %4082 = vrsqrt.f32 %v4833_v30  ;;  %vm865_vm10 = vmor %vm863_vm6, %vm864_vm7 }
 0x115   : > { %v850_v26 = vmul.f32 0.5, %v849_v12  ;;  %v4840_v27 = vadd.f32 1e-05, %v768_v31  ;;  %v898_v14 = vmul.f32 %v4077_v55, %v4808_v44  ;;  %v4843_v16 = vadd.f32 1e-05, %v767_v13 }
 0x116   : > { %1041 = vst [vmem:[#allocation2 + $0x40] sm:$0xff] %v1025_v21  ;;  %v862_v37 = vmul.f32 %v4073_v22, %v861_v1  ;;  %v770_v9 = vmul.f32 %v4697_v40, %v747_v0  ;;  %v4079_v38 = vpop.eup %4078  ;;  %vm854_vm11 = vweird.f32 %v4075_v15  ;;  %vm893_vm12 = vweird.f32 %v4811_v42 }
 0x117   : > { %v851_v5 = vsub.f32 1.5, %v850_v26  ;;  %4084 = vrsqrt.f32 %v4840_v27  ;;  %v4081_v25 = vpop.eup %4080  ;;  %v899_v41 = vmul.f32 %v4077_v55, %v898_v14  ;;  %vm904_vm13 = vweird.f32 %v4077_v55  ;;  %vm855_vm14 = vmor %vm853_vm8, %vm854_vm11 }
 0x118   : > { %v866_v39 = vsel %vm865_vm10, %v4073_v22, %v862_v37  ;;  %v888_v7 = vmul.f32 %v4079_v38, %v4811_v42  ;;  %v878_v54 = vmul.f32 %v4081_v25, %v4820_v18  ;;  %vm883_vm15 = vweird.f32 %v4820_v18  ;;  %vm905_vm3 = vmor %vm903_vm9, %vm904_vm13 }
 0x119   : > { %v961_v8 = vmul.f32 %v866_v39, %v4604_v32  ;;  %v962_v40 = vmul.f32 %v866_v39, %v4607_v33  ;;  %v852_v53 = vmul.f32 %v4075_v15, %v851_v5  ;;  %v900_v28 = vmul.f32 0.5, %v899_v41 }
 0x11a   : > { %v889_v51 = vmul.f32 %v4079_v38, %v888_v7  ;;  %4086 = vrsqrt.f32 %v4843_v16  ;;  %v4858_v22 = vadd.f32 1e-05, %v770_v9  ;;  %v4860_v17 = vpop.eup %4082  ;;  %v879_v43 = vmul.f32 %v4081_v25, %v878_v54 }
 0x11b   : > { %v999_v32 = vmul.f32 %v4720_v29, %v961_v8  ;;  %v1000_v33 = vmul.f32 %v4722_v36, %v962_v40  ;;  %v856_v52 = vsel %vm855_vm14, %v4075_v15, %v852_v53  ;;  %v901_v56 = vsub.f32 1.5, %v900_v28 }
 0x11c   : > { %v959_v10 = vmul.f32 %v856_v52, %v4610_v34  ;;  %v960_v6 = vmul.f32 %v856_v52, %v4613_v35  ;;  %v890_v11 = vmul.f32 0.5, %v889_v51  ;;  %vm933_vm0 = vweird.f32 %v4833_v30 }
 0x11d   : > { %v4867_v58 = vpop.eup %4084  ;;  %v1024_v19 = vpack.c.bf16 %v1000_v33, %v999_v32  ;;  %vm894_vm1 = vweird.f32 %v4079_v38  ;;  %v880_v59 = vmul.f32 0.5, %v879_v43  ;;  %v928_v2 = vmul.f32 %v4860_v17, %v4833_v30 }
 0x11e   : > { %v997_v57 = vmul.f32 %v4720_v29, %v959_v10  ;;  %v998_v15 = vmul.f32 %v4722_v36, %v960_v6  ;;  %v902_v20 = vmul.f32 %v4077_v55, %v901_v56  ;;  %v891_v34 = vsub.f32 1.5, %v890_v11  ;;  %vm895_vm6 = vmor %vm893_vm12, %vm894_vm1 }
 0x11f   : > { %vm923_vm2 = vweird.f32 %v4840_v27  ;;  %1040 = vst [vmem:[#allocation2 + $0x38] sm:$0xff] %v1024_v19  ;;  %v881_v35 = vsub.f32 1.5, %v880_v59  ;;  %vm884_vm4 = vweird.f32 %v4081_v25  ;;  %v929_v12 = vmul.f32 %v4860_v17, %v928_v2 }
 0x120   : > { %v918_v31 = vmul.f32 %v4867_v58, %v4840_v27  ;;  %v4087_v13 = vpop.eup %4086  ;;  %v1023_v0 = vpack.c.bf16 %v998_v15, %v997_v57  ;;  %v906_v21 = vsel %vm905_vm3, %v4077_v55, %v902_v20  ;;  %v892_v1 = vmul.f32 %v4079_v38, %v891_v34  ;;  %vm885_vm8 = vmor %vm883_vm15, %vm884_vm4 }
 0x121   : > { %vm934_vm5 = vweird.f32 %v4860_v17  ;;  %v969_v26 = vmul.f32 %v906_v21, %v4628_v45  ;;  %v970_v37 = vmul.f32 %v906_v21, %v4631_v46  ;;  %v882_v44 = vmul.f32 %v4081_v25, %v881_v35 }
 0x122   : > { %v930_v14 = vmul.f32 0.5, %v929_v12  ;;  %1039 = vst [vmem:[#allocation2 + $0x30] sm:$0xff] %v1023_v0  ;;  %v896_v9 = vsel %vm895_vm6, %v4079_v38, %v892_v1  ;;  %v919_v5 = vmul.f32 %v4867_v58, %v918_v31  ;;  %vm924_vm7 = vweird.f32 %v4867_v58  ;;  %vm935_vm9 = vmor %vm933_vm0, %vm934_vm5 }
 0x123   : > { %v908_v55 = vmul.f32 %v4087_v13, %v4843_v16  ;;  %v1007_v39 = vmul.f32 %v4720_v29, %v969_v26  ;;  %v1008_v45 = vmul.f32 %v4722_v36, %v970_v37  ;;  %v967_v46 = vmul.f32 %v896_v9, %v4634_v47  ;;  %vm925_vm11 = vmor %vm923_vm2, %vm924_vm7 }
 0x124   : > { %v968_v41 = vmul.f32 %v896_v9, %v4637_v48  ;;  %v886_v42 = vsel %vm885_vm8, %v4081_v25, %v882_v44  ;;  %v931_v38 = vsub.f32 1.5, %v930_v14  ;;  %v920_v7 = vmul.f32 0.5, %v919_v5 }
 0x125   : > { %v909_v8 = vmul.f32 %v4087_v13, %v908_v55  ;;  %v1028_v40 = vpack.c.bf16 %v1008_v45, %v1007_v39  ;;  %v1005_v53 = vmul.f32 %v4720_v29, %v967_v46  ;;  %v965_v28 = vmul.f32 %v886_v42, %v4640_v49 }
 0x126   : > { %v1006_v54 = vmul.f32 %v4722_v36, %v968_v41  ;;  %v966_v51 = vmul.f32 %v886_v42, %v4643_v50  ;;  %v932_v47 = vmul.f32 %v4860_v17, %v931_v38  ;;  %v921_v48 = vsub.f32 1.5, %v920_v7 }
 0x127   : > { %v910_v32 = vmul.f32 0.5, %v909_v8  ;;  %1044 = vst [vmem:[#allocation2 + $0x58] sm:$0xff] %v1028_v40  ;;  %v1003_v25 = vmul.f32 %v4720_v29, %v965_v28  ;;  %vm914_vm10 = vweird.f32 %v4087_v13  ;;  %4088 = vrsqrt.f32 %v4858_v22 }
 0x128   : > { %v1027_v18 = vpack.c.bf16 %v1006_v54, %v1005_v53  ;;  %v1004_v49 = vmul.f32 %v4722_v36, %v966_v51  ;;  %v936_v50 = vsel %vm935_vm9, %v4860_v17, %v932_v47  ;;  %v922_v33 = vmul.f32 %v4867_v58, %v921_v48 }
 0x129   : > { %v911_v52 = vsub.f32 1.5, %v910_v32  ;;  %v975_v43 = vmul.f32 %v936_v50, %v4658_v60  ;;  %v976_v10 = vmul.f32 %v936_v50, %v4661_v61  ;;  %vm913_vm12 = vweird.f32 %v4843_v16 }
 0x12a   : > { %1043 = vst [vmem:[#allocation2 + $0x50] sm:$0xff] %v1027_v18  ;;  %v1026_v30 = vpack.c.bf16 %v1004_v49, %v1003_v25  ;;  %v926_v6 = vsel %vm925_vm11, %v4867_v58, %v922_v33  ;;  %v4275_v17 = vmov 0.0   ;;  %vm915_vm13 = vmor %vm913_vm12, %vm914_vm10  ;;  %vm943_vm15 = vweird.f32 %v4858_v22 }
 0x12b   : > { %v912_v56 = vmul.f32 %v4087_v13, %v911_v52  ;;  %1049 = vst [vmem:[#allocation3 + $0xb0] sm:$0xff] %v4275_v17  ;;  %v1013_v11 = vmul.f32 %v4720_v29, %v975_v43  ;;  %v1014_v60 = vmul.f32 %v4722_v36, %v976_v10  ;;  %v973_v61 = vmul.f32 %v926_v6, %v4664_v62 }
 0x12c   : > { %v974_v19 = vmul.f32 %v926_v6, %v4667_v63  ;;  %1050 = vst [vmem:[#allocation3] sm:$0xff] %v4275_v17 }
 0x12d   : > { %1042 = vst [vmem:[#allocation2 + $0x48] sm:$0xff] %v1026_v30  ;;  %v916_v27 = vsel %vm915_vm13, %v4087_v13, %v912_v56  ;;  %v4089_v58 = vpop.eup %4088  ;;  %v1031_v59 = vpack.c.bf16 %v1014_v60, %v1013_v11  ;;  %v1011_v16 = vmul.f32 %v4720_v29, %v973_v61 }
 0x12e   : > { %v1012_v2 = vmul.f32 %v4722_v36, %v974_v19  ;;  %v971_v57 = vmul.f32 %v916_v27, %v4670_v3  ;;  %1051 = vst [vmem:[#allocation3 + $0xd8] sm:$0xff] %v4275_v17  ;;  %v972_v62 = vmul.f32 %v916_v27, %v4673_v4  ;;  %v938_v63 = vmul.f32 %v4089_v58, %v4858_v22 }
 0x12f   : > { %1052 = vst [vmem:[#allocation3 + $0x18] sm:$0xff] %v4275_v17  ;;  %vm944_vm14 = vweird.f32 %v4089_v58 }
 0x130   : > { %1047 = vst [vmem:[#allocation2 + $0x70] sm:$0xff] %v1031_v59  ;;  %v1030_v15 = vpack.c.bf16 %v1012_v2, %v1011_v16  ;;  %v1009_v20 = vmul.f32 %v4720_v29, %v971_v57  ;;  %v1010_v34 = vmul.f32 %v4722_v36, %v972_v62  ;;  %v939_v35 = vmul.f32 %v4089_v58, %v938_v63  ;;  %vm945_vm0 = vmor %vm943_vm15, %vm944_vm14 }
 0x131   : > { %1053 = vst [vmem:[#allocation3 + $0x50] sm:$0xff] %v4275_v17 }
 0x132   : > { %1046 = vst [vmem:[#allocation2 + $0x68] sm:$0xff] %v1030_v15  ;;  %v1029_v12 = vpack.c.bf16 %v1010_v34, %v1009_v20  ;;  %v940_v3 = vmul.f32 0.5, %v939_v35 }
 0x133   : > { %1054 = vst [vmem:[#allocation3 + $0x68] sm:$0xff] %v4275_v17 }
 0x134   : > { %1055 = vst [vmem:[#allocation3 + $0x30] sm:$0xff] %v4275_v17  ;;  %v941_v4 = vsub.f32 1.5, %v940_v3 }
 0x135   : > { %1045 = vst [vmem:[#allocation2 + $0x60] sm:$0xff] %v1029_v12 }
 0x136   : > { %1056 = vst [vmem:[#allocation3 + $0x48] sm:$0xff] %v4275_v17  ;;  %v942_v31 = vmul.f32 %v4089_v58, %v941_v4 }
 0x137   : > { %1057 = vst [vmem:[#allocation3 + $0x80] sm:$0xff] %v4275_v17 }
 0x138   : > { %1058 = vst [vmem:[#allocation3 + $0x88] sm:$0xff] %v4275_v17  ;;  %v946_v13 = vsel %vm945_vm0, %v4089_v58, %v942_v31 }
 0x139   : > { %1059 = vst [vmem:[#allocation3 + $0xe8] sm:$0xff] %v4275_v17  ;;  %v977_v0 = vmul.f32 %v946_v13, %v4688_v23  ;;  %v978_v21 = vmul.f32 %v946_v13, %v4691_v24 }
 0x13a   : > { %1060 = vst [vmem:[#allocation3 + $0xb8] sm:$0xff] %v4275_v17 }
 0x13b   : > { %1061 = vst [vmem:[#allocation3 + $0x60] sm:$0xff] %v4275_v17  ;;  %v1015_v1 = vmul.f32 %v4720_v29, %v977_v0  ;;  %v1016_v22 = vmul.f32 %v4722_v36, %v978_v21 }
 0x13c   : > { %1062 = vst [vmem:[#allocation3 + $0xf0] sm:$0xff] %v4275_v17 }
 0x13d   : > { %1063 = vst [vmem:[#allocation3 + $0x8] sm:$0xff] %v4275_v17  ;;  %v1032_v26 = vpack.c.bf16 %v1016_v22, %v1015_v1 }
 0x13e   : > { %1064 = vst [vmem:[#allocation3 + $0x78] sm:$0xff] %v4275_v17 }
 0x13f   : > { %1065 = vst [vmem:[#allocation3 + $0x38] sm:$0xff] %v4275_v17 }
 0x140   : > { %1048 = vst [vmem:[#allocation2 + $0x78] sm:$0xff] %v1032_v26 }
 0x141   : > { %1066 = vst [vmem:[#allocation3 + $0x58] sm:$0xff] %v4275_v17 }
 0x142   : > { %1067 = vst [vmem:[#allocation3 + $0x40] sm:$0xff] %v4275_v17 }
 0x143   : > { %1068 = vst [vmem:[#allocation3 + $0xc8] sm:$0xff] %v4275_v17 }
 0x144   : > { %1069 = vst [vmem:[#allocation3 + $0xe0] sm:$0xff] %v4275_v17 }
 0x145   : > { %1070 = vst [vmem:[#allocation3 + $0x90] sm:$0xff] %v4275_v17 }
 0x146   : > { %1071 = vst [vmem:[#allocation3 + $0x70] sm:$0xff] %v4275_v17 }
 0x147   : > { %1072 = vst [vmem:[#allocation3 + $0xc0] sm:$0xff] %v4275_v17 }
 0x148   : > { %1073 = vst [vmem:[#allocation3 + $0xa8] sm:$0xff] %v4275_v17 }
 0x149   : > { %1074 = vst [vmem:[#allocation3 + $0xd0] sm:$0xff] %v4275_v17 }
 0x14a   : > { %1075 = vst [vmem:[#allocation3 + $0x10] sm:$0xff] %v4275_v17 }
 0x14b   : > { %1076 = vst [vmem:[#allocation3 + $0x28] sm:$0xff] %v4275_v17 }
 0x14c   : > { %1077 = vst [vmem:[#allocation3 + $0xa0] sm:$0xff] %v4275_v17 }
 0x14d   : > { %1078 = vst [vmem:[#allocation3 + $0xf8] sm:$0xff] %v4275_v17 }
 0x14e   : > { %1079 = vst [vmem:[#allocation3 + $0x20] sm:$0xff] %v4275_v17 }
 0x14f   : > { %1080 = vst [vmem:[#allocation3 + $0x98] sm:$0xff] %v4275_v17 }
 0x150 PF: > { %v3520_v23 = vld [vmem:[%s4532_s27 + $0x70] sm:$0xf]  ;;  %v3917_v24 = vld [vmem:[%s4532_s27 + $0x74] sm:$0xf0]  ;;  %v3916_v44 = vld [vmem:[%s4532_s27 + $0x74] sm:$0xf] }
 0x151   : > { %v3584_v29 = vld [vmem:[%s4532_s27 + $0xf0] sm:$0xf]  ;;  %v3521_v36 = vor.u32 %v3917_v24, %v3520_v23  ;;  %v3933_v37 = vld [vmem:[%s4532_s27 + $0xf4] sm:$0xf0]  ;;  %v3522_v14 = vld [vmem:[%s4532_s27 + $0x78] sm:$0xf0] }
 0x152   : > { %v3585_v9 = vor.u32 %v3933_v37, %v3584_v29  ;;  %v3525_v5 = vor.u32 %v3916_v44, %v3522_v14  ;;  %v3932_v55 = vld [vmem:[%s4532_s27 + $0xf4] sm:$0xf]  ;;  %v3586_v39 = vld [vmem:[%s4532_s27 + $0xf8] sm:$0xf0]  ;;  %v3512_v45 = vld [vmem:[%s4532_s27 + $0x60] sm:$0xf] }
 0x153   : > { %1369 = vmatpush.bf16.msra.mxu0 %v3521_v36  ;;  %v3589_v46 = vor.u32 %v3932_v55, %v3586_v39  ;;  %v3915_v41 = vld [vmem:[%s4532_s27 + $0x64] sm:$0xf0]  ;;  %v3576_v42 = vld [vmem:[%s4532_s27 + $0xe0] sm:$0xf]  ;;  %v3914_v40 = vld [vmem:[%s4532_s27 + $0x64] sm:$0xf] }
 0x154   : > { %v3931_v38 = vld [vmem:[%s4532_s27 + $0xe4] sm:$0xf0]  ;;  %1418 = vmatpush.bf16.msra.mxu1 %v3585_v9  ;;  %1467 = vmatpush.bf16.msra.mxu2 %v3525_v5  ;;  %v3513_v7 = vor.u32 %v3915_v41, %v3512_v45  ;;  %v3514_v53 = vld [vmem:[%s4532_s27 + $0x68] sm:$0xf0]  ;;  %v3930_v54 = vld [vmem:[%s4532_s27 + $0xe4] sm:$0xf] }
 0x155   : > { %v3577_v8 = vor.u32 %v3931_v38, %v3576_v42  ;;  %1516 = vmatpush.bf16.msra.mxu3 %v3589_v46  ;;  %v3517_v28 = vor.u32 %v3914_v40, %v3514_v53  ;;  %v3578_v51 = vld [vmem:[%s4532_s27 + $0xe8] sm:$0xf0]  ;;  %v3504_v47 = vld [vmem:[%s4532_s27 + $0x50] sm:$0xf]  ;;  %v3913_v48 = vld [vmem:[%s4532_s27 + $0x54] sm:$0xf0] }
 0x156   : > { %v3581_v32 = vor.u32 %v3930_v54, %v3578_v51  ;;  %v3568_v18 = vld [vmem:[%s4532_s27 + $0xd0] sm:$0xf]  ;;  %v3929_v25 = vld [vmem:[%s4532_s27 + $0xd4] sm:$0xf0]  ;;  %v3912_v49 = vld [vmem:[%s4532_s27 + $0x54] sm:$0xf]  ;;  %v3505_v50 = vor.u32 %v3913_v48, %v3504_v47 }
 0x157   : > { %1370 = vmatpush.bf16.msra.mxu0 %v3513_v7  ;;  %v3506_v33 = vld [vmem:[%s4532_s27 + $0x58] sm:$0xf0]  ;;  %v3928_v52 = vld [vmem:[%s4532_s27 + $0xd4] sm:$0xf]  ;;  %v3569_v10 = vor.u32 %v3929_v25, %v3568_v18  ;;  %v3496_v6 = vld [vmem:[%s4532_s27 + $0x40] sm:$0xf] }
 0x158   : > { %v3570_v43 = vld [vmem:[%s4532_s27 + $0xd8] sm:$0xf0]  ;;  %1419 = vmatpush.bf16.msra.mxu1 %v3577_v8  ;;  %1468 = vmatpush.bf16.msra.mxu2 %v3517_v28  ;;  %v3509_v30 = vor.u32 %v3912_v49, %v3506_v33  ;;  %v3911_v56 = vld [vmem:[%s4532_s27 + $0x44] sm:$0xf0]  ;;  %v3560_v17 = vld [vmem:[%s4532_s27 + $0xc0] sm:$0xf] }
 0x159   : > { %1517 = vmatpush.bf16.msra.mxu3 %v3581_v32  ;;  %v3573_v11 = vor.u32 %v3928_v52, %v3570_v43  ;;  %v3927_v60 = vld [vmem:[%s4532_s27 + $0xc4] sm:$0xf0]  ;;  %v3910_v61 = vld [vmem:[%s4532_s27 + $0x44] sm:$0xf]  ;;  %v3498_v19 = vld [vmem:[%s4532_s27 + $0x48] sm:$0xf0]  ;;  %v3497_v59 = vor.u32 %v3911_v56, %v3496_v6 }
 0x15a   : > { %v3926_v27 = vld [vmem:[%s4532_s27 + $0xc4] sm:$0xf]  ;;  %v3562_v58 = vld [vmem:[%s4532_s27 + $0xc8] sm:$0xf0]  ;;  %v3561_v16 = vor.u32 %v3927_v60, %v3560_v17  ;;  %v3501_v2 = vor.u32 %v3910_v61, %v3498_v19  ;;  %v3488_v57 = vld [vmem:[%s4532_s27 + $0x30] sm:$0xf] }
 0x15b   : > { %1371 = vmatpush.bf16.msra.mxu0 %v3505_v50  ;;  %v3909_v62 = vld [vmem:[%s4532_s27 + $0x34] sm:$0xf0]  ;;  %v3552_v63 = vld [vmem:[%s4532_s27 + $0xb0] sm:$0xf]  ;;  %v3565_v15 = vor.u32 %v3926_v27, %v3562_v58  ;;  %v3908_v34 = vld [vmem:[%s4532_s27 + $0x34] sm:$0xf] }
 0x15c   : > { %1420 = vmatpush.bf16.msra.mxu1 %v3569_v10  ;;  %1469 = vmatpush.bf16.msra.mxu2 %v3509_v30  ;;  %v3925_v20 = vld [vmem:[%s4532_s27 + $0xb4] sm:$0xf0]  ;;  %v3490_v35 = vld [vmem:[%s4532_s27 + $0x38] sm:$0xf0]  ;;  %v3924_v12 = vld [vmem:[%s4532_s27 + $0xb4] sm:$0xf]  ;;  %v3489_v4 = vor.u32 %v3909_v62, %v3488_v57 }
 0x15d   : > { %1518 = vmatpush.bf16.msra.mxu3 %v3573_v11  ;;  %v3554_v3 = vld [vmem:[%s4532_s27 + $0xb8] sm:$0xf0]  ;;  %v3553_v31 = vor.u32 %v3925_v20, %v3552_v63  ;;  %v3493_v13 = vor.u32 %v3908_v34, %v3490_v35  ;;  %v3480_v0 = vld [vmem:[%s4532_s27 + $0x20] sm:$0xf]  ;;  %v3907_v21 = vld [vmem:[%s4532_s27 + $0x24] sm:$0xf0] }
 0x15e   : > { %v3544_v1 = vld [vmem:[%s4532_s27 + $0xa0] sm:$0xf]  ;;  %v3557_v22 = vor.u32 %v3924_v12, %v3554_v3  ;;  %v3923_v26 = vld [vmem:[%s4532_s27 + $0xa4] sm:$0xf0]  ;;  %v3906_v23 = vld [vmem:[%s4532_s27 + $0x24] sm:$0xf]  ;;  %v3481_v37 = vor.u32 %v3907_v21, %v3480_v0 }
 0x15f   : > { %1372 = vmatpush.bf16.msra.mxu0 %v3497_v59  ;;  %v3482_v24 = vld [vmem:[%s4532_s27 + $0x28] sm:$0xf0]  ;;  %v3922_v29 = vld [vmem:[%s4532_s27 + $0xa4] sm:$0xf]  ;;  %v3545_v44 = vor.u32 %v3923_v26, %v3544_v1  ;;  %v3472_v9 = vld [vmem:[%s4532_s27 + $0x10] sm:$0xf] }
 0x160   : > { %1421 = vmatpush.bf16.msra.mxu1 %v3561_v16  ;;  %1470 = vmatpush.bf16.msra.mxu2 %v3501_v2  ;;  %v3546_v36 = vld [vmem:[%s4532_s27 + $0xa8] sm:$0xf0]  ;;  %v3485_v14 = vor.u32 %v3906_v23, %v3482_v24  ;;  %v3905_v5 = vld [vmem:[%s4532_s27 + $0x14] sm:$0xf0]  ;;  %v3536_v55 = vld [vmem:[%s4532_s27 + $0x90] sm:$0xf] }
 0x161   : > { %1519 = vmatpush.bf16.msra.mxu3 %v3565_v15  ;;  %v3549_v39 = vor.u32 %v3922_v29, %v3546_v36  ;;  %v3921_v45 = vld [vmem:[%s4532_s27 + $0x94] sm:$0xf0]  ;;  %v3904_v46 = vld [vmem:[%s4532_s27 + $0x14] sm:$0xf]  ;;  %v3474_v41 = vld [vmem:[%s4532_s27 + $0x18] sm:$0xf0]  ;;  %v3473_v7 = vor.u32 %v3905_v5, %v3472_v9 }
 0x162   : > { %v3920_v42 = vld [vmem:[%s4532_s27 + $0x94] sm:$0xf]  ;;  %v3538_v38 = vld [vmem:[%s4532_s27 + $0x98] sm:$0xf0]  ;;  %v3464_v8 = vld [vmem:[%s4532_s27] sm:$0xf]  ;;  %v3537_v53 = vor.u32 %v3921_v45, %v3536_v55  ;;  %v3477_v54 = vor.u32 %v3904_v46, %v3474_v41 }
 0x163   : > { %1373 = vmatpush.bf16.msra.mxu0 %v3489_v4  ;;  %v3903_v40 = vld [vmem:[%s4532_s27 + $0x4] sm:$0xf0]  ;;  %v3528_v28 = vld [vmem:[%s4532_s27 + $0x80] sm:$0xf]  ;;  %v3902_v47 = vld [vmem:[%s4532_s27 + $0x4] sm:$0xf]  ;;  %v3541_v48 = vor.u32 %v3920_v42, %v3538_v38 }
 0x164   : > { %1422 = vmatpush.bf16.msra.mxu1 %v3553_v31  ;;  %1471 = vmatpush.bf16.msra.mxu2 %v3493_v13  ;;  %v3919_v51 = vld [vmem:[%s4532_s27 + $0x84] sm:$0xf0]  ;;  %v3466_v32 = vld [vmem:[%s4532_s27 + $0x8] sm:$0xf0]  ;;  %v3918_v18 = vld [vmem:[%s4532_s27 + $0x84] sm:$0xf]  ;;  %v3465_v52 = vor.u32 %v3903_v40, %v3464_v8 }
 0x165   : > { %1520 = vmatpush.bf16.msra.mxu3 %v3557_v22  ;;  %v3530_v25 = vld [vmem:[%s4532_s27 + $0x88] sm:$0xf0]  ;;  %v3400_v49 = vld [vmem:[#allocation2] sm:$0xf]  ;;  %v3948_v50 = vld [vmem:[%s4534_s28 + $0x74] sm:$0xf]  ;;  %v3529_v6 = vor.u32 %v3919_v51, %v3528_v28  ;;  %v3469_v56 = vor.u32 %v3902_v47, %v3466_v32 }
 0x166   : > { %v3650_v33 = vld [vmem:[%s4534_s28 + $0x78] sm:$0xf0]  ;;  %v3887_v43 = vld [vmem:[#allocation2 + $0x4] sm:$0xf0]  ;;  %v3964_v10 = vld [vmem:[%s4534_s28 + $0xf4] sm:$0xf]  ;;  %v3533_v60 = vor.u32 %v3918_v18, %v3530_v25 }
 0x167   : > { %1374 = vmatpush.bf16.msra.mxu0 %v3481_v37  ;;  %v3714_v30 = vld [vmem:[%s4534_s28 + $0xf8] sm:$0xf0]  ;;  %v3886_v17 = vld [vmem:[#allocation2 + $0x4] sm:$0xf]  ;;  %v3402_v11 = vld [vmem:[#allocation2 + $0x8] sm:$0xf0]  ;;  %v3653_v61 = vor.u32 %v3948_v50, %v3650_v33  ;;  %v5038_v59 = vor.u32 %v3887_v43, %v3400_v49 }
 0x168   : > { %1423 = vmatpush.bf16.msra.mxu1 %v3545_v44  ;;  %1472 = vmatpush.bf16.msra.mxu2 %v3485_v14  ;;  %v3648_v19 = vld [vmem:[%s4534_s28 + $0x70] sm:$0xf]  ;;  %v3949_v27 = vld [vmem:[%s4534_s28 + $0x74] sm:$0xf0]  ;;  %v3717_v16 = vor.u32 %v3964_v10, %v3714_v30  ;;  %v3946_v57 = vld [vmem:[%s4534_s28 + $0x64] sm:$0xf]  ;;  %v5043_v63 = vor.u32 %v3886_v17, %v3402_v11 }
 0x169   : > { %1521 = vmatpush.bf16.msra.mxu3 %v3549_v39  ;;  %v3712_v58 = vld [vmem:[%s4534_s28 + $0xf0] sm:$0xf]  ;;  %v3965_v2 = vld [vmem:[%s4534_s28 + $0xf4] sm:$0xf0]  ;;  %v3642_v62 = vld [vmem:[%s4534_s28 + $0x68] sm:$0xf0]  ;;  %v3649_v34 = vor.u32 %v3949_v27, %v3648_v19 }
 0x16a   : > { %v3962_v15 = vld [vmem:[%s4534_s28 + $0xe4] sm:$0xf]  ;;  %v3706_v20 = vld [vmem:[%s4534_s28 + $0xe8] sm:$0xf0]  ;;  %v3713_v35 = vor.u32 %v3965_v2, %v3712_v58  ;;  %v3645_v12 = vor.u32 %v3946_v57, %v3642_v62  ;;  %v3640_v3 = vld [vmem:[%s4534_s28 + $0x60] sm:$0xf] }
 0x16b   : > { %1375 = vmatpush.bf16.msra.mxu0 %v3473_v7  ;;  %v3947_v4 = vld [vmem:[%s4534_s28 + $0x64] sm:$0xf0]  ;;  %v3709_v31 = vor.u32 %v3962_v15, %v3706_v20  ;;  %v3704_v13 = vld [vmem:[%s4534_s28 + $0xe0] sm:$0xf]  ;;  %v3944_v1 = vld [vmem:[%s4534_s28 + $0x54] sm:$0xf] }
 0x16c   : > { %1424 = vmatpush.bf16.msra.mxu1 %v3537_v53  ;;  %1473 = vmatpush.bf16.msra.mxu2 %v3477_v54  ;;  %v3963_v0 = vld [vmem:[%s4534_s28 + $0xe4] sm:$0xf0]  ;;  %v3641_v21 = vor.u32 %v3947_v4, %v3640_v3  ;;  %v3634_v22 = vld [vmem:[%s4534_s28 + $0x58] sm:$0xf0]  ;;  %v3960_v26 = vld [vmem:[%s4534_s28 + $0xd4] sm:$0xf] }
 0x16d   : > { %1522 = vmatpush.bf16.msra.mxu3 %v3541_v48  ;;  %v3705_v23 = vor.u32 %v3963_v0, %v3704_v13  ;;  %v3637_v24 = vor.u32 %v3944_v1, %v3634_v22  ;;  %v3698_v29 = vld [vmem:[%s4534_s28 + $0xd8] sm:$0xf0]  ;;  %v3632_v36 = vld [vmem:[%s4534_s28 + $0x50] sm:$0xf]  ;;  %v3945_v37 = vld [vmem:[%s4534_s28 + $0x54] sm:$0xf0] }
 0x16e   : > { %v3701_v44 = vor.u32 %v3960_v26, %v3698_v29  ;;  %v3696_v14 = vld [vmem:[%s4534_s28 + $0xd0] sm:$0xf]  ;;  %v3961_v9 = vld [vmem:[%s4534_s28 + $0xd4] sm:$0xf0]  ;;  %v3633_v5 = vor.u32 %v3945_v37, %v3632_v36  ;;  %v3888_v46 = vld [vmem:[#allocation2 + $0x14] sm:$0xf] }
 0x16f   : > { %1376 = vmatpush.bf16.msra.mxu0 %v3465_v52  ;;  %v3697_v55 = vor.u32 %v3961_v9, %v3696_v14  ;;  %v3408_v39 = vld [vmem:[#allocation2 + $0x10] sm:$0xf]  ;;  %v3889_v45 = vld [vmem:[#allocation2 + $0x14] sm:$0xf0]  ;;  %v3410_v41 = vld [vmem:[#allocation2 + $0x18] sm:$0xf0] }
 0x170   : > { %1425 = vmatpush.bf16.msra.mxu1 %v3529_v6  ;;  %1474 = vmatpush.bf16.msra.mxu2 %v3469_v56  ;;  %v5063_v42 = vor.u32 %v3889_v45, %v3408_v39  ;;  %v5065_v38 = vor.u32 %v3888_v46, %v3410_v41  ;;  %v3942_v7 = vld [vmem:[%s4534_s28 + $0x44] sm:$0xf]  ;;  %v3626_v8 = vld [vmem:[%s4534_s28 + $0x48] sm:$0xf0]  ;;  %v3624_v28 = vld [vmem:[%s4534_s28 + $0x40] sm:$0xf] }
 0x171   : > { %1523 = vmatpush.bf16.msra.mxu3 %v3533_v60  ;;  %v3958_v40 = vld [vmem:[%s4534_s28 + $0xc4] sm:$0xf]  ;;  %v3629_v53 = vor.u32 %v3942_v7, %v3626_v8  ;;  %v3690_v54 = vld [vmem:[%s4534_s28 + $0xc8] sm:$0xf0]  ;;  %v3943_v51 = vld [vmem:[%s4534_s28 + $0x44] sm:$0xf0] }
 0x172   : > { %1377 = vmatmul.bf16.vlgmr.msra.gmra.mxu0 %v5038_v59  ;;  %v3693_v47 = vor.u32 %v3958_v40, %v3690_v54  ;;  %v3625_v48 = vor.u32 %v3943_v51, %v3624_v28  ;;  %v3688_v32 = vld [vmem:[%s4534_s28 + $0xc0] sm:$0xf]  ;;  %v3959_v18 = vld [vmem:[%s4534_s28 + $0xc4] sm:$0xf0]  ;;  %v3890_v33 = vld [vmem:[#allocation2 + $0x24] sm:$0xf] }
 0x173   : > { %1426 = vmatmul.bf16.vlgmr.msra.gmra.mxu1 %v5043_v63  ;;  %1475 = vmatmul.bf16.vlgmr.msra.gmra.mxu2 %v5038_v59  ;;  %v3689_v25 = vor.u32 %v3959_v18, %v3688_v32  ;;  %v3416_v49 = vld [vmem:[#allocation2 + $0x20] sm:$0xf]  ;;  %v3891_v50 = vld [vmem:[#allocation2 + $0x24] sm:$0xf0]  ;;  %v3418_v52 = vld [vmem:[#allocation2 + $0x28] sm:$0xf0] }
 0x174   : > { %1855 = vmatpush.bf16.msrb.mxu2 %v3653_v61  ;;  %1524 = vmatmul.bf16.vlgmr.msra.gmra.mxu3 %v5043_v63  ;;  %v5079_v43 = vor.u32 %v3891_v50, %v3416_v49  ;;  %v5081_v10 = vor.u32 %v3890_v33, %v3418_v52  ;;  %v3940_v30 = vld [vmem:[%s4534_s28 + $0x34] sm:$0xf]  ;;  %v3618_v6 = vld [vmem:[%s4534_s28 + $0x38] sm:$0xf0]  ;;  %v3616_v60 = vld [vmem:[%s4534_s28 + $0x30] sm:$0xf] }
 0x175   : > { %1904 = vmatpush.bf16.msrb.mxu3 %v3717_v16  ;;  %1757 = vmatpush.bf16.msrb.mxu0 %v3649_v34  ;;  %v3956_v56 = vld [vmem:[%s4534_s28 + $0xb4] sm:$0xf]  ;;  %v3621_v17 = vor.u32 %v3940_v30, %v3618_v6  ;;  %v3682_v11 = vld [vmem:[%s4534_s28 + $0xb8] sm:$0xf0]  ;;  %v3941_v61 = vld [vmem:[%s4534_s28 + $0x34] sm:$0xf0] }
 0x176   : > { %1806 = vmatpush.bf16.msrb.mxu1 %v3713_v35  ;;  %v3685_v19 = vor.u32 %v3956_v56, %v3682_v11  ;;  %v3617_v27 = vor.u32 %v3941_v61, %v3616_v60  ;;  %v3680_v58 = vld [vmem:[%s4534_s28 + $0xb0] sm:$0xf]  ;;  %v3957_v16 = vld [vmem:[%s4534_s28 + $0xb4] sm:$0xf0]  ;;  %v3892_v15 = vld [vmem:[#allocation2 + $0x34] sm:$0xf] }
 0x177   : > { %v3681_v2 = vor.u32 %v3957_v16, %v3680_v58  ;;  %v3424_v57 = vld [vmem:[#allocation2 + $0x30] sm:$0xf]  ;;  %v3893_v62 = vld [vmem:[#allocation2 + $0x34] sm:$0xf0]  ;;  %v3426_v20 = vld [vmem:[#allocation2 + $0x38] sm:$0xf0] }
 0x178   : > { %1856 = vmatpush.bf16.msrb.mxu2 %v3645_v12  ;;  %v5095_v34 = vor.u32 %v3893_v62, %v3424_v57  ;;  %v5097_v35 = vor.u32 %v3892_v15, %v3426_v20  ;;  %v3938_v12 = vld [vmem:[%s4534_s28 + $0x24] sm:$0xf]  ;;  %v3610_v3 = vld [vmem:[%s4534_s28 + $0x28] sm:$0xf0]  ;;  %v3608_v0 = vld [vmem:[%s4534_s28 + $0x20] sm:$0xf] }
 0x179   : > { %1905 = vmatpush.bf16.msrb.mxu3 %v3709_v31  ;;  %1758 = vmatpush.bf16.msrb.mxu0 %v3641_v21  ;;  %v3954_v4 = vld [vmem:[%s4534_s28 + $0xa4] sm:$0xf]  ;;  %v3613_v31 = vor.u32 %v3938_v12, %v3610_v3  ;;  %v3674_v13 = vld [vmem:[%s4534_s28 + $0xa8] sm:$0xf0]  ;;  %v3939_v21 = vld [vmem:[%s4534_s28 + $0x24] sm:$0xf0] }
 0x17a   : > { %1807 = vmatpush.bf16.msrb.mxu1 %v3705_v23  ;;  %v3677_v1 = vor.u32 %v3954_v4, %v3674_v13  ;;  %v3609_v22 = vor.u32 %v3939_v21, %v3608_v0  ;;  %v3672_v26 = vld [vmem:[%s4534_s28 + $0xa0] sm:$0xf]  ;;  %v3955_v23 = vld [vmem:[%s4534_s28 + $0xa4] sm:$0xf0]  ;;  %v3894_v37 = vld [vmem:[#allocation2 + $0x44] sm:$0xf] }
 0x17b   : > { %v3432_v29 = vld [vmem:[#allocation2 + $0x40] sm:$0xf]  ;;  %v3895_v36 = vld [vmem:[#allocation2 + $0x44] sm:$0xf0]  ;;  %v3952_v39 = vld [vmem:[%s4534_s28 + $0x94] sm:$0xf] }
 0x17c   : > { %1857 = vmatpush.bf16.msrb.mxu2 %v3637_v24  ;;  %v3673_v24 = vor.u32 %v3955_v23, %v3672_v26  ;;  %v5111_v14 = vor.u32 %v3895_v36, %v3432_v29  ;;  %v3666_v46 = vld [vmem:[%s4534_s28 + $0x98] sm:$0xf0]  ;;  %v3600_v41 = vld [vmem:[%s4534_s28 + $0x10] sm:$0xf]  ;;  %v3937_v7 = vld [vmem:[%s4534_s28 + $0x14] sm:$0xf0] }
 0x17d   : > { %1906 = vmatpush.bf16.msrb.mxu3 %v3701_v44  ;;  %1759 = vmatpush.bf16.msrb.mxu0 %v3633_v5  ;;  %v3434_v44 = vld [vmem:[#allocation2 + $0x48] sm:$0xf0]  ;;  %v3936_v5 = vld [vmem:[%s4534_s28 + $0x14] sm:$0xf]  ;;  %v3669_v8 = vor.u32 %v3952_v39, %v3666_v46  ;;  %v3601_v40 = vor.u32 %v3937_v7, %v3600_v41  ;;  %v3953_v54 = vld [vmem:[%s4534_s28 + $0x94] sm:$0xf0] }
 0x17e   : > { %1808 = vmatpush.bf16.msrb.mxu1 %v3697_v55  ;;  %v5113_v9 = vor.u32 %v3894_v37, %v3434_v44  ;;  %v3602_v55 = vld [vmem:[%s4534_s28 + $0x18] sm:$0xf0]  ;;  %v3440_v51 = vld [vmem:[#allocation2 + $0x50] sm:$0xf]  ;;  %v3934_v49 = vld [vmem:[%s4534_s28 + $0x4] sm:$0xf] }
 0x17f   : > { %v3605_v45 = vor.u32 %v3936_v5, %v3602_v55  ;;  %v3442_v32 = vld [vmem:[#allocation2 + $0x58] sm:$0xf0]  ;;  %v3594_v50 = vld [vmem:[%s4534_s28 + $0x8] sm:$0xf0]  ;;  %v3950_v33 = vld [vmem:[%s4534_s28 + $0x84] sm:$0xf] }
 0x180   : > { %1858 = vmatpush.bf16.msrb.mxu2 %v3629_v53  ;;  %v3664_v53 = vld [vmem:[%s4534_s28 + $0x90] sm:$0xf]  ;;  %v3597_v52 = vor.u32 %v3934_v49, %v3594_v50  ;;  %v3658_v30 = vld [vmem:[%s4534_s28 + $0x88] sm:$0xf0]  ;;  %v3592_v6 = vld [vmem:[%s4534_s28] sm:$0xf] }
 0x181   : > { %1907 = vmatpush.bf16.msrb.mxu3 %v3693_v47  ;;  %1760 = vmatpush.bf16.msrb.mxu0 %v3625_v48  ;;  %v3665_v28 = vor.u32 %v3953_v54, %v3664_v53  ;;  %v3897_v47 = vld [vmem:[#allocation2 + $0x54] sm:$0xf0]  ;;  %v3896_v48 = vld [vmem:[#allocation2 + $0x54] sm:$0xf]  ;;  %v3935_v56 = vld [vmem:[%s4534_s28 + $0x4] sm:$0xf0] }
 0x182   : > { %1382 = vmatmul.bf16.gmra.mxu0 %v5063_v42  ;;  %1809 = vmatpush.bf16.msrb.mxu1 %v3689_v25  ;;  %v5127_v18 = vor.u32 %v3897_v47, %v3440_v51  ;;  %v5129_v25 = vor.u32 %v3896_v48, %v3442_v32  ;;  %v3593_v11 = vor.u32 %v3935_v56, %v3592_v6  ;;  %v3656_v60 = vld [vmem:[%s4534_s28 + $0x80] sm:$0xf]  ;;  %v3951_v61 = vld [vmem:[%s4534_s28 + $0x84] sm:$0xf0]  ;;  %v3898_v16 = vld [vmem:[#allocation2 + $0x64] sm:$0xf] }
 0x183   : > { %1431 = vmatmul.bf16.gmra.mxu1 %v5065_v38  ;;  %1480 = vmatmul.bf16.gmra.mxu2 %v5063_v42  ;;  %v3899_v58 = vld [vmem:[#allocation2 + $0x64] sm:$0xf0]  ;;  %v3456_v15 = vld [vmem:[#allocation2 + $0x70] sm:$0xf]  ;;  %v3901_v20 = vld [vmem:[#allocation2 + $0x74] sm:$0xf0] }
 0x184   : > { %1529 = vmatmul.bf16.gmra.mxu3 %v5065_v38  ;;  %1859 = vmatpush.bf16.msrb.mxu2 %v3621_v17  ;;  %v3661_v17 = vor.u32 %v3950_v33, %v3658_v30  ;;  %v3900_v12 = vld [vmem:[#allocation2 + $0x74] sm:$0xf]  ;;  %v3458_v3 = vld [vmem:[#allocation2 + $0x78] sm:$0xf0]  ;;  %v5151_v4 = vor.u32 %v3901_v20, %v3456_v15  ;;  %v3808_v47 = vld [vmem:[%s4530_s17 + $0x70] sm:$0xf] }
 0x185   : > { %1908 = vmatpush.bf16.msrb.mxu3 %v3685_v19  ;;  %1761 = vmatpush.bf16.msrb.mxu0 %v3617_v27  ;;  %v3657_v19 = vor.u32 %v3951_v61, %v3656_v60  ;;  %v3448_v27 = vld [vmem:[#allocation2 + $0x60] sm:$0xf]  ;;  %v3810_v39 = vld [vmem:[%s4530_s17 + $0x78] sm:$0xf0]  ;;  %v3996_v46 = vld [vmem:[%s4530_s17 + $0xf4] sm:$0xf] }
 0x186   : > { %1810 = vmatpush.bf16.msrb.mxu1 %v3681_v2  ;;  %v3450_v2 = vld [vmem:[#allocation2 + $0x68] sm:$0xf0]  ;;  %v5143_v57 = vor.u32 %v3899_v58, %v3448_v27  ;;  %v3874_v41 = vld [vmem:[%s4530_s17 + $0xf8] sm:$0xf0]  ;;  %v3997_v32 = vld [vmem:[%s4530_s17 + $0xf4] sm:$0xf0] }
 0x187   : > { %v5145_v62 = vor.u32 %v3898_v16, %v3450_v2  ;;  %v3877_v53 = vor.u32 %v3996_v46, %v3874_v41  ;;  %v3978_v61 = vld [vmem:[%s4530_s17 + $0x64] sm:$0xf]  ;;  %v3866_v16 = vld [vmem:[%s4530_s17 + $0xe8] sm:$0xf0]  ;;  %v3794_v41 = vld [vmem:[%s4530_s17 + $0x58] sm:$0xf0] }
 0x188   : > { %1860 = vmatpush.bf16.msrb.mxu2 %v3613_v31  ;;  %v5153_v31 = vor.u32 %v3900_v12, %v3458_v3  ;;  %v3994_v58 = vld [vmem:[%s4530_s17 + $0xe4] sm:$0xf]  ;;  %p3878_p13 = scmp.ne.s32.totalorder %s4256_s20, 2 }
 0x189   : > { %1909 = vmatpush.bf16.msrb.mxu3 %v3677_v1  ;;  %1762 = vmatpush.bf16.msrb.mxu0 %v3609_v22  ;;  %v3869_v15 = vor.u32 %v3994_v58, %v3866_v16 }
 0x18a   : > { %1811 = vmatpush.bf16.msrb.mxu1 %v3673_v24 }
 0x18c   : > { %1861 = vmatpush.bf16.msrb.mxu2 %v3605_v45 }
 0x18d   : > { %1910 = vmatpush.bf16.msrb.mxu3 %v3669_v8  ;;  %1763 = vmatpush.bf16.msrb.mxu0 %v3601_v40 }
 0x18e   : > { %1812 = vmatpush.bf16.msrb.mxu1 %v3665_v28 }
 0x190   : > { %1862 = vmatpush.bf16.msrb.mxu2 %v3597_v52 }
 0x191   : > { %1911 = vmatpush.bf16.msrb.mxu3 %v3661_v17  ;;  %1764 = vmatpush.bf16.msrb.mxu0 %v3593_v11 }
 0x192   : > { %1387 = vmatmul.bf16.gmra.mxu0 %v5079_v43  ;;  %1813 = vmatpush.bf16.msrb.mxu1 %v3657_v19  ;;  %v3802_v19 = vld [vmem:[%s4530_s17 + $0x68] sm:$0xf0] }
 0x193   : > { %1436 = vmatmul.bf16.gmra.mxu1 %v5081_v10  ;;  %1485 = vmatmul.bf16.gmra.mxu2 %v5079_v43  ;;  %v3805_v2 = vor.u32 %v3978_v61, %v3802_v19 }
 0x194   : > { %1534 = vmatmul.bf16.gmra.mxu3 %v5081_v10 }
 0x195   : > { %3012 = vmatpush.bf16.msra.mxu3 %v3877_v53  ;;  %v3858_v53 = vld [vmem:[%s4530_s17 + $0xd8] sm:$0xf0] }
 0x199   : > { %3013 = vmatpush.bf16.msra.mxu3 %v3869_v15  ;;  %v3786_v15 = vld [vmem:[%s4530_s17 + $0x48] sm:$0xf0] }
 0x1a2   : > { %1392 = vmatmul.bf16.gmra.mxu0 %v5095_v34 }
 0x1a3   : > { %1441 = vmatmul.bf16.gmra.mxu1 %v5097_v35  ;;  %1490 = vmatmul.bf16.gmra.mxu2 %v5095_v34 }
 0x1a4   : > { %1539 = vmatmul.bf16.gmra.mxu3 %v5097_v35 }
 0x1b2   : > { %1397 = vmatmul.bf16.gmra.mxu0 %v5111_v14 }
 0x1b3   : > { %1446 = vmatmul.bf16.gmra.mxu1 %v5113_v9  ;;  %1495 = vmatmul.bf16.gmra.mxu2 %v5111_v14 }
 0x1b4   : > { %1544 = vmatmul.bf16.gmra.mxu3 %v5113_v9 }
 0x1c2   : > { %1402 = vmatmul.bf16.gmra.mxu0 %v5127_v18 }
 0x1c3   : > { %1451 = vmatmul.bf16.gmra.mxu1 %v5129_v25  ;;  %1500 = vmatmul.bf16.gmra.mxu2 %v5127_v18 }
 0x1c4   : > { %1549 = vmatmul.bf16.gmra.mxu3 %v5129_v25 }
 0x1d2   : > { %1407 = vmatmul.bf16.gmra.mxu0 %v5143_v57 }
 0x1d3   : > { %1456 = vmatmul.bf16.gmra.mxu1 %v5145_v62  ;;  %1505 = vmatmul.bf16.gmra.mxu2 %v5143_v57 }
 0x1d4   : > { %1554 = vmatmul.bf16.gmra.mxu3 %v5145_v62 }
 0x1e2   : > { %1412 = vmatmul.bf16.gmra.mxu0 %v5151_v4 }
 0x1e3   : > { %1461 = vmatmul.bf16.gmra.mxu1 %v5153_v31  ;;  %1510 = vmatmul.bf16.gmra.mxu2 %v5151_v4 }
 0x1e4   : > { %1559 = vmatmul.bf16.gmra.mxu3 %v5153_v31 }
 0x1ef   : > { %v1378_v13 = vpop.f32.mrf.mxu0 }
 0x1f0   : > { %v1427_v0 = vpop.f32.mrf.mxu1 }
 0x1f1   : > { %v5159_v21 = vadd.f32 %v1427_v0, %v1378_v13  ;;  %v3800_v13 = vld [vmem:[%s4530_s17 + $0x60] sm:$0xf]  ;;  %v3979_v0 = vld [vmem:[%s4530_s17 + $0x64] sm:$0xf0] }
 0x1f2   : > { %1765 = vmatmul.bf16.vlgmr.msrb.gmra.mxu0 %v5038_v59 }
 0x1f3   : > { %1814 = vmatmul.bf16.vlgmr.msrb.gmra.mxu1 %v5043_v63  ;;  %1863 = vmatmul.bf16.vlgmr.msrb.gmra.mxu2 %v5038_v59 }
 0x1f4   : > { %1912 = vmatmul.bf16.vlgmr.msrb.gmra.mxu3 %v5043_v63  ;;  %v3980_v63 = vld [vmem:[%s4530_s17 + $0x74] sm:$0xf] }
 0x1f5   : > { %v3813_v45 = vor.u32 %v3980_v63, %v3810_v39 }
 0x1f6   : > { %v1476_v1 = vpop.f32.mrf.mxu2 }
 0x1f7   : > { %v1525_v22 = vpop.f32.mrf.mxu3  ;;  %v1380_v26 = vpop.f32.mrf.mxu0  ;;  %2963 = vmatpush.bf16.msra.mxu2 %v3813_v45  ;;  %v3976_v45 = vld [vmem:[%s4530_s17 + $0x54] sm:$0xf] }
 0x1f8   : > { %v5165_v23 = vadd.f32 %v1525_v22, %v1476_v1  ;;  %v1429_v24 = vpop.f32.mrf.mxu1  ;;  %v3864_v1 = vld [vmem:[%s4530_s17 + $0xe0] sm:$0xf] }
 0x1f9   : > { %v5167_v29 = vadd.f32 %v1429_v24, %v1380_v26  ;;  %v3801_v26 = vor.u32 %v3979_v0, %v3800_v13  ;;  %v3995_v24 = vld [vmem:[%s4530_s17 + $0xe4] sm:$0xf0] }
 0x1fa   : > { %v3719_v13 = vmul.f32 -1.442695, %v5165_v23 }
 0x1fb   : > { %2964 = vmatpush.bf16.msra.mxu2 %v3805_v2  ;;  %v3974_v2 = vld [vmem:[%s4530_s17 + $0x44] sm:$0xf] }
 0x1fe   : > { %v1478_v36 = vpop.f32.mrf.mxu2 }
 0x1ff   : > { %v1527_v37 = vpop.f32.mrf.mxu3  ;;  %v1383_v44 = vpop.f32.mrf.mxu0 }
 0x200   : > { %v5169_v5 = vadd.f32 %v1527_v37, %v1478_v36  ;;  %v1432_v55 = vpop.f32.mrf.mxu1  ;;  %v3865_v36 = vor.u32 %v3995_v24, %v3864_v1  ;;  %v3720_v24 = vmul.f32 -1.442695, %v5167_v29 }
 0x201   : > { %v5171_v59 = vadd.f32 %v1432_v55, %v1383_v44 }
 0x202   : > { %1770 = vmatmul.bf16.gmra.mxu0 %v5063_v42 }
 0x203   : > { %1819 = vmatmul.bf16.gmra.mxu1 %v5065_v38  ;;  %1868 = vmatmul.bf16.gmra.mxu2 %v5063_v42  ;;  %v3981_v42 = vld [vmem:[%s4530_s17 + $0x74] sm:$0xf0] }
 0x204   : > { %1917 = vmatmul.bf16.gmra.mxu3 %v5065_v38  ;;  %v3809_v48 = vor.u32 %v3981_v42, %v3808_v47  ;;  %v3872_v38 = vld [vmem:[%s4530_s17 + $0xf0] sm:$0xf] }
 0x205   : > { %v3873_v52 = vor.u32 %v3997_v32, %v3872_v38 }
 0x206   : > { %v1481_v7 = vpop.f32.mrf.mxu2  ;;  %2865 = vmatpush.bf16.msra.mxu0 %v3809_v48 }
 0x207   : > { %v1530_v8 = vpop.f32.mrf.mxu3  ;;  %v1385_v40 = vpop.f32.mrf.mxu0  ;;  %2914 = vmatpush.bf16.msra.mxu1 %v3873_v52 }
 0x208   : > { %v5181_v54 = vadd.f32 %v1530_v8, %v1481_v7  ;;  %v1434_v28 = vpop.f32.mrf.mxu1 }
 0x209   : > { %v5183_v51 = vadd.f32 %v1434_v28, %v1385_v40  ;;  %v3992_v40 = vld [vmem:[%s4530_s17 + $0xd4] sm:$0xf]  ;;  %v3797_v28 = vor.u32 %v3976_v45, %v3794_v41 }
 0x20a   : > { %2866 = vmatpush.bf16.msra.mxu0 %v3801_v26  ;;  %v3975_v26 = vld [vmem:[%s4530_s17 + $0x44] sm:$0xf0] }
 0x20b   : > { %2915 = vmatpush.bf16.msra.mxu1 %v3865_v36  ;;  %2965 = vmatpush.bf16.msra.mxu2 %v3797_v28  ;;  %v3848_v36 = vld [vmem:[%s4530_s17 + $0xc0] sm:$0xf] }
 0x20e   : > { %v1483_v49 = vpop.f32.mrf.mxu2 }
 0x20f   : > { %v1532_v50 = vpop.f32.mrf.mxu3  ;;  %v1388_v33 = vpop.f32.mrf.mxu0 }
 0x210   : > { %v1437_v30 = vpop.f32.mrf.mxu1  ;;  %v5189_v6 = vadd.f32 %v1532_v50, %v1483_v49  ;;  %v3792_v49 = vld [vmem:[%s4530_s17 + $0x50] sm:$0xf]  ;;  %v3977_v50 = vld [vmem:[%s4530_s17 + $0x54] sm:$0xf0] }
 0x211   : > { %v5192_v56 = vadd.f32 %v1437_v30, %v1388_v33 }
 0x212   : > { %1775 = vmatmul.bf16.gmra.mxu0 %v5079_v43 }
 0x213   : > { %1824 = vmatmul.bf16.gmra.mxu1 %v5081_v10  ;;  %1873 = vmatmul.bf16.gmra.mxu2 %v5079_v43 }
 0x214   : > { %1922 = vmatmul.bf16.gmra.mxu3 %v5081_v10 }
 0x216   : > { %v1486_v17 = vpop.f32.mrf.mxu2 }
 0x217   : > { %v1535_v11 = vpop.f32.mrf.mxu3  ;;  %v1390_v60 = vpop.f32.mrf.mxu0 }
 0x218   : > { %v1439_v27 = vpop.f32.mrf.mxu1  ;;  %v5201_v20 = vadd.f32 %v1535_v11, %v1486_v17  ;;  %v3793_v17 = vor.u32 %v3977_v50, %v3792_v49  ;;  %v3856_v11 = vld [vmem:[%s4530_s17 + $0xd0] sm:$0xf]  ;;  %v3842_v50 = vld [vmem:[%s4530_s17 + $0xb8] sm:$0xf0] }
 0x219   : > { %v5203_v10 = vadd.f32 %v1439_v27, %v1390_v60  ;;  %v3993_v60 = vld [vmem:[%s4530_s17 + $0xd4] sm:$0xf0] }
 0x21a   : > { %6561 = vst [vmem:[#allocation6_spill] sm:$0xff] %v5201_v20  ;;  %2867 = vmatpush.bf16.msra.mxu0 %v3793_v17  ;;  %v3857_v61 = vor.u32 %v3993_v60, %v3856_v11  ;;  %v3722_v60 = vmul.f32 -1.442695, %v5171_v59 }
 0x21c   : > { %2916 = vmatpush.bf16.msra.mxu1 %v3857_v61 }
 0x21e   : > { %v1488_v43 = vpop.f32.mrf.mxu2 }
 0x21f   : > { %v1537_v12 = vpop.f32.mrf.mxu3  ;;  %v1393_v3 = vpop.f32.mrf.mxu0 }
 0x220   : > { %v1442_v22 = vpop.f32.mrf.mxu1  ;;  %v5210_v37 = vadd.f32 %v1537_v12, %v1488_v43  ;;  %v3990_v43 = vld [vmem:[%s4530_s17 + $0xc4] sm:$0xf]  ;;  %v3850_v12 = vld [vmem:[%s4530_s17 + $0xc8] sm:$0xf0] }
 0x221   : > { %v5212_v44 = vadd.f32 %v1442_v22, %v1393_v3  ;;  %v3789_v3 = vor.u32 %v3974_v2, %v3786_v15  ;;  %v3853_v0 = vor.u32 %v3990_v43, %v3850_v12  ;;  %v3784_v22 = vld [vmem:[%s4530_s17 + $0x40] sm:$0xf]  ;;  %v3724_v15 = vmul.f32 -1.442695, %v5183_v51 }
 0x222   : > { %1780 = vmatmul.bf16.gmra.mxu0 %v5095_v34  ;;  %6562 = vst [vmem:[#allocation7_spill] sm:$0xff] %v5210_v37  ;;  %v3785_v45 = vor.u32 %v3975_v26, %v3784_v22 }
 0x223   : > { %6563 = vst [vmem:[#allocation8_spill] sm:$0xff] %v5212_v44  ;;  %1829 = vmatmul.bf16.gmra.mxu1 %v5097_v35  ;;  %1878 = vmatmul.bf16.gmra.mxu2 %v5095_v34  ;;  %v3861_v34 = vor.u32 %v3992_v40, %v3858_v53 }
 0x224   : > { %1927 = vmatmul.bf16.gmra.mxu3 %v5097_v35  ;;  %2966 = vmatpush.bf16.msra.mxu2 %v3789_v3 }
 0x225   : > { %3014 = vmatpush.bf16.msra.mxu3 %v3861_v34  ;;  %2868 = vmatpush.bf16.msra.mxu0 %v3785_v45  ;;  %v3972_v34 = vld [vmem:[%s4530_s17 + $0x34] sm:$0xf] }
 0x226   : > { %v1491_v55 = vpop.f32.mrf.mxu2 }
 0x227   : > { %v1540_v63 = vpop.f32.mrf.mxu3  ;;  %v1395_v39 = vpop.f32.mrf.mxu0 }
 0x228   : > { %v1444_v46 = vpop.f32.mrf.mxu1  ;;  %v5219_v7 = vadd.f32 %v1540_v63, %v1491_v55  ;;  %v3991_v55 = vld [vmem:[%s4530_s17 + $0xc4] sm:$0xf0] }
 0x229   : > { %v5221_v8 = vadd.f32 %v1444_v46, %v1395_v39  ;;  %3015 = vmatpush.bf16.msra.mxu3 %v3853_v0  ;;  %v3849_v41 = vor.u32 %v3991_v55, %v3848_v36 }
 0x22a   : > { %6564 = vst [vmem:[#allocation9_spill] sm:$0xff] %v5219_v7 }
 0x22b   : > { %6565 = vst [vmem:[#allocation10_spill] sm:$0xff] %v5221_v8  ;;  %2917 = vmatpush.bf16.msra.mxu1 %v3849_v41 }
 0x22e   : > { %v1493_v47 = vpop.f32.mrf.mxu2 }
 0x22f   : > { %v1542_v35 = vpop.f32.mrf.mxu3  ;;  %v1398_v42 = vpop.f32.mrf.mxu0 }
 0x230   : > { %v1447_v48 = vpop.f32.mrf.mxu1  ;;  %v5225_v38 = vadd.f32 %v1542_v35, %v1493_v47  ;;  %v3778_v47 = vld [vmem:[%s4530_s17 + $0x38] sm:$0xf0]  ;;  %v3988_v35 = vld [vmem:[%s4530_s17 + $0xb4] sm:$0xf] }
 0x231   : > { %v5244_v16 = vadd.f32 %v1447_v48, %v1398_v42  ;;  %v3781_v49 = vor.u32 %v3972_v34, %v3778_v47  ;;  %v3776_v47 = vld [vmem:[%s4530_s17 + $0x30] sm:$0xf] }
 0x232   : > { %6566 = vst [vmem:[#allocation11_spill] sm:$0xff] %v5225_v38  ;;  %1785 = vmatmul.bf16.gmra.mxu0 %v5111_v14 }
 0x233   : > { %1834 = vmatmul.bf16.gmra.mxu1 %v5113_v9  ;;  %1883 = vmatmul.bf16.gmra.mxu2 %v5111_v14  ;;  %v3718_v14 = vmul.f32 -1.442695, %v5159_v21 }
 0x234   : > { %1932 = vmatmul.bf16.gmra.mxu3 %v5113_v9  ;;  %2967 = vmatpush.bf16.msra.mxu2 %v3781_v49  ;;  %v3840_v49 = vld [vmem:[%s4530_s17 + $0xb0] sm:$0xf] }
 0x235   : > { %4090 = vpow2.f32 %v3718_v14  ;;  %v3723_v14 = vmul.f32 -1.442695, %v5181_v54 }
 0x236   : > { %v1496_v32 = vpop.f32.mrf.mxu2  ;;  %4092 = vpow2.f32 %v3719_v13 }
 0x237   : > { %v1545_v33 = vpop.f32.mrf.mxu3  ;;  %v5233_v52 = vpop.f32.mrf.mxu0  ;;  %4094 = vpow2.f32 %v3720_v24  ;;  %v3725_v24 = vmul.f32 -1.442695, %v5189_v6 }
 0x238   : > { %v5235_v30 = vpop.f32.mrf.mxu1  ;;  %v5255_v1 = vadd.f32 %v1545_v33, %v1496_v32  ;;  %v3721_v32 = vmul.f32 -1.442695, %v5169_v5 }
 0x23a   : > { %6569 = vst [vmem:[#allocation14_spill] sm:$0xff] %v5255_v1  ;;  %v3987_v1 = vld [vmem:[%s4530_s17 + $0xa4] sm:$0xf0] }
 0x23e   : > { %v5240_v9 = vpop.f32.mrf.mxu2 }
 0x23f   : > { %6567 = vst [vmem:[#allocation12_spill] sm:$0xff] %v5240_v9  ;;  %v5242_v19 = vpop.f32.mrf.mxu3  ;;  %v1403_v27 = vpop.f32.mrf.mxu0  ;;  %v3832_v9 = vld [vmem:[%s4530_s17 + $0xa0] sm:$0xf] }
 0x240   : > { %6568 = vst [vmem:[#allocation13_spill] sm:$0xff] %v5242_v19  ;;  %v1452_v58 = vpop.f32.mrf.mxu1  ;;  %v3729_v19 = vmul.f32 -1.442695, %v5210_v37 }
 0x241   : > { %v5266_v40 = vadd.f32 %v1452_v58, %v1403_v27  ;;  %v3845_v27 = vor.u32 %v3988_v35, %v3842_v50  ;;  %v3989_v50 = vld [vmem:[%s4530_s17 + $0xb4] sm:$0xf0] }
 0x242   : > { %1790 = vmatmul.bf16.gmra.mxu0 %v5127_v18 }
 0x243   : > { %1839 = vmatmul.bf16.gmra.mxu1 %v5129_v25  ;;  %1888 = vmatmul.bf16.gmra.mxu2 %v5127_v18  ;;  %6572 = vst [vmem:[#allocation17_spill] sm:$0xff] %v5266_v40  ;;  %v3768_v40 = vld [vmem:[%s4530_s17 + $0x20] sm:$0xf] }
 0x244   : > { %1937 = vmatmul.bf16.gmra.mxu3 %v5129_v25  ;;  %v4091_v25 = vpop.eup %4090 }
 0x245   : > { %v5268_v53 = vadd.f32 1.0, %v4091_v25  ;;  %v4093_v48 = vpop.eup %4092  ;;  %3016 = vmatpush.bf16.msra.mxu3 %v3845_v27 }
 0x246   : > { %v1501_v63 = vpop.f32.mrf.mxu2  ;;  %v4095_v11 = vpop.eup %4094  ;;  %v5288_v58 = vadd.f32 1.0, %v4093_v48 }
 0x247   : > { %v1550_v18 = vpop.f32.mrf.mxu3  ;;  %v5262_v39 = vpop.f32.mrf.mxu0  ;;  %4096 = vrcp.f32 %v5268_v53  ;;  %v5291_v2 = vadd.f32 1.0, %v4095_v11  ;;  %v2090_v45 = vand.u32 2147483647, %v5268_v53  ;;  %vm2086_vm1 = vweird.f32 %v5268_v53 }
 0x248   : > { %6570 = vst [vmem:[#allocation15_spill] sm:$0xff] %v5262_v39  ;;  %v5264_v46 = vpop.f32.mrf.mxu1  ;;  %v5270_v28 = vadd.f32 %v1550_v18, %v1501_v63  ;;  %4098 = vpow2.f32 %v3721_v32  ;;  %v3973_v32 = vld [vmem:[%s4530_s17 + $0x34] sm:$0xf0]  ;;  %vm2101_vm5 = vweird.f32 %v5288_v58 }
 0x249   : > { %6571 = vst [vmem:[#allocation16_spill] sm:$0xff] %v5264_v46  ;;  %4100 = vpow2.f32 %v3722_v60  ;;  %vm5349_vm3 = vcmp.eq.f32.partialorder %v2090_v45, 8.507059e+37  ;;  %v2105_v45 = vand.u32 2147483647, %v5288_v58  ;;  %vm2116_vm6 = vweird.f32 %v5291_v2 }
 0x24a   : > { %6573 = vst [vmem:[#allocation18_spill] sm:$0xff] %v5270_v28  ;;  %4102 = vpow2.f32 %v3723_v14 }
 0x24b   : > { %4104 = vrcp.f32 %v5288_v58  ;;  %vm5410_vm9 = vcmp.eq.f32.partialorder %v2105_v45, 8.507059e+37 }
 0x24c   : > { %4106 = vrcp.f32 %v5291_v2 }
 0x24d   : > { %v5297_v43 = vpop.eup %4096  ;;  %4108 = vpow2.f32 %v3724_v15  ;;  %v3726_v15 = vmul.f32 -1.442695, %v5192_v56 }
 0x24e   : > { %v5275_v42 = vpop.f32.mrf.mxu2  ;;  %v2082_v0 = vmul.f32 %v5297_v43, %v5268_v53  ;;  %4110 = vpow2.f32 %v3725_v24  ;;  %v3841_v24 = vor.u32 %v3989_v50, %v3840_v49  ;;  %vm2087_vm2 = vweird.f32 %v5297_v43 }
 0x24f   : > { %6574 = vst [vmem:[#allocation19_spill] sm:$0xff] %v5275_v42  ;;  %v5280_v33 = vpop.f32.mrf.mxu3  ;;  %v5282_v17 = vpop.f32.mrf.mxu0  ;;  %vm5369_vm4 = vmor %vm2086_vm1, %vm2087_vm2 }
 0x250   : > { %6575 = vst [vmem:[#allocation20_spill] sm:$0xff] %v5280_v33  ;;  %v5285_v61 = vpop.f32.mrf.mxu1  ;;  %v2083_v55 = vsub.f32 1.0, %v2082_v0  ;;  %2918 = vmatpush.bf16.msra.mxu1 %v3841_v24 }
 0x252   : > { %1795 = vmatmul.bf16.gmra.mxu0 %v5143_v57  ;;  %v2084_v14 = vmul.f32 %v5297_v43, %v2083_v55 }
 0x253   : > { %1844 = vmatmul.bf16.gmra.mxu1 %v5145_v62  ;;  %1893 = vmatmul.bf16.gmra.mxu2 %v5143_v57 }
 0x254   : > { %1942 = vmatmul.bf16.gmra.mxu3 %v5145_v62  ;;  %v4099_v62 = vpop.eup %4098 }
 0x255   : > { %v4101_v22 = vpop.eup %4100  ;;  %v5314_v63 = vadd.f32 1.0, %v4099_v62 }
 0x256   : > { %v5300_v12 = vpop.f32.mrf.mxu2  ;;  %v4103_v26 = vpop.eup %4102  ;;  %v5319_v41 = vadd.f32 1.0, %v4101_v22  ;;  %v2092_v22 = vand.u32 2147483648, %v5268_v53  ;;  %v3770_v53 = vld [vmem:[%s4530_s17 + $0x28] sm:$0xf0] }
 0x257   : > { %v5303_v3 = vpop.f32.mrf.mxu3  ;;  %v5305_v13 = vpop.f32.mrf.mxu0  ;;  %v5321_v34 = vadd.f32 1.0, %v4103_v26  ;;  %4112 = vrcp.f32 %v5314_v63  ;;  %v3777_v26 = vor.u32 %v3973_v32, %v3776_v47  ;;  %v2120_v32 = vand.u32 2147483647, %v5291_v2 }
 0x258   : > { %6576 = vst [vmem:[#allocation21_spill] sm:$0xff] %v5305_v13  ;;  %v5309_v57 = vpop.f32.mrf.mxu1  ;;  %v5312_v36 = vpop.eup %4104  ;;  %4114 = vrcp.f32 %v5319_v41  ;;  %v3986_v13 = vld [vmem:[%s4530_s17 + $0xa4] sm:$0xf]  ;;  %vm2131_vm13 = vweird.f32 %v5314_v63  ;;  %vm2146_vm14 = vweird.f32 %v5319_v41 }
 0x259   : > { %6577 = vst [vmem:[#allocation22_spill] sm:$0xff] %v5309_v57  ;;  %v5316_v18 = vpop.eup %4106  ;;  %v2097_v48 = vmul.f32 %v5312_v36, %v5288_v58  ;;  %4116 = vrcp.f32 %v5321_v34  ;;  %2869 = vmatpush.bf16.msra.mxu0 %v3777_v26  ;;  %v3970_v26 = vld [vmem:[%s4530_s17 + $0x24] sm:$0xf]  ;;  %vm2102_vm7 = vweird.f32 %v5312_v36  ;;  %vm5414_vm10 = vcmp.eq.f32.partialorder %v2120_v32, 8.507059e+37 }
 0x25a   : > { %v4109_v25 = vpop.eup %4108  ;;  %v2112_v27 = vmul.f32 %v5316_v18, %v5291_v2  ;;  %4118 = vpow2.f32 %v3726_v15  ;;  %v3727_v15 = vmul.f32 -1.442695, %v5201_v20  ;;  %vm2117_vm8 = vweird.f32 %v5316_v18  ;;  %vm5448_vm11 = vmor %vm2101_vm5, %vm2102_vm7 }
 0x25b   : > { %v5343_v62 = vadd.f32 1.0, %v4109_v25  ;;  %v2085_v25 = vadd.f32 %v5297_v43, %v2084_v14  ;;  %v4111_v47 = vpop.eup %4110  ;;  %v2093_v14 = vor.u32 1.1754944e-38, %v2092_v22  ;;  %v3834_v22 = vld [vmem:[%s4530_s17 + $0xa8] sm:$0xf0]  ;;  %vm5461_vm12 = vmor %vm2116_vm6, %vm2117_vm8 }
 0x25c   : > { %v2113_v57 = vsub.f32 1.0, %v2112_v27  ;;  %v2122_v27 = vand.u32 2147483648, %v5291_v2 }
 0x25d   : > { %4120 = vrcp.f32 %v5343_v62  ;;  %v5363_v49 = vpop.eup %4112 }
 0x25e   : > { %v5324_v35 = vpop.f32.mrf.mxu2  ;;  %v5392_v42 = vpop.eup %4114  ;;  %v2114_v39 = vmul.f32 %v5316_v18, %v2113_v57  ;;  %v2127_v50 = vmul.f32 %v5363_v49, %v5314_v63  ;;  %v2123_v55 = vor.u32 1.1754944e-38, %v2122_v27  ;;  %vm2132_vm15 = vweird.f32 %v5363_v49 }
 0x25f   : > { %6578 = vst [vmem:[#allocation23_spill] sm:$0xff] %v5324_v35  ;;  %v5331_v11 = vpop.f32.mrf.mxu3  ;;  %v5333_v60 = vpop.f32.mrf.mxu0  ;;  %v2107_v35 = vand.u32 2147483648, %v5288_v58  ;;  %vm2147_vm1 = vweird.f32 %v5392_v42 }
 0x260   : > { %6579 = vst [vmem:[#allocation24_spill] sm:$0xff] %v5331_v11  ;;  %v5340_v0 = vpop.f32.mrf.mxu1  ;;  %v2098_v11 = vsub.f32 1.0, %v2097_v48  ;;  %v3728_v48 = vmul.f32 -1.442695, %v5203_v10  ;;  %vm5571_vm7 = vmor %vm2146_vm14, %vm2147_vm1 }
 0x261   : > { %v5397_v46 = vor.u32 1.1754944e-38, %v2107_v35 }
 0x262   : > { %1800 = vmatmul.bf16.gmra.mxu0 %v5151_v4  ;;  %4122 = vpow2.f32 %v3728_v48  ;;  %v3971_v48 = vld [vmem:[%s4530_s17 + $0x24] sm:$0xf0] }
 0x263   : > { %1849 = vmatmul.bf16.gmra.mxu1 %v5153_v31  ;;  %1898 = vmatmul.bf16.gmra.mxu2 %v5151_v4  ;;  %v2099_v4 = vmul.f32 %v5312_v36, %v2098_v11  ;;  %v2089_v11 = vsel %vm5369_vm4, %v5297_v43, %v2085_v25  ;;  %v2137_v25 = vand.u32 2147483648, %v5314_v63  ;;  %4124 = vpow2.f32 %v3727_v15  ;;  %vm5547_vm4 = vmor %vm2131_vm13, %vm2132_vm15 }
 0x264   : > { %1947 = vmatmul.bf16.gmra.mxu3 %v5153_v31  ;;  %v5383_v31 = vadd.f32 %v5285_v61, %v5282_v17  ;;  %v5400_v17 = vadd.f32 1.0, %v4111_v47  ;;  %v3773_v47 = vor.u32 %v3970_v26, %v3770_v53  ;;  %v2094_v45 = vsel %vm5349_vm3, %v2093_v14, %v2089_v11 }
 0x265   : > { %v2100_v32 = vadd.f32 %v5312_v36, %v2099_v4  ;;  %v2128_v14 = vsub.f32 1.0, %v2127_v50  ;;  %v3769_v15 = vor.u32 %v3971_v48, %v3768_v40  ;;  %v5442_v4 = vmul.f32 %v2094_v45, %v5159_v21 }
 0x266   : > { %v5376_v24 = vpop.f32.mrf.mxu2  ;;  %6584 = vst [vmem:[#allocation25_spill] sm:$0xff] %v5383_v31  ;;  %v5404_v31 = vpop.eup %4116  ;;  %4126 = vrcp.f32 %v5400_v17  ;;  %2968 = vmatpush.bf16.msra.mxu2 %v3773_v47  ;;  %v2135_v53 = vand.u32 2147483647, %v5314_v63  ;;  %v5466_v58 = vor.u32 1.1754944e-38, %v2137_v25  ;;  %vm2161_vm3 = vweird.f32 %v5321_v34 }
 0x267   : > { %v5388_v28 = vpop.f32.mrf.mxu3  ;;  %v5390_v33 = vpop.f32.mrf.mxu0  ;;  %4128 = vpow2.f32 %v3729_v19  ;;  %2870 = vmatpush.bf16.msra.mxu0 %v3769_v15  ;;  %v2104_v2 = vsel %vm5448_vm11, %v5312_v36, %v2100_v32  ;;  %v2129_v15 = vmul.f32 %v5363_v49, %v2128_v14  ;;  %v5489_v36 = vadd.f32 %v5340_v0, %v5333_v60 }
 0x268   : > { %6585 = vst [vmem:[#allocation26_spill] sm:$0xff] %v5390_v33  ;;  %v5402_v61 = vpop.f32.mrf.mxu1  ;;  %v4119_v43 = vpop.eup %4118  ;;  %v5421_v33 = vadd.f32 %v5303_v3, %v5300_v12  ;;  %v2142_v12 = vmul.f32 %v5392_v42, %v5319_v41  ;;  %v2157_v3 = vmul.f32 %v5404_v31, %v5321_v34  ;;  %v2109_v14 = vsel %vm5410_vm9, %v5397_v46, %v2104_v2 }
 0x269   : > { %6586 = vst [vmem:[#allocation27_spill] sm:$0xff] %v5402_v61  ;;  %v3837_v61 = vor.u32 %v3986_v13, %v3834_v22  ;;  %v5425_v20 = vpop.eup %4120  ;;  %v2115_v13 = vadd.f32 %v5316_v18, %v2114_v39  ;;  %v5439_v26 = vadd.f32 1.0, %v4119_v43  ;;  %v3833_v22 = vor.u32 %v3987_v1, %v3832_v9  ;;  %v3968_v9 = vld [vmem:[%s4530_s17 + $0x14] sm:$0xf]  ;;  %v3762_v1 = vld [vmem:[%s4530_s17 + $0x18] sm:$0xf0] }
 0x26a   : > { %6591 = vst [vmem:[#allocation28_spill] sm:$0xff] %v5421_v33  ;;  %v2172_v27 = vmul.f32 %v5425_v20, %v5343_v62  ;;  %v4123_v40 = vpop.eup %4122  ;;  %v2143_v47 = vsub.f32 1.0, %v2142_v12  ;;  %v2158_v48 = vsub.f32 1.0, %v2157_v3  ;;  %v3984_v12 = vld [vmem:[%s4530_s17 + $0x94] sm:$0xf]  ;;  %vm5507_vm0 = vcmp.eq.f32.partialorder %v2135_v53, 8.507059e+37 }
 0x26b   : > { %3017 = vmatpush.bf16.msra.mxu3 %v3837_v61  ;;  %v2152_v61 = vand.u32 2147483648, %v5319_v41  ;;  %v2119_v25 = vsel %vm5461_vm12, %v5316_v18, %v2115_v13  ;;  %2919 = vmatpush.bf16.msra.mxu1 %v3833_v22  ;;  %v4125_v45 = vpop.eup %4124  ;;  %4130 = vrcp.f32 %v5439_v26  ;;  %6598 = vst [vmem:[#allocation31_spill] sm:$0xff] %v5489_v36  ;;  %v5493_v18 = vadd.f32 1.0, %v4123_v40  ;;  %v3826_v3 = vld [vmem:[%s4530_s17 + $0x98] sm:$0xf0] }
 0x26c   : > { %v5491_v32 = vpop.eup %4126  ;;  %v2173_v39 = vsub.f32 1.0, %v2172_v27  ;;  %v3765_v13 = vor.u32 %v3968_v9, %v3762_v1  ;;  %v5499_v22 = vadd.f32 %v5388_v28, %v5376_v24  ;;  %v2124_v60 = vsel %vm5414_vm10, %v2123_v55, %v2119_v25 }
 0x26d   : > { %v2150_v27 = vand.u32 2147483647, %v5319_v41  ;;  %v2144_v40 = vmul.f32 %v5392_v42, %v2143_v47  ;;  %v2159_v28 = vmul.f32 %v5404_v31, %v2158_v48  ;;  %v2165_v24 = vand.u32 2147483647, %v5321_v34  ;;  %v4129_v46 = vpop.eup %4128 }
 0x26e   : > { %v5455_v11 = vpop.f32.mrf.mxu2  ;;  %6599 = vst [vmem:[#allocation32_spill] sm:$0xff] %v5499_v22  ;;  %2969 = vmatpush.bf16.msra.mxu2 %v3765_v13  ;;  %v3829_v57 = vor.u32 %v3984_v12, %v3826_v3  ;;  %v2130_v35 = vadd.f32 %v5363_v49, %v2129_v15  ;;  %v2187_v55 = vmul.f32 %v5491_v32, %v5400_v17  ;;  %v5518_v53 = vadd.f32 1.0, %v4125_v45  ;;  %v3985_v22 = vld [vmem:[%s4530_s17 + $0x94] sm:$0xf0] }
 0x26f   : > { %6594 = vst [vmem:[#allocation29_spill] sm:$0xff] %v5455_v11  ;;  %v5472_v50 = vpop.f32.mrf.mxu3  ;;  %v5474_v43 = vpop.f32.mrf.mxu0  ;;  %v5521_v21 = vmul.f32 %v2109_v14, %v5165_v23  ;;  %v2153_v9 = vor.u32 1.1754944e-38, %v2152_v61  ;;  %v2174_v1 = vmul.f32 %v5425_v20, %v2173_v39  ;;  %v5530_v47 = vmul.f32 %v2124_v60, %v5167_v29 }
 0x270   : > { %6597 = vst [vmem:[#allocation30_spill] sm:$0xff] %v5472_v50  ;;  %v5482_v19 = vpop.f32.mrf.mxu1  ;;  %v3730_v50 = vmul.f32 -1.442695, %v5212_v44  ;;  %3018 = vmatpush.bf16.msra.mxu3 %v3829_v57  ;;  %vm5533_vm2 = vcmp.eq.f32.partialorder %v2150_v27, 8.507059e+37  ;;  %v2167_v23 = vand.u32 2147483648, %v5321_v34  ;;  %v2145_v45 = vadd.f32 %v5392_v42, %v2144_v40 }
 0x271   : > { %v5527_v25 = vpop.eup %4130  ;;  %v2160_v15 = vadd.f32 %v5404_v31, %v2159_v28  ;;  %vm2162_vm5 = vweird.f32 %v5404_v31  ;;  %vm5554_vm6 = vcmp.eq.f32.partialorder %v2165_v24, 8.507059e+37  ;;  %v5558_v13 = vadd.f32 1.0, %v4129_v46  ;;  %v3983_v44 = vld [vmem:[%s4530_s17 + $0x84] sm:$0xf0] }
 0x272   : > { %4132 = vpow2.f32 %v3730_v50  ;;  %v2134_v63 = vsel %vm5547_vm4, %v5363_v49, %v2130_v35  ;;  %v2188_v3 = vsub.f32 1.0, %v2187_v55  ;;  %v3732_v14 = vmul.f32 -1.442695, %v5221_v8  ;;  %vm5582_vm9 = vmor %vm2161_vm3, %vm2162_vm5  ;;  %v3816_v8 = vld [vmem:[%s4530_s17 + $0x80] sm:$0xf] }
 0x273   : > { %4134 = vrcp.f32 %v5493_v18  ;;  %v2175_v27 = vadd.f32 %v5425_v20, %v2174_v1  ;;  %vm2177_vm8 = vweird.f32 %v5425_v20  ;;  %v2202_v49 = vmul.f32 %v5527_v25, %v5439_v26 }
 0x274   : > { %4136 = vrcp.f32 %v5518_v53  ;;  %v3731_v40 = vmul.f32 -1.442695, %v5219_v7  ;;  %v2168_v41 = vor.u32 1.1754944e-38, %v2167_v23  ;;  %vm2176_vm10 = vweird.f32 %v5343_v62  ;;  %v3760_v23 = vld [vmem:[%s4530_s17 + $0x10] sm:$0xf] }
 0x275   : > { %v2180_v57 = vand.u32 2147483647, %v5343_v62  ;;  %v2182_v46 = vand.u32 2147483648, %v5343_v62  ;;  %v2139_v55 = vsel %vm5507_vm0, %v5466_v58, %v2134_v63  ;;  %v2149_v34 = vsel %vm5571_vm7, %v5392_v42, %v2145_v45  ;;  %vm5601_vm11 = vmor %vm2176_vm10, %vm2177_vm8  ;;  %v3967_v7 = vld [vmem:[%s4530_s17 + $0x4] sm:$0xf0] }
 0x276   : > { %v5525_v2 = vpop.f32.mrf.mxu2  ;;  %v2164_v1 = vsel %vm5582_vm9, %v5404_v31, %v2160_v15  ;;  %4138 = vrcp.f32 %v5558_v13  ;;  %v2189_v62 = vmul.f32 %v5491_v32, %v2188_v3  ;;  %v2195_v29 = vand.u32 2147483647, %v5400_v17 }
 0x277   : > { %v5539_v61 = vpop.f32.mrf.mxu3  ;;  %v5541_v48 = vpop.f32.mrf.mxu0  ;;  %v2197_v58 = vand.u32 2147483648, %v5400_v17  ;;  %4140 = vpow2.f32 %v3732_v14  ;;  %v2179_v42 = vsel %vm5601_vm11, %v5425_v20, %v2175_v27  ;;  %v2203_v0 = vsub.f32 1.0, %v2202_v49 }
 0x278   : > { %v5560_v12 = vpop.f32.mrf.mxu1  ;;  %v4133_v28 = vpop.eup %4132  ;;  %4142 = vpow2.f32 %v3731_v40  ;;  %vm2181_vm12 = vcmp.eq.f32.partialorder %v2180_v57, 8.507059e+37  ;;  %v2183_v63 = vor.u32 1.1754944e-38, %v2182_v46  ;;  %v3733_v60 = vmul.f32 -1.442695, %v5225_v38 }
 0x279   : > { %v5589_v35 = vpop.eup %4134  ;;  %v5611_v45 = vadd.f32 1.0, %v4133_v28  ;;  %v5625_v20 = vmul.f32 %v2139_v55, %v5169_v5  ;;  %v2154_v27 = vsel %vm5533_vm2, %v2153_v9, %v2149_v34  ;;  %vm2191_vm13 = vweird.f32 %v5400_v17 }
 0x27a   : > { %v5615_v15 = vpop.eup %4136  ;;  %v2232_v3 = vmul.f32 %v5589_v35, %v5493_v18  ;;  %vm2192_vm14 = vweird.f32 %v5491_v32  ;;  %v2169_v40 = vsel %vm5554_vm6, %v2168_v41, %v2164_v1  ;;  %v2184_v28 = vsel %vm2181_vm12, %v2183_v63, %v2179_v42  ;;  %v3824_v63 = vld [vmem:[%s4530_s17 + $0x90] sm:$0xf] }
 0x27b   : > { %v2190_v57 = vadd.f32 %v5491_v32, %v2189_v62  ;;  %vm5636_vm15 = vcmp.eq.f32.partialorder %v2195_v29, 8.507059e+37  ;;  %v2198_v9 = vor.u32 1.1754944e-38, %v2197_v58  ;;  %v2204_v17 = vmul.f32 %v5527_v25, %v2203_v0  ;;  %vm5646_vm0 = vmor %vm2191_vm13, %vm2192_vm14  ;;  %v3969_v0 = vld [vmem:[%s4530_s17 + $0x14] sm:$0xf0] }
 0x27c   : > { %v5640_v5 = vpop.eup %4138  ;;  %v2217_v50 = vmul.f32 %v5615_v15, %v5518_v53  ;;  %4144 = vrcp.f32 %v5611_v45  ;;  %v2210_v55 = vand.u32 2147483647, %v5439_v26  ;;  %v2212_v34 = vand.u32 2147483648, %v5439_v26 }
 0x27d   : > { %v4141_v39 = vpop.eup %4140  ;;  %v2233_v1 = vsub.f32 1.0, %v2232_v3  ;;  %4146 = vpow2.f32 %v3733_v60  ;;  %v5654_v29 = vmul.f32 %v2154_v27, %v5171_v59  ;;  %v5657_v58 = vmul.f32 %v2169_v40, %v5181_v54 }
 0x27e   : > { %v5613_v31 = vpop.f32.mrf.mxu2  ;;  %v4143_v62 = vpop.eup %4142  ;;  %v5660_v42 = vmul.f32 %v2184_v28, %v5183_v51  ;;  %vm2206_vm1 = vweird.f32 %v5439_v26  ;;  %v2194_v3 = vsel %vm5646_vm0, %v5491_v32, %v2190_v57  ;;  %vm2207_vm2 = vweird.f32 %v5527_v25 }
 0x27f   : > { %v5620_v14 = vpop.f32.mrf.mxu3  ;;  %v5622_v24 = vpop.f32.mrf.mxu0  ;;  %v2227_v59 = vand.u32 2147483648, %v5518_v53  ;;  %v2240_v60 = vand.u32 2147483647, %v5493_v18  ;;  %v2205_v54 = vadd.f32 %v5527_v25, %v2204_v17  ;;  %v2218_v27 = vsub.f32 1.0, %v2217_v50  ;;  %vm5702_vm5 = vmor %vm2206_vm1, %vm2207_vm2 }
 0x280   : > { %v5631_v49 = vpop.f32.mrf.mxu1  ;;  %v2247_v51 = vmul.f32 %v5640_v5, %v5558_v13  ;;  %v5675_v40 = vadd.f32 1.0, %v4141_v39  ;;  %v2234_v36 = vmul.f32 %v5589_v35, %v2233_v1  ;;  %v5680_v41 = vadd.f32 1.0, %v4143_v62 }
 0x281   : > { %v3761_v32 = vor.u32 %v3969_v0, %v3760_v23  ;;  %v3825_v57 = vor.u32 %v3985_v22, %v3824_v63  ;;  %vm5688_vm3 = vcmp.eq.f32.partialorder %v2210_v55, 8.507059e+37  ;;  %v2213_v50 = vor.u32 1.1754944e-38, %v2212_v34  ;;  %v3966_v63 = vld [vmem:[%s4530_s17 + $0x4] sm:$0xf]  ;;  %v3752_v34 = vld [vmem:[%s4530_s17] sm:$0xf] }
 0x282   : > { %v5686_v38 = vpop.eup %4144  ;;  %vm2221_vm4 = vweird.f32 %v5518_v53  ;;  %v2242_v39 = vand.u32 2147483648, %v5493_v18  ;;  %v2199_v23 = vsel %vm5636_vm15, %v2198_v9, %v2194_v3  ;;  %v5707_v62 = vor.u32 1.1754944e-38, %v2227_v59  ;;  %v3754_v3 = vld [vmem:[%s4530_s17 + $0x8] sm:$0xf0] }
 0x283   : > { %v4147_v22 = vpop.eup %4146  ;;  %vm5709_vm6 = vcmp.eq.f32.partialorder %v2240_v60, 8.507059e+37  ;;  %2871 = vmatpush.bf16.msra.mxu0 %v3761_v32  ;;  %2920 = vmatpush.bf16.msra.mxu1 %v3825_v57  ;;  %v2209_v26 = vsel %vm5702_vm5, %v5527_v25, %v2205_v54  ;;  %v2219_v46 = vmul.f32 %v5615_v15, %v2218_v27  ;;  %v2257_v9 = vand.u32 2147483648, %v5558_v13  ;;  %v3982_v25 = vld [vmem:[%s4530_s17 + $0x84] sm:$0xf]  ;;  %v3818_v54 = vld [vmem:[%s4530_s17 + $0x88] sm:$0xf0] }
 0x284   : > { %6622 = vst [vmem:[#allocation33_spill] sm:$0xff] %v5707_v62  ;;  %4148 = vrcp.f32 %v5675_v40  ;;  %v2235_v59 = vadd.f32 %v5589_v35, %v2234_v36  ;;  %vm2237_vm7 = vweird.f32 %v5589_v35  ;;  %v2248_v60 = vsub.f32 1.0, %v2247_v51 }
 0x285   : > { %4150 = vrcp.f32 %v5680_v41  ;;  %v2243_v32 = vor.u32 1.1754944e-38, %v2242_v39  ;;  %v2255_v27 = vand.u32 2147483647, %v5558_v13  ;;  %v2262_v57 = vmul.f32 %v5686_v38, %v5611_v45 }
 0x286   : > { %v5677_v28 = vpop.f32.mrf.mxu2  ;;  %v5729_v55 = vadd.f32 1.0, %v4147_v22  ;;  %v5733_v36 = vmul.f32 %v2199_v23, %v5189_v6  ;;  %vm2222_vm8 = vweird.f32 %v5615_v15  ;;  %vm2236_vm9 = vweird.f32 %v5493_v18 }
 0x287   : > { %v5682_v11 = vpop.f32.mrf.mxu3  ;;  %v5684_v33 = vpop.f32.mrf.mxu0  ;;  %v3757_v51 = vor.u32 %v3966_v63, %v3754_v3  ;;  %v2214_v39 = vsel %vm5688_vm3, %v2213_v50, %v2209_v26  ;;  %v5743_v37 = vadd.f32 %v5615_v15, %v2219_v46  ;;  %vm5747_vm10 = vmor %vm2236_vm9, %vm2237_vm7  ;;  %vm2251_vm11 = vweird.f32 %v5558_v13 }
 0x288   : > { %v5694_v1 = vpop.f32.mrf.mxu1  ;;  %v5752_v6 = vor.u32 1.1754944e-38, %v2257_v9  ;;  %v3821_v18 = vor.u32 %v3982_v25, %v3818_v54  ;;  %v2239_v17 = vsel %vm5747_vm10, %v5589_v35, %v2235_v59  ;;  %v2249_v50 = vmul.f32 %v5640_v5, %v2248_v60  ;;  %vm5773_vm12 = vmor %vm2221_vm4, %vm2222_vm8 }
 0x289   : > { %v1816_v26 = vadd.f32 %v5482_v19, %v5474_v43  ;;  %2970 = vmatpush.bf16.msra.mxu2 %v3757_v51  ;;  %v1914_v46 = vadd.f32 %v5539_v61, %v5525_v2  ;;  %v2263_v9 = vsub.f32 1.0, %v2262_v57  ;;  %v1818_v25 = vadd.f32 %v5560_v12, %v5541_v48 }
 0x28a   : > { %v5762_v62 = vpop.eup %4148  ;;  %3019 = vmatpush.bf16.msra.mxu3 %v3821_v18  ;;  %v3753_v54 = vor.u32 %v3967_v7, %v3752_v34  ;;  %v3817_v35 = vor.u32 %v3983_v44, %v3816_v8  ;;  %v2569_v43 = vmul.f32 %v2214_v39, %v5192_v56  ;;  %v2272_v2 = vand.u32 2147483648, %v5611_v45  ;;  %v6638_v18 = vld [vmem:[#allocation13_spill] sm:$0xff] }
 0x28b   : > { %v5766_v60 = vpop.eup %4150  ;;  %4152 = vrcp.f32 %v5729_v55  ;;  %v1916_v44 = vadd.f32 %v5620_v14, %v5613_v31  ;;  %v2224_v56 = vsel %vm5773_vm12, %v5615_v15, %v5743_v37  ;;  %v2244_v7 = vsel %vm5709_vm6, %v2243_v32, %v2239_v17 }
 0x28c   : > { %vm2252_vm13 = vweird.f32 %v5640_v5  ;;  %vm2266_vm14 = vweird.f32 %v5611_v45  ;;  %v2595_v8 = vmul.f32 %v5530_v47, %v1818_v25  ;;  %2872 = vmatpush.bf16.msra.mxu0 %v3753_v54  ;;  %2921 = vmatpush.bf16.msra.mxu1 %v3817_v35  ;;  %v2292_v61 = vmul.f32 %v5762_v62, %v5675_v40  ;;  %v6642_v47 = vld [vmem:[#allocation6_spill] sm:$0xff] }
 0x28d   : > { %v2593_v48 = vmul.f32 %v5442_v4, %v1816_v26  ;;  %v2594_v12 = vmul.f32 %v5521_v21, %v1914_v46  ;;  %v2596_v37 = vmul.f32 %v5625_v20, %v1916_v44  ;;  %v6629_v31 = vand.u32 2147483647, %v5518_v53  ;;  %vm5828_vm2 = vmor %vm2251_vm11, %vm2252_vm13 }
 0x28e   : > { %v1871_v23 = vpop.f32.mrf.mxu2  ;;  %v2250_v14 = vadd.f32 %v5640_v5, %v2249_v50  ;;  %vm5802_vm0 = vcmp.eq.f32.partialorder %v2255_v27, 8.507059e+37  ;;  %v2264_v34 = vmul.f32 %v5686_v38, %v2263_v9  ;;  %vm2267_vm1 = vweird.f32 %v5686_v38 }
 0x28f   : > { %v1920_v63 = vpop.f32.mrf.mxu3  ;;  %v1776_v3 = vpop.f32.mrf.mxu0  ;;  %vm5797_vm15 = vcmp.eq.f32.partialorder %v6629_v31, 8.507059e+37  ;;  %v2277_v4 = vmul.f32 %v5766_v60, %v5680_v41  ;;  %v5812_v53 = vadd.f32 %v5235_v30, %v5233_v52  ;;  %v2657_v21 = vpack.c.bf16 %v2595_v8, %v2593_v48  ;;  %v6636_v30 = vld [vmem:[#allocation14_spill] sm:$0xff]  ;;  %vm5863_vm3 = vmor %vm2266_vm14, %vm2267_vm1 }
 0x290   : > { %v1825_v59 = vpop.f32.mrf.mxu1  ;;  %v2658_v20 = vpack.c.bf16 %v2596_v37, %v2594_v12  ;;  %v1821_v0 = vadd.f32 %v5631_v49, %v5622_v24  ;;  %v2571_v32 = vmul.f32 %v2244_v7, %v5203_v10  ;;  %v3734_v27 = vmul.f32 -1.442695, %v5244_v16  ;;  %v6637_v49 = vld [vmem:[#allocation12_spill] sm:$0xff] }
 0x291   : > { %v1919_v57 = vadd.f32 %v5682_v11, %v5677_v28  ;;  %v1823_v51 = vadd.f32 %v5694_v1, %v5684_v33  ;;  %v5822_v22 = vpop.eup %4152  ;;  %v2293_v10 = vsub.f32 1.0, %v2292_v61  ;;  %v3735_v24 = vmul.f32 -1.442695, %v6636_v30  ;;  %2873 = vmatmul.bf16.vlgmr.msra.gmra.mxu0 %v2657_v21  ;;  %2971 = vmatmul.bf16.vlgmr.msra.gmra.mxu2 %v2657_v21 }
 0x292   : > { %v5835_v11 = vadd.f32 %v6638_v18, %v6637_v49  ;;  %v1921_v33 = vadd.f32 %v1920_v63, %v1871_v23  ;;  %v2254_v13 = vsel %vm5828_vm2, %v5640_v5, %v2250_v14  ;;  %v2265_v17 = vadd.f32 %v5686_v38, %v2264_v34  ;;  %2922 = vmatmul.bf16.vlgmr.msra.gmra.mxu1 %v2658_v20 }
 0x293   : > { %v2278_v50 = vsub.f32 1.0, %v2277_v4  ;;  %3020 = vmatmul.bf16.vlgmr.msra.gmra.mxu3 %v2658_v20  ;;  %v1826_v26 = vadd.f32 %v1825_v59, %v1776_v3  ;;  %v3736_v9 = vmul.f32 -1.442695, %v5812_v53  ;;  %v2597_v25 = vmul.f32 %v5654_v29, %v1821_v0  ;;  %v6643_v4 = vld [vmem:[#allocation7_spill] sm:$0xff] }
 0x294   : > { %v2599_v54 = vmul.f32 %v5660_v42, %v1823_v51  ;;  %v2600_v23 = vmul.f32 %v5733_v36, %v1921_v33  ;;  %v2307_v63 = vmul.f32 %v5822_v22, %v5729_v55  ;;  %4154 = vpow2.f32 %v3734_v27  ;;  %v6639_v36 = vld [vmem:[#allocation33_spill] sm:$0xff] }
 0x295   : > { %v2598_v5 = vmul.f32 %v5657_v58, %v1919_v57  ;;  %v2294_v19 = vmul.f32 %v5762_v62, %v2293_v10  ;;  %4156 = vpow2.f32 %v3735_v24  ;;  %v3737_v3 = vmul.f32 -1.442695, %v5835_v11 }
 0x296   : > { %v1874_v39 = vpop.f32.mrf.mxu2  ;;  %v2659_v59 = vpack.c.bf16 %v2599_v54, %v2597_v25  ;;  %v2270_v44 = vand.u32 2147483647, %v5611_v45  ;;  %v2601_v29 = vmul.f32 %v2569_v43, %v1826_v26  ;;  %v2229_v8 = vsel %vm5797_vm15, %v6639_v36, %v2224_v56  ;;  %v6650_v36 = vld [vmem:[#allocation10_spill] sm:$0xff] }
 0x297   : > { %v1923_v28 = vpop.f32.mrf.mxu3  ;;  %v1778_v1 = vpop.f32.mrf.mxu0  ;;  %v5851_v7 = vpack.c.bf16 %v2600_v23, %v2598_v5  ;;  %v2259_v58 = vsel %vm5802_vm0, %v5752_v6, %v2254_v13  ;;  %v2273_v43 = vor.u32 1.1754944e-38, %v2272_v2  ;;  %4158 = vpow2.f32 %v3736_v9  ;;  %v6647_v9 = vld [vmem:[#allocation17_spill] sm:$0xff] }
 0x298   : > { %v1827_v46 = vpop.f32.mrf.mxu1  ;;  %v2269_v56 = vsel %vm5863_vm3, %v5686_v38, %v2265_v17  ;;  %v2308_v48 = vsub.f32 1.0, %v2307_v63  ;;  %v1924_v12 = vadd.f32 %v1923_v28, %v1874_v39  ;;  %v2279_v31 = vmul.f32 %v5766_v60, %v2278_v50  ;;  %v6646_v50 = vld [vmem:[#allocation8_spill] sm:$0xff] }
 0x299   : > { %v1828_v35 = vadd.f32 %v1827_v46, %v1778_v1  ;;  %v2295_v15 = vadd.f32 %v5762_v62, %v2294_v19  ;;  %vm2297_vm4 = vweird.f32 %v5762_v62  ;;  %4160 = vpow2.f32 %v3737_v3 }
 0x29a   : > { %v4155_v2 = vpop.eup %4154  ;;  %v2570_v34 = vmul.f32 %v2229_v8, %v6642_v47  ;;  %v2572_v21 = vmul.f32 %v2259_v58, %v6643_v4  ;;  %v2302_v38 = vand.u32 2147483648, %v5675_v40  ;;  %vm2271_vm5 = vcmp.eq.f32.partialorder %v2270_v44, 8.507059e+37  ;;  %v6654_v58 = vld [vmem:[#allocation16_spill] sm:$0xff] }
 0x29b   : > { %v2603_v42 = vmul.f32 %v2571_v32, %v1828_v35  ;;  %v4157_v32 = vpop.eup %4156  ;;  %vm2281_vm6 = vweird.f32 %v5680_v41  ;;  %vm2296_vm7 = vweird.f32 %v5675_v40  ;;  %v2300_v27 = vand.u32 2147483647, %v5675_v40 }
 0x29c   : > { %v2274_v57 = vsel %vm2271_vm5, %v2273_v43, %v2269_v56  ;;  %vm5885_vm8 = vmor %vm2296_vm7, %vm2297_vm4  ;;  %v2309_v39 = vmul.f32 %v5822_v22, %v2308_v48  ;;  %v2602_v52 = vmul.f32 %v2570_v34, %v1924_v12  ;;  %v2280_v49 = vadd.f32 %v5766_v60, %v2279_v31  ;;  %v6655_v48 = vld [vmem:[#allocation19_spill] sm:$0xff]  ;;  %v6656_v12 = vld [vmem:[#allocation20_spill] sm:$0xff] }
 0x29d   : > { %v5872_v6 = vpack.c.bf16 %v2603_v42, %v2601_v29  ;;  %v4159_v24 = vpop.eup %4158  ;;  %vm2282_vm9 = vweird.f32 %v5766_v60  ;;  %v2299_v40 = vsel %vm5885_vm8, %v5762_v62, %v2295_v15  ;;  %v5895_v18 = vadd.f32 1.0, %v4155_v2  ;;  %v6657_v2 = vld [vmem:[#allocation18_spill] sm:$0xff] }
 0x29e   : > { %v1876_v37 = vpop.f32.mrf.mxu2  ;;  %v2285_v33 = vand.u32 2147483647, %v5680_v41  ;;  %v2303_v28 = vor.u32 1.1754944e-38, %v2302_v38  ;;  %v5898_v1 = vadd.f32 1.0, %v4157_v32  ;;  %v2573_v26 = vmul.f32 %v2274_v57, %v6646_v50  ;;  %vm5907_vm11 = vmor %vm2281_vm6, %vm2282_vm9 }
 0x29f   : > { %v1925_v14 = vpop.f32.mrf.mxu3  ;;  %v1781_v45 = vpop.f32.mrf.mxu0  ;;  %v2287_v46 = vand.u32 2147483648, %v5680_v41  ;;  %vm2301_vm10 = vcmp.eq.f32.partialorder %v2300_v27, 8.507059e+37  ;;  %v3738_v25 = vmul.f32 -1.442695, %v6647_v9  ;;  %v2310_v23 = vadd.f32 %v5822_v22, %v2309_v39  ;;  %v6658_v27 = vld [vmem:[#allocation9_spill] sm:$0xff] }
 0x2a0   : > { %v1926_v20 = vadd.f32 %v1925_v14, %v1876_v37  ;;  %v1830_v0 = vpop.f32.mrf.mxu1  ;;  %v4161_v17 = vpop.eup %4160  ;;  %v2304_v54 = vsel %vm2301_vm10, %v2303_v28, %v2299_v40  ;;  %vm2312_vm12 = vweird.f32 %v5822_v22  ;;  %v5913_v63 = vadd.f32 1.0, %v4159_v24 }
 0x2a1   : > { %v2284_v5 = vsel %vm5907_vm11, %v5766_v60, %v2280_v49  ;;  %v2317_v35 = vand.u32 2147483648, %v5729_v55  ;;  %4162 = vrcp.f32 %v5895_v18  ;;  %2878 = vmatmul.bf16.gmra.mxu0 %v2659_v59  ;;  %2976 = vmatmul.bf16.gmra.mxu2 %v2659_v59  ;;  %v1831_v41 = vadd.f32 %v1830_v0, %v1781_v45 }
 0x2a2   : > { %v2604_v10 = vmul.f32 %v2572_v21, %v1926_v20  ;;  %vm2311_vm13 = vweird.f32 %v5729_v55  ;;  %v2315_v44 = vand.u32 2147483647, %v5729_v55  ;;  %4164 = vrcp.f32 %v5898_v1  ;;  %2927 = vmatmul.bf16.gmra.mxu1 %v5851_v7  ;;  %v6653_v55 = vld [vmem:[#allocation15_spill] sm:$0xff] }
 0x2a3   : > { %v5923_v29 = vadd.f32 1.0, %v4161_v17  ;;  %3025 = vmatmul.bf16.gmra.mxu3 %v5851_v7  ;;  %v2575_v8 = vmul.f32 %v2304_v54, %v6650_v36  ;;  %vm5930_vm14 = vmor %vm2311_vm13, %vm2312_vm12  ;;  %4166 = vpow2.f32 %v3738_v25  ;;  %v5936_v61 = vadd.f32 %v6654_v58, %v6653_v55 }
 0x2a4   : > { %v5900_v13 = vpack.c.bf16 %v2604_v10, %v2602_v52  ;;  %v2288_v56 = vor.u32 1.1754944e-38, %v2287_v46  ;;  %v2314_v7 = vsel %vm5930_vm14, %v5822_v22, %v2310_v23  ;;  %4168 = vrcp.f32 %v5913_v63  ;;  %v6659_v10 = vld [vmem:[#allocation11_spill] sm:$0xff] }
 0x2a5   : > { %v5944_v37 = vadd.f32 %v6656_v12, %v6655_v48  ;;  %vm2286_vm15 = vcmp.eq.f32.partialorder %v2285_v33, 8.507059e+37  ;;  %v2318_v31 = vor.u32 1.1754944e-38, %v2317_v35  ;;  %v2605_v15 = vmul.f32 %v2573_v26, %v1831_v41 }
 0x2a6   : > { %v1879_v19 = vpop.f32.mrf.mxu2  ;;  %v2289_v45 = vsel %vm2286_vm15, %v2288_v56, %v2284_v5  ;;  %vm2316_vm0 = vcmp.eq.f32.partialorder %v2315_v44, 8.507059e+37  ;;  %4170 = vrcp.f32 %v5923_v29  ;;  %v3739_v47 = vmul.f32 -1.442695, %v6657_v2  ;;  %v6661_v56 = vld [vmem:[#allocation22_spill] sm:$0xff] }
 0x2a7   : > { %v1928_v3 = vpop.f32.mrf.mxu3  ;;  %v1783_v60 = vpop.f32.mrf.mxu0  ;;  %v2319_v4 = vsel %vm2316_vm0, %v2318_v31, %v2314_v7  ;;  %v3740_v22 = vmul.f32 -1.442695, %v5936_v61  ;;  %v3741_v20 = vmul.f32 -1.442695, %v5944_v37  ;;  %v2574_v57 = vmul.f32 %v2289_v45, %v6658_v27 }
 0x2a8   : > { %v1832_v42 = vpop.f32.mrf.mxu1  ;;  %v5948_v34 = vpop.eup %4162  ;;  %v1929_v0 = vadd.f32 %v1928_v3, %v1879_v19  ;;  %v2576_v24 = vmul.f32 %v2319_v4, %v6659_v10  ;;  %4172 = vpow2.f32 %v3739_v47  ;;  %v2330_v3 = vand.u32 2147483647, %v5895_v18 }
 0x2a9   : > { %v1833_v43 = vadd.f32 %v1832_v42, %v1783_v60  ;;  %v5953_v38 = vpop.eup %4164  ;;  %v2322_v49 = vmul.f32 %v5948_v34, %v5895_v18  ;;  %4174 = vpow2.f32 %v3740_v22  ;;  %vm2326_vm1 = vweird.f32 %v5895_v18 }
 0x2aa   : > { %v4167_v32 = vpop.eup %4166  ;;  %v2337_v33 = vmul.f32 %v5953_v38, %v5898_v1  ;;  %4176 = vpow2.f32 %v3741_v20  ;;  %v2606_v17 = vmul.f32 %v2574_v57, %v1929_v0  ;;  %v2332_v59 = vand.u32 2147483648, %v5895_v18  ;;  %v6666_v0 = vld [vmem:[#allocation25_spill] sm:$0xff] }
 0x2ab   : > { %v2607_v14 = vmul.f32 %v2575_v8, %v1833_v43  ;;  %v5957_v52 = vpop.eup %4168  ;;  %v5972_v62 = vadd.f32 1.0, %v4167_v32  ;;  %v2323_v54 = vsub.f32 1.0, %v2322_v49  ;;  %vm2341_vm2 = vweird.f32 %v5898_v1  ;;  %v6660_v43 = vld [vmem:[#allocation21_spill] sm:$0xff] }
 0x2ac   : > { %v5964_v28 = vpop.eup %4170  ;;  %v2352_v25 = vmul.f32 %v5957_v52, %v5913_v63  ;;  %v2338_v5 = vsub.f32 1.0, %v2337_v33  ;;  %v5997_v7 = vadd.f32 %v6661_v56, %v6660_v43  ;;  %v2345_v48 = vand.u32 2147483647, %v5898_v1 }
 0x2ad   : > { %v5951_v21 = vpack.c.bf16 %v2607_v14, %v2605_v15  ;;  %v2367_v35 = vmul.f32 %v5964_v28, %v5923_v29  ;;  %4178 = vrcp.f32 %v5972_v62  ;;  %v2324_v8 = vmul.f32 %v5948_v34, %v2323_v54  ;;  %v6662_v15 = vld [vmem:[#allocation23_spill] sm:$0xff]  ;;  %v6663_v14 = vld [vmem:[#allocation24_spill] sm:$0xff] }
 0x2ae   : > { %v1881_v51 = vpop.f32.mrf.mxu2  ;;  %v4173_v41 = vpop.eup %4172  ;;  %v2353_v44 = vsub.f32 1.0, %v2352_v25  ;;  %v2339_v55 = vmul.f32 %v5953_v38, %v2338_v5  ;;  %v2347_v12 = vand.u32 2147483648, %v5898_v1  ;;  %v6005_v45 = vadd.f32 %v6663_v14, %v6662_v15  ;;  %v6669_v25 = vld [vmem:[#allocation28_spill] sm:$0xff] }
 0x2af   : > { %v1930_v39 = vpop.f32.mrf.mxu3  ;;  %v5966_v26 = vpop.f32.mrf.mxu0  ;;  %v5993_v58 = vadd.f32 1.0, %v4173_v41  ;;  %vm6007_vm3 = vcmp.eq.f32.partialorder %v2330_v3, 8.507059e+37  ;;  %vm2356_vm4 = vweird.f32 %v5913_v63  ;;  %v2360_v4 = vand.u32 2147483647, %v5913_v63 }
 0x2b0   : > { %v1931_v40 = vadd.f32 %v1930_v39, %v1881_v51  ;;  %v5968_v46 = vpop.f32.mrf.mxu1  ;;  %v4175_v19 = vpop.eup %4174  ;;  %v2354_v47 = vmul.f32 %v5957_v52, %v2353_v44  ;;  %v2325_v20 = vadd.f32 %v5948_v34, %v2324_v8  ;;  %vm2327_vm5 = vweird.f32 %v5948_v34 }
 0x2b1   : > { %2883 = vmatmul.bf16.gmra.mxu0 %v5872_v6  ;;  %2981 = vmatmul.bf16.gmra.mxu2 %v5872_v6  ;;  %v4177_v36 = vpop.eup %4176  ;;  %v2368_v6 = vsub.f32 1.0, %v2367_v35  ;;  %v6001_v31 = vadd.f32 1.0, %v4175_v19  ;;  %vm2342_vm6 = vweird.f32 %v5953_v38  ;;  %v3742_v32 = vmul.f32 -1.442695, %v6666_v0  ;;  %vm6036_vm7 = vmor %vm2326_vm1, %vm2327_vm5 }
 0x2b2   : > { %v2608_v50 = vmul.f32 %v2576_v24, %v1931_v40  ;;  %2932 = vmatmul.bf16.gmra.mxu1 %v5900_v13  ;;  %v6014_v22 = vadd.f32 1.0, %v4177_v36  ;;  %v2340_v39 = vadd.f32 %v5953_v38, %v2339_v55  ;;  %4180 = vrcp.f32 %v5993_v58  ;;  %vm6052_vm9 = vmor %vm2341_vm2, %vm2342_vm6 }
 0x2b3   : > { %3030 = vmatmul.bf16.gmra.mxu3 %v5900_v13  ;;  %v6024_v51 = vpop.eup %4178  ;;  %v2369_v10 = vmul.f32 %v5964_v28, %v2368_v6  ;;  %v3744_v24 = vmul.f32 -1.442695, %v5997_v7  ;;  %v2362_v49 = vand.u32 2147483648, %v5913_v63  ;;  %v2375_v40 = vand.u32 2147483647, %v5923_v29 }
 0x2b4   : > { %v5974_v23 = vpack.c.bf16 %v2608_v50, %v2606_v17  ;;  %4182 = vrcp.f32 %v6001_v31  ;;  %v3745_v33 = vmul.f32 -1.442695, %v6005_v45  ;;  %v2355_v50 = vadd.f32 %v5957_v52, %v2354_v47 }
 0x2b5   : > { %vm2357_vm8 = vweird.f32 %v5957_v52  ;;  %4184 = vrcp.f32 %v6014_v22  ;;  %v3743_v54 = vmul.f32 -1.442695, %v6669_v25  ;;  %vm2372_vm10 = vweird.f32 %v5964_v28 }
 0x2b6   : > { %v5982_v60 = vpop.f32.mrf.mxu2  ;;  %v2377_v41 = vand.u32 2147483648, %v5923_v29  ;;  %v2382_v19 = vmul.f32 %v6024_v51, %v5972_v62  ;;  %4186 = vpow2.f32 %v3742_v32  ;;  %v2329_v3 = vsel %vm6036_vm7, %v5948_v34, %v2325_v20  ;;  %vm6071_vm12 = vmor %vm2356_vm4, %vm2357_vm8 }
 0x2b7   : > { %v5984_v42 = vpop.f32.mrf.mxu3  ;;  %v6020_v27 = vpop.f32.mrf.mxu0  ;;  %v2344_v1 = vsel %vm6052_vm9, %v5953_v38, %v2340_v39  ;;  %v2370_v44 = vadd.f32 %v5964_v28, %v2369_v10  ;;  %4188 = vpow2.f32 %v3744_v24  ;;  %v2333_v36 = vor.u32 1.1754944e-38, %v2332_v59 }
 0x2b8   : > { %v6022_v57 = vpop.f32.mrf.mxu1  ;;  %vm2346_vm11 = vcmp.eq.f32.partialorder %v2345_v48, 8.507059e+37  ;;  %v2348_v8 = vor.u32 1.1754944e-38, %v2347_v12  ;;  %4190 = vpow2.f32 %v3745_v33  ;;  %v6075_v34 = vpop.eup %4180  ;;  %v2359_v38 = vsel %vm6071_vm12, %v5957_v52, %v2355_v50 }
 0x2b9   : > { %vm2371_vm13 = vweird.f32 %v5923_v29  ;;  %v2392_v59 = vand.u32 2147483648, %v5972_v62  ;;  %4192 = vpow2.f32 %v3743_v54  ;;  %v2334_v63 = vsel %vm6007_vm3, %v2333_v36, %v2329_v3  ;;  %v6678_v3 = vld [vmem:[#allocation26_spill] sm:$0xff] }
 0x2ba   : > { %v6082_v6 = vpop.eup %4182  ;;  %v2349_v43 = vsel %vm2346_vm11, %v2348_v8, %v2344_v1  ;;  %v2363_v56 = vor.u32 1.1754944e-38, %v2362_v49  ;;  %vm6088_vm14 = vmor %vm2371_vm13, %vm2372_vm10  ;;  %v2383_v12 = vsub.f32 1.0, %v2382_v19  ;;  %vm2361_vm15 = vcmp.eq.f32.partialorder %v2360_v4, 8.507059e+37  ;;  %v6679_v1 = vld [vmem:[#allocation27_spill] sm:$0xff] }
 0x2bb   : > { %v6092_v52 = vpop.eup %4184  ;;  %v2374_v29 = vsel %vm6088_vm14, %v5964_v28, %v2370_v44  ;;  %vm6097_vm0 = vcmp.eq.f32.partialorder %v2375_v40, 8.507059e+37  ;;  %v2378_v14 = vor.u32 1.1754944e-38, %v2377_v41  ;;  %vm2386_vm1 = vweird.f32 %v5972_v62 }
 0x2bc   : > { %v4187_v13 = vpop.eup %4186  ;;  %v2364_v47 = vsel %vm2361_vm15, %v2363_v56, %v2359_v38  ;;  %v2390_v20 = vand.u32 2147483647, %v5972_v62  ;;  %v2397_v32 = vmul.f32 %v6075_v34, %v5993_v58  ;;  %v2577_v28 = vmul.f32 %v2334_v63, %v5244_v16  ;;  %v6680_v38 = vld [vmem:[#allocation29_spill] sm:$0xff] }
 0x2bd   : > { %v4189_v10 = vpop.eup %4188  ;;  %v2578_v24 = vmul.f32 %v2349_v43, %v6636_v30  ;;  %v6111_v49 = vor.u32 1.1754944e-38, %v2392_v59  ;;  %v2412_v40 = vmul.f32 %v6082_v6, %v6001_v31  ;;  %v2379_v54 = vsel %vm6097_vm0, %v2378_v14, %v2374_v29  ;;  %v6681_v59 = vld [vmem:[#allocation30_spill] sm:$0xff] }
 0x2be   : > { %v6044_v5 = vpop.f32.mrf.mxu2  ;;  %v4191_v50 = vpop.eup %4190  ;;  %v2384_v16 = vmul.f32 %v6024_v51, %v2383_v12  ;;  %vm2387_vm2 = vweird.f32 %v6024_v51  ;;  %v2427_v30 = vmul.f32 %v6092_v52, %v6014_v22  ;;  %v2579_v18 = vmul.f32 %v2364_v47, %v5812_v53 }
 0x2bf   : > { %v6046_v35 = vpop.f32.mrf.mxu3  ;;  %v6105_v39 = vpop.f32.mrf.mxu0  ;;  %v2405_v41 = vand.u32 2147483647, %v5993_v58  ;;  %v6131_v19 = vadd.f32 1.0, %v4187_v13  ;;  %v6135_v44 = vadd.f32 %v6679_v1, %v6678_v3  ;;  %v2398_v36 = vsub.f32 1.0, %v2397_v32  ;;  %vm6172_vm4 = vmor %vm2386_vm1, %vm2387_vm2 }
 0x2c0   : > { %v6107_v4 = vpop.f32.mrf.mxu1  ;;  %v2407_v8 = vand.u32 2147483648, %v5993_v58  ;;  %v6138_v55 = vadd.f32 1.0, %v4189_v10  ;;  %v6142_v63 = vadd.f32 %v6681_v59, %v6680_v38  ;;  %v2413_v53 = vsub.f32 1.0, %v2412_v40 }
 0x2c1   : > { %2888 = vmatmul.bf16.gmra.mxu0 %v5951_v21  ;;  %2986 = vmatmul.bf16.gmra.mxu2 %v5951_v21  ;;  %v4193_v21 = vpop.eup %4192  ;;  %v6145_v43 = vadd.f32 1.0, %v4191_v50  ;;  %v1838_v56 = vadd.f32 %v6022_v57, %v6020_v27  ;;  %v2385_v48 = vadd.f32 %v6024_v51, %v2384_v16  ;;  %vm2401_vm3 = vweird.f32 %v5993_v58 }
 0x2c2   : > { %2937 = vmatmul.bf16.gmra.mxu1 %v5974_v23  ;;  %v2428_v12 = vsub.f32 1.0, %v2427_v30  ;;  %v6151_v29 = vadd.f32 1.0, %v4193_v21  ;;  %v1936_v15 = vadd.f32 %v6046_v35, %v6044_v5  ;;  %v2420_v14 = vand.u32 2147483647, %v6001_v31  ;;  %v6682_v35 = vld [vmem:[#allocation31_spill] sm:$0xff] }
 0x2c3   : > { %3035 = vmatmul.bf16.gmra.mxu3 %v5974_v23  ;;  %v2580_v23 = vmul.f32 %v2379_v54, %v5835_v11  ;;  %4194 = vrcp.f32 %v6131_v19  ;;  %v3748_v11 = vmul.f32 -1.442695, %v6135_v44  ;;  %v1836_v13 = vadd.f32 %v5968_v46, %v5966_v26 }
 0x2c4   : > { %v2399_v27 = vmul.f32 %v6075_v34, %v2398_v36  ;;  %4196 = vrcp.f32 %v6138_v55  ;;  %v3749_v57 = vmul.f32 -1.442695, %v6142_v63  ;;  %v1934_v47 = vadd.f32 %v5984_v42, %v5982_v60  ;;  %v6685_v60 = vld [vmem:[#allocation32_spill] sm:$0xff] }
 0x2c5   : > { %v2414_v5 = vmul.f32 %v6082_v6, %v2413_v53  ;;  %4198 = vrcp.f32 %v6145_v43  ;;  %v3746_v32 = vmul.f32 -1.442695, %v6682_v35  ;;  %v2611_v10 = vmul.f32 %v2579_v18, %v1838_v56 }
 0x2c6   : > { %v6117_v33 = vpop.f32.mrf.mxu2  ;;  %v2429_v46 = vmul.f32 %v6092_v52, %v2428_v12  ;;  %4200 = vrcp.f32 %v6151_v29  ;;  %v3747_v42 = vmul.f32 -1.442695, %v6685_v60  ;;  %v2612_v40 = vmul.f32 %v2580_v23, %v1936_v15 }
 0x2c7   : > { %v6119_v17 = vpop.f32.mrf.mxu3  ;;  %v6179_v50 = vpop.f32.mrf.mxu0  ;;  %v2389_v16 = vsel %vm6172_vm4, %v6024_v51, %v2385_v48  ;;  %v2422_v30 = vand.u32 2147483648, %v6001_v31  ;;  %4202 = vpow2.f32 %v3748_v11  ;;  %v2609_v21 = vmul.f32 %v2577_v28, %v1836_v13 }
 0x2c8   : > { %v1842_v54 = vpop.f32.mrf.mxu1  ;;  %vm2402_vm5 = vweird.f32 %v6075_v34  ;;  %vm2417_vm6 = vweird.f32 %v6082_v6  ;;  %4204 = vpow2.f32 %v3749_v57  ;;  %v2610_v1 = vmul.f32 %v2578_v24, %v1934_v47 }
 0x2c9   : > { %v6189_v36 = vpop.eup %4194  ;;  %v2400_v38 = vadd.f32 %v6075_v34, %v2399_v27  ;;  %v2415_v59 = vadd.f32 %v6082_v6, %v2414_v5  ;;  %4206 = vpow2.f32 %v3746_v32  ;;  %v2665_v51 = vpack.c.bf16 %v2611_v10, %v2609_v21  ;;  %vm6205_vm9 = vmor %vm2401_vm3, %vm2402_vm5 }
 0x2ca   : > { %v6193_v23 = vpop.eup %4196  ;;  %v2430_v28 = vadd.f32 %v6092_v52, %v2429_v46  ;;  %vm2432_vm7 = vweird.f32 %v6092_v52  ;;  %4208 = vpow2.f32 %v3747_v42  ;;  %v2666_v53 = vpack.c.bf16 %v2612_v40, %v2610_v1 }
 0x2cb   : > { %v6197_v56 = vpop.eup %4198  ;;  %vm2391_vm8 = vcmp.eq.f32.partialorder %v2390_v20, 8.507059e+37  ;;  %vm2416_vm10 = vweird.f32 %v6001_v31  ;;  %v2435_v48 = vand.u32 2147483647, %v6014_v22  ;;  %v2437_v12 = vand.u32 2147483648, %v6014_v22 }
 0x2cc   : > { %v6212_v15 = vpop.eup %4200  ;;  %v2394_v11 = vsel %vm2391_vm8, %v6111_v49, %v2389_v16  ;;  %vm6217_vm11 = vcmp.eq.f32.partialorder %v2405_v41, 8.507059e+37  ;;  %vm6223_vm12 = vmor %vm2416_vm10, %vm2417_vm6  ;;  %vm2431_vm13 = vweird.f32 %v6014_v22  ;;  %v2404_v13 = vsel %vm6205_vm9, %v6075_v34, %v2400_v38 }
 0x2cd   : > { %v4203_v31 = vpop.eup %4202  ;;  %v2408_v49 = vor.u32 1.1754944e-38, %v2407_v8  ;;  %v2419_v41 = vsel %vm6223_vm12, %v6082_v6, %v2415_v59  ;;  %vm6238_vm14 = vmor %vm2431_vm13, %vm2432_vm7  ;;  %v2472_v22 = vmul.f32 %v6193_v23, %v6138_v55  ;;  %vm2421_vm15 = vcmp.eq.f32.partialorder %v2420_v14, 8.507059e+37 }
 0x2ce   : > { %v6185_v18 = vpop.f32.mrf.mxu2  ;;  %v4205_v57 = vpop.eup %4204  ;;  %v2423_v34 = vor.u32 1.1754944e-38, %v2422_v30  ;;  %v2434_v58 = vsel %vm6238_vm14, %v6092_v52, %v2430_v28  ;;  %v2487_v6 = vmul.f32 %v6197_v56, %v6145_v43  ;;  %v2581_v47 = vmul.f32 %v2394_v11, %v6647_v9 }
 0x2cf   : > { %v1940_v3 = vpop.f32.mrf.mxu3  ;;  %v4207_v8 = vpop.eup %4206  ;;  %vm2436_vm0 = vcmp.eq.f32.partialorder %v2435_v48, 8.507059e+37  ;;  %v2438_v5 = vor.u32 1.1754944e-38, %v2437_v12  ;;  %v2442_v32 = vmul.f32 %v6189_v36, %v6131_v19  ;;  %v2409_v14 = vsel %vm6217_vm11, %v2408_v49, %v2404_v13 }
 0x2d0   : > { %v4209_v10 = vpop.eup %4208  ;;  %v2424_v26 = vsel %vm2421_vm15, %v2423_v34, %v2419_v41  ;;  %v2457_v52 = vmul.f32 %v6212_v15, %v6151_v29  ;;  %v6256_v46 = vadd.f32 1.0, %v4203_v31  ;;  %v6258_v42 = vpop.f32.mrf.mxu0  ;;  %v2473_v16 = vsub.f32 1.0, %v2472_v22 }
 0x2d1   : > { %2893 = vmatmul.bf16.gmra.mxu0 %v2665_v51  ;;  %2991 = vmatmul.bf16.gmra.mxu2 %v2665_v51  ;;  %v6260_v40 = vpop.f32.mrf.mxu1  ;;  %v2439_v9 = vsel %vm2436_vm0, %v2438_v5, %v2434_v58  ;;  %v6262_v30 = vadd.f32 1.0, %v4205_v57  ;;  %v1843_v21 = vadd.f32 %v1842_v54, %v6179_v50  ;;  %v2452_v59 = vand.u32 2147483648, %v6131_v19 }
 0x2d2   : > { %2942 = vmatmul.bf16.gmra.mxu1 %v2666_v53  ;;  %v2488_v51 = vsub.f32 1.0, %v2487_v6  ;;  %v6270_v28 = vadd.f32 1.0, %v4207_v8  ;;  %v2583_v24 = vmul.f32 %v2424_v26, %v5936_v61  ;;  %v2443_v48 = vsub.f32 1.0, %v2442_v32 }
 0x2d3   : > { %3040 = vmatmul.bf16.gmra.mxu3 %v2666_v53  ;;  %v1941_v53 = vadd.f32 %v1940_v3, %v6185_v18  ;;  %v6274_v12 = vadd.f32 1.0, %v4209_v10  ;;  %v1841_v11 = vadd.f32 %v6107_v4, %v6105_v39  ;;  %v2584_v50 = vmul.f32 %v2439_v9, %v5944_v37 }
 0x2d4   : > { %v2458_v54 = vsub.f32 1.0, %v2457_v52  ;;  %4210 = vrcp.f32 %v6256_v46  ;;  %v1939_v62 = vadd.f32 %v6119_v17, %v6117_v33  ;;  %v2450_v20 = vand.u32 2147483647, %v6131_v19 }
 0x2d5   : > { %v2474_v18 = vmul.f32 %v6193_v23, %v2473_v16  ;;  %4212 = vrcp.f32 %v6262_v30  ;;  %v2615_v61 = vmul.f32 %v2583_v24, %v1843_v21  ;;  %v2582_v3 = vmul.f32 %v2409_v14, %v6657_v2 }
 0x2d6   : > { %v6265_v1 = vpop.f32.mrf.mxu2  ;;  %v2489_v31 = vmul.f32 %v6197_v56, %v2488_v51  ;;  %4214 = vrcp.f32 %v6270_v28  ;;  %v2616_v37 = vmul.f32 %v2584_v50, %v1941_v53  ;;  %v2444_v39 = vmul.f32 %v6189_v36, %v2443_v48 }
 0x2d7   : > { %v6267_v38 = vpop.f32.mrf.mxu3  ;;  %4216 = vrcp.f32 %v6274_v12  ;;  %v2613_v4 = vmul.f32 %v2581_v47, %v1841_v11  ;;  %vm2446_vm1 = vweird.f32 %v6131_v19  ;;  %v2453_v33 = vor.u32 1.1754944e-38, %v2452_v59 }
 0x2d8   : > { %v2459_v17 = vmul.f32 %v6212_v15, %v2458_v54  ;;  %v2614_v13 = vmul.f32 %v2582_v3, %v1939_v62  ;;  %vm6292_vm2 = vcmp.eq.f32.partialorder %v2450_v20, 8.507059e+37  ;;  %v2475_v2 = vadd.f32 %v6193_v23, %v2474_v18  ;;  %v1798_v58 = vpop.f32.mrf.mxu0 }
 0x2d9   : > { %vm2476_vm3 = vweird.f32 %v6138_v55  ;;  %vm2477_vm4 = vweird.f32 %v6193_v23  ;;  %v2667_v41 = vpack.c.bf16 %v2615_v61, %v2613_v4  ;;  %v2482_v22 = vand.u32 2147483648, %v6138_v55  ;;  %v1847_v6 = vpop.f32.mrf.mxu1 }
 0x2da   : > { %v6299_v27 = vpop.eup %4210  ;;  %v2490_v57 = vadd.f32 %v6197_v56, %v2489_v31  ;;  %vm2492_vm5 = vweird.f32 %v6197_v56  ;;  %v2668_v34 = vpack.c.bf16 %v2616_v37, %v2614_v13  ;;  %v2445_v47 = vadd.f32 %v6189_v36, %v2444_v39  ;;  %vm6318_vm8 = vmor %vm2476_vm3, %vm2477_vm4 }
 0x2db   : > { %v6304_v8 = vpop.eup %4212  ;;  %vm2447_vm6 = vweird.f32 %v6189_v36  ;;  %v2480_v5 = vand.u32 2147483647, %v6138_v55  ;;  %v2497_v32 = vand.u32 2147483648, %v6145_v43  ;;  %v2460_v52 = vadd.f32 %v6212_v15, %v2459_v17  ;;  %v2630_v55 = vld [vmem:[#allocation3 + $0x68] sm:$0xff] }
 0x2dc   : > { %v6310_v26 = vpop.eup %4214  ;;  %vm2462_vm7 = vweird.f32 %v6212_v15  ;;  %vm2491_vm9 = vweird.f32 %v6145_v43  ;;  %v2495_v16 = vand.u32 2147483647, %v6145_v43  ;;  %vm2461_vm10 = vweird.f32 %v6151_v29  ;;  %vm6343_vm12 = vmor %vm2446_vm1, %vm2447_vm6 }
 0x2dd   : > { %v6324_v21 = vpop.eup %4216  ;;  %v2467_v59 = vand.u32 2147483648, %v6151_v29  ;;  %v2479_v51 = vsel %vm6318_vm8, %v6193_v23, %v2475_v2  ;;  %vm6333_vm11 = vmor %vm2491_vm9, %vm2492_vm5  ;;  %v2532_v53 = vmul.f32 %v6299_v27, %v6256_v46  ;;  %v2465_v23 = vand.u32 2147483647, %v6151_v29 }
 0x2de   : > { %v1896_v10 = vpop.f32.mrf.mxu2  ;;  %v2483_v24 = vor.u32 1.1754944e-38, %v2482_v22  ;;  %v2494_v48 = vsel %vm6333_vm11, %v6197_v56, %v2490_v57  ;;  %v2547_v11 = vmul.f32 %v6304_v8, %v6262_v30  ;;  %v2449_v19 = vsel %vm6343_vm12, %v6189_v36, %v2445_v47  ;;  %vm6360_vm13 = vmor %vm2461_vm10, %vm2462_vm7 }
 0x2df   : > { %v1945_v14 = vpop.f32.mrf.mxu3  ;;  %vm2481_vm14 = vcmp.eq.f32.partialorder %v2480_v5, 8.507059e+37  ;;  %v2498_v54 = vor.u32 1.1754944e-38, %v2497_v32  ;;  %v2502_v56 = vmul.f32 %v6310_v26, %v6270_v28  ;;  %v2464_v62 = vsel %vm6360_vm13, %v6212_v15, %v2460_v52 }
 0x2e0   : > { %v2484_v20 = vsel %vm2481_vm14, %v2483_v24, %v2479_v51  ;;  %vm2496_vm15 = vcmp.eq.f32.partialorder %v2495_v16, 8.507059e+37  ;;  %v2517_v36 = vmul.f32 %v6324_v21, %v6274_v12  ;;  %v2468_v18 = vor.u32 1.1754944e-38, %v2467_v59  ;;  %v6379_v57 = vpop.f32.mrf.mxu0 }
 0x2e1   : > { %2898 = vmatmul.bf16.gmra.mxu0 %v2667_v41  ;;  %2996 = vmatmul.bf16.gmra.mxu2 %v2667_v41  ;;  %v2499_v29 = vsel %vm2496_vm15, %v2498_v54, %v2494_v48  ;;  %v2533_v61 = vsub.f32 1.0, %v2532_v53  ;;  %v1848_v3 = vadd.f32 %v1847_v6, %v1798_v58  ;;  %v2454_v31 = vsel %vm6292_vm2, %v2453_v33, %v2449_v19  ;;  %v6381_v49 = vpop.f32.mrf.mxu1 }
 0x2e2   : > { %2947 = vmatmul.bf16.gmra.mxu1 %v2668_v34  ;;  %vm2466_vm0 = vcmp.eq.f32.partialorder %v2465_v23, 8.507059e+37  ;;  %v2548_v37 = vsub.f32 1.0, %v2547_v11  ;;  %v1946_v39 = vadd.f32 %v1945_v14, %v1896_v10  ;;  %v2587_v17 = vmul.f32 %v2484_v20, %v5997_v7 }
 0x2e3   : > { %3045 = vmatmul.bf16.gmra.mxu3 %v2668_v34  ;;  %v2469_v4 = vsel %vm2466_vm0, %v2468_v18, %v2464_v62  ;;  %v2503_v13 = vsub.f32 1.0, %v2502_v56  ;;  %v1846_v15 = vadd.f32 %v6260_v40, %v6258_v42  ;;  %v2588_v2 = vmul.f32 %v2499_v29, %v6005_v45 }
 0x2e4   : > { %v2518_v41 = vsub.f32 1.0, %v2517_v36  ;;  %v1944_v22 = vadd.f32 %v6267_v38, %v6265_v1  ;;  %v2585_v33 = vmul.f32 %v2454_v31, %v6666_v0  ;;  %v2534_v34 = vmul.f32 %v6299_v27, %v2533_v61 }
 0x2e5   : > { %v2619_v58 = vmul.f32 %v2587_v17, %v1848_v3  ;;  %v2586_v42 = vmul.f32 %v2469_v4, %v6669_v25  ;;  %v2549_v45 = vmul.f32 %v6304_v8, %v2548_v37  ;;  %v2620_v40 = vmul.f32 %v2588_v2, %v1946_v39 }
 0x2e6   : > { %v6385_v7 = vpop.f32.mrf.mxu2  ;;  %v2504_v1 = vmul.f32 %v6310_v26, %v2503_v13  ;;  %v2617_v38 = vmul.f32 %v2585_v33, %v1846_v15  ;;  %vm2506_vm1 = vweird.f32 %v6270_v28  ;;  %v2512_v47 = vand.u32 2147483648, %v6270_v28 }
 0x2e7   : > { %v6387_v6 = vpop.f32.mrf.mxu3  ;;  %v2519_v0 = vmul.f32 %v6324_v21, %v2518_v41  ;;  %v2618_v5 = vmul.f32 %v2586_v42, %v1944_v22  ;;  %vm2507_vm2 = vweird.f32 %v6310_v26  ;;  %v2535_v32 = vadd.f32 %v6299_v27, %v2534_v34 }
 0x2e8   : > { %vm2537_vm3 = vweird.f32 %v6299_v27  ;;  %v2669_v25 = vpack.c.bf16 %v2619_v58, %v2617_v38  ;;  %v2542_v10 = vand.u32 2147483648, %v6256_v46  ;;  %v2550_v14 = vadd.f32 %v6304_v8, %v2549_v45  ;;  %vm6426_vm10 = vmor %vm2506_vm1, %vm2507_vm2  ;;  %v1803_v19 = vpop.f32.mrf.mxu0  ;;  %v2627_v45 = vld [vmem:[#allocation3 + $0xd8] sm:$0xff] }
 0x2e9   : > { %vm2552_vm4 = vweird.f32 %v6304_v8  ;;  %v2670_v52 = vpack.c.bf16 %v2620_v40, %v2618_v5  ;;  %v2505_v9 = vadd.f32 %v6310_v26, %v2504_v1  ;;  %vm2536_vm5 = vweird.f32 %v6256_v46  ;;  %v1852_v50 = vpop.f32.mrf.mxu1  ;;  %v2628_v5 = vld [vmem:[#allocation3 + $0x18] sm:$0xff] }
 0x2ea   : > { %v2540_v16 = vand.u32 2147483647, %v6256_v46  ;;  %v2557_v59 = vand.u32 2147483648, %v6262_v30  ;;  %v2520_v51 = vadd.f32 %v6324_v21, %v2519_v0  ;;  %vm2522_vm6 = vweird.f32 %v6324_v21  ;;  %vm6407_vm7 = vmor %vm2536_vm5, %vm2537_vm3 }
 0x2eb   : > { %vm2551_vm8 = vweird.f32 %v6262_v30  ;;  %v2555_v53 = vand.u32 2147483647, %v6262_v30  ;;  %v2510_v43 = vand.u32 2147483647, %v6270_v28  ;;  %v2527_v23 = vand.u32 2147483648, %v6274_v12 }
 0x2ec   : > { %v2539_v46 = vsel %vm6407_vm7, %v6299_v27, %v2535_v32  ;;  %vm6418_vm9 = vmor %vm2551_vm8, %vm2552_vm4  ;;  %vm2521_vm11 = vweird.f32 %v6274_v12  ;;  %v2525_v48 = vand.u32 2147483647, %v6274_v12  ;;  %v2543_v11 = vor.u32 1.1754944e-38, %v2542_v10 }
 0x2ed   : > { %v2554_v27 = vsel %vm6418_vm9, %v6304_v8, %v2550_v14  ;;  %v2509_v28 = vsel %vm6426_vm10, %v6310_v26, %v2505_v9  ;;  %vm6440_vm12 = vmor %vm2521_vm11, %vm2522_vm6  ;;  %vm2541_vm13 = vcmp.eq.f32.partialorder %v2540_v16, 8.507059e+37  ;;  %v2558_v12 = vor.u32 1.1754944e-38, %v2557_v59  ;;  %v2629_v14 = vld [vmem:[#allocation3 + $0x50] sm:$0xff] }
 0x2ee   : > { %v1901_v56 = vpop.f32.mrf.mxu2  ;;  %v2513_v20 = vor.u32 1.1754944e-38, %v2512_v47  ;;  %v2524_v8 = vsel %vm6440_vm12, %v6324_v21, %v2520_v51  ;;  %v2544_v36 = vsel %vm2541_vm13, %v2543_v11, %v2539_v46  ;;  %vm2556_vm14 = vcmp.eq.f32.partialorder %v2555_v53, 8.507059e+37  ;;  %v2631_v46 = vld [vmem:[#allocation3 + $0x30] sm:$0xff] }
 0x2ef   : > { %v1950_v62 = vpop.f32.mrf.mxu3  ;;  %vm2511_vm15 = vcmp.eq.f32.partialorder %v2510_v43, 8.507059e+37  ;;  %v2528_v18 = vor.u32 1.1754944e-38, %v2527_v23  ;;  %v2559_v26 = vsel %vm2556_vm14, %v2558_v12, %v2554_v27  ;;  %v1853_v29 = vadd.f32 %v1852_v50, %v1803_v19  ;;  %v2632_v19 = vld [vmem:[#allocation3 + $0x48] sm:$0xff]  ;;  %v2633_v12 = vld [vmem:[#allocation3 + $0x80] sm:$0xff] }
 0x2f0   : > { %v2514_v61 = vsel %vm2511_vm15, %v2513_v20, %v2509_v28  ;;  %vm2526_vm0 = vcmp.eq.f32.partialorder %v2525_v48, 8.507059e+37  ;;  %v1951_v3 = vadd.f32 %v1950_v62, %v1901_v56  ;;  %v2591_v37 = vmul.f32 %v2544_v36, %v6135_v44 }
 0x2f1   : > { %2903 = vmatmul.bf16.gmra.mxu0 %v2669_v25  ;;  %3001 = vmatmul.bf16.gmra.mxu2 %v2669_v25  ;;  %v2529_v31 = vsel %vm2526_vm0, %v2528_v18, %v2524_v8  ;;  %v1851_v39 = vadd.f32 %v6381_v49, %v6379_v57  ;;  %v2592_v4 = vmul.f32 %v2559_v26, %v6142_v63  ;;  %v2625_v57 = vld [vmem:[#allocation3 + $0xb0] sm:$0xff]  ;;  %v2634_v18 = vld [vmem:[#allocation3 + $0x88] sm:$0xff] }
 0x2f2   : > { %2952 = vmatmul.bf16.gmra.mxu1 %v2670_v52  ;;  %v1949_v21 = vadd.f32 %v6387_v6, %v6385_v7  ;;  %v2589_v17 = vmul.f32 %v2514_v61, %v6682_v35  ;;  %v2623_v13 = vmul.f32 %v2591_v37, %v1853_v29  ;;  %v2590_v15 = vmul.f32 %v2529_v31, %v6685_v60  ;;  %v2626_v35 = vld [vmem:[#allocation3] sm:$0xff] }
 0x2f3   : > { %3050 = vmatmul.bf16.gmra.mxu3 %v2670_v52  ;;  %v2624_v2 = vmul.f32 %v2592_v4, %v1951_v3  ;;  %v2635_v3 = vld [vmem:[#allocation3 + $0xe8] sm:$0xff] }
 0x2f4   : > { %v2621_v41 = vmul.f32 %v2589_v17, %v1851_v39  ;;  %v2622_v22 = vmul.f32 %v2590_v15, %v1949_v21  ;;  %v2636_v17 = vld [vmem:[#allocation3 + $0xb8] sm:$0xff] }
 0x2f6   : > { %v2671_v33 = vpack.c.bf16 %v2623_v13, %v2621_v41  ;;  %v2672_v34 = vpack.c.bf16 %v2624_v2, %v2622_v22  ;;  %v2637_v41 = vld [vmem:[#allocation3 + $0x60] sm:$0xff] }
 0x301   : > { %2908 = vmatmul.bf16.gmra.mxu0 %v2671_v33  ;;  %3006 = vmatmul.bf16.gmra.mxu2 %v2671_v33 }
 0x302   : > { %2957 = vmatmul.bf16.gmra.mxu1 %v2672_v34 }
 0x303   : > { %3055 = vmatmul.bf16.gmra.mxu3 %v2672_v34 }
 0x30e   : > { %v2874_v44 = vpop.f32.mrf.mxu0 }
 0x30f   : > { %v2923_v63 = vpop.f32.mrf.mxu1 }
 0x310   : > { %v2924_v49 = vadd.f32 %v2923_v63, %v2874_v44  ;;  %v2638_v63 = vld [vmem:[#allocation3 + $0xf0] sm:$0xff] }
 0x312   : > { %v3061_v58 = vadd.f32 %v2924_v49, %v2625_v57 }
 0x314   : > { %3093 = vst [vmem:[#allocation3 + $0xb0] sm:$0xff] %v3061_v58  ;;  %v2972_v7 = vpop.f32.mrf.mxu2 }
 0x316   : > { %v3021_v6 = vpop.f32.mrf.mxu3  ;;  %v2876_v42 = vpop.f32.mrf.mxu0 }
 0x317   : > { %v3022_v60 = vadd.f32 %v3021_v6, %v2972_v7  ;;  %v2925_v40 = vpop.f32.mrf.mxu1 }
 0x318   : > { %v2926_v38 = vadd.f32 %v2925_v40, %v2876_v42 }
 0x319   : > { %v3062_v1 = vadd.f32 %v3022_v60, %v2626_v35  ;;  %v2639_v35 = vld [vmem:[#allocation3 + $0x8] sm:$0xff] }
 0x31a   : > { %v3063_v47 = vadd.f32 %v2926_v38, %v2627_v45 }
 0x31b   : > { %3094 = vst [vmem:[#allocation3] sm:$0xff] %v3062_v1  ;;  %v2640_v1 = vld [vmem:[#allocation3 + $0x78] sm:$0xff] }
 0x31c   : > { %3095 = vst [vmem:[#allocation3 + $0xd8] sm:$0xff] %v3063_v47  ;;  %v2974_v0 = vpop.f32.mrf.mxu2 }
 0x31e   : > { %v3023_v32 = vpop.f32.mrf.mxu3  ;;  %v2879_v25 = vpop.f32.mrf.mxu0 }
 0x31f   : > { %v3024_v10 = vadd.f32 %v3023_v32, %v2974_v0  ;;  %v2928_v52 = vpop.f32.mrf.mxu1 }
 0x320   : > { %v2929_v16 = vadd.f32 %v2928_v52, %v2879_v25 }
 0x321   : > { %v3064_v9 = vadd.f32 %v3024_v10, %v2628_v5  ;;  %v2641_v5 = vld [vmem:[#allocation3 + $0x38] sm:$0xff] }
 0x322   : > { %v3065_v59 = vadd.f32 %v2929_v16, %v2629_v14 }
 0x323   : > { %3096 = vst [vmem:[#allocation3 + $0x18] sm:$0xff] %v3064_v9  ;;  %v2642_v9 = vld [vmem:[#allocation3 + $0x58] sm:$0xff] }
 0x324   : > { %3097 = vst [vmem:[#allocation3 + $0x50] sm:$0xff] %v3065_v59  ;;  %v2977_v51 = vpop.f32.mrf.mxu2 }
 0x326   : > { %v3026_v53 = vpop.f32.mrf.mxu3  ;;  %v2881_v43 = vpop.f32.mrf.mxu0 }
 0x327   : > { %v3027_v23 = vadd.f32 %v3026_v53, %v2977_v51  ;;  %v2930_v24 = vpop.f32.mrf.mxu1 }
 0x328   : > { %v2931_v48 = vadd.f32 %v2930_v24, %v2881_v43 }
 0x329   : > { %v3066_v30 = vadd.f32 %v3027_v23, %v2630_v55  ;;  %v2643_v55 = vld [vmem:[#allocation3 + $0x40] sm:$0xff] }
 0x32a   : > { %v3067_v11 = vadd.f32 %v2931_v48, %v2631_v46 }
 0x32b   : > { %3098 = vst [vmem:[#allocation3 + $0x68] sm:$0xff] %v3066_v30  ;;  %v2644_v30 = vld [vmem:[#allocation3 + $0xc8] sm:$0xff] }
 0x32c   : > { %3099 = vst [vmem:[#allocation3 + $0x30] sm:$0xff] %v3067_v11  ;;  %v2979_v27 = vpop.f32.mrf.mxu2 }
 0x32e   : > { %v3028_v50 = vpop.f32.mrf.mxu3  ;;  %v2884_v28 = vpop.f32.mrf.mxu0 }
 0x32f   : > { %v3029_v54 = vadd.f32 %v3028_v50, %v2979_v27  ;;  %v2933_v56 = vpop.f32.mrf.mxu1 }
 0x330   : > { %v2934_v20 = vadd.f32 %v2933_v56, %v2884_v28 }
 0x331   : > { %v3068_v62 = vadd.f32 %v3029_v54, %v2632_v19  ;;  %v2645_v19 = vld [vmem:[#allocation3 + $0xe0] sm:$0xff] }
 0x332   : > { %v3069_v8 = vadd.f32 %v2934_v20, %v2633_v12 }
 0x333   : > { %3100 = vst [vmem:[#allocation3 + $0x48] sm:$0xff] %v3068_v62  ;;  %v2646_v62 = vld [vmem:[#allocation3 + $0x90] sm:$0xff] }
 0x334   : > { %3101 = vst [vmem:[#allocation3 + $0x80] sm:$0xff] %v3069_v8  ;;  %v2982_v36 = vpop.f32.mrf.mxu2 }
 0x336   : > { %v3031_v26 = vpop.f32.mrf.mxu3  ;;  %v2886_v29 = vpop.f32.mrf.mxu0 }
 0x337   : > { %v3032_v61 = vadd.f32 %v3031_v26, %v2982_v36  ;;  %v2935_v31 = vpop.f32.mrf.mxu1 }
 0x338   : > { %v2936_v39 = vadd.f32 %v2935_v31, %v2886_v29 }
 0x339   : > { %v3070_v37 = vadd.f32 %v3032_v61, %v2634_v18  ;;  %v2647_v18 = vld [vmem:[#allocation3 + $0x70] sm:$0xff] }
 0x33a   : > { %v3071_v4 = vadd.f32 %v2936_v39, %v2635_v3 }
 0x33b   : > { %3102 = vst [vmem:[#allocation3 + $0x88] sm:$0xff] %v3070_v37  ;;  %v2648_v37 = vld [vmem:[#allocation3 + $0xc0] sm:$0xff] }
 0x33c   : > { %3103 = vst [vmem:[#allocation3 + $0xe8] sm:$0xff] %v3071_v4  ;;  %v2984_v21 = vpop.f32.mrf.mxu2 }
 0x33e   : > { %v3033_v13 = vpop.f32.mrf.mxu3  ;;  %v2889_v15 = vpop.f32.mrf.mxu0 }
 0x33f   : > { %v3034_v2 = vadd.f32 %v3033_v13, %v2984_v21  ;;  %v2938_v22 = vpop.f32.mrf.mxu1 }
 0x340   : > { %v2939_v34 = vadd.f32 %v2938_v22, %v2889_v15 }
 0x341   : > { %v3072_v33 = vadd.f32 %v3034_v2, %v2636_v17  ;;  %v2649_v17 = vld [vmem:[#allocation3 + $0xa8] sm:$0xff] }
 0x342   : > { %v3073_v44 = vadd.f32 %v2939_v34, %v2637_v41 }
 0x343   : > { %3104 = vst [vmem:[#allocation3 + $0xb8] sm:$0xff] %v3072_v33  ;;  %v2650_v33 = vld [vmem:[#allocation3 + $0xd0] sm:$0xff] }
 0x344   : > { %3105 = vst [vmem:[#allocation3 + $0x60] sm:$0xff] %v3073_v44  ;;  %v2987_v57 = vpop.f32.mrf.mxu2 }
 0x346   : > { %v3036_v49 = vpop.f32.mrf.mxu3  ;;  %v2891_v58 = vpop.f32.mrf.mxu0 }
 0x347   : > { %v3037_v7 = vadd.f32 %v3036_v49, %v2987_v57  ;;  %v2940_v6 = vpop.f32.mrf.mxu1 }
 0x348   : > { %v2941_v60 = vadd.f32 %v2940_v6, %v2891_v58 }
 0x349   : > { %v3074_v42 = vadd.f32 %v3037_v7, %v2638_v63  ;;  %v2651_v63 = vld [vmem:[#allocation3 + $0x10] sm:$0xff] }
 0x34a   : > { %v3075_v45 = vadd.f32 %v2941_v60, %v2639_v35 }
 0x34b   : > { %3106 = vst [vmem:[#allocation3 + $0xf0] sm:$0xff] %v3074_v42  ;;  %v2652_v42 = vld [vmem:[#allocation3 + $0x28] sm:$0xff] }
 0x34c   : > { %3107 = vst [vmem:[#allocation3 + $0x8] sm:$0xff] %v3075_v45  ;;  %v2989_v40 = vpop.f32.mrf.mxu2 }
 0x34e   : > { %v3038_v38 = vpop.f32.mrf.mxu3  ;;  %v2894_v47 = vpop.f32.mrf.mxu0 }
 0x34f   : > { %v3039_v0 = vadd.f32 %v3038_v38, %v2989_v40  ;;  %v2943_v32 = vpop.f32.mrf.mxu1 }
 0x350   : > { %v2944_v10 = vadd.f32 %v2943_v32, %v2894_v47 }
 0x351   : > { %v3076_v25 = vadd.f32 %v3039_v0, %v2640_v1  ;;  %v2653_v1 = vld [vmem:[#allocation3 + $0xa0] sm:$0xff] }
 0x352   : > { %v3077_v14 = vadd.f32 %v2944_v10, %v2641_v5 }
 0x353   : > { %3108 = vst [vmem:[#allocation3 + $0x78] sm:$0xff] %v3076_v25  ;;  %v2654_v25 = vld [vmem:[#allocation3 + $0xf8] sm:$0xff] }
 0x354   : > { %3109 = vst [vmem:[#allocation3 + $0x38] sm:$0xff] %v3077_v14  ;;  %v2992_v52 = vpop.f32.mrf.mxu2 }
 0x356   : > { %v3041_v16 = vpop.f32.mrf.mxu3  ;;  %v2896_v59 = vpop.f32.mrf.mxu0 }
 0x357   : > { %v3042_v51 = vadd.f32 %v3041_v16, %v2992_v52  ;;  %v2945_v53 = vpop.f32.mrf.mxu1 }
 0x358   : > { %v2946_v23 = vadd.f32 %v2945_v53, %v2896_v59 }
 0x359   : > { %v3078_v43 = vadd.f32 %v3042_v51, %v2642_v9  ;;  %v2655_v9 = vld [vmem:[#allocation3 + $0x20] sm:$0xff] }
 0x35a   : > { %v3079_v46 = vadd.f32 %v2946_v23, %v2643_v55 }
 0x35b   : > { %3110 = vst [vmem:[#allocation3 + $0x58] sm:$0xff] %v3078_v43  ;;  %v2656_v43 = vld [vmem:[#allocation3 + $0x98] sm:$0xff] }
 0x35c   : > { %3111 = vst [vmem:[#allocation3 + $0x40] sm:$0xff] %v3079_v46  ;;  %v2994_v24 = vpop.f32.mrf.mxu2 }
 0x35e   : > { %v3043_v48 = vpop.f32.mrf.mxu3  ;;  %v2899_v11 = vpop.f32.mrf.mxu0 }
 0x35f   : > { %v3044_v27 = vadd.f32 %v3043_v48, %v2994_v24  ;;  %v2948_v50 = vpop.f32.mrf.mxu1 }
 0x360   : > { %v2949_v54 = vadd.f32 %v2948_v50, %v2899_v11 }
 0x361   : > { %v3080_v28 = vadd.f32 %v3044_v27, %v2644_v30 }
 0x362   : > { %v3081_v12 = vadd.f32 %v2949_v54, %v2645_v19 }
 0x363   : > { %3112 = vst [vmem:[#allocation3 + $0xc8] sm:$0xff] %v3080_v28 }
 0x364   : > { %3113 = vst [vmem:[#allocation3 + $0xe0] sm:$0xff] %v3081_v12  ;;  %v2997_v56 = vpop.f32.mrf.mxu2 }
 0x366   : > { %v3046_v20 = vpop.f32.mrf.mxu3  ;;  %v2901_v8 = vpop.f32.mrf.mxu0 }
 0x367   : > { %v3047_v36 = vadd.f32 %v3046_v20, %v2997_v56  ;;  %v2950_v26 = vpop.f32.mrf.mxu1 }
 0x368   : > { %v2951_v61 = vadd.f32 %v2950_v26, %v2901_v8 }
 0x369   : > { %v3082_v29 = vadd.f32 %v3047_v36, %v2646_v62 }
 0x36a   : > { %v3083_v3 = vadd.f32 %v2951_v61, %v2647_v18 }
 0x36b   : > { %3114 = vst [vmem:[#allocation3 + $0x90] sm:$0xff] %v3082_v29 }
 0x36c   : > { %3115 = vst [vmem:[#allocation3 + $0x70] sm:$0xff] %v3083_v3  ;;  %v2999_v31 = vpop.f32.mrf.mxu2 }
 0x36e   : > { %v3048_v39 = vpop.f32.mrf.mxu3  ;;  %v2904_v4 = vpop.f32.mrf.mxu0 }
 0x36f   : > { %v3049_v21 = vadd.f32 %v3048_v39, %v2999_v31  ;;  %v2953_v13 = vpop.f32.mrf.mxu1 }
 0x370   : > { %v2954_v2 = vadd.f32 %v2953_v13, %v2904_v4 }
 0x371   : > { %v3084_v15 = vadd.f32 %v3049_v21, %v2648_v37 }
 0x372   : > { %v3085_v41 = vadd.f32 %v2954_v2, %v2649_v17 }
 0x373   : > { %3116 = vst [vmem:[#allocation3 + $0xc0] sm:$0xff] %v3084_v15 }
 0x374   : > { %3117 = vst [vmem:[#allocation3 + $0xa8] sm:$0xff] %v3085_v41  ;;  %v3002_v22 = vpop.f32.mrf.mxu2 }
 0x376   : > { %v3051_v34 = vpop.f32.mrf.mxu3  ;;  %v2906_v44 = vpop.f32.mrf.mxu0 }
 0x377   : > { %v3052_v57 = vadd.f32 %v3051_v34, %v3002_v22  ;;  %v2955_v49 = vpop.f32.mrf.mxu1 }
 0x378   : > { %v2956_v7 = vadd.f32 %v2955_v49, %v2906_v44 }
 0x379   : > { %v3086_v58 = vadd.f32 %v3052_v57, %v2650_v33 }
 0x37a   : > { %v3087_v35 = vadd.f32 %v2956_v7, %v2651_v63 }
 0x37b   : > { %3118 = vst [vmem:[#allocation3 + $0xd0] sm:$0xff] %v3086_v58 }
 0x37c   : > { %3119 = vst [vmem:[#allocation3 + $0x10] sm:$0xff] %v3087_v35  ;;  %v3004_v6 = vpop.f32.mrf.mxu2 }
 0x37e   : > { %v3053_v60 = vpop.f32.mrf.mxu3  ;;  %v2909_v45 = vpop.f32.mrf.mxu0 }
 0x37f   : > { %v3054_v40 = vadd.f32 %v3053_v60, %v3004_v6  ;;  %v2958_v38 = vpop.f32.mrf.mxu1 }
 0x380   : > { %v2959_v0 = vadd.f32 %v2958_v38, %v2909_v45 }
 0x381   : > { %v3088_v47 = vadd.f32 %v3054_v40, %v2652_v42 }
 0x382   : > { %v3089_v5 = vadd.f32 %v2959_v0, %v2653_v1 }
 0x383   : > { %3120 = vst [vmem:[#allocation3 + $0x28] sm:$0xff] %v3088_v47 }
 0x384   : > { %3121 = vst [vmem:[#allocation3 + $0xa0] sm:$0xff] %v3089_v5  ;;  %v3007_v32 = vpop.f32.mrf.mxu2 }
 0x386   : > { %v3056_v10 = vpop.f32.mrf.mxu3  ;;  %v2911_v52 = vpop.f32.mrf.mxu0 }
 0x387   : > { %v3057_v14 = vadd.f32 %v3056_v10, %v3007_v32  ;;  %v2960_v16 = vpop.f32.mrf.mxu1 }
 0x388   : > { %v2961_v51 = vadd.f32 %v2960_v16, %v2911_v52 }
 0x389   : > { %v3090_v59 = vadd.f32 %v3057_v14, %v2654_v25 }
 0x38a   : > { %v3091_v55 = vadd.f32 %v2961_v51, %v2655_v9 }
 0x38b   : > { %3122 = vst [vmem:[#allocation3 + $0xf8] sm:$0xff] %v3090_v59 }
 0x38c   : > { %3123 = vst [vmem:[#allocation3 + $0x20] sm:$0xff] %v3091_v55  ;;  %v3009_v53 = vpop.f32.mrf.mxu2 }
 0x38e   : > { %v3058_v23 = vpop.f32.mrf.mxu3 }
 0x38f   : > { %v3059_v46 = vadd.f32 %v3058_v23, %v3009_v53  ;;  %3128 = sbr.rel (%p3878_p13) target bundleno = 951 (0x3b7), region = 124 }
 0x391   : > { %v3092_v24 = vadd.f32 %v3059_v46, %v2656_v43 }
 0x393   : > { %3124 = vst [vmem:[#allocation3 + $0x98] sm:$0xff] %v3092_v24 }
 0x394   : > { %v3129_v30 = vld [vmem:[#allocation3 + $0xb0] sm:$0xff]  ;;  %v3161_v48 = vld [vmem:[%s4520_s12] sm:$0xff]  ;;  %v3162_v19 = vld [vmem:[%s4520_s12 + $0x8] sm:$0xff] }
 0x395   : > { %v3130_v11 = vld [vmem:[#allocation3] sm:$0xff]  ;;  %v3193_v27 = vadd.f32 %v3161_v48, %v3129_v30  ;;  %v3131_v50 = vld [vmem:[#allocation3 + $0xd8] sm:$0xff]  ;;  %v3163_v28 = vld [vmem:[%s4520_s12 + $0x10] sm:$0xff] }
 0x396   : > { %v3194_v54 = vadd.f32 %v3162_v19, %v3130_v11  ;;  %v3195_v12 = vadd.f32 %v3163_v28, %v3131_v50  ;;  %v3132_v56 = vld [vmem:[#allocation3 + $0x18] sm:$0xff]  ;;  %v3133_v20 = vld [vmem:[#allocation3 + $0x50] sm:$0xff]  ;;  %v3165_v36 = vld [vmem:[%s4520_s12 + $0x20] sm:$0xff] }
 0x397   : > { %v3164_v62 = vld [vmem:[%s4520_s12 + $0x18] sm:$0xff]  ;;  %3225 = vst [vmem:[%s4525_s15] sm:$0xff] %v3193_v27  ;;  %v3134_v18 = vld [vmem:[#allocation3 + $0x68] sm:$0xff]  ;;  %v3197_v29 = vadd.f32 %v3165_v36, %v3133_v20  ;;  %v3135_v3 = vld [vmem:[#allocation3 + $0x30] sm:$0xff] }
 0x398   : > { %v3196_v8 = vadd.f32 %v3164_v62, %v3132_v56  ;;  %v3166_v26 = vld [vmem:[%s4520_s12 + $0x28] sm:$0xff]  ;;  %3226 = vst [vmem:[%s4525_s15 + $0x8] sm:$0xff] %v3194_v54  ;;  %v3167_v31 = vld [vmem:[%s4520_s12 + $0x30] sm:$0xff]  ;;  %v3168_v4 = vld [vmem:[%s4520_s12 + $0x38] sm:$0xff] }
 0x399   : > { %v3198_v61 = vadd.f32 %v3166_v26, %v3134_v18  ;;  %v3136_v37 = vld [vmem:[#allocation3 + $0x48] sm:$0xff]  ;;  %3227 = vst [vmem:[%s4525_s15 + $0x10] sm:$0xff] %v3195_v12  ;;  %v3199_v39 = vadd.f32 %v3167_v31, %v3135_v3  ;;  %v3137_v21 = vld [vmem:[#allocation3 + $0x80] sm:$0xff]  ;;  %v3171_v33 = vld [vmem:[%s4520_s12 + $0x50] sm:$0xff] }
 0x39a   : > { %v3169_v17 = vld [vmem:[%s4520_s12 + $0x40] sm:$0xff]  ;;  %3228 = vst [vmem:[%s4525_s15 + $0x18] sm:$0xff] %v3196_v8  ;;  %v3200_v13 = vadd.f32 %v3168_v4, %v3136_v37  ;;  %v3138_v15 = vld [vmem:[#allocation3 + $0x88] sm:$0xff]  ;;  %v3140_v34 = vld [vmem:[#allocation3 + $0xb8] sm:$0xff] }
 0x39b   : > { %v3170_v2 = vld [vmem:[%s4520_s12 + $0x48] sm:$0xff]  ;;  %3229 = vst [vmem:[%s4525_s15 + $0x20] sm:$0xff] %v3197_v29  ;;  %v3201_v22 = vadd.f32 %v3169_v17, %v3137_v21  ;;  %v3172_v44 = vld [vmem:[%s4520_s12 + $0x58] sm:$0xff]  ;;  %v3141_v63 = vld [vmem:[#allocation3 + $0x60] sm:$0xff] }
 0x39c   : > { %v3139_v41 = vld [vmem:[#allocation3 + $0xe8] sm:$0xff]  ;;  %3230 = vst [vmem:[%s4525_s15 + $0x28] sm:$0xff] %v3198_v61  ;;  %v3202_v57 = vadd.f32 %v3170_v2, %v3138_v15  ;;  %v3173_v49 = vld [vmem:[%s4520_s12 + $0x60] sm:$0xff]  ;;  %v3142_v7 = vld [vmem:[#allocation3 + $0xf0] sm:$0xff]  ;;  %v3204_v6 = vadd.f32 %v3172_v44, %v3140_v34 }
 0x39d   : > { %3231 = vst [vmem:[%s4525_s15 + $0x30] sm:$0xff] %v3199_v39  ;;  %v3203_v58 = vadd.f32 %v3171_v33, %v3139_v41  ;;  %v3174_v35 = vld [vmem:[%s4520_s12 + $0x68] sm:$0xff]  ;;  %v3175_v60 = vld [vmem:[%s4520_s12 + $0x70] sm:$0xff]  ;;  %v3205_v45 = vadd.f32 %v3173_v49, %v3141_v63  ;;  %v3144_v40 = vld [vmem:[#allocation3 + $0x78] sm:$0xff] }
 0x39e   : > { %3232 = vst [vmem:[%s4525_s15 + $0x38] sm:$0xff] %v3200_v13  ;;  %v3143_v42 = vld [vmem:[#allocation3 + $0x8] sm:$0xff]  ;;  %v3176_v1 = vld [vmem:[%s4520_s12 + $0x78] sm:$0xff]  ;;  %v3206_v38 = vadd.f32 %v3174_v35, %v3142_v7  ;;  %v3177_v0 = vld [vmem:[%s4520_s12 + $0x80] sm:$0xff] }
 0x39f   : > { %3233 = vst [vmem:[%s4525_s15 + $0x40] sm:$0xff] %v3201_v22  ;;  %v3145_v47 = vld [vmem:[#allocation3 + $0x38] sm:$0xff]  ;;  %v3207_v5 = vadd.f32 %v3175_v60, %v3143_v42  ;;  %v3178_v25 = vld [vmem:[%s4520_s12 + $0x88] sm:$0xff]  ;;  %v3208_v10 = vadd.f32 %v3176_v1, %v3144_v40  ;;  %v3147_v14 = vld [vmem:[#allocation3 + $0x40] sm:$0xff] }
 0x3a0   : > { %3234 = vst [vmem:[%s4525_s15 + $0x48] sm:$0xff] %v3202_v57  ;;  %v3146_v32 = vld [vmem:[#allocation3 + $0x58] sm:$0xff]  ;;  %v3179_v52 = vld [vmem:[%s4520_s12 + $0x90] sm:$0xff]  ;;  %v3209_v9 = vadd.f32 %v3177_v0, %v3145_v47  ;;  %v3148_v16 = vld [vmem:[#allocation3 + $0xc8] sm:$0xff] }
 0x3a1   : > { %3235 = vst [vmem:[%s4525_s15 + $0x50] sm:$0xff] %v3203_v58  ;;  %v3180_v59 = vld [vmem:[%s4520_s12 + $0x98] sm:$0xff]  ;;  %v3210_v51 = vadd.f32 %v3178_v25, %v3146_v32  ;;  %v3149_v55 = vld [vmem:[#allocation3 + $0xe0] sm:$0xff]  ;;  %v3211_v43 = vadd.f32 %v3179_v52, %v3147_v14  ;;  %v3150_v23 = vld [vmem:[#allocation3 + $0x90] sm:$0xff] }
 0x3a2   : > { %3236 = vst [vmem:[%s4525_s15 + $0x58] sm:$0xff] %v3204_v6  ;;  %v3181_v53 = vld [vmem:[%s4520_s12 + $0xa0] sm:$0xff]  ;;  %v3182_v46 = vld [vmem:[%s4520_s12 + $0xa8] sm:$0xff]  ;;  %v3212_v24 = vadd.f32 %v3180_v59, %v3148_v16  ;;  %v3151_v30 = vld [vmem:[#allocation3 + $0x70] sm:$0xff] }
 0x3a3   : > { %3237 = vst [vmem:[%s4525_s15 + $0x60] sm:$0xff] %v3205_v45  ;;  %v3183_v48 = vld [vmem:[%s4520_s12 + $0xb0] sm:$0xff]  ;;  %v3213_v11 = vadd.f32 %v3181_v53, %v3149_v55  ;;  %v3152_v27 = vld [vmem:[#allocation3 + $0xc0] sm:$0xff]  ;;  %v3184_v19 = vld [vmem:[%s4520_s12 + $0xb8] sm:$0xff]  ;;  %v3214_v50 = vadd.f32 %v3182_v46, %v3150_v23 }
 0x3a4   : > { %3238 = vst [vmem:[%s4525_s15 + $0x68] sm:$0xff] %v3206_v38  ;;  %v3153_v28 = vld [vmem:[#allocation3 + $0xa8] sm:$0xff]  ;;  %v3185_v54 = vld [vmem:[%s4520_s12 + $0xc0] sm:$0xff]  ;;  %v3215_v12 = vadd.f32 %v3183_v48, %v3151_v30  ;;  %v3154_v56 = vld [vmem:[#allocation3 + $0xd0] sm:$0xff]  ;;  %v3216_v20 = vadd.f32 %v3184_v19, %v3152_v27 }
 0x3a5   : > { %3239 = vst [vmem:[%s4525_s15 + $0x70] sm:$0xff] %v3207_v5  ;;  %v3186_v62 = vld [vmem:[%s4520_s12 + $0xc8] sm:$0xff]  ;;  %v3155_v8 = vld [vmem:[#allocation3 + $0x10] sm:$0xff]  ;;  %v3217_v18 = vadd.f32 %v3185_v54, %v3153_v28  ;;  %v3188_v29 = vld [vmem:[%s4520_s12 + $0xd8] sm:$0xff] }
 0x3a6   : > { %3240 = vst [vmem:[%s4525_s15 + $0x78] sm:$0xff] %v3208_v10  ;;  %v3187_v36 = vld [vmem:[%s4520_s12 + $0xd0] sm:$0xff]  ;;  %v3156_v26 = vld [vmem:[#allocation3 + $0x28] sm:$0xff]  ;;  %v3218_v61 = vadd.f32 %v3186_v62, %v3154_v56  ;;  %v3157_v3 = vld [vmem:[#allocation3 + $0xa0] sm:$0xff] }
 0x3a7   : > { %3241 = vst [vmem:[%s4525_s15 + $0x80] sm:$0xff] %v3209_v9  ;;  %v3189_v31 = vld [vmem:[%s4520_s12 + $0xe0] sm:$0xff]  ;;  %v3219_v37 = vadd.f32 %v3187_v36, %v3155_v8  ;;  %v3158_v39 = vld [vmem:[#allocation3 + $0xf8] sm:$0xff]  ;;  %v3190_v4 = vld [vmem:[%s4520_s12 + $0xe8] sm:$0xff]  ;;  %v3220_v21 = vadd.f32 %v3188_v29, %v3156_v26 }
 0x3a8   : > { %3242 = vst [vmem:[%s4525_s15 + $0x88] sm:$0xff] %v3210_v51  ;;  %v3159_v17 = vld [vmem:[#allocation3 + $0x20] sm:$0xff]  ;;  %v3191_v13 = vld [vmem:[%s4520_s12 + $0xf0] sm:$0xff]  ;;  %v3221_v15 = vadd.f32 %v3189_v31, %v3157_v3  ;;  %v3160_v2 = vld [vmem:[#allocation3 + $0x98] sm:$0xff]  ;;  %v3222_v22 = vadd.f32 %v3190_v4, %v3158_v39 }
 0x3a9   : > { %3243 = vst [vmem:[%s4525_s15 + $0x90] sm:$0xff] %v3211_v43  ;;  %v3192_v41 = vld [vmem:[%s4520_s12 + $0xf8] sm:$0xff]  ;;  %v3223_v33 = vadd.f32 %v3191_v13, %v3159_v17 }
 0x3aa   : > { %3244 = vst [vmem:[%s4525_s15 + $0x98] sm:$0xff] %v3212_v24  ;;  %v3224_v34 = vadd.f32 %v3192_v41, %v3160_v2 }
 0x3ab   : > { %3245 = vst [vmem:[%s4525_s15 + $0xa0] sm:$0xff] %v3213_v11 }
 0x3ac   : > { %3246 = vst [vmem:[%s4525_s15 + $0xa8] sm:$0xff] %v3214_v50 }
 0x3ad   : > { %3247 = vst [vmem:[%s4525_s15 + $0xb0] sm:$0xff] %v3215_v12 }
 0x3ae   : > { %3248 = vst [vmem:[%s4525_s15 + $0xb8] sm:$0xff] %v3216_v20 }
 0x3af   : > { %3249 = vst [vmem:[%s4525_s15 + $0xc0] sm:$0xff] %v3217_v18 }
 0x3b0   : > { %3250 = vst [vmem:[%s4525_s15 + $0xc8] sm:$0xff] %v3218_v61 }
 0x3b1   : > { %3251 = vst [vmem:[%s4525_s15 + $0xd0] sm:$0xff] %v3219_v37 }
 0x3b2   : > { %3252 = vst [vmem:[%s4525_s15 + $0xd8] sm:$0xff] %v3220_v21 }
 0x3b3   : > { %3253 = vst [vmem:[%s4525_s15 + $0xe0] sm:$0xff] %v3221_v15 }
 0x3b4   : > { %3254 = vst [vmem:[%s4525_s15 + $0xe8] sm:$0xff] %v3222_v22 }
 0x3b5   : > { %3255 = vst [vmem:[%s4525_s15 + $0xf0] sm:$0xff] %v3223_v33 }
 0x3b6   : > { %3256 = vst [vmem:[%s4525_s15 + $0xf8] sm:$0xff] %v3224_v34 }
 0x3b7 PF: > { %s15_s24 = sadd.s32 1, %s4272_s24   ;;  %s6712_s18 = smov %s4252_s19 }
 0x3b8   : > { %p12_p0 = scmp.ge.s32.totalorder %s15_s24, 8   ;;  %s6713_s19 = smov %s4359_s30 }
 0x3b9   : > { %s6714_s20 = smov %s4264_s22  ;;  %s6715_s21 = smov %s4268_s23 }
 0x3ba   : > { %s6716_s22 = smov %s6719_s25  ;;  %s6717_s23 = smov %s6723_s26 }
 0x3bb   :  { %14 = sbr.rel (!%p12_p0) target bundleno = 4 (0x4), region = 173 }

// kernel: transformer_forward.10
= control target key start
LH: loop header
LB: loop body
LE: loop exit
PB: predicated region body
PF: predicated region fallthrough
CT: control target
= control target key end

     0   :  { %s3100_s12 = smov 0   ;;  %s3102_s13 = smov 0   ;;  %s4292_s0 = inlined_call_operand.vmem [shape: bf16[2,128,256], index: 0, kind: input, shape index: {}]   ;;  %s4293_s1 = inlined_call_operand.vmem [shape: bf16[2,128,128], index: 1, kind: input, shape index: {}]   ;;  %s4294_s2 = inlined_call_operand.vmem [shape: bf16[2,128,128], index: 2, kind: input, shape index: {}]   ;;  %s4295_s3 = inlined_call_operand.vmem [shape: bf16[2,128,256], index: 3, kind: output, shape index: {}]  }
   0x1   :  { %s3104_s14 = smov 0  }
   0x2 LB: > { %s32_s15 = sadd.s32 1, %s3071_s13  ;;  %p2576_p0 = scmp.ge.s32.totalorder %s3075_s14, 1  ;;  %s3075_s14 = sphi %s3104_s14, %s13_s14   ;;  %s3071_s13 = sphi %s3102_s13, %s4396_s13   ;;  %s3067_s12 = sphi %s3100_s12, %s4395_s12  }
   0x3   : > { %p34_p1 = scmp.ge.s32.totalorder %s32_s15, 2  ;;  %p200_p2 = scmp.lt.s32.totalorder %s3075_s14, 3 }
   0x5   : > { %s4398_s15 = smov (%p34_p1, %s32_s15), 0  ;;  %p201_p3 = pnand %p2576_p0, %p200_p2 }
   0x7   : > { %204 = sbr.rel (%p201_p3) target bundleno = 950 (0x3b6), region = 32 }
   0xc   : > { %p253_p4 = scmp.lt.s32.totalorder %s3067_s12, 1  ;;  %vm300_vm11 = vcmask 7168  }
   0xe   : > { %s4400_s12 = smov (!%p253_p4, %s3067_s12), 1 }
   0xf   : > { %s2780_s16 = sshll.u32 %s4400_s12, 6  ;;  %s2779_s20 = sshll.u32 %s4400_s12, 7 }
  0x10   : > { %s3126_s19 = scalar_lea.vmem %s4293_s1, %s2780_s16  ;;  %s3150_s23 = scalar_lea.vmem %s4292_s0, %s2779_s20 }
  0x11   : > { %v2798_v0 = vld [vmem:[%s3126_s19 + $0x38] sm:$0xff]  ;;  %v2797_v2 = vld [vmem:[%s3126_s19 + $0x30] sm:$0xff]  ;;  %v2796_v4 = vld [vmem:[%s3126_s19 + $0x28] sm:$0xff]  ;;  %s3639_s26 = scalar_lea.vmem %s4294_s2, %s2780_s16  ;;  %s4178_s29 = scalar_lea.vmem %s4295_s3, %s2779_s20 }
  0x12   : > { %v2822_v1 = vld [vmem:[%s3126_s19 + $0x38] sm:$0xff]  ;;  %600 = vmatpush.bf16.xpose.msra.mxu0 %v2798_v0  ;;  %v2821_v3 = vld [vmem:[%s3126_s19 + $0x30] sm:$0xff]  ;;  %v2820_v5 = vld [vmem:[%s3126_s19 + $0x28] sm:$0xff]  ;;  %v402_v0 = vlaneseq }
  0x13   : > { %1411 = vmatpush.bf16.xpose.msra.mxu2 %v2822_v1  ;;  %v2795_v6 = vld [vmem:[%s3126_s19 + $0x20] sm:$0xff]  ;;  %v2794_v8 = vld [vmem:[%s3126_s19 + $0x18] sm:$0xff]  ;;  %v2793_v10 = vld [vmem:[%s3126_s19 + $0x10] sm:$0xff] }
  0x14   : > { %v2819_v7 = vld [vmem:[%s3126_s19 + $0x20] sm:$0xff]  ;;  %v2818_v9 = vld [vmem:[%s3126_s19 + $0x18] sm:$0xff]  ;;  %v2817_v11 = vld [vmem:[%s3126_s19 + $0x10] sm:$0xff]  ;;  %v3184_v1 = vshrl.u32 %v402_v0, 7 }
  0x15   : > { %v2792_v12 = vld [vmem:[%s3126_s19 + $0x8] sm:$0xff]  ;;  %v2791_v14 = vld [vmem:[%s3126_s19] sm:$0xff]  ;;  %v2591_v22 = vld [vmem:[%s3150_s23 + $0x10] sm:$0xf] }
  0x16   : > { %v2816_v13 = vld [vmem:[%s3126_s19 + $0x8] sm:$0xff]  ;;  %v2815_v15 = vld [vmem:[%s3126_s19] sm:$0xff]  ;;  %v2784_v23 = vld [vmem:[%s3150_s23 + $0x14] sm:$0xf0] }
  0x17   : > { %v2587_v16 = vld [vmem:[%s3150_s23] sm:$0xf]  ;;  %v2783_v17 = vld [vmem:[%s3150_s23 + $0x4] sm:$0xf0]  ;;  %v2683_v18 = vld [vmem:[%s3150_s23 + $0x4] sm:$0xf]  ;;  %v2592_v26 = vor.u32 %v2784_v23, %v2591_v22 }
  0x18   : > { %v2807_v19 = vld [vmem:[%s3150_s23 + $0x8] sm:$0xf0]  ;;  %v2588_v20 = vor.u32 %v2783_v17, %v2587_v16  ;;  %v2687_v24 = vld [vmem:[%s3150_s23 + $0x14] sm:$0xf]  ;;  %v2808_v25 = vld [vmem:[%s3150_s23 + $0x18] sm:$0xf0] }
  0x19   : > { %v2684_v21 = vor.u32 %v2807_v19, %v2683_v18  ;;  %v2688_v27 = vor.u32 %v2808_v25, %v2687_v24  ;;  %v2595_v28 = vld [vmem:[%s3150_s23 + $0x20] sm:$0xf]  ;;  %v2785_v29 = vld [vmem:[%s3150_s23 + $0x24] sm:$0xf0]  ;;  %v2691_v30 = vld [vmem:[%s3150_s23 + $0x24] sm:$0xf] }
  0x1a   : > { %601 = vmatpush.bf16.xpose.msra.mxu0 %v2797_v2  ;;  %v2809_v31 = vld [vmem:[%s3150_s23 + $0x28] sm:$0xf0]  ;;  %v2596_v32 = vor.u32 %v2785_v29, %v2595_v28  ;;  %v2599_v34 = vld [vmem:[%s3150_s23 + $0x30] sm:$0xf]  ;;  %v2786_v35 = vld [vmem:[%s3150_s23 + $0x34] sm:$0xf0] }
  0x1b   : > { %1412 = vmatpush.bf16.xpose.msra.mxu2 %v2821_v3  ;;  %v2692_v33 = vor.u32 %v2809_v31, %v2691_v30  ;;  %v2695_v36 = vld [vmem:[%s3150_s23 + $0x34] sm:$0xf]  ;;  %v2810_v37 = vld [vmem:[%s3150_s23 + $0x38] sm:$0xf0]  ;;  %v2600_v38 = vor.u32 %v2786_v35, %v2599_v34  ;;  %v2603_v40 = vld [vmem:[%s3150_s23 + $0x40] sm:$0xf] }
  0x1c   : > { %v2696_v39 = vor.u32 %v2810_v37, %v2695_v36  ;;  %v2787_v41 = vld [vmem:[%s3150_s23 + $0x44] sm:$0xf0]  ;;  %v2699_v42 = vld [vmem:[%s3150_s23 + $0x44] sm:$0xf]  ;;  %v2811_v43 = vld [vmem:[%s3150_s23 + $0x48] sm:$0xf0] }
  0x1d   : > { %v2604_v44 = vor.u32 %v2787_v41, %v2603_v40  ;;  %v2700_v45 = vor.u32 %v2811_v43, %v2699_v42  ;;  %v2607_v46 = vld [vmem:[%s3150_s23 + $0x50] sm:$0xf]  ;;  %v2788_v47 = vld [vmem:[%s3150_s23 + $0x54] sm:$0xf0]  ;;  %v2703_v48 = vld [vmem:[%s3150_s23 + $0x54] sm:$0xf] }
  0x1e   : > { %v2812_v49 = vld [vmem:[%s3150_s23 + $0x58] sm:$0xf0]  ;;  %v2608_v50 = vor.u32 %v2788_v47, %v2607_v46  ;;  %v2611_v52 = vld [vmem:[%s3150_s23 + $0x60] sm:$0xf]  ;;  %v2789_v53 = vld [vmem:[%s3150_s23 + $0x64] sm:$0xf0] }
  0x1f   : > { %v2704_v51 = vor.u32 %v2812_v49, %v2703_v48  ;;  %v2707_v54 = vld [vmem:[%s3150_s23 + $0x64] sm:$0xf]  ;;  %v2813_v55 = vld [vmem:[%s3150_s23 + $0x68] sm:$0xf0]  ;;  %v2612_v56 = vor.u32 %v2789_v53, %v2611_v52  ;;  %v2615_v58 = vld [vmem:[%s3150_s23 + $0x70] sm:$0xf] }
  0x20   : > { %v2708_v57 = vor.u32 %v2813_v55, %v2707_v54  ;;  %v2790_v59 = vld [vmem:[%s3150_s23 + $0x74] sm:$0xf0]  ;;  %v2711_v60 = vld [vmem:[%s3150_s23 + $0x74] sm:$0xf]  ;;  %v2814_v61 = vld [vmem:[%s3150_s23 + $0x78] sm:$0xf0] }
  0x21   : > { %v2616_v62 = vor.u32 %v2790_v59, %v2615_v58  ;;  %v2712_v63 = vor.u32 %v2814_v61, %v2711_v60  ;;  %v3186_v2 = vand.u32 127, %v402_v0  ;;  %v406_v18 = vadd.s32 24, %v3184_v1 }
  0x22   : > { %602 = vmatpush.bf16.xpose.msra.mxu0 %v2796_v4  ;;  %v407_v19 = vadd.s32 32, %v3184_v1  ;;  %v408_v28 = vadd.s32 40, %v3184_v1  ;;  %v409_v29 = vadd.s32 48, %v3184_v1  ;;  %v410_v35 = vadd.s32 56, %v3184_v1 }
  0x23   : > { %1413 = vmatpush.bf16.xpose.msra.mxu2 %v2820_v5  ;;  %vm440_vm0 = vcmp.le.s32.totalorder %v3186_v2, %v3184_v1  ;;  %vm443_vm3 = vcmp.le.s32.totalorder %v3186_v2, %v406_v18  ;;  %v411_v41 = vadd.s32 64, %v3184_v1  ;;  %v3077_v55 = vmov -1e+30  }
  0x24   : > { %vm444_vm4 = vcmp.le.s32.totalorder %v3186_v2, %v407_v19  ;;  %vm445_vm5 = vcmp.le.s32.totalorder %v3186_v2, %v408_v28  ;;  %vm446_vm6 = vcmp.le.s32.totalorder %v3186_v2, %v409_v29  ;;  %vm447_vm7 = vcmp.le.s32.totalorder %v3186_v2, %v410_v35  ;;  %301 = vst.msk [vmem:[#allocation2] sm:$0xff] %vm300_vm11, %v3077_v55 }
  0x25   : > { %vm448_vm8 = vcmp.le.s32.totalorder %v3186_v2, %v411_v41  ;;  %302 = vst.msk [vmem:[#allocation2 + $0x8] sm:$0xff] %vm300_vm11, %v3077_v55  ;;  %v414_v59 = vadd.s32 88, %v3184_v1  ;;  %v415_v60 = vadd.s32 96, %v3184_v1 }
  0x26   : > { %303 = vst.msk [vmem:[#allocation2 + $0x10] sm:$0xff] %vm300_vm11, %v3077_v55 }
  0x27   : > { %304 = vst.msk [vmem:[#allocation2 + $0x18] sm:$0xff] %vm300_vm11, %v3077_v55  ;;  %vm451_vm12 = vcmp.le.s32.totalorder %v3186_v2, %v414_v59  ;;  %vm452_vm13 = vcmp.le.s32.totalorder %v3186_v2, %v415_v60 }
  0x28   : > { %305 = vst.msk [vmem:[#allocation2 + $0x20] sm:$0xff] %vm300_vm11, %v3077_v55 }
  0x29   : > { %306 = vst.msk [vmem:[#allocation2 + $0x28] sm:$0xff] %vm300_vm11, %v3077_v55 }
  0x2a   : > { %603 = vmatpush.bf16.xpose.msra.mxu0 %v2795_v6  ;;  %307 = vst.msk [vmem:[#allocation2 + $0x30] sm:$0xff] %vm300_vm11, %v3077_v55 }
  0x2b   : > { %1414 = vmatpush.bf16.xpose.msra.mxu2 %v2819_v7  ;;  %308 = vst.msk [vmem:[#allocation2 + $0x38] sm:$0xff] %vm300_vm11, %v3077_v55 }
  0x2c   : > { %309 = vst.msk [vmem:[#allocation2 + $0x40] sm:$0xff] %vm300_vm11, %v3077_v55 }
  0x2d   : > { %310 = vst.msk [vmem:[#allocation2 + $0x48] sm:$0xff] %vm300_vm11, %v3077_v55 }
  0x2e   : > { %311 = vst.msk [vmem:[#allocation2 + $0x50] sm:$0xff] %vm300_vm11, %v3077_v55 }
  0x2f   : > { %312 = vst.msk [vmem:[#allocation2 + $0x58] sm:$0xff] %vm300_vm11, %v3077_v55 }
  0x30   : > { %313 = vst.msk [vmem:[#allocation2 + $0x60] sm:$0xff] %vm300_vm11, %v3077_v55 }
  0x31   : > { %314 = vst.msk [vmem:[#allocation2 + $0x68] sm:$0xff] %vm300_vm11, %v3077_v55 }
  0x32   : > { %604 = vmatpush.bf16.xpose.msra.mxu0 %v2794_v8  ;;  %v404_v8 = vadd.s32 8, %v3184_v1  ;;  %315 = vst.msk [vmem:[#allocation2 + $0x70] sm:$0xff] %vm300_vm11, %v3077_v55 }
  0x33   : > { %1415 = vmatpush.bf16.xpose.msra.mxu2 %v2818_v9  ;;  %v405_v9 = vadd.s32 16, %v3184_v1  ;;  %316 = vst.msk [vmem:[#allocation2 + $0x78] sm:$0xff] %vm300_vm11, %v3077_v55 }
  0x34   : > { %vm441_vm1 = vcmp.le.s32.totalorder %v3186_v2, %v404_v8  ;;  %317 = vst.msk [vmem:[#allocation2 + $0x80] sm:$0xff] %vm300_vm11, %v3077_v55 }
  0x35   : > { %vm442_vm2 = vcmp.le.s32.totalorder %v3186_v2, %v405_v9  ;;  %318 = vst.msk [vmem:[#allocation2 + $0x88] sm:$0xff] %vm300_vm11, %v3077_v55 }
  0x36   : > { %319 = vst.msk [vmem:[#allocation2 + $0x90] sm:$0xff] %vm300_vm11, %v3077_v55 }
  0x37   : > { %320 = vst.msk [vmem:[#allocation2 + $0x98] sm:$0xff] %vm300_vm11, %v3077_v55 }
  0x38   : > { %321 = vst.msk [vmem:[#allocation2 + $0xa0] sm:$0xff] %vm300_vm11, %v3077_v55 }
  0x39   : > { %322 = vst.msk [vmem:[#allocation2 + $0xa8] sm:$0xff] %vm300_vm11, %v3077_v55 }
  0x3a   : > { %605 = vmatpush.bf16.xpose.msra.mxu0 %v2793_v10  ;;  %323 = vst.msk [vmem:[#allocation2 + $0xb0] sm:$0xff] %vm300_vm11, %v3077_v55 }
  0x3b   : > { %1416 = vmatpush.bf16.xpose.msra.mxu2 %v2817_v11  ;;  %324 = vst.msk [vmem:[#allocation2 + $0xb8] sm:$0xff] %vm300_vm11, %v3077_v55 }
  0x3c   : > { %325 = vst.msk [vmem:[#allocation2 + $0xc0] sm:$0xff] %vm300_vm11, %v3077_v55 }
  0x3d   : > { %326 = vst.msk [vmem:[#allocation2 + $0xc8] sm:$0xff] %vm300_vm11, %v3077_v55  ;;  %v1479_v60 = vld [vmem:[#allocation2 + $0x90] sm:$0xff] }
  0x3e   : > { %327 = vst.msk [vmem:[#allocation2 + $0xd0] sm:$0xff] %vm300_vm11, %v3077_v55 }
  0x3f   : > { %328 = vst.msk [vmem:[#allocation2 + $0xd8] sm:$0xff] %vm300_vm11, %v3077_v55 }
  0x40   : > { %329 = vst.msk [vmem:[#allocation2 + $0xe0] sm:$0xff] %vm300_vm11, %v3077_v55 }
  0x41   : > { %330 = vst.msk [vmem:[#allocation2 + $0xe8] sm:$0xff] %vm300_vm11, %v3077_v55 }
  0x42   : > { %606 = vmatpush.bf16.xpose.msra.mxu0 %v2792_v12  ;;  %331 = vst.msk [vmem:[#allocation2 + $0xf0] sm:$0xff] %vm300_vm11, %v3077_v55 }
  0x43   : > { %1417 = vmatpush.bf16.xpose.msra.mxu2 %v2816_v13  ;;  %332 = vst.msk [vmem:[#allocation2 + $0xf8] sm:$0xff] %vm300_vm11, %v3077_v55 }
  0x4a   : > { %607 = vmatpush.bf16.xpose.msra.mxu0 %v2791_v14 }
  0x4b   : > { %1418 = vmatpush.bf16.xpose.msra.mxu2 %v2815_v15 }
  0x51   : > { %608 = vmatmul.bf16.vlgmr.msra.gmra.mxu0 %v2588_v20 }
  0x52   : > { %1419 = vmatmul.bf16.vlgmr.msra.gmra.mxu2 %v2684_v21 }
  0x61   : > { %613 = vmatmul.bf16.gmra.mxu0 %v2592_v26 }
  0x62   : > { %1424 = vmatmul.bf16.gmra.mxu2 %v2688_v27 }
  0x71   : > { %618 = vmatmul.bf16.gmra.mxu0 %v2596_v32 }
  0x72   : > { %1429 = vmatmul.bf16.gmra.mxu2 %v2692_v33 }
  0x81   : > { %623 = vmatmul.bf16.gmra.mxu0 %v2600_v38 }
  0x82   : > { %1434 = vmatmul.bf16.gmra.mxu2 %v2696_v39 }
  0x91   : > { %628 = vmatmul.bf16.gmra.mxu0 %v2604_v44  ;;  %v412_v44 = vadd.s32 72, %v3184_v1 }
  0x92   : > { %1439 = vmatmul.bf16.gmra.mxu2 %v2700_v45 }
  0x93   : > { %vm449_vm9 = vcmp.le.s32.totalorder %v3186_v2, %v412_v44 }
  0xa1   : > { %633 = vmatmul.bf16.gmra.mxu0 %v2608_v50  ;;  %v413_v50 = vadd.s32 80, %v3184_v1 }
  0xa2   : > { %1444 = vmatmul.bf16.gmra.mxu2 %v2704_v51 }
  0xa3   : > { %vm450_vm10 = vcmp.le.s32.totalorder %v3186_v2, %v413_v50  ;;  %v666_v50 = vld [vmem:[#allocation2 + $0x8] sm:$0xff] }
  0xb1   : > { %638 = vmatmul.bf16.gmra.mxu0 %v2612_v56 }
  0xb2   : > { %1449 = vmatmul.bf16.gmra.mxu2 %v2708_v57 }
  0xc1   : > { %643 = vmatmul.bf16.gmra.mxu0 %v2616_v62 }
  0xc2   : > { %1454 = vmatmul.bf16.gmra.mxu2 %v2712_v63 }
  0xce   : > { %v609_v3 = vpop.f32.mrf.mxu0 }
  0xcf   : > { %v3190_v4 = vsel %vm440_vm0, %v609_v3, -1e+30 }
  0xd0   : > { %681 = vmax.xlane.f32.xlu0 %v3190_v4 }
  0xd5   : > { %v1420_v5 = vpop.f32.mrf.mxu2 }
  0xd6   : > { %v611_v6 = vpop.f32.mrf.mxu0  ;;  %v3193_v7 = vsel %vm440_vm0, %v1420_v5, -1e+30  ;;  %v416_v5 = vadd.s32 104, %v3184_v1 }
  0xd7   : > { %v3203_v13 = vsel %vm441_vm1, %v611_v6, -1e+30  ;;  %v3078_v6 = vmov 0  }
  0xd8   : > { %1493 = vmax.xlane.f32.xlu0 %v3193_v7  ;;  %2858 = vset.pattern.permute.xlu1 %v3078_v6  ;;  %vm453_vm14 = vcmp.le.s32.totalorder %v3186_v2, %v416_v5 }
  0xd9   : > { %2859 = vset.pattern.permute.xlu2 %v3078_v6  ;;  %2860 = vset.pattern.permute.xlu0 %v3078_v6  ;;  %v3479_v6 = vld [vmem:[#allocation2 + $0x98] sm:$0xff] }
  0xdd   : > { %v1422_v10 = vpop.f32.mrf.mxu2 }
  0xde   : > { %v3200_v11 = vsel %vm441_vm1, %v1422_v10, -1e+30  ;;  %v614_v12 = vpop.f32.mrf.mxu0 }
  0xdf   : > { %1495 = vmax.xlane.f32.xlu2 %v3200_v11  ;;  %v3205_v14 = vsel %vm442_vm2, %v614_v12, -1e+30 }
  0xe0   : > { %683 = vmax.xlane.f32.xlu0 %v3203_v13  ;;  %685 = vmax.xlane.f32.xlu1 %v3205_v14 }
  0xe5   : > { %v1425_v15 = vpop.f32.mrf.mxu2 }
  0xe6   : > { %v616_v16 = vpop.f32.mrf.mxu0  ;;  %v3209_v17 = vsel %vm442_vm2, %v1425_v15, -1e+30 }
  0xe7   : > { %v3219_v23 = vsel %vm443_vm3, %v616_v16, -1e+30  ;;  %v3364_v16 = vadd.s32 112, %v3184_v1 }
  0xe8   : > { %1497 = vmax.xlane.f32.xlu1 %v3209_v17 }
  0xe9   : > { %vm454_vm15 = vcmp.le.s32.totalorder %v3186_v2, %v3364_v16  ;;  %v3576_v16 = vld [vmem:[#allocation2 + $0xb8] sm:$0xff] }
  0xed   : > { %v1427_v20 = vpop.f32.mrf.mxu2 }
  0xee   : > { %v3216_v21 = vsel %vm443_vm3, %v1427_v20, -1e+30  ;;  %v619_v22 = vpop.f32.mrf.mxu0  ;;  %v3079_v20 = vmov 0.0  }
  0xef   : > { %1499 = vmax.xlane.f32.xlu0 %v3216_v21  ;;  %v3221_v24 = vsel %vm444_vm4, %v619_v22, -1e+30  ;;  %349 = vst.msk [vmem:[#allocation3 + $0x80] sm:$0xff] %vm300_vm11, %v3079_v20  ;;  %v418_v22 = vadd.s32 120, %v3184_v1 }
  0xf0   : > { %687 = vmax.xlane.f32.xlu1 %v3219_v23  ;;  %689 = vmax.xlane.f32.xlu2 %v3221_v24  ;;  %333 = vst.msk [vmem:[#allocation3] sm:$0xff] %vm300_vm11, %v3079_v20 }
  0xf1   : > { %334 = vst.msk [vmem:[#allocation3 + $0x8] sm:$0xff] %vm300_vm11, %v3079_v20  ;;  %vm455_vm0 = vcmp.le.s32.totalorder %v3186_v2, %v418_v22 }
  0xf2   : > { %335 = vst.msk [vmem:[#allocation3 + $0x10] sm:$0xff] %vm300_vm11, %v3079_v20 }
  0xf3   : > { %336 = vst.msk [vmem:[#allocation3 + $0x18] sm:$0xff] %vm300_vm11, %v3079_v20 }
  0xf4   : > { %337 = vst.msk [vmem:[#allocation3 + $0x20] sm:$0xff] %vm300_vm11, %v3079_v20 }
  0xf5   : > { %v1430_v25 = vpop.f32.mrf.mxu2  ;;  %338 = vst.msk [vmem:[#allocation3 + $0x28] sm:$0xff] %vm300_vm11, %v3079_v20 }
  0xf6   : > { %v621_v26 = vpop.f32.mrf.mxu0  ;;  %v3225_v27 = vsel %vm444_vm4, %v1430_v25, -1e+30  ;;  %v3382_v25 = vld [vmem:[#allocation2] sm:$0xff]  ;;  %339 = vst.msk [vmem:[#allocation3 + $0x30] sm:$0xff] %vm300_vm11, %v3079_v20 }
  0xf7   : > { %v3235_v33 = vsel %vm445_vm5, %v621_v26, -1e+30  ;;  %340 = vst.msk [vmem:[#allocation3 + $0x38] sm:$0xff] %vm300_vm11, %v3079_v20 }
  0xf8   : > { %1501 = vmax.xlane.f32.xlu2 %v3225_v27  ;;  %341 = vst.msk [vmem:[#allocation3 + $0x40] sm:$0xff] %vm300_vm11, %v3079_v20 }
  0xf9   : > { %342 = vst.msk [vmem:[#allocation3 + $0x48] sm:$0xff] %vm300_vm11, %v3079_v20 }
  0xfa   : > { %343 = vst.msk [vmem:[#allocation3 + $0x50] sm:$0xff] %vm300_vm11, %v3079_v20 }
  0xfb   : > { %344 = vst.msk [vmem:[#allocation3 + $0x58] sm:$0xff] %vm300_vm11, %v3079_v20 }
  0xfc   : > { %345 = vst.msk [vmem:[#allocation3 + $0x60] sm:$0xff] %vm300_vm11, %v3079_v20 }
  0xfd   : > { %v1432_v30 = vpop.f32.mrf.mxu2  ;;  %346 = vst.msk [vmem:[#allocation3 + $0x68] sm:$0xff] %vm300_vm11, %v3079_v20 }
  0xfe   : > { %v3232_v31 = vsel %vm445_vm5, %v1432_v30, -1e+30  ;;  %v624_v32 = vpop.f32.mrf.mxu0  ;;  %347 = vst.msk [vmem:[#allocation3 + $0x70] sm:$0xff] %vm300_vm11, %v3079_v20 }
  0xff   : > { %1503 = vmax.xlane.f32.xlu1 %v3232_v31  ;;  %v3237_v34 = vsel %vm446_vm6, %v624_v32, -1e+30  ;;  %348 = vst.msk [vmem:[#allocation3 + $0x78] sm:$0xff] %vm300_vm11, %v3079_v20 }
 0x100   : > { %691 = vmax.xlane.f32.xlu2 %v3235_v33  ;;  %693 = vmax.xlane.f32.xlu0 %v3237_v34  ;;  %350 = vst.msk [vmem:[#allocation3 + $0x88] sm:$0xff] %vm300_vm11, %v3079_v20 }
 0x101   : > { %351 = vst.msk [vmem:[#allocation3 + $0x90] sm:$0xff] %vm300_vm11, %v3079_v20 }
 0x102   : > { %352 = vst.msk [vmem:[#allocation3 + $0x98] sm:$0xff] %vm300_vm11, %v3079_v20 }
 0x103   : > { %353 = vst.msk [vmem:[#allocation3 + $0xa0] sm:$0xff] %vm300_vm11, %v3079_v20 }
 0x104   : > { %354 = vst.msk [vmem:[#allocation3 + $0xa8] sm:$0xff] %vm300_vm11, %v3079_v20 }
 0x105   : > { %v1435_v36 = vpop.f32.mrf.mxu2  ;;  %355 = vst.msk [vmem:[#allocation3 + $0xb0] sm:$0xff] %vm300_vm11, %v3079_v20 }
 0x106   : > { %v626_v37 = vpop.f32.mrf.mxu0  ;;  %v3243_v38 = vsel %vm446_vm6, %v1435_v36, -1e+30  ;;  %v3419_v36 = vld [vmem:[#allocation2 + $0x80] sm:$0xff]  ;;  %356 = vst.msk [vmem:[#allocation3 + $0xb8] sm:$0xff] %vm300_vm11, %v3079_v20 }
 0x107   : > { %v3245_v39 = vsel %vm447_vm7, %v626_v37, -1e+30  ;;  %357 = vst.msk [vmem:[#allocation3 + $0xc0] sm:$0xff] %vm300_vm11, %v3079_v20 }
 0x108   : > { %1505 = vmax.xlane.f32.xlu0 %v3243_v38  ;;  %695 = vmax.xlane.f32.xlu1 %v3245_v39  ;;  %358 = vst.msk [vmem:[#allocation3 + $0xc8] sm:$0xff] %vm300_vm11, %v3079_v20 }
 0x109   : > { %359 = vst.msk [vmem:[#allocation3 + $0xd0] sm:$0xff] %vm300_vm11, %v3079_v20 }
 0x10a   : > { %360 = vst.msk [vmem:[#allocation3 + $0xd8] sm:$0xff] %vm300_vm11, %v3079_v20 }
 0x10b   : > { %361 = vst.msk [vmem:[#allocation3 + $0xe0] sm:$0xff] %vm300_vm11, %v3079_v20 }
 0x10c   : > { %362 = vst.msk [vmem:[#allocation3 + $0xe8] sm:$0xff] %vm300_vm11, %v3079_v20 }
 0x10d   : > { %v1437_v40 = vpop.f32.mrf.mxu2  ;;  %363 = vst.msk [vmem:[#allocation3 + $0xf0] sm:$0xff] %vm300_vm11, %v3079_v20 }
 0x10e   : > { %v3250_v42 = vsel %vm447_vm7, %v1437_v40, -1e+30  ;;  %v629_v43 = vpop.f32.mrf.mxu0  ;;  %364 = vst.msk [vmem:[#allocation3 + $0xf8] sm:$0xff] %vm300_vm11, %v3079_v20 }
 0x10f   : > { %1507 = vmax.xlane.f32.xlu2 %v3250_v42  ;;  %v3255_v45 = vsel %vm448_vm8, %v629_v43, -1e+30 }
 0x115   : > { %v1440_v46 = vpop.f32.mrf.mxu2 }
 0x116   : > { %v3258_v47 = vsel %vm448_vm8, %v1440_v46, -1e+30  ;;  %v631_v48 = vpop.f32.mrf.mxu0  ;;  %v3442_v46 = vld [vmem:[#allocation2 + $0x88] sm:$0xff] }
 0x117   : > { %1509 = vmax.xlane.f32.xlu1 %v3258_v47  ;;  %697 = vmax.xlane.f32.xlu2 %v3255_v45  ;;  %v3262_v49 = vsel %vm449_vm9, %v631_v48, -1e+30 }
 0x118   : > { %699 = vmax.xlane.f32.xlu0 %v3262_v49 }
 0x11d   : > { %v1442_v51 = vpop.f32.mrf.mxu2 }
 0x11e   : > { %v634_v52 = vpop.f32.mrf.mxu0  ;;  %v3267_v53 = vsel %vm449_vm9, %v1442_v51, -1e+30  ;;  %v667_v51 = vld [vmem:[#allocation2 + $0x10] sm:$0xff] }
 0x11f   : > { %v3269_v54 = vsel %vm450_vm10, %v634_v52, -1e+30 }
 0x120   : > { %1511 = vmax.xlane.f32.xlu0 %v3267_v53  ;;  %701 = vmax.xlane.f32.xlu1 %v3269_v54 }
 0x125   : > { %v1445_v56 = vpop.f32.mrf.mxu2 }
 0x126   : > { %v3285_v57 = vsel %vm450_vm10, %v1445_v56, -1e+30  ;;  %v636_v58 = vpop.f32.mrf.mxu0 }
 0x127   : > { %4320 = vst [vmem:[#allocation5_spill] sm:$0xff] %v3285_v57  ;;  %1513 = vmax.xlane.f32.xlu2 %v3285_v57  ;;  %v3310_v63 = vsel %vm451_vm12, %v636_v58, -1e+30 }
 0x12d   : > { %v1447_v61 = vpop.f32.mrf.mxu2 }
 0x12e   : > { %v3308_v62 = vsel %vm451_vm12, %v1447_v61, -1e+30  ;;  %v639_v0 = vpop.f32.mrf.mxu0 }
 0x12f   : > { %4321 = vst [vmem:[#allocation6_spill] sm:$0xff] %v3308_v62  ;;  %1515 = vmax.xlane.f32.xlu1 %v3308_v62  ;;  %703 = vmax.xlane.f32.xlu2 %v3310_v63  ;;  %v3320_v3 = vsel %vm452_vm13, %v639_v0, -1e+30 }
 0x130   : > { %4322 = vst [vmem:[#allocation7_spill] sm:$0xff] %v3320_v3  ;;  %705 = vmax.xlane.f32.xlu0 %v3320_v3  ;;  %v2803_v3 = vld [vmem:[%s3639_s26 + $0x20] sm:$0xff] }
 0x135   : > { %v1450_v8 = vpop.f32.mrf.mxu2 }
 0x136   : > { %v641_v9 = vpop.f32.mrf.mxu0  ;;  %v3343_v10 = vsel %vm452_vm13, %v1450_v8, -1e+30 }
 0x137   : > { %4323 = vst [vmem:[#allocation8_spill] sm:$0xff] %v3343_v10  ;;  %v3347_v12 = vsel %vm453_vm14, %v641_v9, -1e+30  ;;  %v3485_v9 = vld [vmem:[#allocation2 + $0x18] sm:$0xff] }
 0x138   : > { %4324 = vst [vmem:[#allocation9_spill] sm:$0xff] %v3347_v12  ;;  %1517 = vmax.xlane.f32.xlu0 %v3343_v10  ;;  %707 = vmax.xlane.f32.xlu1 %v3347_v12  ;;  %v2805_v10 = vld [vmem:[%s3639_s26 + $0x30] sm:$0xff] }
 0x13d   : > { %v1452_v15 = vpop.f32.mrf.mxu2 }
 0x13e   : > { %v3368_v18 = vsel %vm453_vm14, %v1452_v15, -1e+30  ;;  %v644_v19 = vpop.f32.mrf.mxu0  ;;  %v3487_v15 = vld [vmem:[#allocation2 + $0x20] sm:$0xff] }
 0x13f   : > { %4325 = vst [vmem:[#allocation10_spill] sm:$0xff] %v3368_v18  ;;  %1519 = vmax.xlane.f32.xlu2 %v3368_v18  ;;  %v3391_v28 = vsel %vm454_vm15, %v644_v19, -1e+30 }
 0x140   : > { %4326 = vst [vmem:[#allocation11_spill] sm:$0xff] %v3391_v28 }
 0x143   : > { %v682_v26 = vpop.xlane.xlu0 %681 }
 0x144   : > { %v3396_v1 = vmax.f32 %v3382_v25, %v682_v26 }
 0x145   : > { %v3398_v29 = vpop.f32.mrf.mxu2 }
 0x146   : > { %1251 = vst.msk [vmem:[#allocation2] sm:$0xff] %vm300_vm11, %v3396_v1  ;;  %v646_v32 = vpop.f32.mrf.mxu0 }
 0x147   : > { %709 = vmax.xlane.f32.xlu2 %v3391_v28  ;;  %v3412_v35 = vsel %vm455_vm0, %v646_v32, -1e+30  ;;  %v3596_v28 = vld [vmem:[#allocation2 + $0x48] sm:$0xff] }
 0x148   : > { %4327 = vst [vmem:[#allocation12_spill] sm:$0xff] %v3412_v35  ;;  %711 = vmax.xlane.f32.xlu0 %v3412_v35 }
 0x14b   : > { %v1494_v37 = vpop.xlane.xlu0 %1493 }
 0x14c   : > { %v3428_v40 = vmax.f32 %v3419_v36, %v1494_v37 }
 0x14d   : > { %v1457_v41 = vpop.f32.mrf.mxu2 }
 0x14e   : > { %v3434_v43 = vsel %vm455_vm0, %v1457_v41, -1e+30  ;;  %2064 = vst.msk [vmem:[#allocation2 + $0x80] sm:$0xff] %vm300_vm11, %v3428_v40 }
 0x14f   : > { %4328 = vst [vmem:[#allocation13_spill] sm:$0xff] %v3434_v43 }
 0x150   : > { %1523 = vmax.xlane.f32.xlu0 %v3434_v43 }
 0x151   : > { %779 = vperm.xlu1 %2858, %v3396_v1  }
 0x152   : > { %v1496_v48 = vpop.xlane.xlu2 %1495 }
 0x153   : > { %v3453_v52 = vmax.f32 %v3442_v46, %v1496_v48  ;;  %v684_v55 = vpop.xlane.xlu0 %683  ;;  %v686_v56 = vpop.xlane.xlu1 %685 }
 0x154   : > { %v714_v58 = vmax.f32 %v666_v50, %v684_v55  ;;  %v715_v59 = vmax.f32 %v667_v51, %v686_v56  ;;  %v3514_v56 = vld [vmem:[#allocation2 + $0xa0] sm:$0xff] }
 0x155   : > { %2065 = vst.msk [vmem:[#allocation2 + $0x88] sm:$0xff] %vm300_vm11, %v3453_v52 }
 0x156   : > { %1252 = vst.msk [vmem:[#allocation2 + $0x8] sm:$0xff] %vm300_vm11, %v714_v58  ;;  %v730_v5 = vsub.f32 %v666_v50, %v714_v58  ;;  %v731_v48 = vsub.f32 %v667_v51, %v715_v59 }
 0x157   : > { %1253 = vst.msk [vmem:[#allocation2 + $0x10] sm:$0xff] %vm300_vm11, %v715_v59 }
 0x158   : > { %v747_v22 = vmul.f32 1.442695, %v730_v5  ;;  %v749_v55 = vmul.f32 1.442695, %v731_v48  ;;  %v3530_v48 = vld [vmem:[#allocation2 + $0x30] sm:$0xff] }
 0x15a   : > { %2861 = vpow2.f32 %v747_v22 }
 0x15b   : > { %v1498_v61 = vpop.xlane.xlu1 %1497  ;;  %2863 = vpow2.f32 %v749_v55 }
 0x15c   : > { %v1527_v0 = vmax.f32 %v1479_v60, %v1498_v61 }
 0x15e   : > { %2066 = vst.msk [vmem:[#allocation2 + $0x90] sm:$0xff] %vm300_vm11, %v1527_v0 }
 0x15f   : > { %1591 = vperm.xlu2 %2859, %v3428_v40  }
 0x160   : > { %v3519_v20 = vpop.eup %2861 }
 0x161   : > { %4329 = vst [vmem:[#allocation14_spill] sm:$0xff] %v3519_v20 }
 0x162   : > { %v1500_v8 = vpop.xlane.xlu0 %1499 }
 0x163   : > { %v3492_v19 = vmax.f32 %v3479_v6, %v1500_v8  ;;  %v688_v26 = vpop.xlane.xlu1 %687  ;;  %v690_v32 = vpop.xlane.xlu2 %689  ;;  %v3528_v8 = vld [vmem:[#allocation2 + $0xa8] sm:$0xff] }
 0x164   : > { %v3501_v37 = vmax.f32 %v3485_v9, %v688_v26  ;;  %v3504_v41 = vmax.f32 %v3487_v15, %v690_v32  ;;  %789 = vperm.xlu0 %2860, %v715_v59   ;;  %v1543_v59 = vsub.f32 %v1479_v60, %v1527_v0  ;;  %v670_v32 = vld [vmem:[#allocation2 + $0x28] sm:$0xff] }
 0x165   : > { %2067 = vst.msk [vmem:[#allocation2 + $0x98] sm:$0xff] %vm300_vm11, %v3492_v19  ;;  %v1544_v2 = vsub.f32 %v3479_v6, %v3492_v19 }
 0x166   : > { %1254 = vst.msk [vmem:[#allocation2 + $0x18] sm:$0xff] %vm300_vm11, %v3501_v37  ;;  %v1561_v22 = vmul.f32 1.442695, %v1543_v59  ;;  %v3547_v59 = vld [vmem:[#allocation2 + $0xb0] sm:$0xff]  ;;  %v733_v6 = vsub.f32 %v3487_v15, %v3504_v41 }
 0x167   : > { %784 = vperm.xlu2 %2859, %v714_v58   ;;  %1255 = vst.msk [vmem:[#allocation2 + $0x20] sm:$0xff] %vm300_vm11, %v3504_v41  ;;  %v1542_v58 = vsub.f32 %v3442_v46, %v3453_v52 }
 0x168   : > { %2865 = vpow2.f32 %v1561_v22 }
 0x169   : > { %v1559_v55 = vmul.f32 1.442695, %v1542_v58  ;;  %v3549_v58 = vld [vmem:[#allocation2 + $0x38] sm:$0xff] }
 0x16b   : > { %v1502_v61 = vpop.xlane.xlu2 %1501  ;;  %2867 = vpow2.f32 %v1559_v55 }
 0x16c   : > { %v3517_v51 = vmax.f32 %v3514_v56, %v1502_v61  ;;  %1601 = vperm.xlu0 %2860, %v1527_v0   ;;  %v3535_v0 = vpop.eup %2863 }
 0x16d   : > { %4330 = vst [vmem:[#allocation15_spill] sm:$0xff] %v3535_v0 }
 0x16e   : > { %2068 = vst.msk [vmem:[#allocation2 + $0xa0] sm:$0xff] %vm300_vm11, %v3517_v51 }
 0x16f   : > { %1025 = vperm.xlu2 %2859, %v3519_v20   ;;  %v3591_v20 = vld [vmem:[#allocation2 + $0x40] sm:$0xff] }
 0x172   : > { %v1504_v26 = vpop.xlane.xlu1 %1503 }
 0x173   : > { %v3533_v60 = vmax.f32 %v3528_v8, %v1504_v26  ;;  %v692_v61 = vpop.xlane.xlu2 %691  ;;  %v694_v5 = vpop.xlane.xlu0 %693 }
 0x174   : > { %v718_v50 = vmax.f32 %v670_v32, %v692_v61  ;;  %v3540_v46 = vmax.f32 %v3530_v48, %v694_v5  ;;  %1030 = vperm.xlu0 %2860, %v3535_v0   ;;  %v3555_v5 = vsel %vm454_vm15, %v3398_v29, -1e+30  ;;  %v3557_v26 = vpop.eup %2865  ;;  %v1563_v29 = vmul.f32 1.442695, %v1544_v2  ;;  %v3589_v2 = vld [vmem:[#allocation2 + $0xc0] sm:$0xff] }
 0x175   : > { %2069 = vst.msk [vmem:[#allocation2 + $0xa8] sm:$0xff] %vm300_vm11, %v3533_v60  ;;  %v3567_v30 = vpop.eup %2867  ;;  %v753_v0 = vmul.f32 1.442695, %v733_v6 }
 0x176   : > { %1256 = vst.msk [vmem:[#allocation2 + $0x28] sm:$0xff] %vm300_vm11, %v718_v50  ;;  %2869 = vpow2.f32 %v1563_v29 }
 0x177   : > { %794 = vperm.xlu2 %2859, %v3501_v37   ;;  %1257 = vst.msk [vmem:[#allocation2 + $0x30] sm:$0xff] %vm300_vm11, %v3540_v46 }
 0x178   : > { %4331 = vst [vmem:[#allocation16_spill] sm:$0xff] %v3555_v5 }
 0x179   : > { %4332 = vst [vmem:[#allocation17_spill] sm:$0xff] %v3557_v26 }
 0x17a   : > { %4333 = vst [vmem:[#allocation18_spill] sm:$0xff] %v3567_v30 }
 0x17b   : > { %v1506_v22 = vpop.xlane.xlu0 %1505  ;;  %v696_v61 = vpop.xlane.xlu1 %695  ;;  %1521 = vmax.xlane.f32.xlu1 %v3555_v5 }
 0x17c   : > { %v3561_v55 = vmax.f32 %v3547_v59, %v1506_v22  ;;  %v3564_v44 = vmax.f32 %v3549_v58, %v696_v61  ;;  %1843 = vperm.xlu0 %2860, %v3557_v26  }
 0x17e   : > { %2070 = vst.msk [vmem:[#allocation2 + $0xb0] sm:$0xff] %vm300_vm11, %v3561_v55 }
 0x17f   : > { %1838 = vperm.xlu2 %2859, %v3567_v30   ;;  %1258 = vst.msk [vmem:[#allocation2 + $0x38] sm:$0xff] %vm300_vm11, %v3564_v44  ;;  %v734_v30 = vsub.f32 %v670_v32, %v718_v50 }
 0x181   : > { %v755_v32 = vmul.f32 1.442695, %v734_v30  ;;  %v3618_v30 = vld [vmem:[#allocation2 + $0xc8] sm:$0xff] }
 0x182   : > { %v1508_v22 = vpop.xlane.xlu2 %1507 }
 0x183   : > { %v3579_v61 = vmax.f32 %v3576_v16, %v1508_v22  ;;  %v4334_v22 = vsub.f32 %v3382_v25, %v3396_v1  ;;  %v4339_v1 = vsub.f32 %v3419_v36, %v3428_v40  ;;  %v736_v36 = vsub.f32 %v3549_v58, %v3564_v44 }
 0x184   : > { %1611 = vperm.xlu0 %2860, %v3517_v51   ;;  %v1546_v40 = vsub.f32 %v3528_v8, %v3533_v60 }
 0x185   : > { %2071 = vst.msk [vmem:[#allocation2 + $0xb8] sm:$0xff] %vm300_vm11, %v3579_v61  ;;  %v745_v26 = vmul.f32 1.442695, %v4334_v22 }
 0x187   : > { %1606 = vperm.xlu2 %2859, %v3492_v19   ;;  %v3604_v19 = vpop.eup %2869  ;;  %2871 = vpow2.f32 %v745_v26 }
 0x188   : > { %4335 = vst [vmem:[#allocation19_spill] sm:$0xff] %v3604_v19  ;;  %2873 = vpow2.f32 %v753_v0 }
 0x189   : > { %2875 = vpow2.f32 %v755_v32  ;;  %v1547_v32 = vsub.f32 %v3547_v59, %v3561_v55 }
 0x18a   : > { %v1510_v43 = vpop.xlane.xlu1 %1509  ;;  %v698_v5 = vpop.xlane.xlu2 %697 }
 0x18b   : > { %v3599_v29 = vmax.f32 %v3589_v2, %v1510_v43  ;;  %v3602_v15 = vmax.f32 %v3591_v20, %v698_v5  ;;  %v700_v35 = vpop.xlane.xlu0 %699  ;;  %v3620_v43 = vld [vmem:[#allocation2 + $0x50] sm:$0xff] }
 0x18c   : > { %v3609_v25 = vmax.f32 %v3596_v28, %v700_v35  ;;  %1848 = vperm.xlu0 %2860, %v3604_v19   ;;  %v1569_v19 = vmul.f32 1.442695, %v1547_v32  ;;  %v759_v32 = vmul.f32 1.442695, %v736_v36 }
 0x18d   : > { %2072 = vst.msk [vmem:[#allocation2 + $0xc0] sm:$0xff] %vm300_vm11, %v3599_v29  ;;  %v3622_v35 = vpop.eup %2871 }
 0x18e   : > { %1259 = vst.msk [vmem:[#allocation2 + $0x40] sm:$0xff] %vm300_vm11, %v3602_v15  ;;  %v3624_v5 = vpop.eup %2873 }
 0x18f   : > { %1260 = vst.msk [vmem:[#allocation2 + $0x48] sm:$0xff] %vm300_vm11, %v3609_v25  ;;  %804 = vperm.xlu2 %2859, %v718_v50   ;;  %v3641_v22 = vpop.eup %2875 }
 0x190   : > { %4336 = vst [vmem:[#allocation20_spill] sm:$0xff] %v3622_v35 }
 0x191   : > { %4337 = vst [vmem:[#allocation21_spill] sm:$0xff] %v3624_v5 }
 0x192   : > { %4338 = vst [vmem:[#allocation22_spill] sm:$0xff] %v3641_v22 }
 0x193   : > { %v1512_v0 = vpop.xlane.xlu0 %1511  ;;  %v702_v26 = vpop.xlane.xlu1 %701 }
 0x194   : > { %v3627_v6 = vmax.f32 %v3618_v30, %v1512_v0  ;;  %1020 = vperm.xlu1 %2858, %v3622_v35   ;;  %1040 = vperm.xlu0 %2860, %v3624_v5   ;;  %v3632_v50 = vmax.f32 %v3620_v43, %v702_v26  ;;  %v3648_v0 = vld [vmem:[#allocation2 + $0xd0] sm:$0xff]  ;;  %v2806_v26 = vld [vmem:[%s3639_s26 + $0x38] sm:$0xff]  ;;  %v1557_v5 = vmul.f32 1.442695, %v4339_v1 }
 0x195   : > { %1170 = vmatpush.bf16.msra.mxu1 %v2806_v26  ;;  %v3671_v1 = vld [vmem:[#allocation2 + $0xd8] sm:$0xff] }
 0x196   : > { %2073 = vst.msk [vmem:[#allocation2 + $0xc8] sm:$0xff] %vm300_vm11, %v3627_v6  ;;  %2877 = vpow2.f32 %v1557_v5  ;;  %v2804_v5 = vld [vmem:[%s3639_s26 + $0x28] sm:$0xff] }
 0x197   : > { %1045 = vperm.xlu2 %2859, %v3641_v22   ;;  %1261 = vst.msk [vmem:[#allocation2 + $0x50] sm:$0xff] %vm300_vm11, %v3632_v50  ;;  %2879 = vpow2.f32 %v1569_v19  ;;  %v3676_v22 = vld [vmem:[#allocation2 + $0x60] sm:$0xff] }
 0x198   : > { %2881 = vpow2.f32 %v759_v32  ;;  %v4342_v32 = vsub.f32 %v3485_v9, %v3501_v37  ;;  %v2800_v37 = vld [vmem:[%s3639_s26 + $0x8] sm:$0xff] }
 0x199   : > { %1171 = vmatpush.bf16.msra.mxu1 %v2805_v10 }
 0x19a   : > { %v1514_v35 = vpop.xlane.xlu2 %1513 }
 0x19b   : > { %v3657_v59 = vmax.f32 %v3648_v0, %v1514_v35  ;;  %v3673_v35 = vld [vmem:[#allocation2 + $0x58] sm:$0xff] }
 0x19c   : > { %1596 = vperm.xlu1 %2858, %v3453_v52   ;;  %1626 = vperm.xlu0 %2860, %v3579_v61   ;;  %v3678_v19 = vpop.eup %2877 }
 0x19d   : > { %2074 = vst.msk [vmem:[#allocation2 + $0xd0] sm:$0xff] %vm300_vm11, %v3657_v59  ;;  %1172 = vmatpush.bf16.msra.mxu1 %v2804_v5  ;;  %v3686_v8 = vpop.eup %2879  ;;  %v2802_v5 = vld [vmem:[%s3639_s26 + $0x18] sm:$0xff] }
 0x19e   : > { %4340 = vst [vmem:[#allocation23_spill] sm:$0xff] %v3678_v19 }
 0x19f   : > { %1621 = vperm.xlu2 %2859, %v3561_v55   ;;  %4341 = vst [vmem:[#allocation24_spill] sm:$0xff] %v3686_v8  ;;  %v1567_v55 = vmul.f32 1.442695, %v1546_v40  ;;  %v3713_v40 = vpop.eup %2881 }
 0x1a0   : > { %4343 = vst [vmem:[#allocation25_spill] sm:$0xff] %v3713_v40 }
 0x1a1   : > { %1173 = vmatpush.bf16.msra.mxu1 %v2803_v3  ;;  %2883 = vpow2.f32 %v1567_v55  ;;  %v3711_v3 = vld [vmem:[#allocation2 + $0x68] sm:$0xff]  ;;  %v2801_v55 = vld [vmem:[%s3639_s26 + $0x10] sm:$0xff] }
 0x1a2   : > { %v1516_v52 = vpop.xlane.xlu1 %1515  ;;  %v704_v26 = vpop.xlane.xlu2 %703 }
 0x1a3   : > { %v3681_v10 = vmax.f32 %v3671_v1, %v1516_v52  ;;  %v3684_v58 = vmax.f32 %v3673_v35, %v704_v26  ;;  %v706_v18 = vpop.xlane.xlu0 %705  ;;  %v751_v52 = vmul.f32 1.442695, %v4342_v32  ;;  %v3709_v26 = vld [vmem:[#allocation2 + $0xe0] sm:$0xff] }
 0x1a4   : > { %v3692_v36 = vmax.f32 %v3676_v22, %v706_v18  ;;  %1833 = vperm.xlu1 %2858, %v3678_v19   ;;  %1863 = vperm.xlu0 %2860, %v3686_v8   ;;  %v737_v18 = vsub.f32 %v3591_v20, %v3602_v15 }
 0x1a5   : > { %2075 = vst.msk [vmem:[#allocation2 + $0xd8] sm:$0xff] %vm300_vm11, %v3681_v10  ;;  %1174 = vmatpush.bf16.msra.mxu1 %v2802_v5  ;;  %2885 = vpow2.f32 %v751_v52  ;;  %v2799_v5 = vld [vmem:[%s3639_s26] sm:$0xff]  ;;  %v3753_v52 = vld [vmem:[#allocation2 + $0x78] sm:$0xff] }
 0x1a6   : > { %1262 = vst.msk [vmem:[#allocation2 + $0x58] sm:$0xff] %vm300_vm11, %v3684_v58  ;;  %v761_v8 = vmul.f32 1.442695, %v737_v18 }
 0x1a7   : > { %1263 = vst.msk [vmem:[#allocation2 + $0x60] sm:$0xff] %vm300_vm11, %v3692_v36  ;;  %814 = vperm.xlu2 %2859, %v3564_v44   ;;  %v3724_v9 = vpop.eup %2883 }
 0x1a8   : > { %4344 = vst [vmem:[#allocation26_spill] sm:$0xff] %v3724_v9  ;;  %2887 = vpow2.f32 %v761_v8 }
 0x1a9   : > { %1175 = vmatpush.bf16.msra.mxu1 %v2801_v55  ;;  %v3751_v55 = vld [vmem:[#allocation2 + $0x70] sm:$0xff] }
 0x1ab   : > { %v1518_v19 = vpop.xlane.xlu0 %1517  ;;  %v708_v44 = vpop.xlane.xlu1 %707 }
 0x1ac   : > { %v3717_v12 = vmax.f32 %v3709_v26, %v1518_v19  ;;  %v3720_v20 = vmax.f32 %v3711_v3, %v708_v44  ;;  %799 = vperm.xlu1 %2858, %v3504_v41   ;;  %1055 = vperm.xlu0 %2860, %v3713_v40   ;;  %v3732_v19 = vld [vmem:[#allocation2 + $0xe8] sm:$0xff]  ;;  %v3738_v32 = vpop.eup %2885  ;;  %v1550_v44 = vsub.f32 %v3618_v30, %v3627_v6 }
 0x1ad   : > { %1176 = vmatpush.bf16.msra.mxu1 %v2800_v37  ;;  %4345 = vst [vmem:[#allocation27_spill] sm:$0xff] %v3738_v32  ;;  %v739_v30 = vsub.f32 %v3620_v43, %v3632_v50 }
 0x1ae   : > { %2076 = vst.msk [vmem:[#allocation2 + $0xe0] sm:$0xff] %vm300_vm11, %v3717_v12  ;;  %v3746_v8 = vpop.eup %2887  ;;  %v1575_v37 = vmul.f32 1.442695, %v1550_v44 }
 0x1af   : > { %1858 = vperm.xlu2 %2859, %v3724_v9   ;;  %1264 = vst.msk [vmem:[#allocation2 + $0x68] sm:$0xff] %vm300_vm11, %v3720_v20 }
 0x1b0   : > { %4346 = vst [vmem:[#allocation28_spill] sm:$0xff] %v3746_v8  ;;  %2889 = vpow2.f32 %v1575_v37 }
 0x1b1   : > { %1177 = vmatpush.bf16.msra.mxu1 %v2799_v5 }
 0x1b2   : > { %v1520_v18 = vpop.xlane.xlu2 %1519 }
 0x1b3   : > { %v3735_v41 = vmax.f32 %v3732_v19, %v1520_v18 }
 0x1b4   : > { %1035 = vperm.xlu1 %2858, %v3738_v32   ;;  %824 = vperm.xlu0 %2860, %v3609_v25  }
 0x1b5   : > { %2077 = vst.msk [vmem:[#allocation2 + $0xe8] sm:$0xff] %vm300_vm11, %v3735_v41 }
 0x1b6   : > { %v3781_v43 = vpop.eup %2889 }
 0x1b7   : > { %1060 = vperm.xlu2 %2859, %v3746_v8   ;;  %v3779_v8 = vld [vmem:[#allocation2 + $0xf8] sm:$0xff] }
 0x1ba   : > { %v710_v18 = vpop.xlane.xlu2 %709 }
 0x1bb   : > { %v3756_v9 = vmax.f32 %v3751_v55, %v710_v18  ;;  %v712_v40 = vpop.xlane.xlu0 %711  ;;  %v765_v18 = vmul.f32 1.442695, %v739_v30 }
 0x1bc   : > { %v3761_v32 = vmax.f32 %v3753_v52, %v712_v40  ;;  %1616 = vperm.xlu1 %2858, %v3533_v60   ;;  %1641 = vperm.xlu0 %2860, %v3657_v59   ;;  %v1549_v40 = vsub.f32 %v3589_v2, %v3599_v29  ;;  %v4347_v60 = vsub.f32 %v3514_v56, %v3517_v51 }
 0x1bd   : > { %1265 = vst.msk [vmem:[#allocation2 + $0x70] sm:$0xff] %vm300_vm11, %v3756_v9  ;;  %v740_v2 = vsub.f32 %v3673_v35, %v3684_v58 }
 0x1be   : > { %1266 = vst.msk [vmem:[#allocation2 + $0x78] sm:$0xff] %vm300_vm11, %v3761_v32  ;;  %v1565_v44 = vmul.f32 1.442695, %v4347_v60  ;;  %v1573_v5 = vmul.f32 1.442695, %v1549_v40 }
 0x1bf   : > { %1636 = vperm.xlu2 %2859, %v3627_v6   ;;  %v735_v6 = vsub.f32 %v3530_v48, %v3540_v46 }
 0x1c0   : > { %2891 = vpow2.f32 %v1565_v44  ;;  %v767_v44 = vmul.f32 1.442695, %v740_v2 }
 0x1c1   : > { %2893 = vpow2.f32 %v765_v18  ;;  %v757_v48 = vmul.f32 1.442695, %v735_v6  ;;  %v1553_v18 = vsub.f32 %v3709_v26, %v3717_v12 }
 0x1c2   : > { %v3777_v37 = vpop.permute.xlu2 %1591  ;;  %2895 = vpow2.f32 %v1573_v5 }
 0x1c3   : > { %v780_v62 = vpop.permute.xlu1 %779  ;;  %v1524_v57 = vpop.xlane.xlu0 %1523  ;;  %2897 = vpow2.f32 %v757_v48 }
 0x1c4   : > { %809 = vperm.xlu1 %2858, %v3540_v46   ;;  %1878 = vperm.xlu0 %2860, %v3781_v43   ;;  %v3788_v56 = vmax.f32 %v3779_v8, %v1524_v57  ;;  %v857_v51 = vsub.f32 %v3190_v4, %v780_v62 }
 0x1c6   : > { %2079 = vst.msk [vmem:[#allocation2 + $0xf8] sm:$0xff] %vm300_vm11, %v3788_v56  ;;  %v873_v30 = vmul.f32 1.442695, %v857_v51  ;;  %v3796_v40 = vpop.eup %2891 }
 0x1c7   : > { %829 = vperm.xlu2 %2859, %v3632_v50   ;;  %v3799_v60 = vpop.eup %2893 }
 0x1c8   : > { %v3803_v62 = vpop.eup %2895  ;;  %2899 = vpow2.f32 %v873_v30  ;;  %v1581_v30 = vmul.f32 1.442695, %v1553_v18  ;;  %v2829_v18 = vld [vmem:[%s3639_s26 + $0x30] sm:$0xff] }
 0x1c9   : > { %v3808_v35 = vpop.eup %2897 }
 0x1ca   : > { %v785_v46 = vpop.permute.xlu2 %784 }
 0x1cb   : > { %v858_v57 = vsub.f32 %v3203_v13, %v785_v46 }
 0x1cc   : > { %1853 = vperm.xlu1 %2858, %v3796_v40   ;;  %1070 = vperm.xlu0 %2860, %v3799_v60  }
 0x1cd   : > { %v875_v4 = vmul.f32 1.442695, %v858_v57 }
 0x1ce   : > { %v3810_v13 = vpop.eup %2899 }
 0x1cf   : > { %2901 = vpow2.f32 %v875_v4  ;;  %1873 = vperm.xlu2 %2859, %v3803_v62   ;;  %v2830_v4 = vld [vmem:[%s3639_s26 + $0x38] sm:$0xff] }
 0x1d0   : > { %2903 = vpow2.f32 %v767_v44  ;;  %1983 = vmatpush.bf16.msra.mxu3 %v2830_v4  ;;  %v2826_v4 = vld [vmem:[%s3639_s26 + $0x18] sm:$0xff] }
 0x1d1   : > { %2905 = vpow2.f32 %v1581_v30 }
 0x1d2   : > { %v3806_v50 = vpop.permute.xlu2 %1025 }
 0x1d3   : > { %4348 = vst [vmem:[#allocation29_spill] sm:$0xff] %v3806_v50  ;;  %v742_v50 = vsub.f32 %v3711_v3, %v3720_v20 }
 0x1d4   : > { %1050 = vperm.xlu1 %2858, %v3808_v35   ;;  %839 = vperm.xlu0 %2860, %v3692_v36  }
 0x1d5   : > { %v3812_v5 = vpop.eup %2901  ;;  %1984 = vmatpush.bf16.msra.mxu3 %v2829_v18  ;;  %v2825_v18 = vld [vmem:[%s3639_s26 + $0x10] sm:$0xff] }
 0x1d6   : > { %v3818_v6 = vpop.eup %2903  ;;  %v1114_v51 = vpack.c.bf16 %v3812_v5, %v3810_v13  ;;  %v790_v2 = vpop.permute.xlu0 %789 }
 0x1d7   : > { %1075 = vperm.xlu2 %2859, %v3818_v6   ;;  %v859_v48 = vsub.f32 %v3205_v14, %v790_v2  ;;  %v771_v2 = vmul.f32 1.442695, %v742_v50 }
 0x1d8   : > { %1178 = vmatmul.bf16.vlgmr.msra.gmra.mxu1 %v1114_v51 }
 0x1d9   : > { %v877_v46 = vmul.f32 1.442695, %v859_v48  ;;  %v3839_v48 = vpop.eup %2905 }
 0x1da   : > { %v795_v26 = vpop.permute.xlu2 %794 }
 0x1db   : > { %v860_v57 = vsub.f32 %v3219_v23, %v795_v26  ;;  %2907 = vpow2.f32 %v877_v46  ;;  %v1552_v23 = vsub.f32 %v3671_v1, %v3681_v10  ;;  %v2828_v1 = vld [vmem:[%s3639_s26 + $0x28] sm:$0xff]  ;;  %v2827_v46 = vld [vmem:[%s3639_s26 + $0x20] sm:$0xff] }
 0x1dc   : > { %819 = vperm.xlu1 %2858, %v3602_v15   ;;  %1656 = vperm.xlu0 %2860, %v3735_v41   ;;  %v4349_v15 = vsub.f32 %v3576_v16, %v3579_v61  ;;  %v743_v61 = vsub.f32 %v3751_v55, %v3756_v9  ;;  %v3865_v55 = vld [vmem:[#allocation2 + $0xf0] sm:$0xff] }
 0x1dd   : > { %v879_v44 = vmul.f32 1.442695, %v860_v57  ;;  %v1579_v30 = vmul.f32 1.442695, %v1552_v23  ;;  %1985 = vmatpush.bf16.msra.mxu3 %v2828_v1  ;;  %v2824_v1 = vld [vmem:[%s3639_s26 + $0x8] sm:$0xff] }
 0x1de   : > { %v3831_v14 = vpop.permute.xlu0 %1601  ;;  %v1571_v51 = vmul.f32 1.442695, %v4349_v15 }
 0x1df   : > { %2909 = vpow2.f32 %v879_v44  ;;  %1651 = vperm.xlu2 %2859, %v3717_v12  }
 0x1e0   : > { %2911 = vpow2.f32 %v1571_v51 }
 0x1e1   : > { %v3841_v3 = vpop.eup %2907  ;;  %2913 = vpow2.f32 %v771_v2  ;;  %1986 = vmatpush.bf16.msra.mxu3 %v2827_v46 }
 0x1e2   : > { %2915 = vpow2.f32 %v1579_v30  ;;  %v3883_v30 = vpop.permute.xlu2 %1838 }
 0x1e4   : > { %1631 = vperm.xlu1 %2858, %v3599_v29   ;;  %1893 = vperm.xlu0 %2860, %v3839_v48   ;;  %v4350_v29 = vsub.f32 %v3596_v28, %v3609_v25 }
 0x1e5   : > { %v3843_v12 = vpop.eup %2909  ;;  %1987 = vmatpush.bf16.msra.mxu3 %v2826_v4 }
 0x1e6   : > { %v1115_v16 = vpack.c.bf16 %v3843_v12, %v3841_v3  ;;  %v3853_v50 = vpop.permute.xlu0 %1030  ;;  %v763_v26 = vmul.f32 1.442695, %v4350_v29  ;;  %v3859_v57 = vpop.eup %2911 }
 0x1e7   : > { %844 = vperm.xlu2 %2859, %v3720_v20   ;;  %v3861_v44 = vpop.eup %2913  ;;  %v773_v20 = vmul.f32 1.442695, %v743_v61  ;;  %v2823_v61 = vld [vmem:[%s3639_s26] sm:$0xff] }
 0x1e8   : > { %1183 = vmatmul.bf16.gmra.mxu1 %v1115_v16  ;;  %v3868_v23 = vpop.eup %2915  ;;  %2917 = vpow2.f32 %v763_v26  ;;  %v4351_v26 = vsub.f32 %v3648_v0, %v3657_v59 }
 0x1e9   : > { %2919 = vpow2.f32 %v773_v20  ;;  %1988 = vmatpush.bf16.msra.mxu3 %v2825_v18 }
 0x1ea   : > { %v1607_v29 = vpop.permute.xlu2 %1606  ;;  %v1577_v20 = vmul.f32 1.442695, %v4351_v26 }
 0x1ec   : > { %1868 = vperm.xlu1 %2858, %v3859_v57   ;;  %1085 = vperm.xlu0 %2860, %v3861_v44   ;;  %2921 = vpow2.f32 %v1577_v20 }
 0x1ed   : > { %1989 = vmatpush.bf16.msra.mxu3 %v2824_v1  ;;  %v4353_v1 = vsub.f32 %v3676_v22, %v3692_v36 }
 0x1ee   : > { %v1522_v28 = vpop.xlane.xlu1 %1521  ;;  %v3879_v51 = vpop.permute.xlu0 %1843 }
 0x1ef   : > { %1888 = vperm.xlu2 %2859, %v3868_v23   ;;  %v3872_v25 = vmax.f32 %v3865_v55, %v1522_v28  ;;  %v3881_v2 = vpop.eup %2917 }
 0x1f0   : > { %v3888_v16 = vpop.eup %2919 }
 0x1f1   : > { %2078 = vst.msk [vmem:[#allocation2 + $0xf0] sm:$0xff] %vm300_vm11, %v3872_v25  ;;  %1990 = vmatpush.bf16.msra.mxu3 %v2823_v61  ;;  %v769_v61 = vmul.f32 1.442695, %v4353_v1  ;;  %v1672_v1 = vsub.f32 %v3216_v21, %v1607_v29 }
 0x1f2   : > { %v805_v18 = vpop.permute.xlu2 %804  ;;  %v3908_v15 = vpop.eup %2921 }
 0x1f3   : > { %2923 = vpow2.f32 %v769_v61 }
 0x1f4   : > { %1065 = vperm.xlu1 %2858, %v3881_v2   ;;  %854 = vperm.xlu0 %2860, %v3761_v32  }
 0x1f6   : > { %v3892_v46 = vpop.permute.xlu0 %1611 }
 0x1f7   : > { %1090 = vperm.xlu2 %2859, %v3888_v16  }
 0x1f9   : > { %v3916_v22 = vpop.eup %2923 }
 0x1fc   : > { %834 = vperm.xlu1 %2858, %v3684_v58   ;;  %v1669_v58 = vsub.f32 %v3193_v7, %v3777_v37 }
 0x1fe   : > { %v3899_v4 = vpop.permute.xlu0 %1848  ;;  %v1685_v0 = vmul.f32 1.442695, %v1669_v58 }
 0x1ff   : > { %4352 = vst [vmem:[#allocation30_spill] sm:$0xff] %v3899_v4  ;;  %v3914_v4 = vpop.permute.xlu2 %1045 }
 0x200   : > { %2925 = vpow2.f32 %v1685_v0  ;;  %4354 = vst [vmem:[#allocation31_spill] sm:$0xff] %v3914_v4  ;;  %v1671_v0 = vsub.f32 %v3209_v17, %v3831_v14 }
 0x202   : > { %v1689_v29 = vmul.f32 1.442695, %v1671_v0 }
 0x204   : > { %1646 = vperm.xlu1 %2858, %v3681_v10  }
 0x206   : > { %v3901_v28 = vpop.permute.xlu1 %1020  ;;  %v3911_v10 = vpop.permute.xlu0 %1040 }
 0x207   : > { %v2926_v36 = vpop.eup %2925 }
 0x20c   : > { %1883 = vperm.xlu1 %2858, %v3908_v15  }
 0x20e   : > { %v1597_v59 = vpop.permute.xlu1 %1596  ;;  %v3924_v61 = vpop.permute.xlu0 %1626 }
 0x20f   : > { %v1670_v26 = vsub.f32 %v3200_v11, %v1597_v59  ;;  %v862_v11 = vsub.f32 %v3235_v33, %v805_v18  ;;  %v3930_v59 = vpop.permute.xlu2 %1621  ;;  %v4355_v33 = vsub.f32 %v3732_v19, %v3735_v41 }
 0x211   : > { %v1687_v20 = vmul.f32 1.442695, %v1670_v26  ;;  %v1691_v26 = vmul.f32 1.442695, %v1672_v1  ;;  %v1583_v18 = vmul.f32 1.442695, %v4355_v33 }
 0x213   : > { %2927 = vpow2.f32 %v1687_v20  ;;  %v883_v20 = vmul.f32 1.442695, %v862_v11 }
 0x214   : > { %1080 = vperm.xlu1 %2858, %v3916_v22   ;;  %2929 = vpow2.f32 %v1691_v26 }
 0x215   : > { %2931 = vpow2.f32 %v883_v20 }
 0x216   : > { %v3919_v7 = vpop.permute.xlu1 %1833  ;;  %v3940_v14 = vpop.permute.xlu0 %1863 }
 0x219   : > { %v3921_v37 = vpop.eup %2927 }
 0x21a   : > { %v1927_v58 = vpack.c.bf16 %v3921_v37, %v2926_v36 }
 0x21c   : > { %849 = vperm.xlu1 %2858, %v3756_v9   ;;  %1991 = vmatmul.bf16.vlgmr.msra.gmra.mxu3 %v1927_v58  ;;  %v1556_v9 = vsub.f32 %v3779_v8, %v3788_v56  ;;  %v4357_v8 = vsub.f32 %v3753_v52, %v3761_v32  ;;  %v1673_v58 = vsub.f32 %v3225_v27, %v3892_v46 }
 0x21e   : > { %v800_v4 = vpop.permute.xlu1 %799  ;;  %1750 = vadd.xlane.f32.xlu0 %v2926_v36  ;;  %v1587_v19 = vmul.f32 1.442695, %v1556_v9  ;;  %v775_v1 = vmul.f32 1.442695, %v4357_v8  ;;  %v3965_v32 = vpop.permute.xlu0 %1055  ;;  %v1693_v52 = vmul.f32 1.442695, %v1673_v58  ;;  %v4358_v9 = vsub.f32 %v3865_v55, %v3872_v25 }
 0x21f   : > { %v861_v21 = vsub.f32 %v3221_v24, %v800_v4  ;;  %v815_v24 = vpop.permute.xlu2 %814  ;;  %v3945_v4 = vpop.eup %2929  ;;  %v1676_v55 = vsub.f32 %v3250_v42, %v3924_v61 }
 0x220   : > { %937 = vadd.xlane.f32.xlu2 %v3810_v13  ;;  %v3947_v41 = vpop.eup %2931 }
 0x221   : > { %v881_v17 = vmul.f32 1.442695, %v861_v21 }
 0x223   : > { %2933 = vpow2.f32 %v881_v17 }
 0x224   : > { %2935 = vpow2.f32 %v1689_v29  ;;  %1661 = vperm.xlu1 %2858, %v3872_v25  }
 0x225   : > { %2937 = vpow2.f32 %v1583_v18  ;;  %v864_v18 = vsub.f32 %v3245_v39, %v815_v24 }
 0x226   : > { %v3943_v13 = vpop.permute.xlu1 %1035  ;;  %2939 = vpow2.f32 %v1587_v19  ;;  %v1585_v19 = vmul.f32 1.442695, %v4358_v9 }
 0x227   : > { %4356 = vst [vmem:[#allocation32_spill] sm:$0xff] %v3943_v13  ;;  %2941 = vpow2.f32 %v775_v1  ;;  %v3968_v46 = vpop.permute.xlu2 %1858  ;;  %v825_v1 = vpop.permute.xlu0 %824 }
 0x228   : > { %2943 = vpow2.f32 %v1693_v52  ;;  %v1699_v52 = vmul.f32 1.442695, %v1676_v55 }
 0x229   : > { %v3949_v36 = vpop.eup %2933 }
 0x22a   : > { %v3954_v11 = vpop.eup %2935  ;;  %v1116_v0 = vpack.c.bf16 %v3947_v41, %v3949_v36 }
 0x22b   : > { %v3960_v26 = vpop.eup %2937  ;;  %v1928_v20 = vpack.c.bf16 %v3945_v4, %v3954_v11 }
 0x22c   : > { %1898 = vperm.xlu1 %2858, %v3960_v26   ;;  %1188 = vmatmul.bf16.gmra.mxu1 %v1116_v0  ;;  %v3970_v29 = vpop.eup %2939 }
 0x22d   : > { %1996 = vmatmul.bf16.gmra.mxu3 %v1928_v20  ;;  %v3974_v17 = vpop.eup %2941 }
 0x22e   : > { %v1617_v21 = vpop.permute.xlu1 %1616  ;;  %v3982_v0 = vpop.eup %2943 }
 0x22f   : > { %v1674_v27 = vsub.f32 %v3232_v31, %v1617_v21  ;;  %v887_v31 = vmul.f32 1.442695, %v864_v18  ;;  %v3988_v25 = vpop.permute.xlu2 %1060 }
 0x230   : > { %4359 = vst [vmem:[#allocation33_spill] sm:$0xff] %v3988_v25 }
 0x231   : > { %v1695_v33 = vmul.f32 1.442695, %v1674_v27 }
 0x232   : > { %1908 = vperm.xlu0 %2860, %v3970_v29  }
 0x233   : > { %2945 = vpow2.f32 %v1695_v33  ;;  %v4001_v33 = vpop.permute.xlu0 %1641 }
 0x234   : > { %1095 = vperm.xlu1 %2858, %v3974_v17   ;;  %2947 = vpow2.f32 %v1585_v19 }
 0x235   : > { %2949 = vpow2.f32 %v887_v31  ;;  %v866_v31 = vsub.f32 %v3262_v49, %v825_v1 }
 0x236   : > { %v810_v8 = vpop.permute.xlu1 %809 }
 0x237   : > { %v863_v58 = vsub.f32 %v3237_v34, %v810_v8  ;;  %v1675_v34 = vsub.f32 %v3243_v38, %v3930_v59  ;;  %v1637_v9 = vpop.permute.xlu2 %1636 }
 0x238   : > { %1666 = vperm.xlu2 %2859, %v3788_v56  }
 0x239   : > { %v3984_v39 = vpop.eup %2945  ;;  %v885_v24 = vmul.f32 1.442695, %v863_v58  ;;  %v1697_v42 = vmul.f32 1.442695, %v1675_v34 }
 0x23a   : > { %v1929_v20 = vpack.c.bf16 %v3984_v39, %v3982_v0  ;;  %v3994_v56 = vpop.eup %2947 }
 0x23b   : > { %2951 = vpow2.f32 %v885_v24  ;;  %v3999_v27 = vpop.eup %2949  ;;  %v4009_v8 = vpop.permute.xlu0 %1878  ;;  %v891_v24 = vmul.f32 1.442695, %v866_v31 }
 0x23c   : > { %2953 = vpow2.f32 %v1699_v52  ;;  %4361 = vst [vmem:[#allocation35_spill] sm:$0xff] %v4009_v8 }
 0x23d   : > { %2001 = vmatmul.bf16.gmra.mxu3 %v1929_v20  ;;  %2955 = vpow2.f32 %v1697_v42  ;;  %v1678_v42 = vsub.f32 %v3267_v53, %v1637_v9 }
 0x23e   : > { %v3996_v21 = vpop.permute.xlu1 %1853  ;;  %2957 = vpow2.f32 %v891_v24 }
 0x23f   : > { %v830_v55 = vpop.permute.xlu2 %829  ;;  %v1703_v49 = vmul.f32 1.442695, %v1678_v42 }
 0x240   : > { %1903 = vperm.xlu2 %2859, %v3994_v56  }
 0x241   : > { %v2952_v61 = vpop.eup %2951 }
 0x242   : > { %v1117_v18 = vpack.c.bf16 %v3999_v27, %v2952_v61  ;;  %v4006_v59 = vpop.eup %2953 }
 0x243   : > { %v2956_v19 = vpop.eup %2955  ;;  %v4016_v25 = vpop.permute.xlu0 %1070 }
 0x244   : > { %1193 = vmatmul.bf16.gmra.mxu1 %v1117_v18  ;;  %v1930_v58 = vpack.c.bf16 %v4006_v59, %v2956_v19  ;;  %v2958_v13 = vpop.eup %2957 }
 0x246   : > { %v4004_v38 = vpop.permute.xlu1 %1050 }
 0x247   : > { %4360 = vst [vmem:[#allocation34_spill] sm:$0xff] %v4004_v38 }
 0x24d   : > { %2006 = vmatmul.bf16.gmra.mxu3 %v1930_v58  ;;  %v4019_v58 = vpop.permute.xlu2 %1873 }
 0x24e   : > { %v820_v20 = vpop.permute.xlu1 %819 }
 0x24f   : > { %v865_v34 = vsub.f32 %v3255_v45, %v820_v20 }
 0x251   : > { %v889_v52 = vmul.f32 1.442695, %v865_v34 }
 0x253   : > { %2959 = vpow2.f32 %v889_v52  ;;  %v1100_v52 = vmul.f32 0.0, %v3853_v50 }
 0x254   : > { %2961 = vpow2.f32 %v1703_v49  ;;  %v867_v49 = vsub.f32 %v3269_v54, %v830_v55  ;;  %v4364_v55 = vld [vmem:[#allocation6_spill] sm:$0xff] }
 0x255   : > { %v4014_v18 = vpop.f32.mrf.mxu1  ;;  %v4032_v34 = vpop.permute.xlu2 %1075 }
 0x256   : > { %v1632_v1 = vpop.permute.xlu1 %1631  ;;  %4362 = vst [vmem:[#allocation36_spill] sm:$0xff] %v4032_v34 }
 0x257   : > { %v1677_v38 = vsub.f32 %v3258_v47, %v1632_v1  ;;  %v840_v47 = vpop.permute.xlu0 %839 }
 0x259   : > { %v4021_v31 = vpop.eup %2959  ;;  %v1701_v8 = vmul.f32 1.442695, %v1677_v38 }
 0x25a   : > { %v1118_v45 = vpack.c.bf16 %v2958_v13, %v4021_v31  ;;  %v2962_v24 = vpop.eup %2961 }
 0x25b   : > { %2963 = vpow2.f32 %v1701_v8 }
 0x25c   : > { %941 = vadd.xlane.f32.xlu0 %v3841_v3  ;;  %1198 = vmatmul.bf16.gmra.mxu1 %v1118_v45  ;;  %v893_v45 = vmul.f32 1.442695, %v867_v49 }
 0x25d   : > { %v4024_v53 = vpop.f32.mrf.mxu1  ;;  %v1652_v1 = vpop.permute.xlu2 %1651 }
 0x25e   : > { %v4027_v9 = vpop.permute.xlu1 %1868  ;;  %939 = vadd.xlane.f32.xlu1 %v3812_v5  ;;  %2965 = vpow2.f32 %v893_v45  ;;  %v4366_v45 = vld [vmem:[#allocation7_spill] sm:$0xff] }
 0x25f   : > { %v1657_v5 = vpop.permute.xlu0 %1656 }
 0x261   : > { %v4030_v20 = vpop.eup %2963 }
 0x262   : > { %v1931_v38 = vpack.c.bf16 %v2962_v24, %v4030_v20 }
 0x264   : > { %1756 = vadd.xlane.f32.xlu0 %v3945_v4  ;;  %2011 = vmatmul.bf16.gmra.mxu3 %v1931_v38  ;;  %v4363_v38 = vld [vmem:[#allocation5_spill] sm:$0xff] }
 0x265   : > { %v1184_v8 = vpop.f32.mrf.mxu1 }
 0x266   : > { %v4037_v3 = vadd.f32 %v1184_v8, %v1100_v52  ;;  %v4039_v42 = vpop.permute.xlu1 %1065  ;;  %1752 = vadd.xlane.f32.xlu1 %v3921_v37  ;;  %v1679_v37 = vsub.f32 %v4363_v38, %v4001_v33  ;;  %v2966_v8 = vpop.eup %2965 }
 0x267   : > { %v4049_v52 = vpop.permute.xlu0 %1893 }
 0x268   : > { %v1705_v54 = vmul.f32 1.442695, %v1679_v37 }
 0x269   : > { %1754 = vadd.xlane.f32.xlu2 %v3954_v11  ;;  %v845_v11 = vpop.permute.xlu2 %844 }
 0x26c   : > { %949 = vadd.xlane.f32.xlu0 %v2952_v61 }
 0x26e   : > { %v835_v34 = vpop.permute.xlu1 %834  ;;  %945 = vadd.xlane.f32.xlu1 %v3949_v36 }
 0x26f   : > { %v868_v50 = vsub.f32 %v3310_v63, %v835_v34 }
 0x271   : > { %943 = vadd.xlane.f32.xlu2 %v3843_v12  ;;  %v895_v4 = vmul.f32 1.442695, %v868_v50  ;;  %v4365_v12 = vld [vmem:[#allocation9_spill] sm:$0xff]  ;;  %v4064_v37 = vpop.permute.xlu2 %1888 }
 0x272   : > { %v870_v34 = vsub.f32 %v4365_v12, %v845_v11  ;;  %v4367_v11 = vld [vmem:[#allocation10_spill] sm:$0xff] }
 0x273   : > { %2967 = vpow2.f32 %v895_v4 }
 0x274   : > { %1762 = vadd.xlane.f32.xlu0 %v2956_v19  ;;  %2969 = vpow2.f32 %v1705_v54  ;;  %v869_v19 = vsub.f32 %v4366_v45, %v840_v47  ;;  %v899_v50 = vmul.f32 1.442695, %v870_v34  ;;  %v1682_v47 = vsub.f32 %v4367_v11, %v1657_v5  ;;  %v4369_v5 = vld [vmem:[#allocation12_spill] sm:$0xff]  ;;  %v4370_v11 = vld [vmem:[#allocation11_spill] sm:$0xff] }
 0x276   : > { %v1647_v61 = vpop.permute.xlu1 %1646  ;;  %1758 = vadd.xlane.f32.xlu1 %v3982_v0  ;;  %v4059_v0 = vpop.permute.xlu0 %1085 }
 0x277   : > { %v1680_v36 = vsub.f32 %v4364_v55, %v1647_v61 }
 0x279   : > { %947 = vadd.xlane.f32.xlu2 %v3947_v41  ;;  %v4054_v63 = vpop.eup %2967  ;;  %v1707_v49 = vmul.f32 1.442695, %v1680_v36  ;;  %v897_v41 = vmul.f32 1.442695, %v869_v19  ;;  %v1711_v36 = vmul.f32 1.442695, %v1682_v47 }
 0x27a   : > { %v1119_v33 = vpack.c.bf16 %v4054_v63, %v2966_v8  ;;  %v2970_v38 = vpop.eup %2969 }
 0x27b   : > { %2971 = vpow2.f32 %v1707_v49 }
 0x27c   : > { %955 = vadd.xlane.f32.xlu0 %v2958_v13  ;;  %1203 = vmatmul.bf16.gmra.mxu1 %v1119_v33  ;;  %2973 = vpow2.f32 %v899_v50  ;;  %v4368_v13 = vld [vmem:[#allocation8_spill] sm:$0xff]  ;;  %v4073_v33 = vpop.permute.xlu2 %1090 }
 0x27d   : > { %v1681_v55 = vsub.f32 %v4368_v13, %v1652_v1  ;;  %2975 = vpow2.f32 %v897_v41 }
 0x27e   : > { %v4061_v4 = vpop.permute.xlu1 %1883  ;;  %951 = vadd.xlane.f32.xlu1 %v3999_v27  ;;  %v855_v49 = vpop.permute.xlu0 %854  ;;  %2977 = vpow2.f32 %v1711_v36 }
 0x27f   : > { %v1709_v34 = vmul.f32 1.442695, %v1681_v55  ;;  %v872_v45 = vsub.f32 %v4369_v5, %v855_v49  ;;  %v4372_v49 = vld [vmem:[#allocation20_spill] sm:$0xff] }
 0x281   : > { %1760 = vadd.xlane.f32.xlu2 %v3984_v39  ;;  %v2972_v54 = vpop.eup %2971  ;;  %2979 = vpow2.f32 %v1709_v34  ;;  %v903_v19 = vmul.f32 1.442695, %v872_v45 }
 0x282   : > { %v1932_v61 = vpack.c.bf16 %v2972_v54, %v2970_v38  ;;  %v2974_v27 = vpop.eup %2973 }
 0x283   : > { %v2976_v39 = vpop.eup %2975  ;;  %2981 = vpow2.f32 %v903_v19 }
 0x284   : > { %1768 = vadd.xlane.f32.xlu0 %v2962_v24  ;;  %2016 = vmatmul.bf16.gmra.mxu3 %v1932_v61  ;;  %v1120_v1 = vpack.c.bf16 %v2974_v27, %v2976_v39  ;;  %v1718_v24 = vld [vmem:[#allocation3 + $0x80] sm:$0xff]  ;;  %v2978_v41 = vpop.eup %2977 }
 0x286   : > { %v4069_v12 = vpop.permute.xlu1 %1080  ;;  %1764 = vadd.xlane.f32.xlu1 %v4006_v59  ;;  %v905_v59 = vld [vmem:[#allocation3] sm:$0xff] }
 0x287   : > { %v2980_v13 = vpop.eup %2979  ;;  %v921_v5 = vmul.f32 %v4372_v49, %v905_v59  ;;  %v1912_v49 = vmul.f32 0.0, %v3883_v30 }
 0x289   : > { %953 = vadd.xlane.f32.xlu2 %v4021_v31  ;;  %v4371_v31 = vld [vmem:[#allocation23_spill] sm:$0xff] }
 0x28a   : > { %v1734_v61 = vmul.f32 %v4371_v31, %v1718_v24  ;;  %v4374_v31 = vld [vmem:[#allocation13_spill] sm:$0xff] }
 0x28c   : > { %961 = vadd.xlane.f32.xlu0 %v2976_v39  ;;  %1208 = vmatmul.bf16.gmra.mxu1 %v1120_v1  ;;  %v1933_v1 = vpack.c.bf16 %v2978_v41, %v2980_v13 }
 0x28e   : > { %v850_v50 = vpop.permute.xlu1 %849  ;;  %957 = vadd.xlane.f32.xlu1 %v2966_v8  ;;  %v4373_v8 = vld [vmem:[#allocation16_spill] sm:$0xff] }
 0x28f   : > { %v871_v47 = vsub.f32 %v4370_v11, %v850_v50  ;;  %v2982_v50 = vpop.eup %2981 }
 0x291   : > { %1766 = vadd.xlane.f32.xlu2 %v4030_v20  ;;  %v901_v55 = vmul.f32 1.442695, %v871_v47  ;;  %v1751_v36 = vpop.xlane.xlu0 %1750 }
 0x292   : > { %v1782_v34 = vadd.f32 %v1751_v36, %v1734_v61 }
 0x293   : > { %v938_v39 = vpop.xlane.xlu2 %937  ;;  %2983 = vpow2.f32 %v901_v55 }
 0x294   : > { %v969_v45 = vadd.f32 %v938_v39, %v921_v5  ;;  %1798 = vst.msk [vmem:[#allocation3 + $0x80] sm:$0xff] %vm300_vm11, %v1782_v34  ;;  %1774 = vadd.xlane.f32.xlu0 %v2980_v13  ;;  %2021 = vmatmul.bf16.gmra.mxu3 %v1933_v1  ;;  %v1913_v39 = vmul.f32 0.0, %v3879_v51 }
 0x296   : > { %986 = vst.msk [vmem:[#allocation3] sm:$0xff] %vm300_vm11, %v969_v45  ;;  %v1662_v20 = vpop.permute.xlu1 %1661  ;;  %1770 = vadd.xlane.f32.xlu1 %v2970_v38 }
 0x297   : > { %v1683_v24 = vsub.f32 %v4373_v8, %v1662_v20 }
 0x299   : > { %959 = vadd.xlane.f32.xlu2 %v4054_v63  ;;  %v2984_v59 = vpop.eup %2983  ;;  %v1713_v19 = vmul.f32 1.442695, %v1683_v24 }
 0x29a   : > { %v1121_v47 = vpack.c.bf16 %v2982_v50, %v2984_v59 }
 0x29b   : > { %v1667_v11 = vpop.permute.xlu2 %1666  ;;  %2985 = vpow2.f32 %v1713_v19  ;;  %v2260_v30 = vld [vmem:[#allocation3 + $0x80] sm:$0xff] }
 0x29c   : > { %v1684_v61 = vsub.f32 %v4374_v31, %v1667_v11  ;;  %967 = vadd.xlane.f32.xlu0 %v2982_v50  ;;  %1213 = vmatmul.bf16.gmra.mxu1 %v1121_v47 }
 0x29d   : > { %v2083_v45 = vld [vmem:[#allocation3] sm:$0xff] }
 0x29e   : > { %v1715_v55 = vmul.f32 1.442695, %v1684_v61  ;;  %963 = vadd.xlane.f32.xlu1 %v2974_v27  ;;  %v4096_v8 = vpop.permute.xlu1 %1898  ;;  %v907_v61 = vld [vmem:[#allocation3 + $0x10] sm:$0xff] }
 0x29f   : > { %v4085_v13 = vpop.f32.mrf.mxu3 }
 0x2a0   : > { %2987 = vpow2.f32 %v1715_v55  ;;  %v4375_v55 = vld [vmem:[#allocation15_spill] sm:$0xff] }
 0x2a1   : > { %1772 = vadd.xlane.f32.xlu2 %v2972_v54  ;;  %v2986_v38 = vpop.eup %2985  ;;  %2989 = vrcp.f32 %v2083_v45  ;;  %v1721_v45 = vld [vmem:[#allocation3 + $0x98] sm:$0xff] }
 0x2a2   : > { %2991 = vrcp.f32 %v2260_v30  ;;  %v4377_v30 = vld [vmem:[#allocation19_spill] sm:$0xff] }
 0x2a4   : > { %v4101_v19 = vpop.permute.xlu0 %1908 }
 0x2a6   : > { %v2988_v36 = vpop.eup %2987  ;;  %1776 = vadd.xlane.f32.xlu1 %v2978_v41  ;;  %v1915_v41 = vmul.f32 0.0, %v3996_v21  ;;  %v4103_v47 = vpop.permute.xlu1 %1095  ;;  %v906_v21 = vld [vmem:[#allocation3 + $0x8] sm:$0xff] }
 0x2a7   : > { %1780 = vadd.xlane.f32.xlu0 %v2988_v36  ;;  %v1934_v63 = vpack.c.bf16 %v2988_v36, %v2986_v38  ;;  %v1994_v5 = vpop.f32.mrf.mxu3  ;;  %v2990_v20 = vpop.eup %2989 }
 0x2a8   : > { %v4088_v34 = vadd.f32 %v1994_v5, %v1912_v49  ;;  %v2992_v51 = vpop.eup %2991 }
 0x2a9   : > { %965 = vadd.xlane.f32.xlu2 %v2984_v59  ;;  %2026 = vmatmul.bf16.gmra.mxu3 %v1934_v63  ;;  %v1916_v59 = vmul.f32 0.0, %v3968_v46  ;;  %v4376_v63 = vld [vmem:[#allocation14_spill] sm:$0xff] }
 0x2aa   : > { %v922_v5 = vmul.f32 %v4376_v63, %v906_v21  ;;  %v911_v63 = vld [vmem:[#allocation3 + $0x30] sm:$0xff] }
 0x2b0   : > { %v1997_v1 = vpop.f32.mrf.mxu3 }
 0x2b1   : > { %1778 = vadd.xlane.f32.xlu2 %v2986_v38  ;;  %v4091_v27 = vadd.f32 %v1997_v1, %v1913_v39  ;;  %v923_v38 = vmul.f32 %v4375_v55, %v907_v61  ;;  %v4110_v1 = vpop.permute.xlu2 %1903 }
 0x2b8   : > { %v4093_v54 = vpop.f32.mrf.mxu3 }
 0x2bf   : > { %2133 = vperm.xlu1 %2858, %v2990_v20   ;;  %v1719_v20 = vld [vmem:[#allocation3 + $0x88] sm:$0xff] }
 0x2c0   : > { %v2002_v24 = vpop.f32.mrf.mxu3 }
 0x2c1   : > { %v4098_v50 = vadd.f32 %v2002_v24, %v1915_v41  ;;  %v1737_v41 = vmul.f32 %v4377_v30, %v1721_v45  ;;  %v927_v45 = vmul.f32 %v3808_v35, %v911_v63  ;;  %v1722_v63 = vld [vmem:[#allocation3 + $0xa0] sm:$0xff] }
 0x2c8   : > { %v2004_v11 = vpop.f32.mrf.mxu3 }
 0x2c9   : > { %2311 = vperm.xlu2 %2859, %v2992_v51   ;;  %v4105_v31 = vadd.f32 %v2004_v11, %v1916_v59  ;;  %v1720_v51 = vld [vmem:[#allocation3 + $0x90] sm:$0xff]  ;;  %v4378_v11 = vld [vmem:[#allocation18_spill] sm:$0xff] }
 0x2ca   : > { %v1735_v61 = vmul.f32 %v4378_v11, %v1719_v20  ;;  %v908_v20 = vld [vmem:[#allocation3 + $0x18] sm:$0xff] }
 0x2cf   : > { %v942_v36 = vpop.xlane.xlu0 %941 }
 0x2d0   : > { %v971_v49 = vadd.f32 %v942_v36, %v923_v38  ;;  %v4379_v38 = vld [vmem:[#allocation17_spill] sm:$0xff] }
 0x2d1   : > { %v940_v39 = vpop.xlane.xlu1 %939  ;;  %v1736_v36 = vmul.f32 %v4379_v38, %v1720_v51  ;;  %v4381_v38 = vld [vmem:[#allocation27_spill] sm:$0xff] }
 0x2d2   : > { %988 = vst.msk [vmem:[#allocation3 + $0x10] sm:$0xff] %vm300_vm11, %v971_v49  ;;  %v970_v46 = vadd.f32 %v940_v39, %v922_v5 }
 0x2d4   : > { %987 = vst.msk [vmem:[#allocation3 + $0x8] sm:$0xff] %vm300_vm11, %v970_v46  ;;  %v909_v46 = vld [vmem:[#allocation3 + $0x20] sm:$0xff] }
 0x2d7   : > { %v1757_v24 = vpop.xlane.xlu0 %1756 }
 0x2d8   : > { %v1785_v59 = vadd.f32 %v1757_v24, %v1737_v41  ;;  %v4380_v24 = vld [vmem:[#allocation21_spill] sm:$0xff] }
 0x2d9   : > { %v1753_v55 = vpop.xlane.xlu1 %1752 }
 0x2da   : > { %1801 = vst.msk [vmem:[#allocation3 + $0x98] sm:$0xff] %vm300_vm11, %v1785_v59  ;;  %v1783_v21 = vadd.f32 %v1753_v55, %v1735_v61  ;;  %v925_v59 = vmul.f32 %v4380_v24, %v909_v46  ;;  %v4382_v46 = vld [vmem:[#allocation24_spill] sm:$0xff] }
 0x2db   : > { %v2084_v5 = vld [vmem:[#allocation3 + $0x8] sm:$0xff] }
 0x2dc   : > { %v1755_v49 = vpop.xlane.xlu2 %1754  ;;  %1799 = vst.msk [vmem:[#allocation3 + $0x88] sm:$0xff] %vm300_vm11, %v1783_v21  ;;  %2993 = vrcp.f32 %v2084_v5  ;;  %v924_v21 = vmul.f32 %v4381_v38, %v908_v20  ;;  %v1738_v20 = vmul.f32 %v3796_v40, %v1722_v63  ;;  %v4383_v38 = vld [vmem:[#allocation22_spill] sm:$0xff]  ;;  %v912_v40 = vld [vmem:[#allocation3 + $0x38] sm:$0xff] }
 0x2dd   : > { %v1784_v39 = vadd.f32 %v1755_v49, %v1736_v36  ;;  %v1724_v49 = vld [vmem:[#allocation3 + $0xb0] sm:$0xff] }
 0x2df   : > { %1800 = vst.msk [vmem:[#allocation3 + $0x90] sm:$0xff] %vm300_vm11, %v1784_v39  ;;  %v950_v30 = vpop.xlane.xlu0 %949 }
 0x2e0   : > { %v975_v41 = vadd.f32 %v950_v30, %v927_v45  ;;  %v1740_v45 = vmul.f32 %v4382_v46, %v1724_v49 }
 0x2e1   : > { %v946_v11 = vpop.xlane.xlu1 %945  ;;  %v2263_v61 = vld [vmem:[#allocation3 + $0x98] sm:$0xff] }
 0x2e2   : > { %v2994_v51 = vpop.eup %2993  ;;  %992 = vst.msk [vmem:[#allocation3 + $0x30] sm:$0xff] %vm300_vm11, %v975_v41  ;;  %v973_v55 = vadd.f32 %v946_v11, %v925_v59  ;;  %2995 = vrcp.f32 %v2263_v61  ;;  %v910_v41 = vld [vmem:[#allocation3 + $0x28] sm:$0xff]  ;;  %v2085_v59 = vld [vmem:[#allocation3 + $0x10] sm:$0xff] }
 0x2e3   : > { %2138 = vperm.xlu2 %2859, %v2994_v51   ;;  %v2261_v5 = vld [vmem:[#allocation3 + $0x88] sm:$0xff] }
 0x2e4   : > { %v944_v36 = vpop.xlane.xlu2 %943  ;;  %990 = vst.msk [vmem:[#allocation3 + $0x20] sm:$0xff] %vm300_vm11, %v973_v55  ;;  %2997 = vrcp.f32 %v2261_v5  ;;  %v914_v5 = vld [vmem:[#allocation3 + $0x48] sm:$0xff] }
 0x2e5   : > { %v972_v35 = vadd.f32 %v944_v36, %v924_v21  ;;  %v926_v21 = vmul.f32 %v4383_v38, %v910_v41  ;;  %v930_v46 = vmul.f32 %v3881_v2, %v914_v5  ;;  %v4385_v38 = vld [vmem:[#allocation26_spill] sm:$0xff] }
 0x2e6   : > { %v2262_v39 = vld [vmem:[#allocation3 + $0x90] sm:$0xff] }
 0x2e7   : > { %989 = vst.msk [vmem:[#allocation3 + $0x18] sm:$0xff] %vm300_vm11, %v972_v35  ;;  %2999 = vrcp.f32 %v2262_v39  ;;  %v1763_v30 = vpop.xlane.xlu0 %1762 }
 0x2e8   : > { %v1788_v24 = vadd.f32 %v1763_v30, %v1740_v45  ;;  %v2996_v11 = vpop.eup %2995  ;;  %3001 = vrcp.f32 %v2085_v59  ;;  %v1723_v30 = vld [vmem:[#allocation3 + $0xa8] sm:$0xff] }
 0x2e9   : > { %v1759_v51 = vpop.xlane.xlu1 %1758 }
 0x2ea   : > { %v2998_v61 = vpop.eup %2997  ;;  %1804 = vst.msk [vmem:[#allocation3 + $0xb0] sm:$0xff] %vm300_vm11, %v1788_v24  ;;  %v1786_v55 = vadd.f32 %v1759_v51, %v1738_v20  ;;  %v4384_v24 = vld [vmem:[#allocation25_spill] sm:$0xff] }
 0x2eb   : > { %2316 = vperm.xlu0 %2860, %v2998_v61   ;;  %2326 = vperm.xlu2 %2859, %v2996_v11   ;;  %v2087_v49 = vld [vmem:[#allocation3 + $0x20] sm:$0xff]  ;;  %v928_v20 = vmul.f32 %v4384_v24, %v912_v40 }
 0x2ec   : > { %v948_v36 = vpop.xlane.xlu2 %947  ;;  %1802 = vst.msk [vmem:[#allocation3 + $0xa0] sm:$0xff] %vm300_vm11, %v1786_v55  ;;  %3003 = vrcp.f32 %v2087_v49  ;;  %v1727_v49 = vld [vmem:[#allocation3 + $0xc8] sm:$0xff] }
 0x2ed   : > { %v3000_v35 = vpop.eup %2999  ;;  %v974_v39 = vadd.f32 %v948_v36, %v926_v21  ;;  %v1739_v21 = vmul.f32 %v4385_v38, %v1723_v30  ;;  %v1743_v40 = vmul.f32 %v3781_v43, %v1727_v49  ;;  %v917_v38 = vld [vmem:[#allocation3 + $0x60] sm:$0xff] }
 0x2ee   : > { %2321 = vperm.xlu1 %2858, %v3000_v35   ;;  %v2086_v63 = vld [vmem:[#allocation3 + $0x18] sm:$0xff]  ;;  %v3002_v59 = vpop.eup %3001  ;;  %v933_v49 = vmul.f32 %v3916_v22, %v917_v38 }
 0x2ef   : > { %991 = vst.msk [vmem:[#allocation3 + $0x28] sm:$0xff] %vm300_vm11, %v974_v39  ;;  %3005 = vrcp.f32 %v2086_v63  ;;  %v956_v45 = vpop.xlane.xlu0 %955  ;;  %v1725_v39 = vld [vmem:[#allocation3 + $0xb8] sm:$0xff] }
 0x2f0   : > { %v978_v41 = vadd.f32 %v956_v45, %v930_v46  ;;  %v913_v46 = vld [vmem:[#allocation3 + $0x40] sm:$0xff]  ;;  %v1741_v30 = vmul.f32 %v3859_v57, %v1725_v39  ;;  %v915_v57 = vld [vmem:[#allocation3 + $0x50] sm:$0xff] }
 0x2f1   : > { %v952_v11 = vpop.xlane.xlu1 %951  ;;  %v2266_v51 = vld [vmem:[#allocation3 + $0xb0] sm:$0xff]  ;;  %v931_v39 = vmul.f32 %v3799_v60, %v915_v57 }
 0x2f2   : > { %v3004_v61 = vpop.eup %3003  ;;  %995 = vst.msk [vmem:[#allocation3 + $0x48] sm:$0xff] %vm300_vm11, %v978_v41  ;;  %v976_v55 = vadd.f32 %v952_v11, %v928_v20  ;;  %3007 = vrcp.f32 %v2266_v51  ;;  %v4386_v51 = vld [vmem:[#allocation28_spill] sm:$0xff] }
 0x2f3   : > { %2143 = vperm.xlu0 %2860, %v3002_v59   ;;  %2153 = vperm.xlu2 %2859, %v3004_v61   ;;  %v2264_v2 = vld [vmem:[#allocation3 + $0xa0] sm:$0xff]  ;;  %v929_v61 = vmul.f32 %v4386_v51, %v913_v46  ;;  %v1728_v51 = vld [vmem:[#allocation3 + $0xd0] sm:$0xff] }
 0x2f4   : > { %v1761_v36 = vpop.xlane.xlu2 %1760  ;;  %993 = vst.msk [vmem:[#allocation3 + $0x38] sm:$0xff] %vm300_vm11, %v976_v55  ;;  %3009 = vrcp.f32 %v2264_v2 }
 0x2f5   : > { %v3006_v5 = vpop.eup %3005  ;;  %v1787_v35 = vadd.f32 %v1761_v36, %v1739_v21 }
 0x2f6   : > { %2148 = vperm.xlu1 %2858, %v3006_v5   ;;  %v2088_v41 = vld [vmem:[#allocation3 + $0x28] sm:$0xff]  ;;  %v1726_v5 = vld [vmem:[#allocation3 + $0xc0] sm:$0xff] }
 0x2f7   : > { %1803 = vst.msk [vmem:[#allocation3 + $0xa8] sm:$0xff] %vm300_vm11, %v1787_v35  ;;  %v1769_v63 = vpop.xlane.xlu0 %1768  ;;  %3011 = vrcp.f32 %v2088_v41  ;;  %v1742_v41 = vmul.f32 %v3803_v62, %v1726_v5 }
 0x2f8   : > { %v1791_v45 = vadd.f32 %v1769_v63, %v1743_v40  ;;  %v3008_v24 = vpop.eup %3007 }
 0x2f9   : > { %v1765_v20 = vpop.xlane.xlu1 %1764 }
 0x2fa   : > { %v3010_v59 = vpop.eup %3009  ;;  %1807 = vst.msk [vmem:[#allocation3 + $0xc8] sm:$0xff] %vm300_vm11, %v1791_v45  ;;  %v1789_v11 = vadd.f32 %v1765_v20, %v1741_v30  ;;  %v1730_v20 = vld [vmem:[#allocation3 + $0xe0] sm:$0xff] }
 0x2fb   : > { %2331 = vperm.xlu0 %2860, %v3010_v59   ;;  %2341 = vperm.xlu2 %2859, %v3008_v24   ;;  %v2090_v43 = vld [vmem:[#allocation3 + $0x38] sm:$0xff]  ;;  %v2089_v59 = vld [vmem:[#allocation3 + $0x30] sm:$0xff] }
 0x2fc   : > { %v954_v55 = vpop.xlane.xlu2 %953  ;;  %1805 = vst.msk [vmem:[#allocation3 + $0xb8] sm:$0xff] %vm300_vm11, %v1789_v11  ;;  %3013 = vrcp.f32 %v2090_v43  ;;  %v1744_v43 = vmul.f32 %v3908_v15, %v1728_v51  ;;  %v918_v15 = vld [vmem:[#allocation3 + $0x68] sm:$0xff] }
 0x2fd   : > { %v977_v21 = vadd.f32 %v954_v55, %v929_v61  ;;  %v3012_v40 = vpop.eup %3011  ;;  %v1746_v61 = vmul.f32 %v3839_v48, %v1730_v20  ;;  %v916_v55 = vld [vmem:[#allocation3 + $0x58] sm:$0xff] }
 0x2fe   : > { %v2265_v36 = vld [vmem:[#allocation3 + $0xa8] sm:$0xff]  ;;  %v932_v5 = vmul.f32 %v3818_v6, %v916_v55 }
 0x2ff   : > { %994 = vst.msk [vmem:[#allocation3 + $0x40] sm:$0xff] %vm300_vm11, %v977_v21  ;;  %3015 = vrcp.f32 %v2265_v36  ;;  %v962_v2 = vpop.xlane.xlu0 %961 }
 0x300   : > { %v981_v35 = vadd.f32 %v962_v2, %v933_v49 }
 0x301   : > { %v958_v63 = vpop.xlane.xlu1 %957  ;;  %v2269_v46 = vld [vmem:[#allocation3 + $0xc8] sm:$0xff] }
 0x302   : > { %v3014_v45 = vpop.eup %3013  ;;  %998 = vst.msk [vmem:[#allocation3 + $0x60] sm:$0xff] %vm300_vm11, %v981_v35  ;;  %v979_v30 = vadd.f32 %v958_v63, %v931_v39  ;;  %3017 = vrcp.f32 %v2269_v46  ;;  %v920_v39 = vld [vmem:[#allocation3 + $0x78] sm:$0xff] }
 0x303   : > { %2158 = vperm.xlu0 %2860, %v3012_v40   ;;  %2168 = vperm.xlu2 %2859, %v3014_v45   ;;  %v2267_v22 = vld [vmem:[#allocation3 + $0xb8] sm:$0xff]  ;;  %v936_v45 = vmul.f32 %v3974_v17, %v920_v39  ;;  %v2092_v17 = vld [vmem:[#allocation3 + $0x48] sm:$0xff] }
 0x304   : > { %v1767_v24 = vpop.xlane.xlu2 %1766  ;;  %996 = vst.msk [vmem:[#allocation3 + $0x50] sm:$0xff] %vm300_vm11, %v979_v30  ;;  %3019 = vrcp.f32 %v2267_v22  ;;  %v1729_v30 = vld [vmem:[#allocation3 + $0xd8] sm:$0xff] }
 0x305   : > { %v3016_v11 = vpop.eup %3015  ;;  %v1790_v60 = vadd.f32 %v1767_v24, %v1742_v41  ;;  %3021 = vrcp.f32 %v2089_v59  ;;  %v934_v24 = vmul.f32 %v3861_v44, %v918_v15  ;;  %v1745_v51 = vmul.f32 %v3868_v23, %v1729_v30  ;;  %v1731_v44 = vld [vmem:[#allocation3 + $0xe8] sm:$0xff] }
 0x306   : > { %2336 = vperm.xlu1 %2858, %v3016_v11   ;;  %v2091_v21 = vld [vmem:[#allocation3 + $0x40] sm:$0xff]  ;;  %v1747_v23 = vmul.f32 %v3960_v26, %v1731_v44 }
 0x307   : > { %1806 = vst.msk [vmem:[#allocation3 + $0xc0] sm:$0xff] %vm300_vm11, %v1790_v60  ;;  %v1775_v62 = vpop.xlane.xlu0 %1774  ;;  %3023 = vrcp.f32 %v2091_v21  ;;  %v919_v21 = vld [vmem:[#allocation3 + $0x70] sm:$0xff] }
 0x308   : > { %v1794_v38 = vadd.f32 %v1775_v62, %v1746_v61  ;;  %v3018_v57 = vpop.eup %3017 }
 0x309   : > { %v1771_v36 = vpop.xlane.xlu1 %1770  ;;  %v2095_v30 = vld [vmem:[#allocation3 + $0x60] sm:$0xff] }
 0x30a   : > { %v3020_v49 = vpop.eup %3019  ;;  %1810 = vst.msk [vmem:[#allocation3 + $0xe0] sm:$0xff] %vm300_vm11, %v1794_v38  ;;  %v1792_v2 = vadd.f32 %v1771_v36, %v1744_v43  ;;  %v1733_v43 = vld [vmem:[#allocation3 + $0xf8] sm:$0xff] }
 0x30b   : > { %2346 = vperm.xlu0 %2860, %v3020_v49   ;;  %2356 = vperm.xlu2 %2859, %v3018_v57   ;;  %v2093_v48 = vld [vmem:[#allocation3 + $0x50] sm:$0xff]  ;;  %v3022_v40 = vpop.eup %3021 }
 0x30c   : > { %v960_v35 = vpop.xlane.xlu2 %959  ;;  %1808 = vst.msk [vmem:[#allocation3 + $0xd0] sm:$0xff] %vm300_vm11, %v1792_v2  ;;  %3025 = vrcp.f32 %v2093_v48  ;;  %v1749_v2 = vmul.f32 %v3970_v29, %v1733_v43  ;;  %v935_v48 = vmul.f32 %v3888_v16, %v919_v21  ;;  %v1732_v16 = vld [vmem:[#allocation3 + $0xf0] sm:$0xff] }
 0x30d   : > { %v980_v63 = vadd.f32 %v960_v35, %v932_v5  ;;  %v3024_v20 = vpop.eup %3023 }
 0x30e   : > { %2163 = vperm.xlu1 %2858, %v3022_v40   ;;  %v2268_v46 = vld [vmem:[#allocation3 + $0xc0] sm:$0xff] }
 0x30f   : > { %997 = vst.msk [vmem:[#allocation3 + $0x58] sm:$0xff] %vm300_vm11, %v980_v63  ;;  %3027 = vrcp.f32 %v2268_v46  ;;  %v968_v6 = vpop.xlane.xlu0 %967 }
 0x310   : > { %v984_v41 = vadd.f32 %v968_v6, %v936_v45  ;;  %v4164_v45 = vpop.f32.mrf.mxu1 }
 0x311   : > { %v964_v22 = vpop.xlane.xlu1 %963  ;;  %v2272_v59 = vld [vmem:[#allocation3 + $0xe0] sm:$0xff] }
 0x312   : > { %v3026_v11 = vpop.eup %3025  ;;  %1001 = vst.msk [vmem:[#allocation3 + $0x78] sm:$0xff] %vm300_vm11, %v984_v41  ;;  %v982_v60 = vadd.f32 %v964_v22, %v934_v24  ;;  %3029 = vrcp.f32 %v2272_v59  ;;  %v1748_v24 = vmul.f32 %v3994_v56, %v1732_v16 }
 0x313   : > { %2173 = vperm.xlu0 %2860, %v3024_v20   ;;  %2183 = vperm.xlu2 %2859, %v3026_v11   ;;  %v2270_v62 = vld [vmem:[#allocation3 + $0xd0] sm:$0xff] }
 0x314   : > { %v1773_v61 = vpop.xlane.xlu2 %1772  ;;  %999 = vst.msk [vmem:[#allocation3 + $0x68] sm:$0xff] %vm300_vm11, %v982_v60  ;;  %3031 = vrcp.f32 %v2270_v62 }
 0x315   : > { %v3028_v55 = vpop.eup %3027  ;;  %v1793_v38 = vadd.f32 %v1773_v61, %v1745_v51  ;;  %3033 = vrcp.f32 %v2092_v17  ;;  %v1911_v61 = vmul.f32 0.0, %v3919_v7  ;;  %v1098_v7 = vmul.f32 0.0, %v3901_v28 }
 0x316   : > { %2351 = vperm.xlu1 %2858, %v3028_v55   ;;  %v2094_v57 = vld [vmem:[#allocation3 + $0x58] sm:$0xff] }
 0x317   : > { %1809 = vst.msk [vmem:[#allocation3 + $0xd8] sm:$0xff] %vm300_vm11, %v1793_v38  ;;  %3035 = vrcp.f32 %v2094_v57  ;;  %v2032_v56 = vadd.f32 %v4085_v13, %v1911_v61 }
 0x318   : > { %v3030_v36 = vpop.eup %3029  ;;  %v1189_v59 = vpop.f32.mrf.mxu1 }
 0x319   : > { %v1777_v49 = vpop.xlane.xlu1 %1776  ;;  %v2098_v17 = vld [vmem:[#allocation3 + $0x78] sm:$0xff] }
 0x31a   : > { %v3032_v5 = vpop.eup %3031  ;;  %v1795_v35 = vadd.f32 %v1777_v49, %v1747_v23  ;;  %v1781_v39 = vpop.xlane.xlu0 %1780 }
 0x31b   : > { %v1797_v40 = vadd.f32 %v1781_v39, %v1749_v2  ;;  %2361 = vperm.xlu0 %2860, %v3032_v5   ;;  %2371 = vperm.xlu2 %2859, %v3030_v36   ;;  %v2096_v15 = vld [vmem:[#allocation3 + $0x68] sm:$0xff]  ;;  %v3034_v46 = vpop.eup %3033  ;;  %v2007_v23 = vpop.f32.mrf.mxu3  ;;  %v1219_v36 = vadd.f32 %v4014_v18, %v1098_v7 }
 0x31c   : > { %v966_v63 = vpop.xlane.xlu2 %965  ;;  %1811 = vst.msk [vmem:[#allocation3 + $0xe8] sm:$0xff] %vm300_vm11, %v1795_v35  ;;  %3037 = vrcp.f32 %v2096_v15 }
 0x31d   : > { %v983_v26 = vadd.f32 %v966_v63, %v935_v48  ;;  %1813 = vst.msk [vmem:[#allocation3 + $0xf8] sm:$0xff] %vm300_vm11, %v1797_v40  ;;  %v3036_v6 = vpop.eup %3035  ;;  %v4387_v63 = vld [vmem:[#allocation29_spill] sm:$0xff] }
 0x31e   : > { %2178 = vperm.xlu1 %2858, %v3034_v46   ;;  %v2271_v29 = vld [vmem:[#allocation3 + $0xd8] sm:$0xff]  ;;  %v1099_v15 = vmul.f32 0.0, %v4387_v63 }
 0x31f   : > { %1000 = vst.msk [vmem:[#allocation3 + $0x70] sm:$0xff] %vm300_vm11, %v983_v26  ;;  %3039 = vrcp.f32 %v2271_v29 }
 0x320   : > { %3041 = vrcp.f32 %v2095_v30  ;;  %v4181_v13 = vpop.f32.mrf.mxu1  ;;  %v1220_v18 = vadd.f32 %v4024_v53, %v1099_v15  ;;  %v1102_v53 = vmul.f32 0.0, %v3911_v10  ;;  %v1105_v10 = vmul.f32 0.0, %v3965_v32  ;;  %v4389_v15 = vld [vmem:[#allocation35_spill] sm:$0xff] }
 0x322   : > { %v3038_v41 = vpop.eup %3037 }
 0x323   : > { %2188 = vperm.xlu0 %2860, %v3036_v6   ;;  %2198 = vperm.xlu2 %2859, %v3038_v41   ;;  %v2273_v44 = vld [vmem:[#allocation3 + $0xe8] sm:$0xff]  ;;  %v4188_v28 = vpop.f32.mrf.mxu3 }
 0x324   : > { %v1779_v20 = vpop.xlane.xlu2 %1778  ;;  %v2275_v60 = vld [vmem:[#allocation3 + $0xf8] sm:$0xff]  ;;  %v4388_v41 = vld [vmem:[#allocation30_spill] sm:$0xff] }
 0x325   : > { %v3040_v22 = vpop.eup %3039  ;;  %v1796_v11 = vadd.f32 %v1779_v20, %v1748_v24  ;;  %3043 = vrcp.f32 %v2275_v60  ;;  %v1914_v24 = vmul.f32 0.0, %v4388_v41 }
 0x326   : > { %2366 = vperm.xlu1 %2858, %v3040_v22   ;;  %v2097_v51 = vld [vmem:[#allocation3 + $0x70] sm:$0xff]  ;;  %v3042_v62 = vpop.eup %3041 }
 0x327   : > { %1812 = vst.msk [vmem:[#allocation3 + $0xf0] sm:$0xff] %vm300_vm11, %v1796_v11  ;;  %3045 = vrcp.f32 %v2097_v51  ;;  %v2035_v20 = vadd.f32 %v4093_v54, %v1914_v24 }
 0x328   : > { %3047 = vrcp.f32 %v2098_v17  ;;  %v4185_v40 = vpop.f32.mrf.mxu1 }
 0x329   : > { %3049 = vrcp.f32 %v2273_v44 }
 0x32b   : > { %v3044_v55 = vpop.eup %3043  ;;  %v4192_v6 = vpop.f32.mrf.mxu3 }
 0x32c   : > { %v2312_v38 = vpop.permute.xlu2 %2311  ;;  %2386 = vperm.xlu2 %2859, %v3044_v55  }
 0x32d   : > { %v3046_v43 = vpop.eup %3045  ;;  %v2389_v21 = vmul.f32 %v2312_v38, %v2032_v56  ;;  %v1917_v38 = vmul.f32 0.0, %v3940_v14 }
 0x32e   : > { %2203 = vperm.xlu0 %2860, %v3046_v43   ;;  %2193 = vperm.xlu1 %2858, %v3042_v62   ;;  %v3048_v5 = vpop.eup %3047  ;;  %v2274_v35 = vld [vmem:[#allocation3 + $0xf0] sm:$0xff]  ;;  %v1223_v62 = vadd.f32 %v1189_v59, %v1102_v53 }
 0x32f   : > { %v2405_v57 = vpack.c.bf16 %v2389_v21, %v2389_v21  ;;  %v3050_v39 = vpop.eup %3049  ;;  %3051 = vrcp.f32 %v2274_v35  ;;  %v2038_v54 = vadd.f32 %v2007_v23, %v1917_v38 }
 0x330   : > { %v1196_v16 = vpop.f32.mrf.mxu1 }
 0x331   : > { %2421 = vst [vmem:[%s4178_s29 + $0x4] sm:$0xf] %v2405_v57  ;;  %v2134_v49 = vpop.permute.xlu1 %2133  ;;  %v1226_v59 = vadd.f32 %v1196_v16, %v1105_v10  ;;  %v1923_v10 = vmul.f32 0.0, %v4049_v52 }
 0x332   : > { %v2211_v2 = vmul.f32 %v2134_v49, %v1219_v36 }
 0x333   : > { %v2014_v61 = vpop.f32.mrf.mxu3 }
 0x334   : > { %v2227_v48 = vpack.c.bf16 %v2211_v2, %v2211_v2 }
 0x335   : > { %v3052_v46 = vpop.eup %3051 }
 0x336   : > { %2376 = vperm.xlu0 %2860, %v3050_v39   ;;  %2208 = vperm.xlu1 %2858, %v3048_v5   ;;  %2243 = vst [vmem:[%s4178_s29] sm:$0xf] %v2227_v48 }
 0x338   : > { %v4197_v60 = vpop.f32.mrf.mxu1 }
 0x33b   : > { %v4204_v43 = vpop.f32.mrf.mxu3 }
 0x33d   : > { %v2139_v26 = vpop.permute.xlu2 %2138 }
 0x33e   : > { %2381 = vperm.xlu1 %2858, %v3052_v46   ;;  %v2212_v29 = vmul.f32 %v2139_v26, %v1220_v18  ;;  %v1920_v46 = vmul.f32 0.0, %v4389_v15  ;;  %v4390_v18 = vld [vmem:[#allocation32_spill] sm:$0xff]  ;;  %v1918_v15 = vmul.f32 0.0, %v4027_v9 }
 0x33f   : > { %v1101_v26 = vmul.f32 0.0, %v4390_v18 }
 0x340   : > { %v2228_v30 = vpack.c.bf16 %v2212_v29, %v2212_v29  ;;  %v4202_v44 = vpop.f32.mrf.mxu1  ;;  %v2041_v29 = vadd.f32 %v2014_v61, %v1920_v46  ;;  %v1111_v46 = vmul.f32 0.0, %v4059_v0 }
 0x341   : > { %v1222_v41 = vadd.f32 %v4164_v45, %v1101_v26  ;;  %v2039_v26 = vadd.f32 %v4188_v28, %v1918_v15  ;;  %v1926_v28 = vmul.f32 0.0, %v4101_v19 }
 0x342   : > { %2244 = vst [vmem:[%s4178_s29 + $0x8] sm:$0xf] %v2228_v30 }
 0x343   : > { %v4209_v49 = vpop.f32.mrf.mxu3 }
 0x345   : > { %v2327_v22 = vpop.permute.xlu2 %2326 }
 0x346   : > { %v2392_v11 = vmul.f32 %v2327_v22, %v2035_v20 }
 0x348   : > { %v2408_v51 = vpack.c.bf16 %v2392_v11, %v2392_v11  ;;  %v1204_v36 = vpop.f32.mrf.mxu1 }
 0x34a   : > { %2424 = vst [vmem:[%s4178_s29 + $0x1c] sm:$0xf] %v2408_v51 }
 0x34b   : > { %v2022_v24 = vpop.f32.mrf.mxu3 }
 0x34d   : > { %v2154_v56 = vpop.permute.xlu2 %2153 }
 0x34e   : > { %v2215_v17 = vmul.f32 %v2154_v56, %v1223_v62  ;;  %v1108_v62 = vmul.f32 0.0, %v4016_v25 }
 0x350   : > { %v2231_v55 = vpack.c.bf16 %v2215_v17, %v2215_v17  ;;  %v4217_v16 = vpop.f32.mrf.mxu1  ;;  %v1229_v56 = vadd.f32 %v1204_v36, %v1108_v62  ;;  %v1919_v62 = vmul.f32 0.0, %v4019_v58 }
 0x352   : > { %2247 = vst [vmem:[%s4178_s29 + $0x20] sm:$0xf] %v2231_v55 }
 0x355   : > { %v2342_v21 = vpop.permute.xlu2 %2341 }
 0x356   : > { %v2395_v7 = vmul.f32 %v2342_v21, %v2038_v54 }
 0x358   : > { %v2411_v57 = vpack.c.bf16 %v2395_v7, %v2395_v7  ;;  %v4227_v54 = vpop.f32.mrf.mxu1 }
 0x35a   : > { %2427 = vst [vmem:[%s4178_s29 + $0x34] sm:$0xf] %v2411_v57  ;;  %v4391_v57 = vld [vmem:[#allocation31_spill] sm:$0xff] }
 0x35b   : > { %v1103_v25 = vmul.f32 0.0, %v4391_v57 }
 0x35d   : > { %v2169_v14 = vpop.permute.xlu2 %2168  ;;  %v2317_v2 = vpop.permute.xlu0 %2316  ;;  %v1224_v36 = vadd.f32 %v4181_v13, %v1103_v25  ;;  %v1921_v25 = vmul.f32 0.0, %v4061_v4 }
 0x35e   : > { %v2218_v5 = vmul.f32 %v2169_v14, %v1226_v59  ;;  %v2390_v35 = vmul.f32 %v2317_v2, %v4088_v34  ;;  %v2044_v59 = vadd.f32 %v2022_v24, %v1923_v10 }
 0x35f   : > { %v2042_v10 = vadd.f32 %v4204_v43, %v1921_v25 }
 0x360   : > { %v2322_v39 = vpop.permute.xlu1 %2321  ;;  %v2234_v23 = vpack.c.bf16 %v2218_v5, %v2218_v5  ;;  %v2406_v48 = vpack.c.bf16 %v2390_v35, %v2390_v35  ;;  %v1211_v52 = vpop.f32.mrf.mxu1 }
 0x361   : > { %v2391_v63 = vmul.f32 %v2322_v39, %v4091_v27 }
 0x362   : > { %2250 = vst [vmem:[%s4178_s29 + $0x38] sm:$0xf] %v2234_v23 }
 0x363   : > { %v2407_v32 = vpack.c.bf16 %v2391_v63, %v2391_v63  ;;  %2422 = vst [vmem:[%s4178_s29 + $0xc] sm:$0xf] %v2406_v48 }
 0x365   : > { %2423 = vst [vmem:[%s4178_s29 + $0x14] sm:$0xf] %v2407_v32  ;;  %v2357_v34 = vpop.permute.xlu2 %2356  ;;  %v2144_v30 = vpop.permute.xlu0 %2143  ;;  %v4392_v32 = vld [vmem:[#allocation34_spill] sm:$0xff] }
 0x366   : > { %v2398_v27 = vmul.f32 %v2357_v34, %v2041_v29  ;;  %v2213_v20 = vmul.f32 %v2144_v30, %v4037_v3  ;;  %v4229_v3 = vpop.f32.mrf.mxu3  ;;  %v1104_v18 = vmul.f32 0.0, %v4392_v32  ;;  %v1232_v29 = vadd.f32 %v1211_v52, %v1111_v46 }
 0x367   : > { %v1112_v32 = vmul.f32 0.0, %v4073_v33 }
 0x368   : > { %v2149_v22 = vpop.permute.xlu1 %2148  ;;  %v2414_v11 = vpack.c.bf16 %v2398_v27, %v2398_v27  ;;  %v2229_v51 = vpack.c.bf16 %v2213_v20, %v2213_v20  ;;  %v1214_v46 = vpop.f32.mrf.mxu1 }
 0x369   : > { %v2214_v53 = vmul.f32 %v2149_v22, %v1222_v41  ;;  %v4393_v22 = vld [vmem:[#allocation33_spill] sm:$0xff] }
 0x36a   : > { %2430 = vst [vmem:[%s4178_s29 + $0x4c] sm:$0xf] %v2414_v11  ;;  %v1106_v11 = vmul.f32 0.0, %v4393_v22 }
 0x36b   : > { %v2230_v61 = vpack.c.bf16 %v2214_v53, %v2214_v53  ;;  %2245 = vst [vmem:[%s4178_s29 + $0x10] sm:$0xf] %v2229_v51 }
 0x36d   : > { %2246 = vst [vmem:[%s4178_s29 + $0x18] sm:$0xf] %v2230_v61  ;;  %v2184_v17 = vpop.permute.xlu2 %2183  ;;  %v2332_v55 = vpop.permute.xlu0 %2331 }
 0x36e   : > { %v2221_v45 = vmul.f32 %v2184_v17, %v1229_v56  ;;  %v2393_v38 = vmul.f32 %v2332_v55, %v4098_v50  ;;  %v4236_v39 = vpop.f32.mrf.mxu3  ;;  %v2040_v17 = vadd.f32 %v4192_v6, %v1919_v62 }
 0x370   : > { %v2237_v21 = vpack.c.bf16 %v2221_v45, %v2221_v45  ;;  %v2409_v7 = vpack.c.bf16 %v2393_v38, %v2393_v38 }
 0x372   : > { %2253 = vst [vmem:[%s4178_s29 + $0x50] sm:$0xf] %v2237_v21 }
 0x373   : > { %2425 = vst [vmem:[%s4178_s29 + $0x24] sm:$0xf] %v2409_v7 }
 0x375   : > { %v2372_v14 = vpop.permute.xlu2 %2371  ;;  %v2159_v2 = vpop.permute.xlu0 %2158 }
 0x376   : > { %v2401_v50 = vmul.f32 %v2372_v14, %v2044_v59  ;;  %v2216_v5 = vmul.f32 %v2159_v2, %v1224_v36  ;;  %v2029_v51 = vpop.f32.mrf.mxu3 }
 0x377   : > { %v2047_v61 = vadd.f32 %v2029_v51, %v1926_v28  ;;  %v1925_v51 = vmul.f32 0.0, %v4110_v1 }
 0x378   : > { %v2337_v35 = vpop.permute.xlu1 %2336  ;;  %v2417_v23 = vpack.c.bf16 %v2401_v50, %v2401_v50  ;;  %v2232_v48 = vpack.c.bf16 %v2216_v5, %v2216_v5  ;;  %v4394_v5 = vld [vmem:[#allocation36_spill] sm:$0xff] }
 0x379   : > { %v2394_v63 = vmul.f32 %v2337_v35, %v4105_v31  ;;  %v1225_v31 = vadd.f32 %v4185_v40, %v1104_v18  ;;  %v1227_v40 = vadd.f32 %v4197_v60, %v1106_v11  ;;  %v1107_v60 = vmul.f32 0.0, %v4039_v42 }
 0x37a   : > { %2433 = vst [vmem:[%s4178_s29 + $0x64] sm:$0xf] %v2417_v23  ;;  %v1109_v35 = vmul.f32 0.0, %v4394_v5  ;;  %v1922_v23 = vmul.f32 0.0, %v4064_v37  ;;  %v1110_v18 = vmul.f32 0.0, %v4069_v12 }
 0x37b   : > { %v2410_v13 = vpack.c.bf16 %v2394_v63, %v2394_v63  ;;  %2248 = vst [vmem:[%s4178_s29 + $0x28] sm:$0xf] %v2232_v48  ;;  %v1228_v36 = vadd.f32 %v4202_v44, %v1107_v60 }
 0x37c   : > { %v1230_v42 = vadd.f32 %v4217_v16, %v1109_v35  ;;  %v2043_v48 = vadd.f32 %v4209_v49, %v1922_v23  ;;  %v1231_v37 = vadd.f32 %v4227_v54, %v1110_v18  ;;  %v1233_v16 = vadd.f32 %v1214_v46, %v1112_v32 }
 0x37d   : > { %2426 = vst [vmem:[%s4178_s29 + $0x2c] sm:$0xf] %v2410_v13  ;;  %v2199_v34 = vpop.permute.xlu2 %2198  ;;  %v2347_v30 = vpop.permute.xlu0 %2346 }
 0x37e   : > { %v2224_v41 = vmul.f32 %v2199_v34, %v1232_v29  ;;  %v2396_v9 = vmul.f32 %v2347_v30, %v2039_v26 }
 0x380   : > { %v2164_v24 = vpop.permute.xlu1 %2163  ;;  %v2240_v0 = vpack.c.bf16 %v2224_v41, %v2224_v41  ;;  %v2412_v27 = vpack.c.bf16 %v2396_v9, %v2396_v9  ;;  %v1216_v41 = vpop.f32.mrf.mxu1  ;;  %v1924_v9 = vmul.f32 0.0, %v4096_v8  ;;  %v2046_v8 = vadd.f32 %v4236_v39, %v1925_v51 }
 0x381   : > { %v2217_v20 = vmul.f32 %v2164_v24, %v1225_v31  ;;  %v1113_v24 = vmul.f32 0.0, %v4103_v47 }
 0x382   : > { %2256 = vst [vmem:[%s4178_s29 + $0x68] sm:$0xf] %v2240_v0  ;;  %v2045_v12 = vadd.f32 %v4229_v3, %v1924_v9 }
 0x383   : > { %v2233_v53 = vpack.c.bf16 %v2217_v20, %v2217_v20  ;;  %2428 = vst [vmem:[%s4178_s29 + $0x3c] sm:$0xf] %v2412_v27  ;;  %v1234_v33 = vadd.f32 %v1216_v41, %v1113_v24 }
 0x385   : > { %2249 = vst [vmem:[%s4178_s29 + $0x30] sm:$0xf] %v2233_v53  ;;  %v2174_v56 = vpop.permute.xlu0 %2173 }
 0x386   : > { %v2387_v55 = vpop.permute.xlu2 %2386  ;;  %v2219_v45 = vmul.f32 %v2174_v56, %v1227_v40 }
 0x387   : > { %v2404_v38 = vmul.f32 %v2387_v55, %v2047_v61 }
 0x388   : > { %v2352_v21 = vpop.permute.xlu1 %2351  ;;  %v2235_v7 = vpack.c.bf16 %v2219_v45, %v2219_v45 }
 0x389   : > { %v2397_v57 = vmul.f32 %v2352_v21, %v2040_v17  ;;  %v2420_v19 = vpack.c.bf16 %v2404_v38, %v2404_v38 }
 0x38a   : > { %2251 = vst [vmem:[%s4178_s29 + $0x40] sm:$0xf] %v2235_v7 }
 0x38b   : > { %v2413_v58 = vpack.c.bf16 %v2397_v57, %v2397_v57  ;;  %2436 = vst [vmem:[%s4178_s29 + $0x7c] sm:$0xf] %v2420_v19 }
 0x38d   : > { %2429 = vst [vmem:[%s4178_s29 + $0x44] sm:$0xf] %v2413_v58  ;;  %v2362_v6 = vpop.permute.xlu0 %2361 }
 0x38e   : > { %v2399_v59 = vmul.f32 %v2362_v6, %v2042_v10 }
 0x390   : > { %v2179_v14 = vpop.permute.xlu1 %2178  ;;  %v2415_v2 = vpack.c.bf16 %v2399_v59, %v2399_v59 }
 0x391   : > { %v2220_v50 = vmul.f32 %v2179_v14, %v1228_v36 }
 0x392   : > { %2431 = vst [vmem:[%s4178_s29 + $0x54] sm:$0xf] %v2415_v2 }
 0x393   : > { %v2236_v4 = vpack.c.bf16 %v2220_v50, %v2220_v50 }
 0x395   : > { %2252 = vst [vmem:[%s4178_s29 + $0x48] sm:$0xf] %v2236_v4  ;;  %v2189_v43 = vpop.permute.xlu0 %2188 }
 0x396   : > { %v2222_v63 = vmul.f32 %v2189_v43, %v1230_v42 }
 0x398   : > { %v2367_v44 = vpop.permute.xlu1 %2366  ;;  %v2238_v52 = vpack.c.bf16 %v2222_v63, %v2222_v63 }
 0x399   : > { %v2400_v15 = vmul.f32 %v2367_v44, %v2043_v48 }
 0x39a   : > { %2254 = vst [vmem:[%s4178_s29 + $0x58] sm:$0xf] %v2238_v52 }
 0x39b   : > { %v2416_v13 = vpack.c.bf16 %v2400_v15, %v2400_v15 }
 0x39d   : > { %2432 = vst [vmem:[%s4178_s29 + $0x5c] sm:$0xf] %v2416_v13 }
 0x3a0   : > { %v2194_v26 = vpop.permute.xlu1 %2193  ;;  %v2204_v29 = vpop.permute.xlu0 %2203 }
 0x3a1   : > { %v2223_v49 = vmul.f32 %v2194_v26, %v1231_v37  ;;  %v2225_v34 = vmul.f32 %v2204_v29, %v1233_v16 }
 0x3a3   : > { %v2239_v30 = vpack.c.bf16 %v2223_v49, %v2223_v49  ;;  %v2241_v31 = vpack.c.bf16 %v2225_v34, %v2225_v34 }
 0x3a5   : > { %2255 = vst [vmem:[%s4178_s29 + $0x60] sm:$0xf] %v2239_v30 }
 0x3a6   : > { %2257 = vst [vmem:[%s4178_s29 + $0x70] sm:$0xf] %v2241_v31 }
 0x3a8   : > { %v2209_v54 = vpop.permute.xlu1 %2208  ;;  %v2377_v0 = vpop.permute.xlu0 %2376 }
 0x3a9   : > { %v2226_v27 = vmul.f32 %v2209_v54, %v1234_v33  ;;  %v2402_v20 = vmul.f32 %v2377_v0, %v2045_v12 }
 0x3ab   : > { %v2242_v22 = vpack.c.bf16 %v2226_v27, %v2226_v27  ;;  %v2418_v11 = vpack.c.bf16 %v2402_v20, %v2402_v20 }
 0x3ad   : > { %2258 = vst [vmem:[%s4178_s29 + $0x78] sm:$0xf] %v2242_v22 }
 0x3ae   : > { %2434 = vst [vmem:[%s4178_s29 + $0x6c] sm:$0xf] %v2418_v11 }
 0x3b0   : > { %v2382_v53 = vpop.permute.xlu1 %2381 }
 0x3b1   : > { %v2403_v47 = vmul.f32 %v2382_v53, %v2046_v8 }
 0x3b3   : > { %v2419_v28 = vpack.c.bf16 %v2403_v47, %v2403_v47 }
 0x3b5   : > { %2435 = vst [vmem:[%s4178_s29 + $0x74] sm:$0xf] %v2419_v28 }
 0x3b6 PF: > { %s13_s14 = sadd.s32 1, %s3075_s14   ;;  %s4395_s12 = smov %s3071_s13 }
 0x3b7   : > { %p10_p5 = scmp.ge.s32.totalorder %s13_s14, 4   ;;  %s4396_s13 = smov %s4398_s15 }
 0x3b9   :  { %12 = sbr.rel (!%p10_p5) target bundleno = 2 (0x2), region = 85 }

</bundles_post_ra>
